<compile_context>
chip_gen: v6e
topology: v6e:2x2x1
jax: 0.10.0
libtpu: 0.0.40
codegen_flags: <defaults>
</compile_context>

<pallas_src>
import functools

import jax
import jax.numpy as jnp
import numpy as np
from jax.experimental import pallas as pl
from jax.experimental.pallas import tpu as pltpu


def _round_up(x, m):
    return ((x + m - 1) // m) * m


# ----------------------- fused matmul + bias + activation --------------------

def _mm_bias_act_kernel(p_ref, w_ref, b_ref, o_ref, acc_ref, *, act, neg_slope):
    # p_ref: (tm, tk) bf16, w_ref: (tk, tn) bf16, b_ref: (1, tn) f32.
    k = pl.program_id(2)

    @pl.when(k == 0)
    def _():
        acc_ref[...] = jnp.zeros_like(acc_ref)

    acc_ref[...] += jnp.dot(p_ref[...], w_ref[...],
                            preferred_element_type=jnp.float32)

    @pl.when(k == pl.num_programs(2) - 1)
    def _():
        y = acc_ref[...] + b_ref[...]
        if act == "leaky_relu":
            y = jnp.where(y >= 0, y, neg_slope * y)
        elif act == "tanh":
            y = jnp.tanh(y)
        o_ref[...] = y.astype(o_ref.dtype)


def _matmul_fused(patches, w_mat, bias, *, act, out_dtype, neg_slope=0.2):
    """(M,K) @ (K,N) + bias + activation.  bf16 MXU inputs, fp32 accumulation,
    K streamed through the grid with a VMEM accumulator."""
    M, K = patches.shape
    N = w_mat.shape[1]

    Kp = _round_up(K, 128)                 # lane-dense contraction dim
    tk = min(512, Kp)                      # stream K so the DMA pipelines
    Kp = _round_up(Kp, tk)

    tn = 256 if N >= 256 else 128          # fill the 256-wide MXU on v6e/v7x
    Np = _round_up(N, tn)                  # unmasked, lane-dense output stores

    m_align = 16                           # bf16 sublane pack
    tm = min(256, _round_up(M, m_align))   # size the M tile to the real M
    if Np // tn == 1 and tm >= 2 * m_align:
        # keep >=2 parallel grid points so v7x's second TensorCore has work
        tm = _round_up((tm + 1) // 2, m_align)
    Mp = _round_up(M, tm)

    p = patches.astype(jnp.bfloat16)
    if (Mp, Kp) != (M, K):
        p = jnp.pad(p, ((0, Mp - M), (0, Kp - K)))
    w = w_mat.astype(jnp.bfloat16)
    if (Kp, Np) != (K, N):
        w = jnp.pad(w, ((0, Kp - K), (0, Np - N)))
    b = bias.astype(jnp.float32).reshape(1, N)
    if Np != N:
        b = jnp.pad(b, ((0, 0), (0, Np - N)))

    grid = (Mp // tm, Np // tn, Kp // tk)
    out = pl.pallas_call(
        functools.partial(_mm_bias_act_kernel, act=act, neg_slope=neg_slope),
        out_shape=jax.ShapeDtypeStruct((Mp, Np), out_dtype),
        grid_spec=pltpu.PrefetchScalarGridSpec(
            num_scalar_prefetch=0,
            grid=grid,
            in_specs=[
                pl.BlockSpec((tm, tk), lambda i, j, k: (i, k)),
                pl.BlockSpec((tk, tn), lambda i, j, k: (k, j)),
                pl.BlockSpec((1, tn), lambda i, j, k: (0, j)),
            ],
            out_specs=pl.BlockSpec((tm, tn), lambda i, j, k: (i, j)),
            scratch_shapes=[pltpu.VMEM((tm, tn), jnp.float32)],
        ),
        compiler_params=pltpu.CompilerParams(
            dimension_semantics=("parallel", "parallel", "arbitrary")),
    )(p, w, b)
    return out[:M, :N]


# --------------------------------- conv glue ---------------------------------

def _im2col(x_nhwc, k, stride, pad):
    B, H, W, C = x_nhwc.shape
    xp = jnp.pad(x_nhwc, ((0, 0), (pad, pad), (pad, pad), (0, 0)))
    Hout = (H + 2 * pad - k) // stride + 1
    Wout = (W + 2 * pad - k) // stride + 1
    cols = []
    for kh in range(k):
        for kw in range(k):
            cols.append(xp[:, kh:kh + stride * Hout:stride,
                           kw:kw + stride * Wout:stride, :])
    p = jnp.stack(cols, axis=3)                  # (B, Hout, Wout, k*k, C)
    p = p.reshape(B, Hout, Wout, k * k * C)      # flatten order (kh, kw, c)
    return p.reshape(B * Hout * Wout, k * k * C), Hout, Wout


def conv2d_act(x_nhwc, w_oihw, bias, *, k=4, stride=2, pad=1,
               act="leaky_relu", out_dtype=jnp.bfloat16):
    B = x_nhwc.shape[0]
    Cin = x_nhwc.shape[-1]
    Cout = w_oihw.shape[0]
    patches, Hout, Wout = _im2col(x_nhwc, k, stride, pad)
    # PyTorch (Cout, Cin, kh, kw) -> (kh, kw, Cin, Cout) -> (k*k*Cin, Cout)
    w_mat = jnp.transpose(w_oihw, (2, 3, 1, 0)).reshape(k * k * Cin, Cout)
    out = _matmul_fused(patches, w_mat, bias, act=act, out_dtype=out_dtype)
    return out.reshape(B, Hout, Wout, Cout)


# output-row parity -> (window-tap 0, window-tap 1) kernel index, for the
# sub-pixel decomposition of ConvTranspose2d(k=4, stride=2, padding=1)
_KSEL = ((3, 1), (2, 0))


def conv_transpose2d_act(x_nhwc, w_iohw, bias, *, act="leaky_relu",
                         out_dtype=jnp.bfloat16):
    """ConvTranspose2d(k=4, s=2, p=1) as four stride-1 2x2 convs whose outputs
    interleave (pixel shuffle).  One shared im2col (pad 1, window 2, stride 1)
    feeds all four parities; their 2x2 kernels are concatenated along the
    output-channel axis so a single MXU matmul computes everything."""
    B, H, W, Cin = x_nhwc.shape
    Cout = w_iohw.shape[1]

    patches, Hp1, Wp1 = _im2col(x_nhwc, 2, 1, 1)          # K = 4*Cin

    w_parts, b_parts = [], []
    for ph in range(2):
        for pw in range(2):
            e = jnp.take(w_iohw, jnp.array(_KSEL[ph]), axis=2)
            e = jnp.take(e, jnp.array(_KSEL[pw]), axis=3)  # (Cin,Cout,2,2)
            e = jnp.transpose(e, (2, 3, 0, 1)).reshape(4 * Cin, Cout)
            w_parts.append(e)
            b_parts.append(bias)
    w_all = jnp.concatenate(w_parts, axis=1)               # (4*Cin, 4*Cout)
    b_all = jnp.concatenate(b_parts, axis=0)                # (4*Cout,)

    out = _matmul_fused(patches, w_all, b_all, act=act, out_dtype=out_dtype)
    out = out.reshape(B, Hp1, Wp1, 2, 2, Cout)              # (..., ph, pw, C)

    # pixel-shuffle interleave: y[:, 2m+ph, 2n+pw] = parity(ph,pw) at (m,n)
    rows = []
    for ph in range(2):
        cols = [out[:, ph:ph + H, pw:pw + W, ph, pw, :] for pw in range(2)]
        rows.append(jnp.stack(cols, axis=3))                # (B, H, W, 2, C)
    y = jnp.stack(rows, axis=2)                             # (B, H, 2, W, 2, C)
    return y.reshape(B, 2 * H, 2 * W, Cout)


# ----------------------------- vector quantizer ------------------------------

def _vq_kernel(z_ref, cb_ref, csq_ref, idx_ref):
    # z: (tm, C) f32, cb: (N, C) f32, csq: (1, N) f32.
    # Tiny matmul -> HIGHEST precision on purpose so the argmin matches the
    # fp32 reference exactly (the perf-critical conv path stays bf16).
    z = z_ref[...]
    zc = jax.lax.dot_general(z, cb_ref[...], (((1,), (1,)), ((), ())),
                             preferred_element_type=jnp.float32,
                             precision=jax.lax.Precision.HIGHEST)   # (tm, N)
    zsq = jnp.sum(z * z, axis=1, keepdims=True)                     # (tm, 1)
    d = zsq - 2.0 * zc + csq_ref[...]                               # (tm, N)
    ids = jax.lax.broadcasted_iota(jnp.int32, d.shape, 1)
    dmin = jnp.min(d, axis=1, keepdims=True)
    # first index achieving the min (torch.argmin tie-break); exact for N<2^24
    idx_f = jnp.min(jnp.where(d == dmin, ids.astype(jnp.float32),
                              jnp.float32(d.shape[1])),
                    axis=1, keepdims=True)
    idx_ref[...] = idx_f.astype(jnp.int32)


def _vq_pallas(z_flat, codebook):
    M, C = z_flat.shape
    N = codebook.shape[0]
    tm = 256 if M > 256 else _round_up(M, 8)
    Mp = _round_up(M, tm)
    z = z_flat.astype(jnp.float32)
    if Mp != M:
        z = jnp.pad(z, ((0, Mp - M), (0, 0)))
    cb = codebook.astype(jnp.float32)
    csq = jnp.sum(cb * cb, axis=1)[None, :]                 # (1, N)
    idx = pl.pallas_call(
        _vq_kernel,
        out_shape=jax.ShapeDtypeStruct((Mp, 1), jnp.int32),
        grid=(Mp // tm,),
        in_specs=[
            pl.BlockSpec((tm, C), lambda i: (i, 0)),
            pl.BlockSpec((N, C), lambda i: (0, 0)),   # codebook stays resident
            pl.BlockSpec((1, N), lambda i: (0, 0)),
        ],
        out_specs=pl.BlockSpec((tm, 1), lambda i: (i, 0)),
        compiler_params=pltpu.CompilerParams(
            dimension_semantics=("parallel",)),
    )(z, cb, csq)
    idx = idx[:M, 0]
    z_q = cb[idx]                                           # exact XLA gather
    return z_q, idx


# ------------------------------ module forwards ------------------------------

def encoder_forward(x_nhwc, params):
    (w1, b1), (w2, b2), (w3, b3) = params
    h = conv2d_act(x_nhwc, w1, b1, act="leaky_relu", out_dtype=jnp.bfloat16)
    h = conv2d_act(h, w2, b2, act="leaky_relu", out_dtype=jnp.bfloat16)
    h = conv2d_act(h, w3, b3, act="leaky_relu", out_dtype=jnp.float32)
    return h                                                 # NHWC


def quantizer_forward(z_e_nhwc, codebook, commitment_cost=0.25):
    B, H, W, C = z_e_nhwc.shape
    z_flat = z_e_nhwc.reshape(-1, C).astype(jnp.float32)
    z_q_flat, codes = _vq_pallas(z_flat, codebook)
    # commitment + embedding loss; .detach() only changes gradients, not values
    q_loss = (1.0 + commitment_cost) * jnp.mean((z_q_flat - z_flat) ** 2)
    # straight-through z + (z_q - z).detach() == z_q value-wise in forward
    z_q = z_q_flat.reshape(B, H, W, C)
    return z_q, codes, q_loss                                # NHWC


def decoder_forward(z_q_nhwc, params):
    (w1, b1), (w2, b2), (w3, b3) = params
    g = conv_transpose2d_act(z_q_nhwc, w1, b1, act="leaky_relu",
                             out_dtype=jnp.bfloat16)
    g = conv_transpose2d_act(g, w2, b2, act="leaky_relu",
                             out_dtype=jnp.bfloat16)
    g = conv_transpose2d_act(g, w3, b3, act="tanh", out_dtype=jnp.float32)
    return g                                                 # NHWC


def vqgan_forward(x_nchw, enc_params, dec_params, codebook):
    x = jnp.transpose(x_nchw, (0, 2, 3, 1))                  # NCHW -> NHWC once
    z_e = encoder_forward(x, enc_params)
    z_q, codes, q_loss = quantizer_forward(z_e, codebook)
    x_rec = decoder_forward(z_q, dec_params)
    return jnp.transpose(x_rec, (0, 3, 1, 2)), codes, q_loss


# --------------------- deterministic parameter init --------------------------

def init_encoder_params(key, in_channels=3, latent_dim=256):
    chans = [(in_channels, 128), (128, 256), (256, latent_dim)]
    params = []
    for (cin, cout) in chans:
        key, kw, kb = jax.random.split(key, 3)
        fan_in = cin * 4 * 4
        w = jax.random.normal(kw, (cout, cin, 4, 4), jnp.float32) / np.sqrt(fan_in)
        b = 0.01 * jax.random.normal(kb, (cout,), jnp.float32)
        params.append((w, b))
    return params


def init_decoder_params(key, out_channels=3, latent_dim=256):
    chans = [(latent_dim, 256), (256, 128), (128, out_channels)]
    params = []
    for (cin, cout) in chans:                 # ConvTranspose2d: (Cin, Cout, k, k)
        key, kw, kb = jax.random.split(key, 3)
        fan_in = cin * 4 * 4
        w = jax.random.normal(kw, (cin, cout, 4, 4), jnp.float32) / np.sqrt(fan_in)
        b = 0.01 * jax.random.normal(kb, (cout,), jnp.float32)
        params.append((w, b))
    return params


# ---------------------------- pure-JAX references ----------------------------

def encoder_ref(x_nchw, params):
    h = x_nchw
    for (w, b) in params:
        h = jax.lax.conv_general_dilated(
            h, w, window_strides=(2, 2), padding=[(1, 1), (1, 1)],
            dimension_numbers=("NCHW", "OIHW", "NCHW"),
            precision=jax.lax.Precision.HIGHEST)
        h = h + b[None, :, None, None]
        h = jnp.where(h >= 0, h, 0.2 * h)
    return h


def decoder_ref(z_nchw, params):
    acts = ["leaky", "leaky", "tanh"]
    g = z_nchw
    for (w, b), act in zip(params, acts):
        g = jax.lax.conv_general_dilated(
            g, jnp.flip(w, axis=(2, 3)), window_strides=(1, 1),
            padding=[(2, 2), (2, 2)], lhs_dilation=(2, 2),
            dimension_numbers=("NCHW", "IOHW", "NCHW"),
            precision=jax.lax.Precision.HIGHEST)
        g = g + b[None, :, None, None]
        g = jnp.tanh(g) if act == "tanh" else jnp.where(g >= 0, g, 0.2 * g)
    return g


def vq_ref(z_nhwc, codebook, commitment_cost=0.25):
    B, H, W, C = z_nhwc.shape
    zf = z_nhwc.reshape(-1, C)
    d = jnp.sum((zf[:, None, :] - codebook[None, :, :]) ** 2, axis=-1)
    idx = jnp.argmin(d, axis=1)
    zq_flat = codebook[idx]
    loss = (1.0 + commitment_cost) * jnp.mean((zq_flat - zf) ** 2)
    return zq_flat.reshape(B, H, W, C), idx.astype(jnp.int32), loss


# ---------------------------------- main --------------------------------------

if __name__ == "__main__":
    key = jax.random.PRNGKey(0)
    k_x, k_e, k_d, k_c = jax.random.split(key, 4)

    B, Cin, H, W = 2, 3, 16, 16
    latent_dim, num_codes = 256, 512

    x = jax.random.normal(k_x, (B, Cin, H, W), jnp.float32)
    enc_params = init_encoder_params(k_e, in_channels=Cin, latent_dim=latent_dim)
    dec_params = init_decoder_params(k_d, out_channels=3, latent_dim=latent_dim)
    codebook = 0.02 * jax.random.normal(k_c, (num_codes, latent_dim), jnp.float32)

    # full VQGAN forward (encoder -> quantizer -> decoder)
    fwd = jax.jit(vqgan_forward)
    x_rec, codes, q_loss = jax.block_until_ready(
        fwd(x, enc_params, dec_params, codebook))
    assert x_rec.shape == (B, 3, H, W), x_rec.shape
    assert codes.shape == (B * (H // 8) * (W // 8),), codes.shape

    # staged correctness checks against fp32 JAX references (each Pallas stage
    # is compared on identical inputs so bf16 conv error does not compound
    # into a discrete codebook-index mismatch).
    x_nhwc = jnp.transpose(x, (0, 2, 3, 1))
    z_e_k = jax.block_until_ready(encoder_forward(x_nhwc, enc_params))   # NHWC
    z_e_r = encoder_ref(x, enc_params)                                   # NCHW
    np.testing.assert_allclose(
        np.asarray(jnp.transpose(z_e_k, (0, 3, 1, 2))), np.asarray(z_e_r),
        rtol=2e-2, atol=2e-2)

    zq_k, codes_k, loss_k = quantizer_forward(z_e_k, codebook)
    zq_r, codes_r, loss_r = vq_ref(z_e_k, codebook)
    np.testing.assert_array_equal(np.asarray(codes_k), np.asarray(codes_r))
    np.testing.assert_allclose(np.asarray(zq_k), np.asarray(zq_r),
                               rtol=1e-4, atol=1e-5)
    np.testing.assert_allclose(float(loss_k), float(loss_r),
                               rtol=1e-4, atol=1e-6)

    xr_k = jax.block_until_ready(decoder_forward(zq_k, dec_params))       # NHWC
    xr_r = decoder_ref(jnp.transpose(zq_k, (0, 3, 1, 2)), dec_params)     # NCHW
    np.testing.assert_allclose(
        np.asarray(jnp.transpose(xr_k, (0, 3, 1, 2))), np.asarray(xr_r),
        rtol=2e-2, atol=2e-2)

    print("KERNEL_OK")
</pallas_src>

<mosaic_0001>
module attributes {stable_mosaic.version = 11 : i64} {
  func.func @_mm_bias_act_kernel(%arg0: i32, %arg1: i32, %arg2: i32, %arg3: memref<64x128xbf16, #tpu.memory_space<vmem>>, %arg4: memref<128x128xbf16, #tpu.memory_space<vmem>>, %arg5: memref<1x128xf32, #tpu.memory_space<vmem>>, %arg6: memref<64x128xbf16, #tpu.memory_space<vmem>>, %arg7: memref<64x128xf32, #tpu.memory_space<vmem>>) attributes {dimension_semantics = [#tpu.dimension_semantics<parallel>, #tpu.dimension_semantics<parallel>, #tpu.dimension_semantics<arbitrary>], iteration_bounds = array<i64: 2, 1, 1>, scalar_prefetch = 0 : i64, scratch_operands = 1 : i64, tpu.core_type = #tpu.core_type<tc>, window_params = [{transform_indices = @transform_0, window_bounds = array<i64: 64, 128>}, {transform_indices = @transform_1, window_bounds = array<i64: 128, 128>}, {transform_indices = @transform_2, window_bounds = array<i64: 1, 128>}, {transform_indices = @transform_3, window_bounds = array<i64: 64, 128>}]} {
    %c0_i32 = arith.constant 0 : i32
    %0 = arith.cmpi eq, %arg2, %c0_i32 : i32
    %1 = arith.extui %0 : i1 to i32
    %c0_i32_0 = arith.constant 0 : i32
    %2 = arith.cmpi ne, %1, %c0_i32_0 : i32
    scf.if %2 {
      %cst_10 = arith.constant 0.000000e+00 : f32
      %12 = vector.broadcast %cst_10 : f32 to vector<64x128xf32>
      %c0_11 = arith.constant 0 : index
      %c0_12 = arith.constant 0 : index
      %13 = vector.load %arg7[%c0_11, %c0_12] : memref<64x128xf32, #tpu.memory_space<vmem>>, vector<64x128xf32>
      tpu.vector_store %arg7[%c0_11, %c0_12], %12 {strides = array<i32>} : memref<64x128xf32, #tpu.memory_space<vmem>>, vector<64x128xf32>,
    } else {
    }
    %c0 = arith.constant 0 : index
    %c0_1 = arith.constant 0 : index
    %3 = vector.load %arg7[%c0, %c0_1] : memref<64x128xf32, #tpu.memory_space<vmem>>, vector<64x128xf32>
    %c0_2 = arith.constant 0 : index
    %c0_3 = arith.constant 0 : index
    %4 = vector.load %arg3[%c0_2, %c0_3] : memref<64x128xbf16, #tpu.memory_space<vmem>>, vector<64x128xbf16>
    %c0_4 = arith.constant 0 : index
    %c0_5 = arith.constant 0 : index
    %5 = vector.load %arg4[%c0_4, %c0_5] : memref<128x128xbf16, #tpu.memory_space<vmem>>, vector<128x128xbf16>
    %cst = arith.constant dense<0.000000e+00> : vector<64x128xf32>
    %6 = tpu.matmul %4, %5, %cst {dimension_numbers = #tpu.dot_dimension_numbers<[1], [0], [0], [1], [0, 0, 1, 1], [], []>} : vector<64x128xbf16>, vector<128x128xbf16>, vector<64x128xf32> -> vector<64x128xf32>
    %7 = arith.addf %3, %6 : vector<64x128xf32>
    %c0_6 = arith.constant 0 : index
    %c0_7 = arith.constant 0 : index
    %8 = vector.load %arg7[%c0_6, %c0_7] : memref<64x128xf32, #tpu.memory_space<vmem>>, vector<64x128xf32>
    tpu.vector_store %arg7[%c0_6, %c0_7], %7 {strides = array<i32>} : memref<64x128xf32, #tpu.memory_space<vmem>>, vector<64x128xf32>,
    %c0_i32_8 = arith.constant 0 : i32
    %9 = arith.cmpi eq, %arg2, %c0_i32_8 : i32
    %10 = arith.extui %9 : i1 to i32
    %c0_i32_9 = arith.constant 0 : i32
    %11 = arith.cmpi ne, %10, %c0_i32_9 : i32
    scf.if %11 {
      %c0_10 = arith.constant 0 : index
      %c0_11 = arith.constant 0 : index
      %12 = vector.load %arg7[%c0_10, %c0_11] : memref<64x128xf32, #tpu.memory_space<vmem>>, vector<64x128xf32>
      %c0_12 = arith.constant 0 : index
      %c0_13 = arith.constant 0 : index
      %13 = vector.load %arg5[%c0_12, %c0_13] : memref<1x128xf32, #tpu.memory_space<vmem>>, vector<1x128xf32>
      %14 = vector.broadcast %13 : vector<1x128xf32> to vector<64x128xf32>
      %15 = arith.addf %12, %14 : vector<64x128xf32>
      %cst_14 = arith.constant 0.000000e+00 : f32
      %16 = vector.broadcast %cst_14 : f32 to vector<64x128xf32>
      %17 = arith.cmpf oge, %15, %16 : vector<64x128xf32>
      %cst_15 = arith.constant 2.000000e-01 : f32
      %18 = vector.broadcast %cst_15 : f32 to vector<64x128xf32>
      %19 = arith.mulf %18, %15 : vector<64x128xf32>
      %20 = arith.select %17, %15, %19 : vector<64x128xi1>, vector<64x128xf32>
      %21 = arith.truncf %20 : vector<64x128xf32> to vector<64x128xbf16>
      %c0_16 = arith.constant 0 : index
      %c0_17 = arith.constant 0 : index
      %22 = vector.load %arg6[%c0_16, %c0_17] : memref<64x128xbf16, #tpu.memory_space<vmem>>, vector<64x128xbf16>
      tpu.vector_store %arg6[%c0_16, %c0_17], %21 {strides = array<i32>} : memref<64x128xbf16, #tpu.memory_space<vmem>>, vector<64x128xbf16>,
    } else {
    }
    return
  }
  func.func @transform_0(%arg0: i32, %arg1: i32, %arg2: i32) -> (i32, i32) {
    %c0_i32 = arith.constant 0 : i32
    return %arg0, %arg2 : i32, i32
  }
  func.func @transform_1(%arg0: i32, %arg1: i32, %arg2: i32) -> (i32, i32) {
    %c0_i32 = arith.constant 0 : i32
    return %arg2, %arg1 : i32, i32
  }
  func.func @transform_2(%arg0: i32, %arg1: i32, %arg2: i32) -> (i32, i32) {
    %c0_i32 = arith.constant 0 : i32
    %c0_i32_0 = arith.constant 0 : i32
    return %c0_i32, %arg1 : i32, i32
  }
  func.func @transform_3(%arg0: i32, %arg1: i32, %arg2: i32) -> (i32, i32) {
    %c0_i32 = arith.constant 0 : i32
    return %arg0, %arg1 : i32, i32
  }
}

module attributes {stable_mosaic.version = 11 : i64} {
  func.func @_mm_bias_act_kernel(%arg0: i32, %arg1: i32, %arg2: i32, %arg3: memref<16x512xbf16, #tpu.memory_space<vmem>>, %arg4: memref<512x256xbf16, #tpu.memory_space<vmem>>, %arg5: memref<1x256xf32, #tpu.memory_space<vmem>>, %arg6: memref<16x256xbf16, #tpu.memory_space<vmem>>, %arg7: memref<16x256xf32, #tpu.memory_space<vmem>>) attributes {dimension_semantics = [#tpu.dimension_semantics<parallel>, #tpu.dimension_semantics<parallel>, #tpu.dimension_semantics<arbitrary>], iteration_bounds = array<i64: 2, 1, 4>, scalar_prefetch = 0 : i64, scratch_operands = 1 : i64, tpu.core_type = #tpu.core_type<tc>, window_params = [{transform_indices = @transform_0, window_bounds = array<i64: 16, 512>}, {transform_indices = @transform_1, window_bounds = array<i64: 512, 256>}, {transform_indices = @transform_2, window_bounds = array<i64: 1, 256>}, {transform_indices = @transform_3, window_bounds = array<i64: 16, 256>}]} {
    %c0_i32 = arith.constant 0 : i32
    %0 = arith.cmpi eq, %arg2, %c0_i32 : i32
    %1 = arith.extui %0 : i1 to i32
    %c0_i32_0 = arith.constant 0 : i32
    %2 = arith.cmpi ne, %1, %c0_i32_0 : i32
    scf.if %2 {
      %cst_9 = arith.constant 0.000000e+00 : f32
      %12 = vector.broadcast %cst_9 : f32 to vector<16x256xf32>
      %c0_10 = arith.constant 0 : index
      %c0_11 = arith.constant 0 : index
      %13 = vector.load %arg7[%c0_10, %c0_11] : memref<16x256xf32, #tpu.memory_space<vmem>>, vector<16x256xf32>
      tpu.vector_store %arg7[%c0_10, %c0_11], %12 {strides = array<i32>} : memref<16x256xf32, #tpu.memory_space<vmem>>, vector<16x256xf32>,
    } else {
    }
    %c0 = arith.constant 0 : index
    %c0_1 = arith.constant 0 : index
    %3 = vector.load %arg7[%c0, %c0_1] : memref<16x256xf32, #tpu.memory_space<vmem>>, vector<16x256xf32>
    %c0_2 = arith.constant 0 : index
    %c0_3 = arith.constant 0 : index
    %4 = vector.load %arg3[%c0_2, %c0_3] : memref<16x512xbf16, #tpu.memory_space<vmem>>, vector<16x512xbf16>
    %c0_4 = arith.constant 0 : index
    %c0_5 = arith.constant 0 : index
    %5 = vector.load %arg4[%c0_4, %c0_5] : memref<512x256xbf16, #tpu.memory_space<vmem>>, vector<512x256xbf16>
    %cst = arith.constant dense<0.000000e+00> : vector<16x256xf32>
    %6 = tpu.matmul %4, %5, %cst {dimension_numbers = #tpu.dot_dimension_numbers<[1], [0], [0], [1], [0, 0, 1, 1], [], []>} : vector<16x512xbf16>, vector<512x256xbf16>, vector<16x256xf32> -> vector<16x256xf32>
    %7 = arith.addf %3, %6 : vector<16x256xf32>
    %c0_6 = arith.constant 0 : index
    %c0_7 = arith.constant 0 : index
    %8 = vector.load %arg7[%c0_6, %c0_7] : memref<16x256xf32, #tpu.memory_space<vmem>>, vector<16x256xf32>
    tpu.vector_store %arg7[%c0_6, %c0_7], %7 {strides = array<i32>} : memref<16x256xf32, #tpu.memory_space<vmem>>, vector<16x256xf32>,
    %c3_i32 = arith.constant 3 : i32
    %9 = arith.cmpi eq, %arg2, %c3_i32 : i32
    %10 = arith.extui %9 : i1 to i32
    %c0_i32_8 = arith.constant 0 : i32
    %11 = arith.cmpi ne, %10, %c0_i32_8 : i32
    scf.if %11 {
      %c0_9 = arith.constant 0 : index
      %c0_10 = arith.constant 0 : index
      %12 = vector.load %arg7[%c0_9, %c0_10] : memref<16x256xf32, #tpu.memory_space<vmem>>, vector<16x256xf32>
      %c0_11 = arith.constant 0 : index
      %c0_12 = arith.constant 0 : index
      %13 = vector.load %arg5[%c0_11, %c0_12] : memref<1x256xf32, #tpu.memory_space<vmem>>, vector<1x256xf32>
      %14 = vector.broadcast %13 : vector<1x256xf32> to vector<16x256xf32>
      %15 = arith.addf %12, %14 : vector<16x256xf32>
      %cst_13 = arith.constant 0.000000e+00 : f32
      %16 = vector.broadcast %cst_13 : f32 to vector<16x256xf32>
      %17 = arith.cmpf oge, %15, %16 : vector<16x256xf32>
      %cst_14 = arith.constant 2.000000e-01 : f32
      %18 = vector.broadcast %cst_14 : f32 to vector<16x256xf32>
      %19 = arith.mulf %18, %15 : vector<16x256xf32>
      %20 = arith.select %17, %15, %19 : vector<16x256xi1>, vector<16x256xf32>
      %21 = arith.truncf %20 : vector<16x256xf32> to vector<16x256xbf16>
      %c0_15 = arith.constant 0 : index
      %c0_16 = arith.constant 0 : index
      %22 = vector.load %arg6[%c0_15, %c0_16] : memref<16x256xbf16, #tpu.memory_space<vmem>>, vector<16x256xbf16>
      tpu.vector_store %arg6[%c0_15, %c0_16], %21 {strides = array<i32>} : memref<16x256xbf16, #tpu.memory_space<vmem>>, vector<16x256xbf16>,
    } else {
    }
    return
  }
  func.func @transform_0(%arg0: i32, %arg1: i32, %arg2: i32) -> (i32, i32) {
    %c0_i32 = arith.constant 0 : i32
    return %arg0, %arg2 : i32, i32
  }
  func.func @transform_1(%arg0: i32, %arg1: i32, %arg2: i32) -> (i32, i32) {
    %c0_i32 = arith.constant 0 : i32
    return %arg2, %arg1 : i32, i32
  }
  func.func @transform_2(%arg0: i32, %arg1: i32, %arg2: i32) -> (i32, i32) {
    %c0_i32 = arith.constant 0 : i32
    %c0_i32_0 = arith.constant 0 : i32
    return %c0_i32, %arg1 : i32, i32
  }
  func.func @transform_3(%arg0: i32, %arg1: i32, %arg2: i32) -> (i32, i32) {
    %c0_i32 = arith.constant 0 : i32
    return %arg0, %arg1 : i32, i32
  }
}

module attributes {stable_mosaic.version = 11 : i64} {
  func.func @_mm_bias_act_kernel(%arg0: i32, %arg1: i32, %arg2: i32, %arg3: memref<16x512xbf16, #tpu.memory_space<vmem>>, %arg4: memref<512x256xbf16, #tpu.memory_space<vmem>>, %arg5: memref<1x256xf32, #tpu.memory_space<vmem>>, %arg6: memref<16x256xf32, #tpu.memory_space<vmem>>, %arg7: memref<16x256xf32, #tpu.memory_space<vmem>>) attributes {dimension_semantics = [#tpu.dimension_semantics<parallel>, #tpu.dimension_semantics<parallel>, #tpu.dimension_semantics<arbitrary>], iteration_bounds = array<i64: 1, 1, 8>, scalar_prefetch = 0 : i64, scratch_operands = 1 : i64, tpu.core_type = #tpu.core_type<tc>, window_params = [{transform_indices = @transform_0, window_bounds = array<i64: 16, 512>}, {transform_indices = @transform_1, window_bounds = array<i64: 512, 256>}, {transform_indices = @transform_2, window_bounds = array<i64: 1, 256>}, {transform_indices = @transform_3, window_bounds = array<i64: 16, 256>}]} {
    %c0_i32 = arith.constant 0 : i32
    %0 = arith.cmpi eq, %arg2, %c0_i32 : i32
    %1 = arith.extui %0 : i1 to i32
    %c0_i32_0 = arith.constant 0 : i32
    %2 = arith.cmpi ne, %1, %c0_i32_0 : i32
    scf.if %2 {
      %cst_9 = arith.constant 0.000000e+00 : f32
      %12 = vector.broadcast %cst_9 : f32 to vector<16x256xf32>
      %c0_10 = arith.constant 0 : index
      %c0_11 = arith.constant 0 : index
      %13 = vector.load %arg7[%c0_10, %c0_11] : memref<16x256xf32, #tpu.memory_space<vmem>>, vector<16x256xf32>
      tpu.vector_store %arg7[%c0_10, %c0_11], %12 {strides = array<i32>} : memref<16x256xf32, #tpu.memory_space<vmem>>, vector<16x256xf32>,
    } else {
    }
    %c0 = arith.constant 0 : index
    %c0_1 = arith.constant 0 : index
    %3 = vector.load %arg7[%c0, %c0_1] : memref<16x256xf32, #tpu.memory_space<vmem>>, vector<16x256xf32>
    %c0_2 = arith.constant 0 : index
    %c0_3 = arith.constant 0 : index
    %4 = vector.load %arg3[%c0_2, %c0_3] : memref<16x512xbf16, #tpu.memory_space<vmem>>, vector<16x512xbf16>
    %c0_4 = arith.constant 0 : index
    %c0_5 = arith.constant 0 : index
    %5 = vector.load %arg4[%c0_4, %c0_5] : memref<512x256xbf16, #tpu.memory_space<vmem>>, vector<512x256xbf16>
    %cst = arith.constant dense<0.000000e+00> : vector<16x256xf32>
    %6 = tpu.matmul %4, %5, %cst {dimension_numbers = #tpu.dot_dimension_numbers<[1], [0], [0], [1], [0, 0, 1, 1], [], []>} : vector<16x512xbf16>, vector<512x256xbf16>, vector<16x256xf32> -> vector<16x256xf32>
    %7 = arith.addf %3, %6 : vector<16x256xf32>
    %c0_6 = arith.constant 0 : index
    %c0_7 = arith.constant 0 : index
    %8 = vector.load %arg7[%c0_6, %c0_7] : memref<16x256xf32, #tpu.memory_space<vmem>>, vector<16x256xf32>
    tpu.vector_store %arg7[%c0_6, %c0_7], %7 {strides = array<i32>} : memref<16x256xf32, #tpu.memory_space<vmem>>, vector<16x256xf32>,
    %c7_i32 = arith.constant 7 : i32
    %9 = arith.cmpi eq, %arg2, %c7_i32 : i32
    %10 = arith.extui %9 : i1 to i32
    %c0_i32_8 = arith.constant 0 : i32
    %11 = arith.cmpi ne, %10, %c0_i32_8 : i32
    scf.if %11 {
      %c0_9 = arith.constant 0 : index
      %c0_10 = arith.constant 0 : index
      %12 = vector.load %arg7[%c0_9, %c0_10] : memref<16x256xf32, #tpu.memory_space<vmem>>, vector<16x256xf32>
      %c0_11 = arith.constant 0 : index
      %c0_12 = arith.constant 0 : index
      %13 = vector.load %arg5[%c0_11, %c0_12] : memref<1x256xf32, #tpu.memory_space<vmem>>, vector<1x256xf32>
      %14 = vector.broadcast %13 : vector<1x256xf32> to vector<16x256xf32>
      %15 = arith.addf %12, %14 : vector<16x256xf32>
      %cst_13 = arith.constant 0.000000e+00 : f32
      %16 = vector.broadcast %cst_13 : f32 to vector<16x256xf32>
      %17 = arith.cmpf oge, %15, %16 : vector<16x256xf32>
      %cst_14 = arith.constant 2.000000e-01 : f32
      %18 = vector.broadcast %cst_14 : f32 to vector<16x256xf32>
      %19 = arith.mulf %18, %15 : vector<16x256xf32>
      %20 = arith.select %17, %15, %19 : vector<16x256xi1>, vector<16x256xf32>
      %c0_15 = arith.constant 0 : index
      %c0_16 = arith.constant 0 : index
      %21 = vector.load %arg6[%c0_15, %c0_16] : memref<16x256xf32, #tpu.memory_space<vmem>>, vector<16x256xf32>
      tpu.vector_store %arg6[%c0_15, %c0_16], %20 {strides = array<i32>} : memref<16x256xf32, #tpu.memory_space<vmem>>, vector<16x256xf32>,
    } else {
    }
    return
  }
  func.func @transform_0(%arg0: i32, %arg1: i32, %arg2: i32) -> (i32, i32) {
    %c0_i32 = arith.constant 0 : i32
    return %arg0, %arg2 : i32, i32
  }
  func.func @transform_1(%arg0: i32, %arg1: i32, %arg2: i32) -> (i32, i32) {
    %c0_i32 = arith.constant 0 : i32
    return %arg2, %arg1 : i32, i32
  }
  func.func @transform_2(%arg0: i32, %arg1: i32, %arg2: i32) -> (i32, i32) {
    %c0_i32 = arith.constant 0 : i32
    %c0_i32_0 = arith.constant 0 : i32
    return %c0_i32, %arg1 : i32, i32
  }
  func.func @transform_3(%arg0: i32, %arg1: i32, %arg2: i32) -> (i32, i32) {
    %c0_i32 = arith.constant 0 : i32
    return %arg0, %arg1 : i32, i32
  }
}

module attributes {stable_mosaic.version = 11 : i64} {
  func.func @_vq_kernel(%arg0: i32, %arg1: memref<8x256xf32, #tpu.memory_space<vmem>>, %arg2: memref<512x256xf32, #tpu.memory_space<vmem>>, %arg3: memref<1x512xf32, #tpu.memory_space<vmem>>, %arg4: memref<8x1xi32, #tpu.memory_space<vmem>>) attributes {dimension_semantics = [#tpu.dimension_semantics<parallel>], iteration_bounds = array<i64: 1>, scalar_prefetch = 0 : i64, scratch_operands = 0 : i64, tpu.core_type = #tpu.core_type<tc>, window_params = [{transform_indices = @transform_0, window_bounds = array<i64: 8, 256>}, {pipeline_mode = #tpu.pipeline_mode<synchronous>, transform_indices = @transform_1, window_bounds = array<i64: 512, 256>}, {pipeline_mode = #tpu.pipeline_mode<synchronous>, transform_indices = @transform_2, window_bounds = array<i64: 1, 512>}, {transform_indices = @transform_3, window_bounds = array<i64: 8, 1>}]} {
    %c0 = arith.constant 0 : index
    %c0_0 = arith.constant 0 : index
    %0 = vector.load %arg1[%c0, %c0_0] : memref<8x256xf32, #tpu.memory_space<vmem>>, vector<8x256xf32>
    %c0_1 = arith.constant 0 : index
    %c0_2 = arith.constant 0 : index
    %1 = vector.load %arg2[%c0_1, %c0_2] : memref<512x256xf32, #tpu.memory_space<vmem>>, vector<512x256xf32>
    %cst = arith.constant dense<0.000000e+00> : vector<8x512xf32>
    %2 = tpu.matmul %0, %1, %cst {dimension_numbers = #tpu.dot_dimension_numbers<[1], [1], [0], [0], [0, 0, 1, 0], [], []>, precision = #tpu.contract_precision<fp32>} : vector<8x256xf32>, vector<512x256xf32>, vector<8x512xf32> -> vector<8x512xf32>
    %3 = arith.mulf %0, %0 : vector<8x256xf32>
    %cst_3 = arith.constant dense<0.000000e+00> : vector<8xf32>
    %4 = vector.multi_reduction <add>, %3, %cst_3 [1] : vector<8x256xf32> to vector<8xf32>
    %5 = vector.shape_cast %4 : vector<8xf32> to vector<8x1xf32>
    %cst_4 = arith.constant 2.000000e+00 : f32
    %6 = vector.broadcast %cst_4 : f32 to vector<8x512xf32>
    %7 = arith.mulf %6, %2 : vector<8x512xf32>
    %8 = vector.broadcast %5 : vector<8x1xf32> to vector<8x512xf32>
    %9 = arith.subf %8, %7 : vector<8x512xf32>
    %c0_5 = arith.constant 0 : index
    %c0_6 = arith.constant 0 : index
    %10 = vector.load %arg3[%c0_5, %c0_6] : memref<1x512xf32, #tpu.memory_space<vmem>>, vector<1x512xf32>
    %11 = vector.broadcast %10 : vector<1x512xf32> to vector<8x512xf32>
    %12 = arith.addf %9, %11 : vector<8x512xf32>
    %13 = tpu.iota {dimensions = array<i32: 1>} : vector<8x512xi32>
    %cst_7 = arith.constant dense<0x7F800000> : vector<8xf32>
    %14 = vector.multi_reduction <minimumf>, %12, %cst_7 [1] : vector<8x512xf32> to vector<8xf32>
    %15 = vector.shape_cast %14 : vector<8xf32> to vector<8x1xf32>
    %16 = vector.broadcast %15 : vector<8x1xf32> to vector<8x512xf32>
    %17 = arith.cmpf oeq, %12, %16 : vector<8x512xf32>
    %18 = arith.sitofp %13 : vector<8x512xi32> to vector<8x512xf32>
    %cst_8 = arith.constant 5.120000e+02 : f32
    %19 = vector.broadcast %cst_8 : f32 to vector<8x512xf32>
    %20 = arith.select %17, %18, %19 : vector<8x512xi1>, vector<8x512xf32>
    %cst_9 = arith.constant dense<0x7F800000> : vector<8xf32>
    %21 = vector.multi_reduction <minimumf>, %20, %cst_9 [1] : vector<8x512xf32> to vector<8xf32>
    %22 = vector.shape_cast %21 : vector<8xf32> to vector<8x1xf32>
    %23 = arith.fptosi %22 : vector<8x1xf32> to vector<8x1xi32>
    %c0_10 = arith.constant 0 : index
    %c0_11 = arith.constant 0 : index
    %24 = vector.load %arg4[%c0_10, %c0_11] : memref<8x1xi32, #tpu.memory_space<vmem>>, vector<8x1xi32>
    tpu.vector_store %arg4[%c0_10, %c0_11], %23 {strides = array<i32>} : memref<8x1xi32, #tpu.memory_space<vmem>>, vector<8x1xi32>,
    return
  }
  func.func @transform_0(%arg0: i32) -> (i32, i32) {
    %c0_i32 = arith.constant 0 : i32
    %c0_i32_0 = arith.constant 0 : i32
    return %arg0, %c0_i32 : i32, i32
  }
  func.func @transform_1(%arg0: i32) -> (i32, i32) {
    %c0_i32 = arith.constant 0 : i32
    %c0_i32_0 = arith.constant 0 : i32
    %c0_i32_1 = arith.constant 0 : i32
    return %c0_i32, %c0_i32_0 : i32, i32
  }
  func.func @transform_2(%arg0: i32) -> (i32, i32) {
    %c0_i32 = arith.constant 0 : i32
    %c0_i32_0 = arith.constant 0 : i32
    %c0_i32_1 = arith.constant 0 : i32
    return %c0_i32, %c0_i32_0 : i32, i32
  }
  func.func @transform_3(%arg0: i32) -> (i32, i32) {
    %c0_i32 = arith.constant 0 : i32
    %c0_i32_0 = arith.constant 0 : i32
    return %arg0, %c0_i32 : i32, i32
  }
}

module attributes {stable_mosaic.version = 11 : i64} {
  func.func @_mm_bias_act_kernel(%arg0: i32, %arg1: i32, %arg2: i32, %arg3: memref<32x512xbf16, #tpu.memory_space<vmem>>, %arg4: memref<512x256xbf16, #tpu.memory_space<vmem>>, %arg5: memref<1x256xf32, #tpu.memory_space<vmem>>, %arg6: memref<32x256xbf16, #tpu.memory_space<vmem>>, %arg7: memref<32x256xf32, #tpu.memory_space<vmem>>) attributes {dimension_semantics = [#tpu.dimension_semantics<parallel>, #tpu.dimension_semantics<parallel>, #tpu.dimension_semantics<arbitrary>], iteration_bounds = array<i64: 1, 4, 2>, scalar_prefetch = 0 : i64, scratch_operands = 1 : i64, tpu.core_type = #tpu.core_type<tc>, window_params = [{transform_indices = @transform_0, window_bounds = array<i64: 32, 512>}, {transform_indices = @transform_1, window_bounds = array<i64: 512, 256>}, {transform_indices = @transform_2, window_bounds = array<i64: 1, 256>}, {transform_indices = @transform_3, window_bounds = array<i64: 32, 256>}]} {
    %c0_i32 = arith.constant 0 : i32
    %0 = arith.cmpi eq, %arg2, %c0_i32 : i32
    %1 = arith.extui %0 : i1 to i32
    %c0_i32_0 = arith.constant 0 : i32
    %2 = arith.cmpi ne, %1, %c0_i32_0 : i32
    scf.if %2 {
      %cst_9 = arith.constant 0.000000e+00 : f32
      %12 = vector.broadcast %cst_9 : f32 to vector<32x256xf32>
      %c0_10 = arith.constant 0 : index
      %c0_11 = arith.constant 0 : index
      %13 = vector.load %arg7[%c0_10, %c0_11] : memref<32x256xf32, #tpu.memory_space<vmem>>, vector<32x256xf32>
      tpu.vector_store %arg7[%c0_10, %c0_11], %12 {strides = array<i32>} : memref<32x256xf32, #tpu.memory_space<vmem>>, vector<32x256xf32>,
    } else {
    }
    %c0 = arith.constant 0 : index
    %c0_1 = arith.constant 0 : index
    %3 = vector.load %arg7[%c0, %c0_1] : memref<32x256xf32, #tpu.memory_space<vmem>>, vector<32x256xf32>
    %c0_2 = arith.constant 0 : index
    %c0_3 = arith.constant 0 : index
    %4 = vector.load %arg3[%c0_2, %c0_3] : memref<32x512xbf16, #tpu.memory_space<vmem>>, vector<32x512xbf16>
    %c0_4 = arith.constant 0 : index
    %c0_5 = arith.constant 0 : index
    %5 = vector.load %arg4[%c0_4, %c0_5] : memref<512x256xbf16, #tpu.memory_space<vmem>>, vector<512x256xbf16>
    %cst = arith.constant dense<0.000000e+00> : vector<32x256xf32>
    %6 = tpu.matmul %4, %5, %cst {dimension_numbers = #tpu.dot_dimension_numbers<[1], [0], [0], [1], [0, 0, 1, 1], [], []>} : vector<32x512xbf16>, vector<512x256xbf16>, vector<32x256xf32> -> vector<32x256xf32>
    %7 = arith.addf %3, %6 : vector<32x256xf32>
    %c0_6 = arith.constant 0 : index
    %c0_7 = arith.constant 0 : index
    %8 = vector.load %arg7[%c0_6, %c0_7] : memref<32x256xf32, #tpu.memory_space<vmem>>, vector<32x256xf32>
    tpu.vector_store %arg7[%c0_6, %c0_7], %7 {strides = array<i32>} : memref<32x256xf32, #tpu.memory_space<vmem>>, vector<32x256xf32>,
    %c1_i32 = arith.constant 1 : i32
    %9 = arith.cmpi eq, %arg2, %c1_i32 : i32
    %10 = arith.extui %9 : i1 to i32
    %c0_i32_8 = arith.constant 0 : i32
    %11 = arith.cmpi ne, %10, %c0_i32_8 : i32
    scf.if %11 {
      %c0_9 = arith.constant 0 : index
      %c0_10 = arith.constant 0 : index
      %12 = vector.load %arg7[%c0_9, %c0_10] : memref<32x256xf32, #tpu.memory_space<vmem>>, vector<32x256xf32>
      %c0_11 = arith.constant 0 : index
      %c0_12 = arith.constant 0 : index
      %13 = vector.load %arg5[%c0_11, %c0_12] : memref<1x256xf32, #tpu.memory_space<vmem>>, vector<1x256xf32>
      %14 = vector.broadcast %13 : vector<1x256xf32> to vector<32x256xf32>
      %15 = arith.addf %12, %14 : vector<32x256xf32>
      %cst_13 = arith.constant 0.000000e+00 : f32
      %16 = vector.broadcast %cst_13 : f32 to vector<32x256xf32>
      %17 = arith.cmpf oge, %15, %16 : vector<32x256xf32>
      %cst_14 = arith.constant 2.000000e-01 : f32
      %18 = vector.broadcast %cst_14 : f32 to vector<32x256xf32>
      %19 = arith.mulf %18, %15 : vector<32x256xf32>
      %20 = arith.select %17, %15, %19 : vector<32x256xi1>, vector<32x256xf32>
      %21 = arith.truncf %20 : vector<32x256xf32> to vector<32x256xbf16>
      %c0_15 = arith.constant 0 : index
      %c0_16 = arith.constant 0 : index
      %22 = vector.load %arg6[%c0_15, %c0_16] : memref<32x256xbf16, #tpu.memory_space<vmem>>, vector<32x256xbf16>
      tpu.vector_store %arg6[%c0_15, %c0_16], %21 {strides = array<i32>} : memref<32x256xbf16, #tpu.memory_space<vmem>>, vector<32x256xbf16>,
    } else {
    }
    return
  }
  func.func @transform_0(%arg0: i32, %arg1: i32, %arg2: i32) -> (i32, i32) {
    %c0_i32 = arith.constant 0 : i32
    return %arg0, %arg2 : i32, i32
  }
  func.func @transform_1(%arg0: i32, %arg1: i32, %arg2: i32) -> (i32, i32) {
    %c0_i32 = arith.constant 0 : i32
    return %arg2, %arg1 : i32, i32
  }
  func.func @transform_2(%arg0: i32, %arg1: i32, %arg2: i32) -> (i32, i32) {
    %c0_i32 = arith.constant 0 : i32
    %c0_i32_0 = arith.constant 0 : i32
    return %c0_i32, %arg1 : i32, i32
  }
  func.func @transform_3(%arg0: i32, %arg1: i32, %arg2: i32) -> (i32, i32) {
    %c0_i32 = arith.constant 0 : i32
    return %arg0, %arg1 : i32, i32
  }
}

module attributes {stable_mosaic.version = 11 : i64} {
  func.func @_mm_bias_act_kernel(%arg0: i32, %arg1: i32, %arg2: i32, %arg3: memref<64x512xbf16, #tpu.memory_space<vmem>>, %arg4: memref<512x256xbf16, #tpu.memory_space<vmem>>, %arg5: memref<1x256xf32, #tpu.memory_space<vmem>>, %arg6: memref<64x256xbf16, #tpu.memory_space<vmem>>, %arg7: memref<64x256xf32, #tpu.memory_space<vmem>>) attributes {dimension_semantics = [#tpu.dimension_semantics<parallel>, #tpu.dimension_semantics<parallel>, #tpu.dimension_semantics<arbitrary>], iteration_bounds = array<i64: 1, 2, 2>, scalar_prefetch = 0 : i64, scratch_operands = 1 : i64, tpu.core_type = #tpu.core_type<tc>, window_params = [{transform_indices = @transform_0, window_bounds = array<i64: 64, 512>}, {transform_indices = @transform_1, window_bounds = array<i64: 512, 256>}, {transform_indices = @transform_2, window_bounds = array<i64: 1, 256>}, {transform_indices = @transform_3, window_bounds = array<i64: 64, 256>}]} {
    %c0_i32 = arith.constant 0 : i32
    %0 = arith.cmpi eq, %arg2, %c0_i32 : i32
    %1 = arith.extui %0 : i1 to i32
    %c0_i32_0 = arith.constant 0 : i32
    %2 = arith.cmpi ne, %1, %c0_i32_0 : i32
    scf.if %2 {
      %cst_9 = arith.constant 0.000000e+00 : f32
      %12 = vector.broadcast %cst_9 : f32 to vector<64x256xf32>
      %c0_10 = arith.constant 0 : index
      %c0_11 = arith.constant 0 : index
      %13 = vector.load %arg7[%c0_10, %c0_11] : memref<64x256xf32, #tpu.memory_space<vmem>>, vector<64x256xf32>
      tpu.vector_store %arg7[%c0_10, %c0_11], %12 {strides = array<i32>} : memref<64x256xf32, #tpu.memory_space<vmem>>, vector<64x256xf32>,
    } else {
    }
    %c0 = arith.constant 0 : index
    %c0_1 = arith.constant 0 : index
    %3 = vector.load %arg7[%c0, %c0_1] : memref<64x256xf32, #tpu.memory_space<vmem>>, vector<64x256xf32>
    %c0_2 = arith.constant 0 : index
    %c0_3 = arith.constant 0 : index
    %4 = vector.load %arg3[%c0_2, %c0_3] : memref<64x512xbf16, #tpu.memory_space<vmem>>, vector<64x512xbf16>
    %c0_4 = arith.constant 0 : index
    %c0_5 = arith.constant 0 : index
    %5 = vector.load %arg4[%c0_4, %c0_5] : memref<512x256xbf16, #tpu.memory_space<vmem>>, vector<512x256xbf16>
    %cst = arith.constant dense<0.000000e+00> : vector<64x256xf32>
    %6 = tpu.matmul %4, %5, %cst {dimension_numbers = #tpu.dot_dimension_numbers<[1], [0], [0], [1], [0, 0, 1, 1], [], []>} : vector<64x512xbf16>, vector<512x256xbf16>, vector<64x256xf32> -> vector<64x256xf32>
    %7 = arith.addf %3, %6 : vector<64x256xf32>
    %c0_6 = arith.constant 0 : index
    %c0_7 = arith.constant 0 : index
    %8 = vector.load %arg7[%c0_6, %c0_7] : memref<64x256xf32, #tpu.memory_space<vmem>>, vector<64x256xf32>
    tpu.vector_store %arg7[%c0_6, %c0_7], %7 {strides = array<i32>} : memref<64x256xf32, #tpu.memory_space<vmem>>, vector<64x256xf32>,
    %c1_i32 = arith.constant 1 : i32
    %9 = arith.cmpi eq, %arg2, %c1_i32 : i32
    %10 = arith.extui %9 : i1 to i32
    %c0_i32_8 = arith.constant 0 : i32
    %11 = arith.cmpi ne, %10, %c0_i32_8 : i32
    scf.if %11 {
      %c0_9 = arith.constant 0 : index
      %c0_10 = arith.constant 0 : index
      %12 = vector.load %arg7[%c0_9, %c0_10] : memref<64x256xf32, #tpu.memory_space<vmem>>, vector<64x256xf32>
      %c0_11 = arith.constant 0 : index
      %c0_12 = arith.constant 0 : index
      %13 = vector.load %arg5[%c0_11, %c0_12] : memref<1x256xf32, #tpu.memory_space<vmem>>, vector<1x256xf32>
      %14 = vector.broadcast %13 : vector<1x256xf32> to vector<64x256xf32>
      %15 = arith.addf %12, %14 : vector<64x256xf32>
      %cst_13 = arith.constant 0.000000e+00 : f32
      %16 = vector.broadcast %cst_13 : f32 to vector<64x256xf32>
      %17 = arith.cmpf oge, %15, %16 : vector<64x256xf32>
      %cst_14 = arith.constant 2.000000e-01 : f32
      %18 = vector.broadcast %cst_14 : f32 to vector<64x256xf32>
      %19 = arith.mulf %18, %15 : vector<64x256xf32>
      %20 = arith.select %17, %15, %19 : vector<64x256xi1>, vector<64x256xf32>
      %21 = arith.truncf %20 : vector<64x256xf32> to vector<64x256xbf16>
      %c0_15 = arith.constant 0 : index
      %c0_16 = arith.constant 0 : index
      %22 = vector.load %arg6[%c0_15, %c0_16] : memref<64x256xbf16, #tpu.memory_space<vmem>>, vector<64x256xbf16>
      tpu.vector_store %arg6[%c0_15, %c0_16], %21 {strides = array<i32>} : memref<64x256xbf16, #tpu.memory_space<vmem>>, vector<64x256xbf16>,
    } else {
    }
    return
  }
  func.func @transform_0(%arg0: i32, %arg1: i32, %arg2: i32) -> (i32, i32) {
    %c0_i32 = arith.constant 0 : i32
    return %arg0, %arg2 : i32, i32
  }
  func.func @transform_1(%arg0: i32, %arg1: i32, %arg2: i32) -> (i32, i32) {
    %c0_i32 = arith.constant 0 : i32
    return %arg2, %arg1 : i32, i32
  }
  func.func @transform_2(%arg0: i32, %arg1: i32, %arg2: i32) -> (i32, i32) {
    %c0_i32 = arith.constant 0 : i32
    %c0_i32_0 = arith.constant 0 : i32
    return %c0_i32, %arg1 : i32, i32
  }
  func.func @transform_3(%arg0: i32, %arg1: i32, %arg2: i32) -> (i32, i32) {
    %c0_i32 = arith.constant 0 : i32
    return %arg0, %arg1 : i32, i32
  }
}

module attributes {stable_mosaic.version = 11 : i64} {
  func.func @_mm_bias_act_kernel(%arg0: i32, %arg1: i32, %arg2: i32, %arg3: memref<96x512xbf16, #tpu.memory_space<vmem>>, %arg4: memref<512x128xbf16, #tpu.memory_space<vmem>>, %arg5: memref<1x128xf32, #tpu.memory_space<vmem>>, %arg6: memref<96x128xf32, #tpu.memory_space<vmem>>, %arg7: memref<96x128xf32, #tpu.memory_space<vmem>>) attributes {dimension_semantics = [#tpu.dimension_semantics<parallel>, #tpu.dimension_semantics<parallel>, #tpu.dimension_semantics<arbitrary>], iteration_bounds = array<i64: 2, 1, 1>, scalar_prefetch = 0 : i64, scratch_operands = 1 : i64, tpu.core_type = #tpu.core_type<tc>, window_params = [{transform_indices = @transform_0, window_bounds = array<i64: 96, 512>}, {transform_indices = @transform_1, window_bounds = array<i64: 512, 128>}, {transform_indices = @transform_2, window_bounds = array<i64: 1, 128>}, {transform_indices = @transform_3, window_bounds = array<i64: 96, 128>}]} {
    %c0_i32 = arith.constant 0 : i32
    %0 = arith.cmpi eq, %arg2, %c0_i32 : i32
    %1 = arith.extui %0 : i1 to i32
    %c0_i32_0 = arith.constant 0 : i32
    %2 = arith.cmpi ne, %1, %c0_i32_0 : i32
    scf.if %2 {
      %cst_10 = arith.constant 0.000000e+00 : f32
      %12 = vector.broadcast %cst_10 : f32 to vector<96x128xf32>
      %c0_11 = arith.constant 0 : index
      %c0_12 = arith.constant 0 : index
      %13 = vector.load %arg7[%c0_11, %c0_12] : memref<96x128xf32, #tpu.memory_space<vmem>>, vector<96x128xf32>
      tpu.vector_store %arg7[%c0_11, %c0_12], %12 {strides = array<i32>} : memref<96x128xf32, #tpu.memory_space<vmem>>, vector<96x128xf32>,
    } else {
    }
    %c0 = arith.constant 0 : index
    %c0_1 = arith.constant 0 : index
    %3 = vector.load %arg7[%c0, %c0_1] : memref<96x128xf32, #tpu.memory_space<vmem>>, vector<96x128xf32>
    %c0_2 = arith.constant 0 : index
    %c0_3 = arith.constant 0 : index
    %4 = vector.load %arg3[%c0_2, %c0_3] : memref<96x512xbf16, #tpu.memory_space<vmem>>, vector<96x512xbf16>
    %c0_4 = arith.constant 0 : index
    %c0_5 = arith.constant 0 : index
    %5 = vector.load %arg4[%c0_4, %c0_5] : memref<512x128xbf16, #tpu.memory_space<vmem>>, vector<512x128xbf16>
    %cst = arith.constant dense<0.000000e+00> : vector<96x128xf32>
    %6 = tpu.matmul %4, %5, %cst {dimension_numbers = #tpu.dot_dimension_numbers<[1], [0], [0], [1], [0, 0, 1, 1], [], []>} : vector<96x512xbf16>, vector<512x128xbf16>, vector<96x128xf32> -> vector<96x128xf32>
    %7 = arith.addf %3, %6 : vector<96x128xf32>
    %c0_6 = arith.constant 0 : index
    %c0_7 = arith.constant 0 : index
    %8 = vector.load %arg7[%c0_6, %c0_7] : memref<96x128xf32, #tpu.memory_space<vmem>>, vector<96x128xf32>
    tpu.vector_store %arg7[%c0_6, %c0_7], %7 {strides = array<i32>} : memref<96x128xf32, #tpu.memory_space<vmem>>, vector<96x128xf32>,
    %c0_i32_8 = arith.constant 0 : i32
    %9 = arith.cmpi eq, %arg2, %c0_i32_8 : i32
    %10 = arith.extui %9 : i1 to i32
    %c0_i32_9 = arith.constant 0 : i32
    %11 = arith.cmpi ne, %10, %c0_i32_9 : i32
    scf.if %11 {
      %c0_10 = arith.constant 0 : index
      %c0_11 = arith.constant 0 : index
      %12 = vector.load %arg7[%c0_10, %c0_11] : memref<96x128xf32, #tpu.memory_space<vmem>>, vector<96x128xf32>
      %c0_12 = arith.constant 0 : index
      %c0_13 = arith.constant 0 : index
      %13 = vector.load %arg5[%c0_12, %c0_13] : memref<1x128xf32, #tpu.memory_space<vmem>>, vector<1x128xf32>
      %14 = vector.broadcast %13 : vector<1x128xf32> to vector<96x128xf32>
      %15 = arith.addf %12, %14 : vector<96x128xf32>
      %16 = math.tanh %15 : vector<96x128xf32>
      %c0_14 = arith.constant 0 : index
      %c0_15 = arith.constant 0 : index
      %17 = vector.load %arg6[%c0_14, %c0_15] : memref<96x128xf32, #tpu.memory_space<vmem>>, vector<96x128xf32>
      tpu.vector_store %arg6[%c0_14, %c0_15], %16 {strides = array<i32>} : memref<96x128xf32, #tpu.memory_space<vmem>>, vector<96x128xf32>,
    } else {
    }
    return
  }
  func.func @transform_0(%arg0: i32, %arg1: i32, %arg2: i32) -> (i32, i32) {
    %c0_i32 = arith.constant 0 : i32
    return %arg0, %arg2 : i32, i32
  }
  func.func @transform_1(%arg0: i32, %arg1: i32, %arg2: i32) -> (i32, i32) {
    %c0_i32 = arith.constant 0 : i32
    return %arg2, %arg1 : i32, i32
  }
  func.func @transform_2(%arg0: i32, %arg1: i32, %arg2: i32) -> (i32, i32) {
    %c0_i32 = arith.constant 0 : i32
    %c0_i32_0 = arith.constant 0 : i32
    return %c0_i32, %arg1 : i32, i32
  }
  func.func @transform_3(%arg0: i32, %arg1: i32, %arg2: i32) -> (i32, i32) {
    %c0_i32 = arith.constant 0 : i32
    return %arg0, %arg1 : i32, i32
  }
}

</mosaic_0001>

<bundles_post_ra>
// kernel: vqgan_forward.7
= control target key start
LH: loop header
LB: loop body
LE: loop exit
PB: predicated region body
PF: predicated region fallthrough
CT: control target
= control target key end

     0   :  { %8 = vsyncpa [#allocation4], 0  ;;  %s906_s12 = smov 0   ;;  %s908_s13 = smov 0   ;;  %s1001_s0 = inlined_call_operand.vmem [shape: bf16[128,128], index: 0, kind: input, shape index: {}]   ;;  %s1002_s1 = inlined_call_operand.vmem [shape: bf16[128,128], index: 1, kind: input, shape index: {}]   ;;  %s1003_s2 = inlined_call_operand.hbm [shape: f32[1,128], index: 2, kind: input, shape index: {}]   ;;  %s1004_s3 = inlined_call_operand.vmem [shape: bf16[128,128], index: 3, kind: output, shape index: {}]  }
   0x1   :  { %s910_s14 = smov 0  }
   0x2 LB: > { %s666_s15 = sadd.s32 4294967295, %s883_s14   ;;  %s33_s16 = sadd.s32 1, %s879_s13  ;;  %s883_s14 = sphi %s910_s14, %s14_s14   ;;  %s879_s13 = sphi %s908_s13, %s1008_s13   ;;  %s875_s12 = sphi %s906_s12, %s1007_s12  }
   0x3   : > { %p35_p0 = scmp.ge.s32.totalorder %s33_s16, 2  ;;  %p668_p1 = scmp.ge.s32.totalorder %s883_s14, 1 }
   0x4   : > { %p148_p2 = scmp.lt.s32.totalorder %s883_s14, 3  ;;  %p931_p4 = scmp.eq.s32.totalorder %s666_s15, 0 }
   0x5   : > { %s1010_s16 = smov (%p35_p0, %s33_s16), 0  ;;  %s885_s19 = smov [#allocation3]  }
   0x6   : > { %p927_p3 = pnand %p668_p1, %p148_p2  ;;  %s175_s20 = sshll.u32 %s885_s19, 4  ;;  %s176_s20 = int_to_ptr.vmem [resolvable:$true] %s175_s20 }
   0x7   : > { %s842_s21 = scalar_lea.vmem %s176_s20, 16  ;;  %s849_s22 = scalar_lea.vmem %s176_s20, 32 }
   0x8   : > { %p788_p5 = pneg %p927_p3  ;;  %p843_p8 = scmp.ne.s32.totalorder %s176_s20, %s842_s21 }
   0x9   : > { %p850_p11 = scmp.lt.s32.totalorder %s176_s20, %s176_s20  ;;  %p851_p12 = scmp.lt.s32.totalorder %s849_s22, %s842_s21 }
   0xa   : > { %p789_p6 = pnand %p931_p4, %p788_p5 }
   0xb   : > { %p852_p13 = por %p851_p12, %p850_p11 }
   0xc   : > { %p833_p7 = pneg %p789_p6 }
   0xe   : > { %p845_p9 = pnand %p843_p8, %p833_p7 }
  0x10   : > { %p846_p10 = pneg %p845_p9 }
  0x12   : > { %p853_p0 = pnand %p852_p13, %p846_p10 }
  0x14   : > { %856 = shalt.err (!%p853_p0)
}
  0x15   : > { %791 = dma.hbm_to_vmem [thread:$0]  (!%p789_p6), %s1003_s2, 16, %s176_s20, [#allocation4]  }
  0x16   : > { %200 = sbr.rel (%p927_p3) target bundleno = 270 (0x10e), region = 32 }
  0x1b   : > { %870 = dma.done.wait (%p931_p4), [#allocation4], 16  }
  0x1c   : > { %872 = vsyncadd (%p931_p4), [#allocation4], 4294967280  ;;  %s674_s25 = sshll.u32 %s875_s12, 3  ;;  %v819_v0 = vld [vmem:[%s1002_s1 + $0x38] sm:$0xff]   ;;  %v820_v1 = vld [vmem:[%s1002_s1 + $0x30] sm:$0xff]  }
  0x1d   : > { %p239_p1 = scmp.lt.s32.totalorder %s674_s25, 15  ;;  %744 = vmatprep.subr.bf16.mxu0 %v819_v0  ;;  %768 = vmatprep.subr.bf16.mxu1 %v819_v0  ;;  %v821_v2 = vld [vmem:[%s1002_s1 + $0x28] sm:$0xff]   ;;  %v822_v3 = vld [vmem:[%s1002_s1 + $0x20] sm:$0xff]   ;;  %v823_v6 = vld [vmem:[%s1002_s1 + $0x18] sm:$0xff]  }
  0x1e   : > { %745 = vmatpush3.bf16.msra.mxu0 %v819_v0  ;;  %776 = vmatpush3.bf16.msra.mxu1 %v819_v0  ;;  %v824_v7 = vld [vmem:[%s1002_s1 + $0x10] sm:$0xff]   ;;  %v825_v8 = vld [vmem:[%s1002_s1 + $0x8] sm:$0xff]   ;;  %v826_v9 = vld [vmem:[%s1002_s1] sm:$0xff]  }
  0x1f   : > { %s1012_s25 = smov (!%p239_p1, %s674_s25), 15  ;;  %746 = vmatprep.subr.bf16.mxu0 %v820_v1  ;;  %769 = vmatprep.subr.bf16.mxu1 %v820_v1  ;;  %v690_v12 = vld [vmem:[#allocation3] ss:$0 sm:$0xff] }
  0x20   : > { %s675_s30 = sshll.u32 %s1012_s25, 2 }
  0x21   : > { %s966_s8 = scalar_lea.vmem %s1001_s0, %s675_s30  ;;  %s263_s24 = scalar_lea.vmem %s1004_s3, %s675_s30 }
  0x22   : > { %747 = vmatpush3.bf16.msra.mxu0 %v820_v1  ;;  %777 = vmatpush3.bf16.msra.mxu1 %v820_v1  ;;  %v827_v4 = vld [vmem:[%s966_s8] sm:$0xff]   ;;  %v828_v5 = vld [vmem:[%s966_s8 + $0x10] sm:$0xff]   ;;  %v829_v10 = vld [vmem:[%s966_s8 + $0x8] sm:$0xff]  }
  0x23   : > { %748 = vmatprep.subr.bf16.mxu0 %v821_v2  ;;  %770 = vmatprep.subr.bf16.mxu1 %v821_v2  ;;  %v830_v11 = vld [vmem:[%s966_s8 + $0x18] sm:$0xff]  }
  0x24   : > { %760 = vmatprep.mubr.bf16.mxu0 %v827_v4  ;;  %764 = vmatprep.mubr.bf16.mxu1 %v828_v5 }
  0x26   : > { %749 = vmatpush3.bf16.msra.mxu0 %v821_v2  ;;  %778 = vmatpush3.bf16.msra.mxu1 %v821_v2 }
  0x27   : > { %750 = vmatprep.subr.bf16.mxu0 %v822_v3  ;;  %771 = vmatprep.subr.bf16.mxu1 %v822_v3 }
  0x2a   : > { %751 = vmatpush3.bf16.msra.mxu0 %v822_v3  ;;  %779 = vmatpush3.bf16.msra.mxu1 %v822_v3 }
  0x2b   : > { %752 = vmatprep.subr.bf16.mxu0 %v823_v6  ;;  %772 = vmatprep.subr.bf16.mxu1 %v823_v6 }
  0x2e   : > { %753 = vmatpush3.bf16.msra.mxu0 %v823_v6  ;;  %780 = vmatpush3.bf16.msra.mxu1 %v823_v6 }
  0x2f   : > { %754 = vmatprep.subr.bf16.mxu0 %v824_v7  ;;  %773 = vmatprep.subr.bf16.mxu1 %v824_v7 }
  0x32   : > { %755 = vmatpush3.bf16.msra.mxu0 %v824_v7  ;;  %781 = vmatpush3.bf16.msra.mxu1 %v824_v7 }
  0x33   : > { %756 = vmatprep.subr.bf16.mxu0 %v825_v8  ;;  %774 = vmatprep.subr.bf16.mxu1 %v825_v8 }
  0x36   : > { %757 = vmatpush3.bf16.msra.mxu0 %v825_v8  ;;  %782 = vmatpush3.bf16.msra.mxu1 %v825_v8 }
  0x37   : > { %758 = vmatprep.subr.bf16.mxu0 %v826_v9  ;;  %775 = vmatprep.subr.bf16.mxu1 %v826_v9 }
  0x3a   : > { %759 = vmatpush3.bf16.msra.mxu0 %v826_v9  ;;  %783 = vmatpush3.bf16.msra.mxu1 %v826_v9 }
  0x3d   : > { %761 = vmatmul.mubr.bf16.vlgmr.msra.gmra.mxu0 %v829_v10  ;;  %765 = vmatmul.mubr.bf16.vlgmr.msra.gmra.mxu1 %v830_v11 }
  0xfd   : > { %v762_v13 = vpop.f32.mrf.mxu0  ;;  %v766_v14 = vpop.f32.mrf.mxu1 }
  0xfe   : > { %v483_v15 = vadd.f32 %v762_v13, %v690_v12  ;;  %v487_v16 = vadd.f32 %v766_v14, %v690_v12 }
  0xff   : > { %v416_v17 = vpop.f32.mrf.mxu0  ;;  %v432_v18 = vpop.f32.mrf.mxu1 }
 0x100   : > { %vm491_vm0 = vcmp.ge.f32.partialorder %v483_v15, 0.0  ;;  %v499_v19 = vmul.f32 0.2, %v483_v15  ;;  %vm495_vm1 = vcmp.ge.f32.partialorder %v487_v16, 0.0  ;;  %v503_v20 = vmul.f32 0.2, %v487_v16 }
 0x101   : > { %v481_v21 = vadd.f32 %v690_v12, %v416_v17  ;;  %v763_v22 = vpop.f32.mrf.mxu0  ;;  %v767_v23 = vpop.f32.mrf.mxu1  ;;  %v485_v24 = vadd.f32 %v690_v12, %v432_v18 }
 0x102   : > { %v484_v25 = vadd.f32 %v763_v22, %v690_v12  ;;  %v488_v26 = vadd.f32 %v767_v23, %v690_v12  ;;  %v507_v27 = vsel %vm491_vm0, %v483_v15, %v499_v19  ;;  %v511_v28 = vsel %vm495_vm1, %v487_v16, %v503_v20 }
 0x103   : > { %v419_v29 = vpop.f32.mrf.mxu0  ;;  %v435_v30 = vpop.f32.mrf.mxu1  ;;  %vm489_vm4 = vcmp.ge.f32.partialorder %v481_v21, 0.0  ;;  %v497_v33 = vmul.f32 0.2, %v481_v21  ;;  %vm493_vm5 = vcmp.ge.f32.partialorder %v485_v24, 0.0  ;;  %v501_v36 = vmul.f32 0.2, %v485_v24 }
 0x104   : > { %vm492_vm2 = vcmp.ge.f32.partialorder %v484_v25, 0.0  ;;  %v500_v31 = vmul.f32 0.2, %v484_v25  ;;  %vm496_vm3 = vcmp.ge.f32.partialorder %v488_v26, 0.0  ;;  %v504_v32 = vmul.f32 0.2, %v488_v26 }
 0x105   : > { %v482_v34 = vadd.f32 %v690_v12, %v419_v29  ;;  %v486_v35 = vadd.f32 %v690_v12, %v435_v30  ;;  %v505_v43 = vsel %vm489_vm4, %v481_v21, %v497_v33  ;;  %v509_v45 = vsel %vm493_vm5, %v485_v24, %v501_v36 }
 0x106   : > { %v508_v37 = vsel %vm492_vm2, %v484_v25, %v500_v31  ;;  %v512_v38 = vsel %vm496_vm3, %v488_v26, %v504_v32 }
 0x107   : > { %v717_v39 = vpack.c.bf16 %v508_v37, %v507_v27  ;;  %v727_v40 = vpack.c.bf16 %v512_v38, %v511_v28  ;;  %vm490_vm6 = vcmp.ge.f32.partialorder %v482_v34, 0.0  ;;  %v498_v41 = vmul.f32 0.2, %v482_v34 }
 0x108   : > { %vm494_vm7 = vcmp.ge.f32.partialorder %v486_v35, 0.0  ;;  %v502_v42 = vmul.f32 0.2, %v486_v35 }
 0x109   : > { %729 = vst [vmem:[%s263_s24 + $0x8] sm:$0xff] %v717_v39   ;;  %731 = vst [vmem:[%s263_s24 + $0x18] sm:$0xff] %v727_v40   ;;  %v506_v44 = vsel %vm490_vm6, %v482_v34, %v498_v41 }
 0x10a   : > { %v712_v46 = vpack.c.bf16 %v506_v44, %v505_v43  ;;  %v510_v47 = vsel %vm494_vm7, %v486_v35, %v502_v42 }
 0x10b   : > { %v722_v48 = vpack.c.bf16 %v510_v47, %v509_v45 }
 0x10c   : > { %713 = vst [vmem:[%s263_s24] sm:$0xff] %v712_v46  }
 0x10d   : > { %730 = vst [vmem:[%s263_s24 + $0x10] sm:$0xff] %v722_v48  }
 0x10e PF: > { %s14_s14 = sadd.s32 1, %s883_s14   ;;  %s1007_s12 = smov %s879_s13 }
 0x10f   : > { %p11_p2 = scmp.ge.s32.totalorder %s14_s14, 4   ;;  %s1008_s13 = smov %s1010_s16 }
 0x111   :  { %13 = sbr.rel (!%p11_p2) target bundleno = 2 (0x2), region = 79 }
 0x116   :  { %581 = vsyncpa [#allocation4], 1 }
 0x117   :  { %583 = vsyncpa [#allocation4 + $0x1], 1 }

// kernel: vqgan_forward.8
= control target key start
LH: loop header
LB: loop body
LE: loop exit
PB: predicated region body
PF: predicated region fallthrough
CT: control target
= control target key end

     0   :  { %s1323_s12 = smov 0   ;;  %s1325_s13 = smov 0   ;;  %s1496_s0 = inlined_call_operand.vmem [shape: bf16[32,2048], index: 0, kind: input, shape index: {}]   ;;  %s1497_s1 = inlined_call_operand.vmem [shape: bf16[2048,256], index: 1, kind: input, shape index: {}]   ;;  %s1498_s2 = inlined_call_operand.vmem [shape: f32[1,256], index: 2, kind: input, shape index: {}]   ;;  %s1499_s3 = inlined_call_operand.vmem [shape: bf16[32,256], index: 3, kind: output, shape index: {}]  }
   0x1   :  { %s1327_s14 = smov 0   ;;  %s1329_s15 = smov 0  }
   0x2   :  { %s1331_s16 = smov 0   ;;  %s1333_s17 = smov 0  }
   0x3   :  { %s1335_s18 = smov 0  }
   0x4 LB: > { %s25_s19 = sadd.s32 1, %s1292_s16  ;;  %s32_s20 = sadd.s32 1, %s1296_s17  ;;  %s1300_s18 = sphi %s1335_s18, %s13_s18   ;;  %s1296_s17 = sphi %s1333_s17, %s1505_s17   ;;  %s1292_s16 = sphi %s1331_s16, %s1504_s16   ;;  %s1288_s15 = sphi %s1329_s15, %s1503_s15   ;;  %s1284_s14 = sphi %s1327_s14, %s1502_s14   ;;  %s1280_s13 = sphi %s1325_s13, %s1501_s13   ;;  %s1276_s12 = sphi %s1323_s12, %s1500_s12  }
   0x5   : > { %p26_p0 = scmp.ge.s32.totalorder %s25_s19, 4  ;;  %p48_p1 = scmp.ne.s32.totalorder %s1280_s13, %s1276_s12 }
   0x6   : > { %p49_p2 = scmp.eq.s32.totalorder %s1300_s18, 0  ;;  %s41_s24 = sadd.s32 1, %s1280_s13 }
   0x7   : > { %s1507_s19 = smov (%p26_p0, %s25_s19), 0  ;;  %s1509_s20 = smov (!%p26_p0, %s32_s20), %s1296_s17 }
   0x8   : > { %p50_p3 = por %p49_p2, %p48_p1  ;;  %p34_p4 = scmp.ge.s32.totalorder %s1509_s20, 2 }
   0x9   : > { %s37_s21 = ssub.s32 %s1292_s16, %s1507_s19  ;;  %p994_p6 = scmp.ge.s32.totalorder %s1300_s18, 8 }
   0xa   : > { %s1511_s20 = smov (%p34_p4, %s1509_s20), 0 }
   0xb   : > { %s36_s22 = ssub.s32 %s1296_s17, %s1511_s20  ;;  %164 = sbr.rel (%p994_p6) target bundleno = 25 (0x19), region = 20 }
   0xc   : > { %s38_s23 = sor.u32 %s37_s21, %s36_s22 }
   0xd   : > { %p39_p5 = scmp.eq.s32.totalorder %s38_s23, 0 }
   0xf   : > { %s1374_s25 = scalar_select %p39_p5, %s1280_s13, %s41_s24  }
  0x10   : > { %167 = sbr.rel (!%p50_p3) target bundleno = 25 (0x19), region = 24  ;;  %s169_s26 = sand.u32 (%p50_p3), 1, %s1280_s13  }
  0x11   : > { %s997_s27 = sshll.u32 (%p50_p3), %s1292_s16, 2  ;;  %s995_s28 = sshll.u32 (%p50_p3), %s169_s26, 5 }
  0x12   : > { %s1082_s29 = sshll.u32 (%p50_p3), %s1296_s17, 5  ;;  %s171_s8 = scalar_lea.vmem (%p50_p3), [#allocation3], %s995_s28 }
  0x13   : > { %s175_s30 = sadd.s32 (%p50_p3), %s1082_s29, %s997_s27 }
  0x14   : > { %s999_s4 = sshll.u32 (%p50_p3), %s175_s30, 2 }
  0x15   : > { %s177_s7 = scalar_lea.vmem %s1496_s0, %s999_s4 }
  0x16   : > { %v190_v0 = vld [vmem:[%s177_s7] sm:$0xff]  ;;  %v192_v1 = vld [vmem:[%s177_s7 + $0x8] sm:$0xff] }
  0x17   : > { %v194_v2 = vld [vmem:[%s177_s7 + $0x40] sm:$0xff]  ;;  %191 = vst [vmem:[%s171_s8] sm:$0xff] %v190_v0  ;;  %193 = vst [vmem:[%s171_s8 + $0x8] sm:$0xff] %v192_v1  ;;  %v196_v3 = vld [vmem:[%s177_s7 + $0x48] sm:$0xff] }
  0x18   : > { %195 = vst [vmem:[%s171_s8 + $0x10] sm:$0xff] %v194_v2  ;;  %197 = vst [vmem:[%s171_s8 + $0x18] sm:$0xff] %v196_v3 }
  0x19 PF: > { %p1000_p7 = scmp.ge.s32.totalorder %s1300_s18, 1  ;;  %p217_p8 = scmp.lt.s32.totalorder %s1300_s18, 9 }
  0x1b   : > { %p218_p9 = pnand %p1000_p7, %p217_p8 }
  0x1c   : > { %s224_s9 = sand.u32 (!%p218_p9), 1, %s1276_s12   ;;  %s1002_s10 = sshll.u32 (!%p218_p9), %s1284_s14, 6 }
  0x1d   : > { %221 = sbr.rel (%p218_p9) target bundleno = 332 (0x14c), region = 51  ;;  %s1001_s11 = sshll.u32 (!%p218_p9), %s224_s9, 5 }
  0x1e   : > { %p270_p10 = scmp.lt.s32.totalorder (!%p218_p9), %s1002_s10, 255  ;;  %s1005_s21 = sshll.u32 (!%p218_p9), %s1288_s15, 1 }
  0x1f   : > { %p287_p11 = scmp.lt.s32.totalorder (!%p218_p9), %s1005_s21, 3  ;;  %s1398_s12 = scalar_lea.vmem (!%p218_p9), [#allocation3], %s1001_s11 }
  0x20   : > { %p1008_p12 = scmp.ne.s32.totalorder (!%p218_p9), %s1284_s14, 0 }
  0x22   : > { %s1513_s10 = smov (!%p270_p10, %s1002_s10), 255  ;;  %s1515_s21 = smov (!%p287_p11, %s1005_s21), 3 }
  0x23   : > { %s1083_s22 = sshll.u32 %s1513_s10, 3  ;;  %s1084_s27 = sshll.u32 %s1515_s21, 3 }
  0x24   : > { %s1391_s26 = scalar_lea.vmem %s1497_s1, %s1083_s22  ;;  %s1396_s30 = scalar_lea.vmem %s1499_s3, %s1084_s27 }
  0x25   : > { %300 = sbr.rel (%p1008_p12) target bundleno = 45 (0x2d), region = 59 }
  0x2a   : > { %v1302_v4 = vmov 0.0  }
  0x2b   : > { %301 = vst [vmem:[#allocation2 + $0x10] sm:$0xff] %v1302_v4  ;;  %302 = vst [vmem:[#allocation2] sm:$0xff] %v1302_v4 }
  0x2c   : > { %303 = vst [vmem:[#allocation2 + $0x18] sm:$0xff] %v1302_v4  ;;  %304 = vst [vmem:[#allocation2 + $0x8] sm:$0xff] %v1302_v4 }
  0x2d PF: > { %v1144_v5 = vld [vmem:[%s1391_s26 + $0x74] ss:$8 sps:$4 sm:$0xff]   ;;  %v1148_v7 = vld [vmem:[%s1391_s26 + $0x70] ss:$8 sps:$4 sm:$0xff]   ;;  %v1150_v9 = vld [vmem:[%s1391_s26 + $0x64] ss:$8 sps:$4 sm:$0xff]  }
  0x2e   : > { %v1146_v6 = vld [vmem:[%s1391_s26 + $0x174] ss:$8 sps:$4 sm:$0xff]   ;;  %717 = vmatprep.subr.bf16.mxu0 %v1144_v5  ;;  %v1149_v8 = vld [vmem:[%s1391_s26 + $0x170] ss:$8 sps:$4 sm:$0xff]   ;;  %v1152_v10 = vld [vmem:[%s1391_s26 + $0x164] ss:$8 sps:$4 sm:$0xff]  }
  0x2f   : > { %760 = vmatprep.subr.bf16.mxu1 %v1146_v6  ;;  %718 = vmatpush1.bf16.msra.mxu0 %v1148_v7  ;;  %v1154_v11 = vld [vmem:[%s1391_s26 + $0x60] ss:$8 sps:$4 sm:$0xff]   ;;  %v1156_v13 = vld [vmem:[%s1391_s26 + $0x54] ss:$8 sps:$4 sm:$0xff]   ;;  %v1160_v15 = vld [vmem:[%s1391_s26 + $0x50] ss:$8 sps:$4 sm:$0xff]  }
  0x30   : > { %761 = vmatpush1.bf16.msra.mxu1 %v1149_v8  ;;  %719 = vmatprep.subr.bf16.mxu0 %v1150_v9  ;;  %v1155_v12 = vld [vmem:[%s1391_s26 + $0x160] ss:$8 sps:$4 sm:$0xff]   ;;  %v1158_v14 = vld [vmem:[%s1391_s26 + $0x154] ss:$8 sps:$4 sm:$0xff]   ;;  %v1161_v16 = vld [vmem:[%s1391_s26 + $0x150] ss:$8 sps:$4 sm:$0xff]  }
  0x31   : > { %762 = vmatprep.subr.bf16.mxu1 %v1152_v10  ;;  %v1162_v17 = vld [vmem:[%s1391_s26 + $0x44] ss:$8 sps:$4 sm:$0xff]   ;;  %v1166_v19 = vld [vmem:[%s1391_s26 + $0x40] ss:$8 sps:$4 sm:$0xff]   ;;  %v1168_v21 = vld [vmem:[%s1391_s26 + $0x34] ss:$8 sps:$4 sm:$0xff]  }
  0x32   : > { %v1164_v18 = vld [vmem:[%s1391_s26 + $0x144] ss:$8 sps:$4 sm:$0xff]   ;;  %v1167_v20 = vld [vmem:[%s1391_s26 + $0x140] ss:$8 sps:$4 sm:$0xff]   ;;  %v1170_v22 = vld [vmem:[%s1391_s26 + $0x134] ss:$8 sps:$4 sm:$0xff]  }
  0x33   : > { %720 = vmatpush1.bf16.msra.mxu0 %v1154_v11  ;;  %v1172_v23 = vld [vmem:[%s1391_s26 + $0x30] ss:$8 sps:$4 sm:$0xff]   ;;  %v1174_v25 = vld [vmem:[%s1391_s26 + $0x24] ss:$8 sps:$4 sm:$0xff]   ;;  %v1178_v27 = vld [vmem:[%s1391_s26 + $0x20] ss:$8 sps:$4 sm:$0xff]  }
  0x34   : > { %763 = vmatpush1.bf16.msra.mxu1 %v1155_v12  ;;  %721 = vmatprep.subr.bf16.mxu0 %v1156_v13  ;;  %v1173_v24 = vld [vmem:[%s1391_s26 + $0x130] ss:$8 sps:$4 sm:$0xff]   ;;  %v1176_v26 = vld [vmem:[%s1391_s26 + $0x124] ss:$8 sps:$4 sm:$0xff]   ;;  %v1179_v28 = vld [vmem:[%s1391_s26 + $0x120] ss:$8 sps:$4 sm:$0xff]  }
  0x35   : > { %764 = vmatprep.subr.bf16.mxu1 %v1158_v14  ;;  %v1180_v29 = vld [vmem:[%s1391_s26 + $0x14] ss:$8 sps:$4 sm:$0xff]   ;;  %v1184_v31 = vld [vmem:[%s1391_s26 + $0x10] ss:$8 sps:$4 sm:$0xff]   ;;  %v1186_v33 = vld [vmem:[%s1391_s26 + $0x4] ss:$8 sps:$4 sm:$0xff]  }
  0x36   : > { %v1182_v30 = vld [vmem:[%s1391_s26 + $0x114] ss:$8 sps:$4 sm:$0xff]   ;;  %v1185_v32 = vld [vmem:[%s1391_s26 + $0x110] ss:$8 sps:$4 sm:$0xff]   ;;  %v1188_v34 = vld [vmem:[%s1391_s26 + $0x104] ss:$8 sps:$4 sm:$0xff]  }
  0x37   : > { %722 = vmatpush1.bf16.msra.mxu0 %v1160_v15  ;;  %v1190_v35 = vld [vmem:[%s1391_s26] ss:$8 sps:$4 sm:$0xff]   ;;  %v1192_v37 = vld [vmem:[%s1391_s26 + $0xf4] ss:$8 sps:$4 sm:$0xff]   ;;  %v1196_v39 = vld [vmem:[%s1391_s26 + $0xf0] ss:$8 sps:$4 sm:$0xff]  }
  0x38   : > { %765 = vmatpush1.bf16.msra.mxu1 %v1161_v16  ;;  %723 = vmatprep.subr.bf16.mxu0 %v1162_v17  ;;  %v1191_v36 = vld [vmem:[%s1391_s26 + $0x100] ss:$8 sps:$4 sm:$0xff]   ;;  %v1194_v38 = vld [vmem:[%s1391_s26 + $0x1f4] ss:$8 sps:$4 sm:$0xff]   ;;  %v1197_v40 = vld [vmem:[%s1391_s26 + $0x1f0] ss:$8 sps:$4 sm:$0xff]  }
  0x39   : > { %766 = vmatprep.subr.bf16.mxu1 %v1164_v18  ;;  %v1198_v41 = vld [vmem:[%s1391_s26 + $0xe4] ss:$8 sps:$4 sm:$0xff]   ;;  %v1202_v43 = vld [vmem:[%s1391_s26 + $0xe0] ss:$8 sps:$4 sm:$0xff]   ;;  %v1204_v45 = vld [vmem:[%s1391_s26 + $0xd4] ss:$8 sps:$4 sm:$0xff]  }
  0x3a   : > { %v1200_v42 = vld [vmem:[%s1391_s26 + $0x1e4] ss:$8 sps:$4 sm:$0xff]   ;;  %v1203_v44 = vld [vmem:[%s1391_s26 + $0x1e0] ss:$8 sps:$4 sm:$0xff]   ;;  %v1206_v46 = vld [vmem:[%s1391_s26 + $0x1d4] ss:$8 sps:$4 sm:$0xff]  }
  0x3b   : > { %724 = vmatpush1.bf16.msra.mxu0 %v1166_v19  ;;  %v1208_v47 = vld [vmem:[%s1391_s26 + $0xd0] ss:$8 sps:$4 sm:$0xff]   ;;  %v1210_v49 = vld [vmem:[%s1391_s26 + $0xc4] ss:$8 sps:$4 sm:$0xff]   ;;  %v1214_v51 = vld [vmem:[%s1391_s26 + $0xc0] ss:$8 sps:$4 sm:$0xff]  }
  0x3c   : > { %767 = vmatpush1.bf16.msra.mxu1 %v1167_v20  ;;  %725 = vmatprep.subr.bf16.mxu0 %v1168_v21  ;;  %v1209_v48 = vld [vmem:[%s1391_s26 + $0x1d0] ss:$8 sps:$4 sm:$0xff]   ;;  %v1212_v50 = vld [vmem:[%s1391_s26 + $0x1c4] ss:$8 sps:$4 sm:$0xff]   ;;  %v1215_v53 = vld [vmem:[%s1391_s26 + $0x1c0] ss:$8 sps:$4 sm:$0xff]  }
  0x3d   : > { %768 = vmatprep.subr.bf16.mxu1 %v1170_v22  ;;  %v1242_v52 = vld [vmem:[%s1398_s12 + $0x4] ss:$16 sps:$4 sm:$0xff]   ;;  %v1245_v56 = vld [vmem:[%s1398_s12 + $0xc] ss:$16 sps:$4 sm:$0xff]   ;;  %v1220_v57 = vld [vmem:[%s1391_s26 + $0xb0] ss:$8 sps:$4 sm:$0xff]  }
  0x3e   : > { %v1216_v54 = vld [vmem:[%s1391_s26 + $0xb4] ss:$8 sps:$4 sm:$0xff]   ;;  %749 = vmatprep.mubr.bf16.mxu0 %v1242_v52  ;;  %792 = vmatprep.mubr.bf16.mxu1 %v1245_v56  ;;  %v1221_v58 = vld [vmem:[%s1391_s26 + $0x1b0] ss:$8 sps:$4 sm:$0xff]   ;;  %v1222_v59 = vld [vmem:[%s1391_s26 + $0xa4] ss:$8 sps:$4 sm:$0xff]  }
  0x3f   : > { %726 = vmatpush1.bf16.msra.mxu0 %v1172_v23  ;;  %v1218_v55 = vld [vmem:[%s1391_s26 + $0x1b4] ss:$8 sps:$4 sm:$0xff]   ;;  %v1224_v60 = vld [vmem:[%s1391_s26 + $0x1a4] ss:$8 sps:$4 sm:$0xff]   ;;  %v1226_v61 = vld [vmem:[%s1391_s26 + $0xa0] ss:$8 sps:$4 sm:$0xff]  }
  0x40   : > { %769 = vmatpush1.bf16.msra.mxu1 %v1173_v24  ;;  %727 = vmatprep.subr.bf16.mxu0 %v1174_v25  ;;  %v1227_v62 = vld [vmem:[%s1391_s26 + $0x1a0] ss:$8 sps:$4 sm:$0xff]   ;;  %v1228_v63 = vld [vmem:[%s1391_s26 + $0x94] ss:$8 sps:$4 sm:$0xff]   ;;  %v1232_v1 = vld [vmem:[%s1391_s26 + $0x90] ss:$8 sps:$4 sm:$0xff]  }
  0x41   : > { %770 = vmatprep.subr.bf16.mxu1 %v1176_v26  ;;  %v1230_v0 = vld [vmem:[%s1391_s26 + $0x194] ss:$8 sps:$4 sm:$0xff]   ;;  %v1233_v2 = vld [vmem:[%s1391_s26 + $0x190] ss:$8 sps:$4 sm:$0xff]   ;;  %v1234_v3 = vld [vmem:[%s1391_s26 + $0x84] ss:$8 sps:$4 sm:$0xff]  }
  0x42   : > { %v1236_v4 = vld [vmem:[%s1391_s26 + $0x184] ss:$8 sps:$4 sm:$0xff]   ;;  %v1238_v5 = vld [vmem:[%s1391_s26 + $0x80] ss:$8 sps:$4 sm:$0xff]   ;;  %v305_v10 = vld [vmem:[#allocation2 + $0x10] sm:$0xff]  ;;  %p1077_p13 = scmp.ne.s32.totalorder %s1284_s14, 3 }
  0x43   : > { %728 = vmatpush1.bf16.msra.mxu0 %v1178_v27  ;;  %v1239_v6 = vld [vmem:[%s1391_s26 + $0x180] ss:$8 sps:$4 sm:$0xff]   ;;  %v307_v19 = vld [vmem:[#allocation2 + $0x18] sm:$0xff] }
  0x44   : > { %771 = vmatpush1.bf16.msra.mxu1 %v1179_v28  ;;  %729 = vmatprep.subr.bf16.mxu0 %v1180_v29  ;;  %v1240_v7 = vld [vmem:[%s1398_s12] ss:$16 sps:$4 sm:$0xff]   ;;  %v1243_v8 = vld [vmem:[%s1398_s12 + $0x8] ss:$16 sps:$4 sm:$0xff]  }
  0x45   : > { %772 = vmatprep.subr.bf16.mxu1 %v1182_v30  ;;  %v306_v14 = vld [vmem:[#allocation2] sm:$0xff]  ;;  %v308_v24 = vld [vmem:[#allocation2 + $0x8] sm:$0xff] }
  0x47   : > { %730 = vmatpush1.bf16.msra.mxu0 %v1184_v31 }
  0x48   : > { %773 = vmatpush1.bf16.msra.mxu1 %v1185_v32  ;;  %731 = vmatprep.subr.bf16.mxu0 %v1186_v33 }
  0x49   : > { %774 = vmatprep.subr.bf16.mxu1 %v1188_v34 }
  0x4b   : > { %732 = vmatpush1.bf16.msra.mxu0 %v1190_v35 }
  0x4c   : > { %775 = vmatpush1.bf16.msra.mxu1 %v1191_v36  ;;  %733 = vmatprep.subr.bf16.mxu0 %v1192_v37 }
  0x4d   : > { %776 = vmatprep.subr.bf16.mxu1 %v1194_v38 }
  0x4f   : > { %734 = vmatpush2.bf16.msra.mxu0 %v1196_v39 }
  0x50   : > { %777 = vmatpush2.bf16.msra.mxu1 %v1197_v40  ;;  %735 = vmatprep.subr.bf16.mxu0 %v1198_v41 }
  0x51   : > { %778 = vmatprep.subr.bf16.mxu1 %v1200_v42 }
  0x53   : > { %736 = vmatpush2.bf16.msra.mxu0 %v1202_v43 }
  0x54   : > { %779 = vmatpush2.bf16.msra.mxu1 %v1203_v44  ;;  %737 = vmatprep.subr.bf16.mxu0 %v1204_v45 }
  0x55   : > { %780 = vmatprep.subr.bf16.mxu1 %v1206_v46 }
  0x57   : > { %738 = vmatpush2.bf16.msra.mxu0 %v1208_v47 }
  0x58   : > { %781 = vmatpush2.bf16.msra.mxu1 %v1209_v48  ;;  %739 = vmatprep.subr.bf16.mxu0 %v1210_v49 }
  0x59   : > { %782 = vmatprep.subr.bf16.mxu1 %v1212_v50 }
  0x5b   : > { %740 = vmatpush2.bf16.msra.mxu0 %v1214_v51 }
  0x5c   : > { %783 = vmatpush2.bf16.msra.mxu1 %v1215_v53  ;;  %741 = vmatprep.subr.bf16.mxu0 %v1216_v54 }
  0x5d   : > { %784 = vmatprep.subr.bf16.mxu1 %v1218_v55 }
  0x5f   : > { %742 = vmatpush2.bf16.msra.mxu0 %v1220_v57 }
  0x60   : > { %785 = vmatpush2.bf16.msra.mxu1 %v1221_v58  ;;  %743 = vmatprep.subr.bf16.mxu0 %v1222_v59 }
  0x61   : > { %786 = vmatprep.subr.bf16.mxu1 %v1224_v60 }
  0x63   : > { %744 = vmatpush2.bf16.msra.mxu0 %v1226_v61 }
  0x64   : > { %787 = vmatpush2.bf16.msra.mxu1 %v1227_v62  ;;  %745 = vmatprep.subr.bf16.mxu0 %v1228_v63 }
  0x65   : > { %788 = vmatprep.subr.bf16.mxu1 %v1230_v0 }
  0x67   : > { %746 = vmatpush2.bf16.msra.mxu0 %v1232_v1 }
  0x68   : > { %789 = vmatpush2.bf16.msra.mxu1 %v1233_v2  ;;  %747 = vmatprep.subr.bf16.mxu0 %v1234_v3 }
  0x69   : > { %790 = vmatprep.subr.bf16.mxu1 %v1236_v4 }
  0x6b   : > { %748 = vmatpush2.bf16.msra.mxu0 %v1238_v5 }
  0x6c   : > { %791 = vmatpush2.bf16.msra.mxu1 %v1239_v6 }
  0x6e   : > { %750 = vmatmul.mubr.bf16.vlgmr.msra.gmra.mxu0 %v1240_v7 }
  0x6f   : > { %793 = vmatmul.mubr.bf16.vlgmr.msra.gmra.mxu1 %v1243_v8 }
 0x12e   : > { %v751_v9 = vpop.f32.mrf.mxu0 }
 0x12f   : > { %v794_v11 = vpop.f32.mrf.mxu1 }
 0x130   : > { %v795_v12 = vadd.f32 %v794_v11, %v751_v9  ;;  %v753_v13 = vpop.f32.mrf.mxu0 }
 0x131   : > { %v796_v15 = vpop.f32.mrf.mxu1 }
 0x132   : > { %v803_v16 = vadd.f32 %v795_v12, %v305_v10  ;;  %v797_v17 = vadd.f32 %v796_v15, %v753_v13  ;;  %v755_v18 = vpop.f32.mrf.mxu0 }
 0x133   : > { %v798_v20 = vpop.f32.mrf.mxu1 }
 0x134   : > { %807 = vst [vmem:[#allocation2 + $0x10] sm:$0xff] %v803_v16  ;;  %v804_v21 = vadd.f32 %v797_v17, %v306_v14  ;;  %v799_v22 = vadd.f32 %v798_v20, %v755_v18  ;;  %v757_v23 = vpop.f32.mrf.mxu0 }
 0x135   : > { %v800_v25 = vpop.f32.mrf.mxu1 }
 0x136   : > { %808 = vst [vmem:[#allocation2] sm:$0xff] %v804_v21  ;;  %v805_v26 = vadd.f32 %v799_v22, %v307_v19  ;;  %v801_v27 = vadd.f32 %v800_v25, %v757_v23  ;;  %814 = sbr.rel (%p1077_p13) target bundleno = 332 (0x14c), region = 63 }
 0x138   : > { %809 = vst [vmem:[#allocation2 + $0x18] sm:$0xff] %v805_v26  ;;  %v806_v28 = vadd.f32 %v801_v27, %v308_v24 }
 0x13a   : > { %810 = vst [vmem:[#allocation2 + $0x8] sm:$0xff] %v806_v28 }
 0x13b   : > { %v821_v29 = vlaneseq  ;;  %v819_v31 = vld [vmem:[%s1498_s2] sm:$0x3]  ;;  %v815_v32 = vld [vmem:[#allocation2 + $0x10] sm:$0xff] }
 0x13d   : > { %v822_v30 = vshrl.u32 %v821_v29, 7  ;;  %v816_v35 = vld [vmem:[#allocation2] sm:$0xff] }
 0x13f   : > { %v823_v33 = vsub.s32 0, %v822_v30  ;;  %v827_v34 = vsub.s32 1, %v822_v30  ;;  %v817_v36 = vld [vmem:[#allocation2 + $0x18] sm:$0xff] }
 0x141   : > { %v818_v37 = vld [vmem:[#allocation2 + $0x8] sm:$0xff]  ;;  %v824_v38 = vrot.slane %v819_v31, %v823_v33  ;;  %v828_v39 = vrot.slane %v819_v31, %v827_v34 }
 0x143   : > { %v831_v40 = vadd.f32 %v824_v38, %v815_v32  ;;  %v832_v41 = vadd.f32 %v828_v39, %v816_v35  ;;  %v833_v42 = vadd.f32 %v824_v38, %v817_v36  ;;  %v834_v43 = vadd.f32 %v828_v39, %v818_v37 }
 0x145   : > { %vm835_vm0 = vcmp.ge.f32.partialorder %v831_v40, 0.0  ;;  %vm836_vm1 = vcmp.ge.f32.partialorder %v832_v41, 0.0  ;;  %v839_v44 = vmul.f32 0.2, %v831_v40  ;;  %v840_v45 = vmul.f32 0.2, %v832_v41 }
 0x146   : > { %vm837_vm2 = vcmp.ge.f32.partialorder %v833_v42, 0.0  ;;  %vm838_vm3 = vcmp.ge.f32.partialorder %v834_v43, 0.0  ;;  %v841_v46 = vmul.f32 0.2, %v833_v42  ;;  %v842_v47 = vmul.f32 0.2, %v834_v43 }
 0x147   : > { %v843_v48 = vsel %vm835_vm0, %v831_v40, %v839_v44  ;;  %v844_v49 = vsel %vm836_vm1, %v832_v41, %v840_v45 }
 0x148   : > { %v1085_v50 = vpack.c.bf16 %v844_v49, %v843_v48  ;;  %v845_v51 = vsel %vm837_vm2, %v833_v42, %v841_v46  ;;  %v846_v52 = vsel %vm838_vm3, %v834_v43, %v842_v47 }
 0x149   : > { %v1086_v53 = vpack.c.bf16 %v846_v52, %v845_v51 }
 0x14a   : > { %859 = vst [vmem:[%s1396_s30] sm:$0xff] %v1085_v50 }
 0x14b   : > { %860 = vst [vmem:[%s1396_s30 + $0x8] sm:$0xff] %v1086_v53 }
 0x14c PF: > { %s13_s18 = sadd.s32 1, %s1300_s18   ;;  %s1500_s12 = smov %s1280_s13 }
 0x14d   : > { %p10_p0 = scmp.ge.s32.totalorder %s13_s18, 10   ;;  %s1501_s13 = smov %s1374_s25 }
 0x14e   : > { %s1502_s14 = smov %s1292_s16  ;;  %s1503_s15 = smov %s1296_s17 }
 0x14f   : > { %s1504_s16 = smov %s1507_s19  ;;  %s1505_s17 = smov %s1511_s20 }
 0x150   :  { %12 = sbr.rel (!%p10_p0) target bundleno = 4 (0x4), region = 104 }

// kernel: vqgan_forward.9
= control target key start
LH: loop header
LB: loop body
LE: loop exit
PB: predicated region body
PF: predicated region fallthrough
CT: control target
= control target key end

     0   :  { %s1266_s12 = smov 0   ;;  %s1268_s13 = smov 0   ;;  %s1420_s0 = inlined_call_operand.vmem [shape: bf16[16,4096], index: 0, kind: input, shape index: {}]   ;;  %s1421_s1 = inlined_call_operand.vmem [shape: bf16[4096,256], index: 1, kind: input, shape index: {}]   ;;  %s1422_s2 = inlined_call_operand.vmem [shape: f32[1,256], index: 2, kind: input, shape index: {}]   ;;  %s1423_s3 = inlined_call_operand.vmem [shape: f32[16,256], index: 3, kind: output, shape index: {}]  }
   0x1   :  { %s1270_s14 = smov 0   ;;  %s1272_s15 = smov 0  }
   0x2   :  { %s1274_s16 = smov 0  }
   0x3 LB: > { %s25_s17 = sadd.s32 1, %s1239_s15  ;;  %p48_p1 = scmp.ne.s32.totalorder %s1231_s13, %s1227_s12  ;;  %s1243_s16 = sphi %s1274_s16, %s13_s16   ;;  %s1239_s15 = sphi %s1272_s15, %s1427_s15   ;;  %s1235_s14 = sphi %s1270_s14, %s1426_s14   ;;  %s1231_s13 = sphi %s1268_s13, %s1425_s13   ;;  %s1227_s12 = sphi %s1266_s12, %s1424_s12  }
   0x4   : > { %p26_p0 = scmp.ge.s32.totalorder %s25_s17, 8  ;;  %p49_p2 = scmp.eq.s32.totalorder %s1243_s16, 0 }
   0x5   : > { %s41_s19 = sadd.s32 1, %s1231_s13  ;;  %p977_p5 = scmp.ge.s32.totalorder %s1243_s16, 8 }
   0x6   : > { %s1429_s17 = smov (%p26_p0, %s25_s17), 0  ;;  %p50_p3 = por %p49_p2, %p48_p1 }
   0x7   : > { %s37_s18 = ssub.s32 %s1239_s15, %s1429_s17  ;;  %164 = sbr.rel (%p977_p5) target bundleno = 18 (0x12), region = 20 }
   0x8   : > { %p39_p4 = scmp.eq.s32.totalorder %s37_s18, 0 }
   0xa   : > { %s1301_s20 = scalar_select %p39_p4, %s1231_s13, %s41_s19  }
   0xc   : > { %167 = sbr.rel (!%p50_p3) target bundleno = 18 (0x12), region = 24  ;;  %s169_s21 = sand.u32 (%p50_p3), 1, %s1231_s13  }
   0xd   : > { %s1060_s22 = sshll.u32 (%p50_p3), %s1239_s15, 4  ;;  %s978_s23 = sshll.u32 (%p50_p3), %s169_s21, 5 }
   0xe   : > { %s177_s26 = scalar_lea.vmem (%p50_p3), %s1420_s0, %s1060_s22  ;;  %s171_s27 = scalar_lea.vmem (%p50_p3), [#allocation3], %s978_s23 }
   0xf   : > { %v190_v0 = vld [vmem:[%s177_s26] sm:$0xff] (%p50_p3)  ;;  %v192_v1 = vld [vmem:[%s177_s26 + $0x8] sm:$0xff] (%p50_p3) }
  0x10   : > { %v194_v2 = vld [vmem:[%s177_s26 + $0x80] sm:$0xff] (%p50_p3)  ;;  %191 = vst [vmem:[%s171_s27] sm:$0xff] (%p50_p3), %v190_v0  ;;  %193 = vst [vmem:[%s171_s27 + $0x8] sm:$0xff] (%p50_p3), %v192_v1  ;;  %v196_v3 = vld [vmem:[%s177_s26 + $0x88] sm:$0xff] (%p50_p3) }
  0x11   : > { %195 = vst [vmem:[%s171_s27 + $0x10] sm:$0xff] %v194_v2  ;;  %197 = vst [vmem:[%s171_s27 + $0x18] sm:$0xff] %v196_v3 }
  0x12 PF: > { %p981_p6 = scmp.ge.s32.totalorder %s1243_s16, 1  ;;  %p217_p7 = scmp.lt.s32.totalorder %s1243_s16, 9 }
  0x14   : > { %p218_p8 = pnand %p981_p6, %p217_p7 }
  0x15   : > { %s224_s28 = sand.u32 (!%p218_p8), 1, %s1227_s12   ;;  %s983_s29 = sshll.u32 (!%p218_p8), %s1235_s14, 6 }
  0x16   : > { %221 = sbr.rel (%p218_p8) target bundleno = 320 (0x140), region = 51  ;;  %s982_s30 = sshll.u32 (!%p218_p8), %s224_s28, 5 }
  0x17   : > { %p270_p9 = scmp.lt.s32.totalorder (!%p218_p8), %s983_s29, 511  ;;  %s1318_s8 = scalar_lea.vmem (!%p218_p8), [#allocation3], %s982_s30 }
  0x18   : > { %p986_p10 = scmp.ne.s32.totalorder (!%p218_p8), %s1235_s14, 0 }
  0x1b   : > { %s1431_s29 = smov (!%p270_p9, %s983_s29), 511  ;;  %300 = sbr.rel (%p986_p10) target bundleno = 35 (0x23), region = 59 }
  0x1c   : > { %s1061_s4 = sshll.u32 %s1431_s29, 3 }
  0x1d   : > { %s1316_s7 = scalar_lea.vmem %s1421_s1, %s1061_s4 }
  0x20   : > { %v1245_v4 = vmov 0.0  }
  0x21   : > { %301 = vst [vmem:[#allocation2 + $0x10] sm:$0xff] %v1245_v4  ;;  %302 = vst [vmem:[#allocation2] sm:$0xff] %v1245_v4 }
  0x22   : > { %303 = vst [vmem:[#allocation2 + $0x18] sm:$0xff] %v1245_v4  ;;  %304 = vst [vmem:[#allocation2 + $0x8] sm:$0xff] %v1245_v4 }
  0x23 PF: > { %v1103_v5 = vld [vmem:[%s1316_s7 + $0x74] ss:$8 sps:$4 sm:$0xff]   ;;  %v1107_v7 = vld [vmem:[%s1316_s7 + $0x70] ss:$8 sps:$4 sm:$0xff]   ;;  %v1109_v9 = vld [vmem:[%s1316_s7 + $0x64] ss:$8 sps:$4 sm:$0xff]  }
  0x24   : > { %v1105_v6 = vld [vmem:[%s1316_s7 + $0x174] ss:$8 sps:$4 sm:$0xff]   ;;  %717 = vmatprep.subr.bf16.mxu0 %v1103_v5  ;;  %v1108_v8 = vld [vmem:[%s1316_s7 + $0x170] ss:$8 sps:$4 sm:$0xff]   ;;  %v1111_v10 = vld [vmem:[%s1316_s7 + $0x164] ss:$8 sps:$4 sm:$0xff]  }
  0x25   : > { %760 = vmatprep.subr.bf16.mxu1 %v1105_v6  ;;  %718 = vmatpush1.bf16.msra.mxu0 %v1107_v7  ;;  %v1113_v11 = vld [vmem:[%s1316_s7 + $0x60] ss:$8 sps:$4 sm:$0xff]   ;;  %v1115_v13 = vld [vmem:[%s1316_s7 + $0x54] ss:$8 sps:$4 sm:$0xff]   ;;  %v1119_v15 = vld [vmem:[%s1316_s7 + $0x50] ss:$8 sps:$4 sm:$0xff]  }
  0x26   : > { %761 = vmatpush1.bf16.msra.mxu1 %v1108_v8  ;;  %719 = vmatprep.subr.bf16.mxu0 %v1109_v9  ;;  %v1114_v12 = vld [vmem:[%s1316_s7 + $0x160] ss:$8 sps:$4 sm:$0xff]   ;;  %v1117_v14 = vld [vmem:[%s1316_s7 + $0x154] ss:$8 sps:$4 sm:$0xff]   ;;  %v1120_v16 = vld [vmem:[%s1316_s7 + $0x150] ss:$8 sps:$4 sm:$0xff]  }
  0x27   : > { %762 = vmatprep.subr.bf16.mxu1 %v1111_v10  ;;  %v1121_v17 = vld [vmem:[%s1316_s7 + $0x44] ss:$8 sps:$4 sm:$0xff]   ;;  %v1125_v19 = vld [vmem:[%s1316_s7 + $0x40] ss:$8 sps:$4 sm:$0xff]   ;;  %v1127_v21 = vld [vmem:[%s1316_s7 + $0x34] ss:$8 sps:$4 sm:$0xff]  }
  0x28   : > { %v1123_v18 = vld [vmem:[%s1316_s7 + $0x144] ss:$8 sps:$4 sm:$0xff]   ;;  %v1126_v20 = vld [vmem:[%s1316_s7 + $0x140] ss:$8 sps:$4 sm:$0xff]   ;;  %v1129_v22 = vld [vmem:[%s1316_s7 + $0x134] ss:$8 sps:$4 sm:$0xff]  }
  0x29   : > { %720 = vmatpush1.bf16.msra.mxu0 %v1113_v11  ;;  %v1131_v23 = vld [vmem:[%s1316_s7 + $0x30] ss:$8 sps:$4 sm:$0xff]   ;;  %v1133_v25 = vld [vmem:[%s1316_s7 + $0x24] ss:$8 sps:$4 sm:$0xff]   ;;  %v1137_v27 = vld [vmem:[%s1316_s7 + $0x20] ss:$8 sps:$4 sm:$0xff]  }
  0x2a   : > { %763 = vmatpush1.bf16.msra.mxu1 %v1114_v12  ;;  %721 = vmatprep.subr.bf16.mxu0 %v1115_v13  ;;  %v1132_v24 = vld [vmem:[%s1316_s7 + $0x130] ss:$8 sps:$4 sm:$0xff]   ;;  %v1135_v26 = vld [vmem:[%s1316_s7 + $0x124] ss:$8 sps:$4 sm:$0xff]   ;;  %v1138_v28 = vld [vmem:[%s1316_s7 + $0x120] ss:$8 sps:$4 sm:$0xff]  }
  0x2b   : > { %764 = vmatprep.subr.bf16.mxu1 %v1117_v14  ;;  %v1139_v29 = vld [vmem:[%s1316_s7 + $0x14] ss:$8 sps:$4 sm:$0xff]   ;;  %v1143_v31 = vld [vmem:[%s1316_s7 + $0x10] ss:$8 sps:$4 sm:$0xff]   ;;  %v1145_v33 = vld [vmem:[%s1316_s7 + $0x4] ss:$8 sps:$4 sm:$0xff]  }
  0x2c   : > { %v1141_v30 = vld [vmem:[%s1316_s7 + $0x114] ss:$8 sps:$4 sm:$0xff]   ;;  %v1144_v32 = vld [vmem:[%s1316_s7 + $0x110] ss:$8 sps:$4 sm:$0xff]   ;;  %v1147_v34 = vld [vmem:[%s1316_s7 + $0x104] ss:$8 sps:$4 sm:$0xff]  }
  0x2d   : > { %722 = vmatpush1.bf16.msra.mxu0 %v1119_v15  ;;  %v1149_v35 = vld [vmem:[%s1316_s7] ss:$8 sps:$4 sm:$0xff]   ;;  %v1151_v37 = vld [vmem:[%s1316_s7 + $0xf4] ss:$8 sps:$4 sm:$0xff]   ;;  %v1155_v39 = vld [vmem:[%s1316_s7 + $0xf0] ss:$8 sps:$4 sm:$0xff]  }
  0x2e   : > { %765 = vmatpush1.bf16.msra.mxu1 %v1120_v16  ;;  %723 = vmatprep.subr.bf16.mxu0 %v1121_v17  ;;  %v1150_v36 = vld [vmem:[%s1316_s7 + $0x100] ss:$8 sps:$4 sm:$0xff]   ;;  %v1153_v38 = vld [vmem:[%s1316_s7 + $0x1f4] ss:$8 sps:$4 sm:$0xff]   ;;  %v1156_v40 = vld [vmem:[%s1316_s7 + $0x1f0] ss:$8 sps:$4 sm:$0xff]  }
  0x2f   : > { %766 = vmatprep.subr.bf16.mxu1 %v1123_v18  ;;  %v1157_v41 = vld [vmem:[%s1316_s7 + $0xe4] ss:$8 sps:$4 sm:$0xff]   ;;  %v1161_v43 = vld [vmem:[%s1316_s7 + $0xe0] ss:$8 sps:$4 sm:$0xff]   ;;  %v1163_v45 = vld [vmem:[%s1316_s7 + $0xd4] ss:$8 sps:$4 sm:$0xff]  }
  0x30   : > { %v1159_v42 = vld [vmem:[%s1316_s7 + $0x1e4] ss:$8 sps:$4 sm:$0xff]   ;;  %v1162_v44 = vld [vmem:[%s1316_s7 + $0x1e0] ss:$8 sps:$4 sm:$0xff]   ;;  %v1165_v46 = vld [vmem:[%s1316_s7 + $0x1d4] ss:$8 sps:$4 sm:$0xff]  }
  0x31   : > { %724 = vmatpush1.bf16.msra.mxu0 %v1125_v19  ;;  %v1167_v47 = vld [vmem:[%s1316_s7 + $0xd0] ss:$8 sps:$4 sm:$0xff]   ;;  %v1169_v49 = vld [vmem:[%s1316_s7 + $0xc4] ss:$8 sps:$4 sm:$0xff]   ;;  %v1173_v51 = vld [vmem:[%s1316_s7 + $0xc0] ss:$8 sps:$4 sm:$0xff]  }
  0x32   : > { %767 = vmatpush1.bf16.msra.mxu1 %v1126_v20  ;;  %725 = vmatprep.subr.bf16.mxu0 %v1127_v21  ;;  %v1168_v48 = vld [vmem:[%s1316_s7 + $0x1d0] ss:$8 sps:$4 sm:$0xff]   ;;  %v1171_v50 = vld [vmem:[%s1316_s7 + $0x1c4] ss:$8 sps:$4 sm:$0xff]   ;;  %v1174_v53 = vld [vmem:[%s1316_s7 + $0x1c0] ss:$8 sps:$4 sm:$0xff]  }
  0x33   : > { %768 = vmatprep.subr.bf16.mxu1 %v1129_v22  ;;  %v1201_v52 = vld [vmem:[%s1318_s8 + $0x4] ss:$16 sps:$4 sm:$0xff]   ;;  %v1204_v56 = vld [vmem:[%s1318_s8 + $0xc] ss:$16 sps:$4 sm:$0xff]   ;;  %v1179_v57 = vld [vmem:[%s1316_s7 + $0xb0] ss:$8 sps:$4 sm:$0xff]  }
  0x34   : > { %v1175_v54 = vld [vmem:[%s1316_s7 + $0xb4] ss:$8 sps:$4 sm:$0xff]   ;;  %749 = vmatprep.mubr.bf16.mxu0 %v1201_v52  ;;  %792 = vmatprep.mubr.bf16.mxu1 %v1204_v56  ;;  %v1180_v58 = vld [vmem:[%s1316_s7 + $0x1b0] ss:$8 sps:$4 sm:$0xff]   ;;  %v1181_v59 = vld [vmem:[%s1316_s7 + $0xa4] ss:$8 sps:$4 sm:$0xff]  }
  0x35   : > { %726 = vmatpush1.bf16.msra.mxu0 %v1131_v23  ;;  %v1177_v55 = vld [vmem:[%s1316_s7 + $0x1b4] ss:$8 sps:$4 sm:$0xff]   ;;  %v1183_v60 = vld [vmem:[%s1316_s7 + $0x1a4] ss:$8 sps:$4 sm:$0xff]   ;;  %v1185_v61 = vld [vmem:[%s1316_s7 + $0xa0] ss:$8 sps:$4 sm:$0xff]  }
  0x36   : > { %769 = vmatpush1.bf16.msra.mxu1 %v1132_v24  ;;  %727 = vmatprep.subr.bf16.mxu0 %v1133_v25  ;;  %v1186_v62 = vld [vmem:[%s1316_s7 + $0x1a0] ss:$8 sps:$4 sm:$0xff]   ;;  %v1187_v63 = vld [vmem:[%s1316_s7 + $0x94] ss:$8 sps:$4 sm:$0xff]   ;;  %v1191_v1 = vld [vmem:[%s1316_s7 + $0x90] ss:$8 sps:$4 sm:$0xff]  }
  0x37   : > { %770 = vmatprep.subr.bf16.mxu1 %v1135_v26  ;;  %v1189_v0 = vld [vmem:[%s1316_s7 + $0x194] ss:$8 sps:$4 sm:$0xff]   ;;  %v1192_v2 = vld [vmem:[%s1316_s7 + $0x190] ss:$8 sps:$4 sm:$0xff]   ;;  %v1193_v3 = vld [vmem:[%s1316_s7 + $0x84] ss:$8 sps:$4 sm:$0xff]  }
  0x38   : > { %v1195_v4 = vld [vmem:[%s1316_s7 + $0x184] ss:$8 sps:$4 sm:$0xff]   ;;  %v1197_v5 = vld [vmem:[%s1316_s7 + $0x80] ss:$8 sps:$4 sm:$0xff]   ;;  %v305_v10 = vld [vmem:[#allocation2 + $0x10] sm:$0xff]  ;;  %p1055_p11 = scmp.ne.s32.totalorder %s1235_s14, 7 }
  0x39   : > { %728 = vmatpush1.bf16.msra.mxu0 %v1137_v27  ;;  %v1198_v6 = vld [vmem:[%s1316_s7 + $0x180] ss:$8 sps:$4 sm:$0xff]   ;;  %v307_v19 = vld [vmem:[#allocation2 + $0x18] sm:$0xff] }
  0x3a   : > { %771 = vmatpush1.bf16.msra.mxu1 %v1138_v28  ;;  %729 = vmatprep.subr.bf16.mxu0 %v1139_v29  ;;  %v1199_v7 = vld [vmem:[%s1318_s8] ss:$16 sps:$4 sm:$0xff]   ;;  %v1202_v8 = vld [vmem:[%s1318_s8 + $0x8] ss:$16 sps:$4 sm:$0xff]  }
  0x3b   : > { %772 = vmatprep.subr.bf16.mxu1 %v1141_v30  ;;  %v306_v14 = vld [vmem:[#allocation2] sm:$0xff]  ;;  %v308_v24 = vld [vmem:[#allocation2 + $0x8] sm:$0xff] }
  0x3d   : > { %730 = vmatpush1.bf16.msra.mxu0 %v1143_v31 }
  0x3e   : > { %773 = vmatpush1.bf16.msra.mxu1 %v1144_v32  ;;  %731 = vmatprep.subr.bf16.mxu0 %v1145_v33 }
  0x3f   : > { %774 = vmatprep.subr.bf16.mxu1 %v1147_v34 }
  0x41   : > { %732 = vmatpush1.bf16.msra.mxu0 %v1149_v35 }
  0x42   : > { %775 = vmatpush1.bf16.msra.mxu1 %v1150_v36  ;;  %733 = vmatprep.subr.bf16.mxu0 %v1151_v37 }
  0x43   : > { %776 = vmatprep.subr.bf16.mxu1 %v1153_v38 }
  0x45   : > { %734 = vmatpush2.bf16.msra.mxu0 %v1155_v39 }
  0x46   : > { %777 = vmatpush2.bf16.msra.mxu1 %v1156_v40  ;;  %735 = vmatprep.subr.bf16.mxu0 %v1157_v41 }
  0x47   : > { %778 = vmatprep.subr.bf16.mxu1 %v1159_v42 }
  0x49   : > { %736 = vmatpush2.bf16.msra.mxu0 %v1161_v43 }
  0x4a   : > { %779 = vmatpush2.bf16.msra.mxu1 %v1162_v44  ;;  %737 = vmatprep.subr.bf16.mxu0 %v1163_v45 }
  0x4b   : > { %780 = vmatprep.subr.bf16.mxu1 %v1165_v46 }
  0x4d   : > { %738 = vmatpush2.bf16.msra.mxu0 %v1167_v47 }
  0x4e   : > { %781 = vmatpush2.bf16.msra.mxu1 %v1168_v48  ;;  %739 = vmatprep.subr.bf16.mxu0 %v1169_v49 }
  0x4f   : > { %782 = vmatprep.subr.bf16.mxu1 %v1171_v50 }
  0x51   : > { %740 = vmatpush2.bf16.msra.mxu0 %v1173_v51 }
  0x52   : > { %783 = vmatpush2.bf16.msra.mxu1 %v1174_v53  ;;  %741 = vmatprep.subr.bf16.mxu0 %v1175_v54 }
  0x53   : > { %784 = vmatprep.subr.bf16.mxu1 %v1177_v55 }
  0x55   : > { %742 = vmatpush2.bf16.msra.mxu0 %v1179_v57 }
  0x56   : > { %785 = vmatpush2.bf16.msra.mxu1 %v1180_v58  ;;  %743 = vmatprep.subr.bf16.mxu0 %v1181_v59 }
  0x57   : > { %786 = vmatprep.subr.bf16.mxu1 %v1183_v60 }
  0x59   : > { %744 = vmatpush2.bf16.msra.mxu0 %v1185_v61 }
  0x5a   : > { %787 = vmatpush2.bf16.msra.mxu1 %v1186_v62  ;;  %745 = vmatprep.subr.bf16.mxu0 %v1187_v63 }
  0x5b   : > { %788 = vmatprep.subr.bf16.mxu1 %v1189_v0 }
  0x5d   : > { %746 = vmatpush2.bf16.msra.mxu0 %v1191_v1 }
  0x5e   : > { %789 = vmatpush2.bf16.msra.mxu1 %v1192_v2  ;;  %747 = vmatprep.subr.bf16.mxu0 %v1193_v3 }
  0x5f   : > { %790 = vmatprep.subr.bf16.mxu1 %v1195_v4 }
  0x61   : > { %748 = vmatpush2.bf16.msra.mxu0 %v1197_v5 }
  0x62   : > { %791 = vmatpush2.bf16.msra.mxu1 %v1198_v6 }
  0x64   : > { %750 = vmatmul.mubr.bf16.vlgmr.msra.gmra.mxu0 %v1199_v7 }
  0x65   : > { %793 = vmatmul.mubr.bf16.vlgmr.msra.gmra.mxu1 %v1202_v8 }
 0x124   : > { %v751_v9 = vpop.f32.mrf.mxu0 }
 0x125   : > { %v794_v11 = vpop.f32.mrf.mxu1 }
 0x126   : > { %v795_v12 = vadd.f32 %v794_v11, %v751_v9  ;;  %v753_v13 = vpop.f32.mrf.mxu0 }
 0x127   : > { %v796_v15 = vpop.f32.mrf.mxu1 }
 0x128   : > { %v803_v16 = vadd.f32 %v795_v12, %v305_v10  ;;  %v797_v17 = vadd.f32 %v796_v15, %v753_v13  ;;  %v755_v18 = vpop.f32.mrf.mxu0 }
 0x129   : > { %v798_v20 = vpop.f32.mrf.mxu1 }
 0x12a   : > { %807 = vst [vmem:[#allocation2 + $0x10] sm:$0xff] %v803_v16  ;;  %v804_v21 = vadd.f32 %v797_v17, %v306_v14  ;;  %v799_v22 = vadd.f32 %v798_v20, %v755_v18  ;;  %v757_v23 = vpop.f32.mrf.mxu0 }
 0x12b   : > { %v800_v25 = vpop.f32.mrf.mxu1 }
 0x12c   : > { %808 = vst [vmem:[#allocation2] sm:$0xff] %v804_v21  ;;  %v805_v26 = vadd.f32 %v799_v22, %v307_v19  ;;  %v801_v27 = vadd.f32 %v800_v25, %v757_v23  ;;  %814 = sbr.rel (%p1055_p11) target bundleno = 320 (0x140), region = 63 }
 0x12e   : > { %809 = vst [vmem:[#allocation2 + $0x18] sm:$0xff] %v805_v26  ;;  %v806_v28 = vadd.f32 %v801_v27, %v308_v24 }
 0x130   : > { %810 = vst [vmem:[#allocation2 + $0x8] sm:$0xff] %v806_v28 }
 0x131   : > { %v821_v29 = vlaneseq  ;;  %v819_v31 = vld [vmem:[%s1422_s2] sm:$0x3]  ;;  %v815_v32 = vld [vmem:[#allocation2 + $0x10] sm:$0xff] }
 0x133   : > { %v822_v30 = vshrl.u32 %v821_v29, 7  ;;  %v816_v35 = vld [vmem:[#allocation2] sm:$0xff] }
 0x135   : > { %v823_v33 = vsub.s32 0, %v822_v30  ;;  %v827_v34 = vsub.s32 1, %v822_v30  ;;  %v817_v36 = vld [vmem:[#allocation2 + $0x18] sm:$0xff] }
 0x137   : > { %v818_v37 = vld [vmem:[#allocation2 + $0x8] sm:$0xff]  ;;  %v824_v38 = vrot.slane %v819_v31, %v823_v33  ;;  %v828_v39 = vrot.slane %v819_v31, %v827_v34 }
 0x139   : > { %v831_v40 = vadd.f32 %v824_v38, %v815_v32  ;;  %v832_v41 = vadd.f32 %v828_v39, %v816_v35  ;;  %v833_v42 = vadd.f32 %v824_v38, %v817_v36  ;;  %v834_v43 = vadd.f32 %v828_v39, %v818_v37 }
 0x13b   : > { %vm835_vm0 = vcmp.ge.f32.partialorder %v831_v40, 0.0  ;;  %v839_v44 = vmul.f32 0.2, %v831_v40  ;;  %vm836_vm1 = vcmp.ge.f32.partialorder %v832_v41, 0.0  ;;  %v840_v45 = vmul.f32 0.2, %v832_v41 }
 0x13c   : > { %vm837_vm2 = vcmp.ge.f32.partialorder %v833_v42, 0.0  ;;  %v841_v46 = vmul.f32 0.2, %v833_v42  ;;  %vm838_vm3 = vcmp.ge.f32.partialorder %v834_v43, 0.0  ;;  %v842_v47 = vmul.f32 0.2, %v834_v43 }
 0x13d   : > { %v843_v48 = vsel %vm835_vm0, %v831_v40, %v839_v44  ;;  %v844_v49 = vsel %vm836_vm1, %v832_v41, %v840_v45 }
 0x13e   : > { %847 = vst [vmem:[%s1423_s3] sm:$0xff] %v843_v48  ;;  %848 = vst [vmem:[%s1423_s3 + $0x8] sm:$0xff] %v844_v49  ;;  %v845_v50 = vsel %vm837_vm2, %v833_v42, %v841_v46  ;;  %v846_v51 = vsel %vm838_vm3, %v834_v43, %v842_v47 }
 0x13f   : > { %849 = vst [vmem:[%s1423_s3 + $0x10] sm:$0xff] %v845_v50  ;;  %850 = vst [vmem:[%s1423_s3 + $0x18] sm:$0xff] %v846_v51 }
 0x140 PF: > { %s13_s16 = sadd.s32 1, %s1243_s16   ;;  %s1424_s12 = smov %s1231_s13 }
 0x141   : > { %p10_p12 = scmp.ge.s32.totalorder %s13_s16, 10   ;;  %s1425_s13 = smov %s1301_s20 }
 0x142   : > { %s1426_s14 = smov %s1239_s15  ;;  %s1427_s15 = smov %s1429_s17 }
 0x143   :  { %12 = sbr.rel (!%p10_p12) target bundleno = 3 (0x3), region = 104 }

// kernel: vqgan_forward.10
= control target key start
LH: loop header
LB: loop body
LE: loop exit
PB: predicated region body
PF: predicated region fallthrough
CT: control target
= control target key end

     0   :  { %vm2779_vm4 = vcmask 7168   ;;  %s5183_s1 = inlined_call_operand.vmem [shape: f32[512,256], index: 1, kind: input, shape index: {}]   ;;  %s5184_s0 = inlined_call_operand.vmem [shape: f32[8,256], index: 0, kind: input, shape index: {}]   ;;  %s5185_s2 = inlined_call_operand.vmem [shape: f32[1,512], index: 2, kind: input, shape index: {}]   ;;  %s5186_s3 = inlined_call_operand.vmem [shape: s32[8,1], index: 3, kind: output, shape index: {}]  }
   0x1   :  { %v47_v0 = vld [vmem:[%s5183_s1 + $0xf8] sm:$0xff]  ;;  %v46_v1 = vld [vmem:[%s5183_s1 + $0xf0] sm:$0xff]  ;;  %v45_v2 = vld [vmem:[%s5183_s1 + $0xe8] sm:$0xff] }
   0x2   :  { %v2816_v3 = vand.u32 4294901760, %v47_v0  ;;  %v2818_v4 = vand.u32 4294901760, %v46_v1  ;;  %v2820_v5 = vand.u32 4294901760, %v45_v2  ;;  %v44_v6 = vld [vmem:[%s5183_s1 + $0xe0] sm:$0xff]  ;;  %v43_v7 = vld [vmem:[%s5183_s1 + $0xd8] sm:$0xff]  ;;  %v42_v8 = vld [vmem:[%s5183_s1 + $0xd0] sm:$0xff] }
   0x3   :  { %v2831_v9 = vand.u32 4294901760, %v44_v6  ;;  %v2833_v10 = vand.u32 4294901760, %v43_v7  ;;  %v2835_v11 = vand.u32 4294901760, %v42_v8  ;;  %v41_v12 = vld [vmem:[%s5183_s1 + $0xc8] sm:$0xff]  ;;  %v40_v13 = vld [vmem:[%s5183_s1 + $0xc0] sm:$0xff]  ;;  %v39_v14 = vld [vmem:[%s5183_s1 + $0xb8] sm:$0xff] }
   0x4   :  { %145 = vmatprep.subr.mxu0 %v2816_v3  ;;  %v2848_v15 = vsub.f32 %v47_v0, %v2816_v3  ;;  %v2851_v16 = vsub.f32 %v46_v1, %v2818_v4  ;;  %v2853_v17 = vand.u32 4294901760, %v41_v12  ;;  %v2856_v18 = vsub.f32 %v45_v2, %v2820_v5  ;;  %v38_v19 = vld [vmem:[%s5183_s1 + $0xb0] sm:$0xff]  ;;  %v37_v27 = vld [vmem:[%s5183_s1 + $0xa8] sm:$0xff]  ;;  %v36_v40 = vld [vmem:[%s5183_s1 + $0xa0] sm:$0xff] }
   0x5   :  { %147 = vmatpush1.xpose.msra.mxu0 %v2818_v4  ;;  %v2862_v20 = vand.u32 4294901760, %v40_v13  ;;  %v2865_v21 = vsub.f32 %v44_v6, %v2831_v9  ;;  %v2868_v22 = vsub.f32 %v43_v7, %v2833_v10  ;;  %v2874_v26 = vand.u32 4294901760, %v39_v14  ;;  %v35_v46 = vld [vmem:[%s5183_s1 + $0x98] sm:$0xff]  ;;  %v34_v53 = vld [vmem:[%s5183_s1 + $0x90] sm:$0xff]  ;;  %v33_v58 = vld [vmem:[%s5183_s1 + $0x88] sm:$0xff] }
   0x6   :  { %149 = vmatprep.subr.mxu0 %v2820_v5  ;;  %v5204_v23 = vand.u32 4294901760, %v2848_v15  ;;  %v5203_v24 = vand.u32 4294901760, %v2851_v16  ;;  %v5201_v25 = vand.u32 4294901760, %v2856_v18  ;;  %v2881_v30 = vand.u32 4294901760, %v38_v19  ;;  %v32_v2 = vld [vmem:[%s5183_s1 + $0x80] sm:$0xff] }
   0x7   :  { %v5200_v28 = vand.u32 4294901760, %v2865_v21  ;;  %v5198_v29 = vand.u32 4294901760, %v2868_v22  ;;  %v2884_v31 = vsub.f32 %v42_v8, %v2835_v11  ;;  %v2896_v35 = vsub.f32 %v41_v12, %v2853_v17  ;;  %v31_v12 = vld [vmem:[%s5183_s1 + $0x78] sm:$0xff] }
   0x8   :  { %v292_v32 = vsub.f32 %v2848_v15, %v5204_v23  ;;  %v298_v33 = vsub.f32 %v2851_v16, %v5203_v24  ;;  %v304_v34 = vsub.f32 %v2856_v18, %v5201_v25  ;;  %v2906_v39 = vand.u32 4294901760, %v37_v27 }
   0x9   :  { %151 = vmatpush1.xpose.msra.mxu0 %v2831_v9  ;;  %v310_v36 = vsub.f32 %v2865_v21, %v5200_v28  ;;  %v316_v37 = vsub.f32 %v2868_v22, %v5198_v29  ;;  %v5197_v38 = vand.u32 4294901760, %v2884_v31  ;;  %v5196_v44 = vand.u32 4294901760, %v2896_v35  ;;  %v22_v28 = vld [vmem:[%s5183_s1 + $0x30] sm:$0xff] }
   0xa   :  { %153 = vmatprep.subr.mxu0 %v2833_v10  ;;  %v293_v41 = vand.u32 4294901760, %v292_v32  ;;  %v299_v42 = vand.u32 4294901760, %v298_v33  ;;  %v305_v43 = vand.u32 4294901760, %v304_v34  ;;  %v2914_v45 = vsub.f32 %v40_v13, %v2862_v20  ;;  %v30_v34 = vld [vmem:[%s5183_s1 + $0x70] sm:$0xff] }
   0xb   :  { %v311_v47 = vand.u32 4294901760, %v310_v36  ;;  %v2919_v48 = vand.u32 4294901760, %v36_v40  ;;  %v2922_v49 = vsub.f32 %v39_v14, %v2874_v26  ;;  %v317_v50 = vand.u32 4294901760, %v316_v37 }
   0xc   :  { %294 = vmatprep.subr.mxu1 %v293_v41  ;;  %v322_v51 = vsub.f32 %v2884_v31, %v5197_v38  ;;  %v5194_v52 = vand.u32 4294901760, %v2914_v45  ;;  %v2933_v54 = vsub.f32 %v38_v19, %v2881_v30  ;;  %v328_v55 = vsub.f32 %v2896_v35, %v5196_v44 }
   0xd   :  { %155 = vmatpush1.xpose.msra.mxu0 %v2835_v11  ;;  %300 = vmatpush1.xpose.msra.mxu1 %v299_v42  ;;  %v2939_v56 = vand.u32 4294901760, %v35_v46  ;;  %v5192_v57 = vand.u32 4294901760, %v2922_v49  ;;  %v2946_v59 = vsub.f32 %v37_v27, %v2906_v39  ;;  %v2948_v60 = vand.u32 4294901760, %v34_v53  ;;  %v29_v42 = vld [vmem:[%s5183_s1 + $0x68] sm:$0xff] }
   0xe   :  { %157 = vmatprep.subr.mxu0 %v2853_v17  ;;  %306 = vmatprep.subr.mxu1 %v305_v43  ;;  %v2951_v61 = vsub.f32 %v36_v40, %v2919_v48  ;;  %v323_v62 = vand.u32 4294901760, %v322_v51  ;;  %v334_v63 = vsub.f32 %v2914_v45, %v5194_v52  ;;  %v5191_v0 = vand.u32 4294901760, %v2933_v54 }
   0xf   :  { %v2958_v1 = vand.u32 4294901760, %v33_v58  ;;  %v329_v6 = vand.u32 4294901760, %v328_v55  ;;  %v340_v7 = vsub.f32 %v2922_v49, %v5192_v57  ;;  %v5190_v8 = vand.u32 4294901760, %v2946_v59  ;;  %v28_v55 = vld [vmem:[%s5183_s1 + $0x60] sm:$0xff] }
  0x10   :  { %v2972_v13 = vsub.f32 %v35_v46, %v2939_v56  ;;  %v2974_v14 = vand.u32 4294901760, %v32_v2  ;;  %v5188_v19 = vand.u32 4294901760, %v2951_v61  ;;  %v335_v27 = vand.u32 4294901760, %v334_v63 }
  0x11   :  { %159 = vmatpush1.xpose.msra.mxu0 %v2862_v20  ;;  %312 = vmatpush1.xpose.msra.mxu1 %v311_v47  ;;  %5583 = vst [vmem:[#allocation2_spill] sm:$0xff] %v2958_v1  ;;  %v346_v32 = vsub.f32 %v2933_v54, %v5191_v0  ;;  %v2981_v33 = vand.u32 4294901760, %v31_v12  ;;  %v2987_v36 = vsub.f32 %v34_v53, %v2948_v60  ;;  %v341_v37 = vand.u32 4294901760, %v340_v7  ;;  %v27_v7 = vld [vmem:[%s5183_s1 + $0x58] sm:$0xff] }
  0x12   :  { %161 = vmatprep.subr.mxu0 %v2874_v26  ;;  %318 = vmatprep.subr.mxu1 %v317_v50  ;;  %5584 = vst [vmem:[#allocation3_spill] sm:$0xff] %v2974_v14  ;;  %v352_v40 = vsub.f32 %v2946_v59, %v5190_v8  ;;  %v5187_v41 = vand.u32 4294901760, %v2972_v13  ;;  %v2998_v43 = vsub.f32 %v33_v58, %v2958_v1  ;;  %v3003_v47 = vand.u32 4294901760, %v30_v34  ;;  %v25_v8 = vld [vmem:[%s5183_s1 + $0x48] sm:$0xff] }
  0x13   :  { %5585 = vst [vmem:[#allocation4_spill] sm:$0xff] %v2981_v33  ;;  %v358_v46 = vsub.f32 %v2951_v61, %v5188_v19  ;;  %v347_v50 = vand.u32 4294901760, %v346_v32  ;;  %v5189_v51 = vand.u32 4294901760, %v2987_v36  ;;  %v3007_v53 = vand.u32 4294901760, %v29_v42  ;;  %v26_v19 = vld [vmem:[%s5183_s1 + $0x50] sm:$0xff] }
  0x14   :  { %5586 = vst [vmem:[#allocation5_spill] sm:$0xff] %v3003_v47  ;;  %v3013_v58 = vsub.f32 %v32_v2, %v2974_v14  ;;  %v364_v63 = vsub.f32 %v2972_v13, %v5187_v41  ;;  %v3026_v2 = vand.u32 4294901760, %v28_v55  ;;  %v3033_v41 = vand.u32 4294901760, %v27_v7 }
  0x15   :  { %163 = vmatpush1.xpose.msra.mxu0 %v2881_v30  ;;  %324 = vmatpush1.xpose.msra.mxu1 %v323_v62  ;;  %5587 = vst [vmem:[#allocation6_spill] sm:$0xff] %v3007_v53  ;;  %v353_v62 = vand.u32 4294901760, %v352_v40  ;;  %v359_v32 = vand.u32 4294901760, %v358_v46  ;;  %v3050_v0 = vsub.f32 %v29_v42, %v3007_v53  ;;  %v3052_v57 = vand.u32 4294901760, %v26_v19  ;;  %v24_v42 = vld [vmem:[%s5183_s1 + $0x40] sm:$0xff] }
  0x16   :  { %165 = vmatprep.subr.mxu0 %v2906_v39  ;;  %330 = vmatprep.subr.mxu1 %v329_v6  ;;  %v5193_v6 = vand.u32 4294901760, %v2998_v43  ;;  %5588 = vst [vmem:[#allocation7_spill] sm:$0xff] %v3026_v2  ;;  %v5195_v40 = vand.u32 4294901760, %v3013_v58  ;;  %5589 = vst [vmem:[#allocation8_spill] sm:$0xff] %v3033_v41  ;;  %v365_v46 = vand.u32 4294901760, %v364_v63  ;;  %v3062_v52 = vand.u32 4294901760, %v25_v8 }
  0x17   :  { %5590 = vst [vmem:[#allocation9_spill] sm:$0xff] %v3052_v57  ;;  %v3076_v44 = vsub.f32 %v27_v7, %v3033_v41  ;;  %v3078_v38 = vand.u32 4294901760, %v24_v42  ;;  %v3091_v7 = vsub.f32 %v26_v19, %v3052_v57  ;;  %v3107_v23 = vand.u32 4294901760, %v22_v28 }
  0x18   :  { %v382_v63 = vsub.f32 %v3013_v58, %v5195_v40  ;;  %5592 = vst [vmem:[#allocation11_spill] sm:$0xff] %v3062_v52  ;;  %v23_v40 = vld [vmem:[%s5183_s1 + $0x38] sm:$0xff]  ;;  %v3102_v24 = vsub.f32 %v25_v8, %v3062_v52 }
  0x19   :  { %167 = vmatpush1.xpose.msra.mxu0 %v2919_v48  ;;  %336 = vmatpush1.xpose.msra.mxu1 %v335_v27  ;;  %v3024_v27 = vsub.f32 %v31_v12, %v2981_v33  ;;  %v3039_v12 = vsub.f32 %v30_v34, %v3003_v47  ;;  %v3055_v34 = vsub.f32 %v28_v55, %v3026_v2 }
  0x1a   :  { %169 = vmatprep.subr.mxu0 %v2939_v56  ;;  %342 = vmatprep.subr.mxu1 %v341_v37  ;;  %v370_v37 = vsub.f32 %v2987_v36, %v5189_v51  ;;  %5593 = vst [vmem:[#allocation12_spill] sm:$0xff] %v3076_v44  ;;  %5594 = vst [vmem:[#allocation13_spill] sm:$0xff] %v3078_v38  ;;  %v3117_v8 = vsub.f32 %v24_v42, %v3078_v38 }
  0x1b   :  { %v5199_v51 = vand.u32 4294901760, %v3024_v27  ;;  %5591 = vst [vmem:[#allocation10_spill] sm:$0xff] %v3055_v34  ;;  %v5206_v29 = vand.u32 4294901760, %v3055_v34  ;;  %5596 = vst [vmem:[#allocation15_spill] sm:$0xff] %v3091_v7 }
  0x1c   :  { %5597 = vst [vmem:[#allocation16_spill] sm:$0xff] %v3102_v24  ;;  %5598 = vst [vmem:[#allocation17_spill] sm:$0xff] %v3107_v23 }
  0x1d   :  { %171 = vmatpush1.xpose.msra.mxu0 %v2948_v60  ;;  %348 = vmatpush1.xpose.msra.mxu1 %v347_v50  ;;  %v376_v50 = vsub.f32 %v2998_v43, %v5193_v6  ;;  %v5202_v6 = vand.u32 4294901760, %v3039_v12  ;;  %v406_v19 = vsub.f32 %v3055_v34, %v5206_v29  ;;  %5600 = vst [vmem:[#allocation19_spill] sm:$0xff] %v3117_v8 }
  0x1e   :  { %173 = vmatprep.subr.mxu0 %v2958_v1  ;;  %354 = vmatprep.subr.mxu1 %v353_v62  ;;  %v371_v62 = vand.u32 4294901760, %v370_v37  ;;  %v5205_v37 = vand.u32 4294901760, %v3050_v0 }
  0x1f   :  { %v377_v55 = vand.u32 4294901760, %v376_v50  ;;  %v394_v50 = vsub.f32 %v3039_v12, %v5202_v6  ;;  %v21_v6 = vld [vmem:[%s5183_s1 + $0x28] sm:$0xff] }
  0x21   :  { %175 = vmatpush1.xpose.msra.mxu0 %v2974_v14  ;;  %360 = vmatpush1.xpose.msra.mxu1 %v359_v32  ;;  %v388_v32 = vsub.f32 %v3024_v27, %v5199_v51  ;;  %v3085_v51 = vand.u32 4294901760, %v23_v40 }
  0x22   :  { %177 = vmatprep.subr.mxu0 %v2981_v33  ;;  %366 = vmatprep.subr.mxu1 %v365_v46  ;;  %v383_v46 = vand.u32 4294901760, %v382_v63  ;;  %v20_v63 = vld [vmem:[%s5183_s1 + $0x20] sm:$0xff] }
  0x23   :  { %5595 = vst [vmem:[#allocation14_spill] sm:$0xff] %v3085_v51  ;;  %v389_v25 = vand.u32 4294901760, %v388_v32  ;;  %v19_v32 = vld [vmem:[%s5183_s1 + $0x18] sm:$0xff]  ;;  %v3130_v42 = vand.u32 4294901760, %v20_v63 }
  0x25   :  { %179 = vmatpush1.xpose.msra.mxu0 %v3003_v47  ;;  %372 = vmatpush1.xpose.msra.mxu1 %v371_v62  ;;  %v400_v62 = vsub.f32 %v3050_v0, %v5205_v37  ;;  %v3111_v37 = vand.u32 4294901760, %v21_v6  ;;  %v407_v47 = vand.u32 4294901760, %v406_v19  ;;  %5603 = vst [vmem:[#allocation21_spill] sm:$0xff] %v3130_v42 }
  0x26   :  { %181 = vmatprep.subr.mxu0 %v3007_v53  ;;  %378 = vmatprep.subr.mxu1 %v377_v55  ;;  %v395_v55 = vand.u32 4294901760, %v394_v50  ;;  %v5601_v53 = vand.u32 4294901760, %v3076_v44  ;;  %v3137_v50 = vand.u32 4294901760, %v19_v32 }
  0x27   :  { %5599 = vst [vmem:[#allocation18_spill] sm:$0xff] %v3111_v37  ;;  %v401_v29 = vand.u32 4294901760, %v400_v62 }
  0x28   :  { %5605 = vst [vmem:[#allocation22_spill] sm:$0xff] %v3137_v50 }
  0x29   :  { %183 = vmatpush1.xpose.msra.mxu0 %v3026_v2  ;;  %384 = vmatpush1.xpose.msra.mxu1 %v383_v46  ;;  %v412_v46 = vsub.f32 %v3076_v44, %v5601_v53  ;;  %v3128_v2 = vsub.f32 %v23_v40, %v3085_v51  ;;  %v3143_v40 = vsub.f32 %v22_v28, %v3107_v23  ;;  %v17_v53 = vld [vmem:[%s5183_s1 + $0x8] sm:$0xff] }
  0x2a   :  { %185 = vmatprep.subr.mxu0 %v3033_v41  ;;  %390 = vmatprep.subr.mxu1 %v389_v25  ;;  %v5604_v25 = vand.u32 4294901760, %v3091_v7  ;;  %v18_v41 = vld [vmem:[%s5183_s1 + $0x10] sm:$0xff]  ;;  %v3159_v28 = vsub.f32 %v20_v63, %v3130_v42 }
  0x2b   :  { %5602 = vst [vmem:[#allocation20_spill] sm:$0xff] %v3128_v2  ;;  %5606 = vst [vmem:[#allocation23_spill] sm:$0xff] %v3143_v40  ;;  %v413_v19 = vand.u32 4294901760, %v412_v46  ;;  %v3156_v33 = vand.u32 4294901760, %v18_v41  ;;  %v5611_v46 = vand.u32 4294901760, %v3117_v8 }
  0x2c   :  { %v418_v62 = vsub.f32 %v3091_v7, %v5604_v25  ;;  %v3154_v7 = vsub.f32 %v21_v6, %v3111_v37  ;;  %5610 = vst [vmem:[#allocation26_spill] sm:$0xff] %v3159_v28  ;;  %v16_v6 = vld [vmem:[%s5183_s1] sm:$0xff]  ;;  %v3180_v25 = vsub.f32 %v19_v32, %v3137_v50 }
  0x2d   :  { %187 = vmatpush1.xpose.msra.mxu0 %v3052_v57  ;;  %396 = vmatpush1.xpose.msra.mxu1 %v395_v55  ;;  %v5607_v55 = vand.u32 4294901760, %v3102_v24  ;;  %5609 = vst [vmem:[#allocation25_spill] sm:$0xff] %v3156_v33  ;;  %v3195_v32 = vsub.f32 %v18_v41, %v3156_v33  ;;  %v5621_v41 = vand.u32 4294901760, %v3159_v28 }
  0x2e   :  { %189 = vmatprep.subr.mxu0 %v3062_v52  ;;  %402 = vmatprep.subr.mxu1 %v401_v29  ;;  %5608 = vst [vmem:[#allocation24_spill] sm:$0xff] %v3154_v7  ;;  %v419_v29 = vand.u32 4294901760, %v418_v62  ;;  %v3166_v52 = vand.u32 4294901760, %v17_v53  ;;  %5614 = vst [vmem:[#allocation28_spill] sm:$0xff] %v3180_v25 }
  0x2f   :  { %v424_v57 = vsub.f32 %v3102_v24, %v5607_v55  ;;  %v430_v55 = vsub.f32 %v3117_v8, %v5611_v46  ;;  %v79_v46 = vld [vmem:[%s5183_s1 + $0x1f8] sm:$0xff]  ;;  %v3182_v8 = vand.u32 4294901760, %v16_v6  ;;  %5618 = vst [vmem:[#allocation31_spill] sm:$0xff] %v3195_v32 }
  0x30   :  { %5612 = vst [vmem:[#allocation27_spill] sm:$0xff] %v3166_v52  ;;  %v3189_v62 = vand.u32 4294901760, %v79_v46 }
  0x31   :  { %191 = vmatpush1.xpose.msra.mxu0 %v3078_v38  ;;  %408 = vmatpush1.xpose.msra.mxu1 %v407_v47  ;;  %v425_v63 = vand.u32 4294901760, %v424_v57  ;;  %v5613_v38 = vand.u32 4294901760, %v3128_v2  ;;  %5615 = vst [vmem:[#allocation29_spill] sm:$0xff] %v3182_v8  ;;  %v431_v57 = vand.u32 4294901760, %v430_v55 }
  0x32   :  { %193 = vmatprep.subr.mxu0 %v3085_v51  ;;  %414 = vmatprep.subr.mxu1 %v413_v19  ;;  %v5616_v19 = vand.u32 4294901760, %v3143_v40  ;;  %5617 = vst [vmem:[#allocation30_spill] sm:$0xff] %v3189_v62  ;;  %v78_v51 = vld [vmem:[%s5183_s1 + $0x1f0] sm:$0xff] }
  0x33   :  { %v436_v47 = vsub.f32 %v3128_v2, %v5613_v38  ;;  %v454_v2 = vsub.f32 %v3159_v28, %v5621_v41  ;;  %v5625_v28 = vand.u32 4294901760, %v3180_v25 }
  0x34   :  { %v442_v38 = vsub.f32 %v3143_v40, %v5616_v19  ;;  %v77_v19 = vld [vmem:[%s5183_s1 + $0x1e8] sm:$0xff]  ;;  %v3206_v40 = vsub.f32 %v17_v53, %v3166_v52  ;;  %v3221_v53 = vsub.f32 %v16_v6, %v3182_v8 }
  0x35   :  { %195 = vmatpush1.xpose.msra.mxu0 %v3107_v23  ;;  %420 = vmatpush1.xpose.msra.mxu1 %v419_v29  ;;  %v437_v24 = vand.u32 4294901760, %v436_v47  ;;  %v5619_v29 = vand.u32 4294901760, %v3154_v7  ;;  %v76_v23 = vld [vmem:[%s5183_s1 + $0x1e0] sm:$0xff]  ;;  %v75_v47 = vld [vmem:[%s5183_s1 + $0x1d8] sm:$0xff] }
  0x36   :  { %197 = vmatprep.subr.mxu0 %v3111_v37  ;;  %426 = vmatprep.subr.mxu1 %v425_v63  ;;  %5620 = vst [vmem:[#allocation32_spill] sm:$0xff] %v3206_v40  ;;  %v3211_v37 = vand.u32 4294901760, %v78_v51  ;;  %v443_v63 = vand.u32 4294901760, %v442_v38  ;;  %5624 = vst [vmem:[#allocation35_spill] sm:$0xff] %v3221_v53  ;;  %v3234_v6 = vand.u32 4294901760, %v76_v23  ;;  %v3241_v38 = vand.u32 4294901760, %v75_v47 }
  0x37   :  { %v448_v55 = vsub.f32 %v3154_v7, %v5619_v29  ;;  %v3215_v29 = vand.u32 4294901760, %v77_v19  ;;  %v455_v7 = vand.u32 4294901760, %v454_v2 }
  0x38   :  { %5622 = vst [vmem:[#allocation33_spill] sm:$0xff] %v3211_v37  ;;  %5627 = vst [vmem:[#allocation37_spill] sm:$0xff] %v3234_v6 }
  0x39   :  { %199 = vmatpush1.xpose.msra.mxu0 %v3130_v42  ;;  %432 = vmatpush1.xpose.msra.mxu1 %v431_v57  ;;  %5623 = vst [vmem:[#allocation34_spill] sm:$0xff] %v3215_v29  ;;  %v449_v41 = vand.u32 4294901760, %v448_v55  ;;  %v460_v57 = vsub.f32 %v3180_v25, %v5625_v28  ;;  %v3232_v42 = vsub.f32 %v79_v46, %v3189_v62  ;;  %5629 = vst [vmem:[#allocation38_spill] sm:$0xff] %v3241_v38  ;;  %v73_v28 = vld [vmem:[%s5183_s1 + $0x1c8] sm:$0xff] }
  0x3a   :  { %201 = vmatprep.subr.mxu0 %v3137_v50  ;;  %438 = vmatprep.subr.mxu1 %v437_v24  ;;  %v5628_v24 = vand.u32 4294901760, %v3195_v32  ;;  %v74_v50 = vld [vmem:[%s5183_s1 + $0x1d0] sm:$0xff]  ;;  %v3247_v46 = vsub.f32 %v78_v51, %v3211_v37  ;;  %v3263_v51 = vsub.f32 %v76_v23, %v3234_v6 }
  0x3b   :  { %5626 = vst [vmem:[#allocation36_spill] sm:$0xff] %v3232_v42  ;;  %v461_v2 = vand.u32 4294901760, %v460_v57  ;;  %v3260_v25 = vand.u32 4294901760, %v74_v50  ;;  %v5635_v57 = vand.u32 4294901760, %v3221_v53 }
  0x3c   :  { %v466_v55 = vsub.f32 %v3195_v32, %v5628_v24  ;;  %5630 = vst [vmem:[#allocation39_spill] sm:$0xff] %v3247_v46  ;;  %v3258_v32 = vsub.f32 %v77_v19, %v3215_v29  ;;  %5634 = vst [vmem:[#allocation42_spill] sm:$0xff] %v3263_v51  ;;  %v5265_v24 = vand.u32 4294901760, %v3247_v46 }
  0x3d   :  { %203 = vmatpush1.xpose.msra.mxu0 %v3156_v33  ;;  %444 = vmatpush1.xpose.msra.mxu1 %v443_v63  ;;  %v5631_v63 = vand.u32 4294901760, %v3206_v40  ;;  %5633 = vst [vmem:[#allocation41_spill] sm:$0xff] %v3260_v25 }
  0x3e   :  { %205 = vmatprep.subr.mxu0 %v3166_v52  ;;  %450 = vmatprep.subr.mxu1 %v449_v41  ;;  %5632 = vst [vmem:[#allocation40_spill] sm:$0xff] %v3258_v32  ;;  %v467_v41 = vand.u32 4294901760, %v466_v55  ;;  %v3270_v52 = vand.u32 4294901760, %v73_v28  ;;  %v71_v55 = vld [vmem:[%s5183_s1 + $0x1b8] sm:$0xff] }
  0x3f   :  { %v472_v33 = vsub.f32 %v3206_v40, %v5631_v63  ;;  %v478_v63 = vsub.f32 %v3221_v53, %v5635_v57  ;;  %v5637_v40 = vand.u32 4294901760, %v3232_v42  ;;  %v3284_v57 = vsub.f32 %v75_v47, %v3241_v38 }
  0x40   :  { %5636 = vst [vmem:[#allocation43_spill] sm:$0xff] %v3270_v52 }
  0x41   :  { %207 = vmatpush1.xpose.msra.mxu0 %v3182_v8  ;;  %456 = vmatpush1.xpose.msra.mxu1 %v455_v7  ;;  %v473_v19 = vand.u32 4294901760, %v472_v33  ;;  %v484_v23 = vsub.f32 %v3232_v42, %v5637_v40  ;;  %v72_v7 = vld [vmem:[%s5183_s1 + $0x1c0] sm:$0xff]  ;;  %5638 = vst [vmem:[#allocation44_spill] sm:$0xff] %v3284_v57  ;;  %v3288_v33 = vsub.f32 %v74_v50, %v3260_v25  ;;  %v479_v40 = vand.u32 4294901760, %v478_v63  ;;  %v69_v63 = vld [vmem:[%s5183_s1 + $0x1a8] sm:$0xff] }
  0x42   :  { %209 = vmatprep.subr.mxu0 %v3189_v62  ;;  %462 = vmatprep.subr.mxu1 %v461_v2  ;;  %v490_v8 = vsub.f32 %v3247_v46, %v5265_v24  ;;  %v3294_v62 = vand.u32 4294901760, %v72_v7  ;;  %v3296_v42 = vand.u32 4294901760, %v71_v55  ;;  %v5642_v2 = vand.u32 4294901760, %v3258_v32 }
  0x43   :  { %5639 = vst [vmem:[#allocation45_spill] sm:$0xff] %v3288_v33  ;;  %v485_v47 = vand.u32 4294901760, %v484_v23  ;;  %v3310_v24 = vsub.f32 %v73_v28, %v3270_v52  ;;  %v3324_v46 = vand.u32 4294901760, %v69_v63  ;;  %v68_v28 = vld [vmem:[%s5183_s1 + $0x1a0] sm:$0xff] }
  0x44   :  { %5640 = vst [vmem:[#allocation46_spill] sm:$0xff] %v3294_v62  ;;  %5641 = vst [vmem:[#allocation47_spill] sm:$0xff] %v3296_v42  ;;  %v496_v50 = vsub.f32 %v3258_v32, %v5642_v2  ;;  %v3319_v2 = vld [vmem:[%s5184_s0 + $0x8] sm:$0xff]  ;;  %v3341_v53 = vsub.f32 %v71_v55, %v3296_v42  ;;  %v66_v55 = vld [vmem:[%s5183_s1 + $0x190] sm:$0xff] }
  0x45   :  { %211 = vmatpush2.xpose.msra.mxu0 %v3211_v37  ;;  %468 = vmatpush1.xpose.msra.mxu1 %v467_v41  ;;  %v70_v41 = vld [vmem:[%s5183_s1 + $0x1b0] sm:$0xff]  ;;  %5643 = vst [vmem:[#allocation48_spill] sm:$0xff] %v3310_v24  ;;  %5645 = vst [vmem:[#allocation49_spill] sm:$0xff] %v3319_v2  ;;  %v491_v37 = vand.u32 4294901760, %v490_v8  ;;  %v3380_v34 = vand.u32 4294901760, %v66_v55 }
  0x46   :  { %213 = vmatprep.subr.mxu0 %v3215_v29  ;;  %474 = vmatprep.subr.mxu1 %v473_v19  ;;  %v5644_v19 = vand.u32 4294901760, %v3263_v51  ;;  %v3322_v32 = vand.u32 4294901760, %v70_v41  ;;  %5647 = vst [vmem:[#allocation51_spill] sm:$0xff] %v3324_v46  ;;  %v497_v29 = vand.u32 4294901760, %v496_v50  ;;  %5650 = vst [vmem:[#allocation53_spill] sm:$0xff] %v3341_v53 }
  0x47   :  { %5660 = vst [vmem:[#allocation61_spill] sm:$0xff] %v3380_v34 }
  0x48   :  { %v502_v23 = vsub.f32 %v3263_v51, %v5644_v19  ;;  %5646 = vst [vmem:[#allocation50_spill] sm:$0xff] %v3322_v32  ;;  %v3330_v19 = vsub.f32 %v72_v7, %v3294_v62  ;;  %v5649_v51 = vand.u32 4294901760, %v3284_v57  ;;  %v3344_v7 = vand.u32 4294901760, %v3319_v2 }
  0x49   :  { %215 = vmatpush2.xpose.msra.mxu0 %v3234_v6  ;;  %480 = vmatpush1.xpose.msra.mxu1 %v479_v40  ;;  %v67_v6 = vld [vmem:[%s5183_s1 + $0x198] sm:$0xff] }
  0x4a   :  { %5648 = vst [vmem:[#allocation52_spill] sm:$0xff] %v3330_v19  ;;  %217 = vmatprep.subr.mxu0 %v3241_v38  ;;  %486 = vmatprep.subr.mxu1 %v485_v47  ;;  %v508_v40 = vsub.f32 %v3284_v57, %v5649_v51  ;;  %5651 = vst [vmem:[#allocation54_spill] sm:$0xff] %v3344_v7  ;;  %v503_v44 = vand.u32 4294901760, %v502_v23  ;;  %v5652_v47 = vand.u32 4294901760, %v3288_v33  ;;  %v3349_v38 = vand.u32 4294901760, %v68_v28  ;;  %v65_v23 = vld [vmem:[%s5183_s1 + $0x188] sm:$0xff] }
  0x4b   :  { %v3353_v8 = vand.u32 4294901760, %v67_v6  ;;  %v3359_v57 = vsub.f32 %v70_v41, %v3322_v32  ;;  %v5657_v51 = vand.u32 4294901760, %v3310_v24  ;;  %v3374_v41 = vsub.f32 %v69_v63, %v3324_v46  ;;  %674 = vmatprep.mubr.f32.mxu1 %v3344_v7 }
  0x4c   :  { %v514_v50 = vsub.f32 %v3288_v33, %v5652_v47  ;;  %5653 = vst [vmem:[#allocation55_spill] sm:$0xff] %v3349_v38  ;;  %v3366_v47 = vsub.f32 %v3319_v2, %v3344_v7  ;;  %v3393_v33 = vsub.f32 %v68_v28, %v3349_v38  ;;  %v5664_v7 = vand.u32 4294901760, %v3341_v53 }
  0x4d   :  { %219 = vmatpush2.xpose.msra.mxu0 %v3260_v25  ;;  %492 = vmatpush2.xpose.msra.mxu1 %v491_v37  ;;  %5654 = vst [vmem:[#allocation56_spill] sm:$0xff] %v3353_v8  ;;  %5655 = vst [vmem:[#allocation57_spill] sm:$0xff] %v3359_v57  ;;  %v509_v37 = vand.u32 4294901760, %v508_v40  ;;  %v520_v25 = vsub.f32 %v3310_v24, %v5657_v51  ;;  %v64_v51 = vld [vmem:[%s5183_s1 + $0x180] sm:$0xff]  ;;  %v3406_v28 = vsub.f32 %v67_v6, %v3353_v8  ;;  %v62_v6 = vld [vmem:[%s5183_s1 + $0x170] sm:$0xff] }
  0x4e   :  { %5656 = vst [vmem:[#allocation58_spill] sm:$0xff] %v3366_v47  ;;  %221 = vmatprep.subr.mxu0 %v3270_v52  ;;  %498 = vmatprep.subr.mxu1 %v497_v29  ;;  %5658 = vst [vmem:[#allocation59_spill] sm:$0xff] %v3374_v41  ;;  %v3377_v14 = vand.u32 4294901760, %v3366_v47  ;;  %v515_v2 = vand.u32 4294901760, %v514_v50  ;;  %v3382_v52 = vand.u32 4294901760, %v65_v23  ;;  %v5662_v29 = vand.u32 4294901760, %v3330_v19 }
  0x4f   :  { %5663 = vst [vmem:[#allocation63_spill] sm:$0xff] %v3393_v33  ;;  %5665 = vst [vmem:[#allocation64_spill] sm:$0xff] %v3406_v28  ;;  %v3410_v24 = vand.u32 4294901760, %v64_v51 }
  0x50   :  { %5659 = vst [vmem:[#allocation60_spill] sm:$0xff] %v3377_v14  ;;  %5661 = vst [vmem:[#allocation62_spill] sm:$0xff] %v3382_v52  ;;  %v526_v40 = vsub.f32 %v3330_v19, %v5662_v29  ;;  %v275_v50 = vsub.f32 %v3366_v47, %v3377_v14  ;;  %v532_v29 = vsub.f32 %v3341_v53, %v5664_v7  ;;  %v5669_v7 = vand.u32 4294901760, %v3359_v57 }
  0x51   :  { %223 = vmatpush2.xpose.msra.mxu0 %v3294_v62  ;;  %504 = vmatpush2.xpose.msra.mxu1 %v503_v44  ;;  %v521_v44 = vand.u32 4294901760, %v520_v25  ;;  %v63_v62 = vld [vmem:[%s5183_s1 + $0x178] sm:$0xff]  ;;  %5667 = vst [vmem:[#allocation66_spill] sm:$0xff] %v3410_v24 }
  0x52   :  { %225 = vmatprep.subr.mxu0 %v3296_v42  ;;  %510 = vmatprep.subr.mxu1 %v509_v37  ;;  %v3408_v19 = vand.u32 4294901760, %v275_v50  ;;  %v3413_v37 = vsub.f32 %v66_v55, %v3380_v34  ;;  %v527_v25 = vand.u32 4294901760, %v526_v40  ;;  %v538_v63 = vsub.f32 %v3359_v57, %v5669_v7  ;;  %v61_v7 = vld [vmem:[%s5183_s1 + $0x168] sm:$0xff] }
  0x53   :  { %v3420_v53 = vand.u32 4294901760, %v63_v62  ;;  %v533_v55 = vand.u32 4294901760, %v532_v29  ;;  %v5671_v50 = vand.u32 4294901760, %v3374_v41  ;;  %v3434_v42 = vsub.f32 %v65_v23, %v3382_v52  ;;  %v60_v23 = vld [vmem:[%s5183_s1 + $0x160] sm:$0xff] }
  0x54   :  { %5666 = vst [vmem:[#allocation65_spill] sm:$0xff] %v3408_v19  ;;  %5668 = vst [vmem:[#allocation67_spill] sm:$0xff] %v3413_v37  ;;  %277 = vmatprep.mubr.f32.mxu0 %v3408_v19  ;;  %v539_v29 = vand.u32 4294901760, %v538_v63  ;;  %v3450_v19 = vsub.f32 %v64_v51, %v3410_v24  ;;  %v5679_v51 = vand.u32 4294901760, %v3413_v37 }
  0x55   :  { %227 = vmatpush2.xpose.msra.mxu0 %v3322_v32  ;;  %516 = vmatpush2.xpose.msra.mxu1 %v515_v2  ;;  %5670 = vst [vmem:[#allocation68_spill] sm:$0xff] %v3420_v53  ;;  %v544_v2 = vsub.f32 %v3374_v41, %v5671_v50  ;;  %5672 = vst [vmem:[#allocation69_spill] sm:$0xff] %v3434_v42  ;;  %v3437_v32 = vand.u32 4294901760, %v62_v6  ;;  %v5674_v50 = vand.u32 4294901760, %v3393_v33 }
  0x56   :  { %229 = vmatprep.subr.mxu0 %v3324_v46  ;;  %522 = vmatprep.subr.mxu1 %v521_v44  ;;  %v3444_v46 = vand.u32 4294901760, %v61_v7  ;;  %5676 = vst [vmem:[#allocation72_spill] sm:$0xff] %v3450_v19  ;;  %v562_v41 = vsub.f32 %v3413_v37, %v5679_v51  ;;  %v5683_v37 = vand.u32 4294901760, %v3434_v42 }
  0x57   :  { %5673 = vst [vmem:[#allocation70_spill] sm:$0xff] %v3437_v32  ;;  %v550_v40 = vsub.f32 %v3393_v33, %v5674_v50  ;;  %v545_v44 = vand.u32 4294901760, %v544_v2  ;;  %v59_v50 = vld [vmem:[%s5183_s1 + $0x158] sm:$0xff]  ;;  %v3461_v33 = vsub.f32 %v63_v62, %v3420_v53  ;;  %v3476_v62 = vsub.f32 %v62_v6, %v3437_v32  ;;  %v57_v2 = vld [vmem:[%s5183_s1 + $0x148] sm:$0xff] }
  0x58   :  { %5675 = vst [vmem:[#allocation71_spill] sm:$0xff] %v3444_v46 }
  0x59   :  { %231 = vmatpush2.xpose.msra.mxu0 %v3349_v38  ;;  %528 = vmatpush2.xpose.msra.mxu1 %v527_v25  ;;  %v5677_v25 = vand.u32 4294901760, %v3406_v28  ;;  %5678 = vst [vmem:[#allocation73_spill] sm:$0xff] %v3461_v33  ;;  %v58_v38 = vld [vmem:[%s5183_s1 + $0x150] sm:$0xff]  ;;  %5682 = vst [vmem:[#allocation76_spill] sm:$0xff] %v3476_v62 }
  0x5a   :  { %233 = vmatprep.subr.mxu0 %v3353_v8  ;;  %534 = vmatprep.subr.mxu1 %v533_v55  ;;  %v3466_v8 = vand.u32 4294901760, %v60_v23  ;;  %v551_v55 = vand.u32 4294901760, %v550_v40  ;;  %v3489_v6 = vand.u32 4294901760, %v58_v38  ;;  %v3496_v40 = vand.u32 4294901760, %v57_v2 }
  0x5b   :  { %v556_v63 = vsub.f32 %v3406_v28, %v5677_v25  ;;  %v3470_v25 = vand.u32 4294901760, %v59_v50  ;;  %v563_v28 = vand.u32 4294901760, %v562_v41 }
  0x5c   :  { %5680 = vst [vmem:[#allocation74_spill] sm:$0xff] %v3466_v8  ;;  %5685 = vst [vmem:[#allocation78_spill] sm:$0xff] %v3489_v6 }
  0x5d   :  { %235 = vmatpush2.xpose.msra.mxu0 %v3380_v34  ;;  %540 = vmatpush2.xpose.msra.mxu1 %v539_v29  ;;  %5681 = vst [vmem:[#allocation75_spill] sm:$0xff] %v3470_v25  ;;  %v557_v51 = vand.u32 4294901760, %v556_v63  ;;  %v568_v29 = vsub.f32 %v3434_v42, %v5683_v37  ;;  %v3487_v34 = vsub.f32 %v61_v7, %v3444_v46  ;;  %5687 = vst [vmem:[#allocation79_spill] sm:$0xff] %v3496_v40  ;;  %v55_v37 = vld [vmem:[%s5183_s1 + $0x138] sm:$0xff] }
  0x5e   :  { %237 = vmatprep.subr.mxu0 %v3382_v52  ;;  %546 = vmatprep.subr.mxu1 %v545_v44  ;;  %v5686_v44 = vand.u32 4294901760, %v3450_v19  ;;  %v56_v52 = vld [vmem:[%s5183_s1 + $0x140] sm:$0xff]  ;;  %v3502_v7 = vsub.f32 %v60_v23, %v3466_v8  ;;  %v3518_v23 = vsub.f32 %v58_v38, %v3489_v6 }
  0x5f   :  { %5684 = vst [vmem:[#allocation77_spill] sm:$0xff] %v3487_v34  ;;  %v569_v41 = vand.u32 4294901760, %v568_v29  ;;  %v3515_v42 = vand.u32 4294901760, %v56_v52  ;;  %v5693_v29 = vand.u32 4294901760, %v3476_v62 }
  0x60   :  { %v574_v63 = vsub.f32 %v3450_v19, %v5686_v44  ;;  %5688 = vst [vmem:[#allocation80_spill] sm:$0xff] %v3502_v7  ;;  %v3513_v19 = vsub.f32 %v59_v50, %v3470_v25  ;;  %5692 = vst [vmem:[#allocation83_spill] sm:$0xff] %v3518_v23  ;;  %v54_v50 = vld [vmem:[%s5183_s1 + $0x130] sm:$0xff]  ;;  %v3539_v44 = vsub.f32 %v57_v2, %v3496_v40 }
  0x61   :  { %239 = vmatpush2.xpose.msra.mxu0 %v3410_v24  ;;  %552 = vmatpush2.xpose.msra.mxu1 %v551_v55  ;;  %v5689_v55 = vand.u32 4294901760, %v3461_v33  ;;  %5691 = vst [vmem:[#allocation82_spill] sm:$0xff] %v3515_v42  ;;  %v3554_v2 = vsub.f32 %v56_v52, %v3515_v42  ;;  %v5701_v52 = vand.u32 4294901760, %v3518_v23 }
  0x62   :  { %241 = vmatprep.subr.mxu0 %v3420_v53  ;;  %558 = vmatprep.subr.mxu1 %v557_v51  ;;  %5690 = vst [vmem:[#allocation81_spill] sm:$0xff] %v3513_v19  ;;  %v575_v51 = vand.u32 4294901760, %v574_v63  ;;  %v3525_v53 = vand.u32 4294901760, %v55_v37  ;;  %5696 = vst [vmem:[#allocation85_spill] sm:$0xff] %v3539_v44 }
  0x63   :  { %v580_v24 = vsub.f32 %v3461_v33, %v5689_v55  ;;  %v586_v55 = vsub.f32 %v3476_v62, %v5693_v29  ;;  %v53_v29 = vld [vmem:[%s5183_s1 + $0x128] sm:$0xff]  ;;  %v3541_v62 = vand.u32 4294901760, %v54_v50  ;;  %5699 = vst [vmem:[#allocation87_spill] sm:$0xff] %v3554_v2 }
  0x64   :  { %5694 = vst [vmem:[#allocation84_spill] sm:$0xff] %v3525_v53  ;;  %v3548_v63 = vand.u32 4294901760, %v53_v29 }
  0x65   :  { %243 = vmatpush2.xpose.msra.mxu0 %v3437_v32  ;;  %564 = vmatpush2.xpose.msra.mxu1 %v563_v28  ;;  %v581_v38 = vand.u32 4294901760, %v580_v24  ;;  %v5695_v32 = vand.u32 4294901760, %v3487_v34  ;;  %v587_v24 = vand.u32 4294901760, %v586_v55 }
  0x66   :  { %245 = vmatprep.subr.mxu0 %v3444_v46  ;;  %570 = vmatprep.subr.mxu1 %v569_v41  ;;  %v5697_v41 = vand.u32 4294901760, %v3502_v7  ;;  %5698 = vst [vmem:[#allocation86_spill] sm:$0xff] %v3548_v63  ;;  %v52_v46 = vld [vmem:[%s5183_s1 + $0x120] sm:$0xff] }
  0x67   :  { %v592_v28 = vsub.f32 %v3487_v34, %v5695_v32  ;;  %v610_v34 = vsub.f32 %v3518_v23, %v5701_v52  ;;  %v3585_v52 = vld [vmem:[%s5184_s0] sm:$0xff]  ;;  %v3596_v23 = vsub.f32 %v53_v29, %v3548_v63 }
  0x68   :  { %v598_v32 = vsub.f32 %v3502_v7, %v5697_v41  ;;  %v51_v41 = vld [vmem:[%s5183_s1 + $0x118] sm:$0xff]  ;;  %v3565_v7 = vsub.f32 %v55_v37, %v3525_v53  ;;  %v3580_v37 = vsub.f32 %v54_v50, %v3541_v62  ;;  %5704 = vst [vmem:[#allocation90_spill] sm:$0xff] %v3585_v52  ;;  %v49_v50 = vld [vmem:[%s5183_s1 + $0x108] sm:$0xff] }
  0x69   :  { %247 = vmatpush2.xpose.msra.mxu0 %v3466_v8  ;;  %576 = vmatpush2.xpose.msra.mxu1 %v575_v51  ;;  %v593_v33 = vand.u32 4294901760, %v592_v28  ;;  %v5700_v51 = vand.u32 4294901760, %v3513_v19  ;;  %v50_v8 = vld [vmem:[%s5183_s1 + $0x110] sm:$0xff] }
  0x6a   :  { %249 = vmatprep.subr.mxu0 %v3470_v25  ;;  %582 = vmatprep.subr.mxu1 %v581_v38  ;;  %v3570_v25 = vand.u32 4294901760, %v52_v46  ;;  %v599_v38 = vand.u32 4294901760, %v598_v32  ;;  %5703 = vst [vmem:[#allocation89_spill] sm:$0xff] %v3580_v37  ;;  %v5705_v32 = vand.u32 4294901760, %v3539_v44  ;;  %v3598_v57 = vand.u32 4294901760, %v50_v8 }
  0x6b   :  { %v604_v55 = vsub.f32 %v3513_v19, %v5700_v51  ;;  %v3574_v51 = vand.u32 4294901760, %v51_v41  ;;  %v611_v19 = vand.u32 4294901760, %v610_v34  ;;  %v48_v34 = vld [vmem:[%s5183_s1 + $0x100] sm:$0xff] }
  0x6c   :  { %v616_v28 = vsub.f32 %v3539_v44, %v5705_v32  ;;  %v3614_v29 = vsub.f32 %v52_v46, %v3570_v25 }
  0x6d   :  { %251 = vmatpush2.xpose.msra.mxu0 %v3489_v6  ;;  %588 = vmatpush2.xpose.msra.mxu1 %v587_v24  ;;  %5702 = vst [vmem:[#allocation88_spill] sm:$0xff] %v3574_v51  ;;  %v605_v24 = vand.u32 4294901760, %v604_v55  ;;  %v3608_v6 = vand.u32 4294901760, %v49_v50  ;;  %v3622_v32 = vsub.f32 %v51_v41, %v3574_v51 }
  0x6e   :  { %253 = vmatprep.subr.mxu0 %v3496_v40  ;;  %594 = vmatprep.subr.mxu1 %v593_v33  ;;  %v3601_v40 = vand.u32 4294901760, %v3585_v52  ;;  %v5707_v33 = vand.u32 4294901760, %v3554_v2 }
  0x70   :  { %5706 = vst [vmem:[#allocation91_spill] sm:$0xff] %v3601_v40  ;;  %v622_v55 = vsub.f32 %v3554_v2, %v5707_v33  ;;  %v3624_v2 = vand.u32 4294901760, %v48_v34  ;;  %v3628_v1 = vsub.f32 %v3585_v52, %v3601_v40  ;;  %v3636_v33 = vsub.f32 %v50_v8, %v3598_v57 }
  0x71   :  { %255 = vmatpush2.xpose.msra.mxu0 %v3515_v42  ;;  %600 = vmatpush2.xpose.msra.mxu1 %v599_v38  ;;  %v617_v42 = vand.u32 4294901760, %v616_v28  ;;  %v5708_v38 = vand.u32 4294901760, %v3565_v7  ;;  %v5710_v28 = vand.u32 4294901760, %v3580_v37  ;;  %v5712_v52 = vand.u32 4294901760, %v3596_v23 }
  0x72   :  { %257 = vmatprep.subr.mxu0 %v3525_v53  ;;  %606 = vmatprep.subr.mxu1 %v605_v24  ;;  %5709 = vst [vmem:[#allocation92_spill] sm:$0xff] %v3628_v1  ;;  %v623_v46 = vand.u32 4294901760, %v622_v55  ;;  %5711 = vst [vmem:[#allocation93_spill] sm:$0xff] %v3636_v33  ;;  %v3644_v55 = vsub.f32 %v49_v50, %v3608_v6 }
  0x73   :  { %v628_v44 = vsub.f32 %v3565_v7, %v5708_v38  ;;  %v634_v24 = vsub.f32 %v3580_v37, %v5710_v28  ;;  %v5375_v38 = vand.u32 4294901760, %v3614_v29  ;;  %v640_v53 = vsub.f32 %v3596_v23, %v5712_v52 }
  0x74   :  { %v3647_v28 = vand.u32 4294901760, %v3628_v1  ;;  %v3655_v52 = vsub.f32 %v48_v34, %v3624_v2 }
  0x75   :  { %259 = vmatpush2.xpose.msra.mxu0 %v3541_v62  ;;  %612 = vmatpush2.xpose.msra.mxu1 %v611_v19  ;;  %v629_v41 = vand.u32 4294901760, %v628_v44  ;;  %v5376_v19 = vand.u32 4294901760, %v3622_v32  ;;  %v635_v8 = vand.u32 4294901760, %v634_v24  ;;  %v5379_v44 = vand.u32 4294901760, %v3636_v33 }
  0x76   :  { %261 = vmatprep.subr.mxu0 %v3548_v63  ;;  %618 = vmatprep.subr.mxu1 %v617_v42  ;;  %5713 = vst [vmem:[#allocation94_spill] sm:$0xff] %v3647_v28  ;;  %v646_v42 = vsub.f32 %v3614_v29, %v5375_v38  ;;  %5714 = vst [vmem:[#allocation95_spill] sm:$0xff] %v3655_v52  ;;  %v641_v50 = vand.u32 4294901760, %v640_v53  ;;  %v281_v24 = vsub.f32 %v3628_v1, %v3647_v28 }
  0x77   :  { %v652_v63 = vsub.f32 %v3622_v32, %v5376_v19  ;;  %v658_v34 = vsub.f32 %v3636_v33, %v5379_v44 }
  0x78   :  { %v647_v38 = vand.u32 4294901760, %v646_v42 }
  0x79   :  { %263 = vmatpush2.xpose.msra.mxu0 %v3570_v25  ;;  %624 = vmatpush2.xpose.msra.mxu1 %v623_v46  ;;  %v5381_v46 = vand.u32 4294901760, %v3644_v55  ;;  %v653_v53 = vand.u32 4294901760, %v652_v63 }
  0x7a   :  { %265 = vmatprep.subr.mxu0 %v3574_v51  ;;  %630 = vmatprep.subr.mxu1 %v629_v41  ;;  %v5380_v41 = vand.u32 4294901760, %v3655_v52  ;;  %v3673_v51 = vand.u32 4294901760, %v281_v24  ;;  %v5720_v24 = vld [vmem:[#allocation4_spill] sm:$0xff] }
  0x7b   :  { %v664_v19 = vsub.f32 %v3644_v55, %v5381_v46  ;;  %v5727_v46 = vld [vmem:[#allocation20_spill] sm:$0xff] }
  0x7c   :  { %5715 = vst [vmem:[#allocation96_spill] sm:$0xff] %v3673_v51  ;;  %v670_v42 = vsub.f32 %v3655_v52, %v5380_v41  ;;  %v5726_v41 = vld [vmem:[#allocation7_spill] sm:$0xff] }
  0x7d   :  { %267 = vmatpush2.xpose.msra.mxu0 %v3598_v57  ;;  %636 = vmatpush2.xpose.msra.mxu1 %v635_v8  ;;  %v659_v8 = vand.u32 4294901760, %v658_v34  ;;  %v665_v44 = vand.u32 4294901760, %v664_v19  ;;  %v5717_v19 = vld [vmem:[#allocation10_spill] sm:$0xff]  ;;  %v5721_v34 = vld [vmem:[#allocation15_spill] sm:$0xff] }
  0x7e   :  { %269 = vmatprep.subr.mxu0 %v3608_v6  ;;  %642 = vmatprep.subr.mxu1 %v641_v50  ;;  %v671_v63 = vand.u32 4294901760, %v670_v42  ;;  %v5719_v50 = vld [vmem:[#allocation12_spill] sm:$0xff]  ;;  %v5724_v42 = vld [vmem:[#allocation6_spill] sm:$0xff] }
  0x81   :  { %271 = vmatpush2.xpose.msra.mxu0 %v3624_v2  ;;  %648 = vmatpush2.xpose.msra.mxu1 %v647_v38  ;;  %v5716_v38 = vld [vmem:[#allocation2_spill] sm:$0xff] }
  0x82   :  { %654 = vmatprep.subr.mxu1 %v653_v53  ;;  %684 = vmatprep.subr.mxu0 %v2848_v15  ;;  %v5722_v53 = vld [vmem:[#allocation5_spill] sm:$0xff] }
  0x84   :  { %283 = vmatmul.mubr.f32.vlgmr.msra.gmra.mxu0 %v3673_v51  ;;  %v5730_v51 = vld [vmem:[#allocation9_spill] sm:$0xff] }
  0x85   :  { %660 = vmatpush2.xpose.msra.mxu1 %v659_v8  ;;  %687 = vmatpush1.xpose.msra.mxu0 %v2851_v16  ;;  %v5723_v8 = vld [vmem:[#allocation16_spill] sm:$0xff] }
  0x86   :  { %666 = vmatprep.subr.mxu1 %v665_v44  ;;  %690 = vmatprep.subr.mxu0 %v2856_v18  ;;  %v5718_v44 = vld [vmem:[#allocation3_spill] sm:$0xff] }
  0x87   :  { %876 = vmatprep.mubr.f32.mxu0 %v3366_v47  ;;  %v5729_v47 = vld [vmem:[#allocation23_spill] sm:$0xff] }
  0x89   :  { %672 = vmatpush2.xpose.msra.mxu1 %v671_v63  ;;  %693 = vmatpush1.xpose.msra.mxu0 %v2865_v21  ;;  %v5725_v63 = vld [vmem:[#allocation19_spill] sm:$0xff] }
  0x8a   :  { %696 = vmatprep.subr.mxu0 %v2868_v22  ;;  %886 = vmatprep.subr.mxu1 %v2816_v3 }
  0x8c   :  { %676 = vmatmul.mubr.f32.vlgmr.msra.gmra.mxu1 %v3601_v40  ;;  %v5731_v40 = vld [vmem:[#allocation24_spill] sm:$0xff] }
  0x8d   :  { %699 = vmatpush1.xpose.msra.mxu0 %v2884_v31  ;;  %888 = vmatpush1.xpose.msra.mxu1 %v2818_v4 }
  0x8e   :  { %702 = vmatprep.subr.mxu0 %v2896_v35  ;;  %890 = vmatprep.subr.mxu1 %v2820_v5 }
  0x8f   :  { %1016 = vmatprep.mubr.f32.mxu1 %v3377_v14  ;;  %v5728_v14 = vld [vmem:[#allocation8_spill] sm:$0xff] }
  0x91   :  { %705 = vmatpush1.xpose.msra.mxu0 %v2914_v45  ;;  %892 = vmatpush1.xpose.msra.mxu1 %v2831_v9 }
  0x92   :  { %708 = vmatprep.subr.mxu0 %v2922_v49  ;;  %894 = vmatprep.subr.mxu1 %v2833_v10 }
  0x95   :  { %711 = vmatpush1.xpose.msra.mxu0 %v2933_v54  ;;  %896 = vmatpush1.xpose.msra.mxu1 %v2835_v11 }
  0x96   :  { %714 = vmatprep.subr.mxu0 %v2946_v59  ;;  %898 = vmatprep.subr.mxu1 %v2853_v17 }
  0x99   :  { %717 = vmatpush1.xpose.msra.mxu0 %v2951_v61  ;;  %900 = vmatpush1.xpose.msra.mxu1 %v2862_v20 }
  0x9a   :  { %720 = vmatprep.subr.mxu0 %v2972_v13  ;;  %902 = vmatprep.subr.mxu1 %v2874_v26 }
  0x9d   :  { %723 = vmatpush1.xpose.msra.mxu0 %v2987_v36  ;;  %904 = vmatpush1.xpose.msra.mxu1 %v2881_v30 }
  0x9e   :  { %726 = vmatprep.subr.mxu0 %v2998_v43  ;;  %906 = vmatprep.subr.mxu1 %v2906_v39 }
  0xa1   :  { %729 = vmatpush1.xpose.msra.mxu0 %v3013_v58  ;;  %908 = vmatpush1.xpose.msra.mxu1 %v2919_v48 }
  0xa2   :  { %732 = vmatprep.subr.mxu0 %v3024_v27  ;;  %910 = vmatprep.subr.mxu1 %v2939_v56 }
  0xa5   :  { %735 = vmatpush1.xpose.msra.mxu0 %v3039_v12  ;;  %912 = vmatpush1.xpose.msra.mxu1 %v2948_v60 }
  0xa6   :  { %738 = vmatprep.subr.mxu0 %v3050_v0  ;;  %914 = vmatprep.subr.mxu1 %v5716_v38 }
  0xa9   :  { %741 = vmatpush1.xpose.msra.mxu0 %v5717_v19  ;;  %916 = vmatpush1.xpose.msra.mxu1 %v5718_v44 }
  0xaa   :  { %744 = vmatprep.subr.mxu0 %v5719_v50  ;;  %918 = vmatprep.subr.mxu1 %v5720_v24 }
  0xad   :  { %747 = vmatpush1.xpose.msra.mxu0 %v5721_v34  ;;  %920 = vmatpush1.xpose.msra.mxu1 %v5722_v53  ;;  %v5732_v34 = vld [vmem:[#allocation11_spill] sm:$0xff]  ;;  %v5733_v53 = vld [vmem:[#allocation26_spill] sm:$0xff] }
  0xae   :  { %750 = vmatprep.subr.mxu0 %v5723_v8  ;;  %922 = vmatprep.subr.mxu1 %v5724_v42  ;;  %v5734_v8 = vld [vmem:[#allocation13_spill] sm:$0xff]  ;;  %v5735_v42 = vld [vmem:[#allocation28_spill] sm:$0xff] }
  0xb1   :  { %753 = vmatpush1.xpose.msra.mxu0 %v5725_v63  ;;  %924 = vmatpush1.xpose.msra.mxu1 %v5726_v41  ;;  %v5736_v63 = vld [vmem:[#allocation14_spill] sm:$0xff]  ;;  %v5737_v41 = vld [vmem:[#allocation31_spill] sm:$0xff] }
  0xb2   :  { %756 = vmatprep.subr.mxu0 %v5727_v46  ;;  %926 = vmatprep.subr.mxu1 %v5728_v14  ;;  %v5738_v46 = vld [vmem:[#allocation17_spill] sm:$0xff]  ;;  %v5739_v14 = vld [vmem:[#allocation32_spill] sm:$0xff] }
  0xb5   :  { %759 = vmatpush1.xpose.msra.mxu0 %v5729_v47  ;;  %928 = vmatpush1.xpose.msra.mxu1 %v5730_v51  ;;  %v5740_v47 = vld [vmem:[#allocation18_spill] sm:$0xff]  ;;  %v5741_v51 = vld [vmem:[#allocation35_spill] sm:$0xff] }
  0xb6   :  { %762 = vmatprep.subr.mxu0 %v5731_v40  ;;  %930 = vmatprep.subr.mxu1 %v5732_v34  ;;  %v5742_v40 = vld [vmem:[#allocation21_spill] sm:$0xff]  ;;  %v5743_v34 = vld [vmem:[#allocation36_spill] sm:$0xff] }
  0xb9   :  { %765 = vmatpush1.xpose.msra.mxu0 %v5733_v53  ;;  %932 = vmatpush1.xpose.msra.mxu1 %v5734_v8  ;;  %v5744_v53 = vld [vmem:[#allocation22_spill] sm:$0xff]  ;;  %v5745_v8 = vld [vmem:[#allocation39_spill] sm:$0xff] }
  0xba   :  { %768 = vmatprep.subr.mxu0 %v5735_v42  ;;  %934 = vmatprep.subr.mxu1 %v5736_v63  ;;  %v5746_v42 = vld [vmem:[#allocation25_spill] sm:$0xff]  ;;  %v5747_v63 = vld [vmem:[#allocation40_spill] sm:$0xff] }
  0xbd   :  { %771 = vmatpush1.xpose.msra.mxu0 %v5737_v41  ;;  %936 = vmatpush1.xpose.msra.mxu1 %v5738_v46  ;;  %v5748_v41 = vld [vmem:[#allocation27_spill] sm:$0xff]  ;;  %v5749_v46 = vld [vmem:[#allocation42_spill] sm:$0xff] }
  0xbe   :  { %774 = vmatprep.subr.mxu0 %v5739_v14  ;;  %938 = vmatprep.subr.mxu1 %v5740_v47  ;;  %v5750_v14 = vld [vmem:[#allocation29_spill] sm:$0xff]  ;;  %v5751_v47 = vld [vmem:[#allocation44_spill] sm:$0xff] }
  0xc1   :  { %777 = vmatpush1.xpose.msra.mxu0 %v5741_v51  ;;  %940 = vmatpush1.xpose.msra.mxu1 %v5742_v40  ;;  %v5752_v51 = vld [vmem:[#allocation30_spill] sm:$0xff]  ;;  %v5753_v40 = vld [vmem:[#allocation45_spill] sm:$0xff] }
  0xc2   :  { %780 = vmatprep.subr.mxu0 %v5743_v34  ;;  %942 = vmatprep.subr.mxu1 %v5744_v53  ;;  %v5754_v34 = vld [vmem:[#allocation33_spill] sm:$0xff]  ;;  %v5755_v53 = vld [vmem:[#allocation48_spill] sm:$0xff] }
  0xc5   :  { %783 = vmatpush2.xpose.msra.mxu0 %v5745_v8  ;;  %944 = vmatpush1.xpose.msra.mxu1 %v5746_v42  ;;  %v5756_v8 = vld [vmem:[#allocation34_spill] sm:$0xff]  ;;  %v5757_v42 = vld [vmem:[#allocation52_spill] sm:$0xff] }
  0xc6   :  { %786 = vmatprep.subr.mxu0 %v5747_v63  ;;  %946 = vmatprep.subr.mxu1 %v5748_v41  ;;  %v5758_v63 = vld [vmem:[#allocation37_spill] sm:$0xff] }
  0xc7   :  { %v5759_v41 = vld [vmem:[#allocation53_spill] sm:$0xff] }
  0xc9   :  { %789 = vmatpush2.xpose.msra.mxu0 %v5749_v46  ;;  %948 = vmatpush1.xpose.msra.mxu1 %v5750_v14  ;;  %v5760_v46 = vld [vmem:[#allocation38_spill] sm:$0xff]  ;;  %v5761_v14 = vld [vmem:[#allocation57_spill] sm:$0xff] }
  0xca   :  { %792 = vmatprep.subr.mxu0 %v5751_v47  ;;  %950 = vmatprep.subr.mxu1 %v5752_v51  ;;  %v5762_v47 = vld [vmem:[#allocation41_spill] sm:$0xff]  ;;  %v5763_v51 = vld [vmem:[#allocation59_spill] sm:$0xff] }
  0xcd   :  { %795 = vmatpush2.xpose.msra.mxu0 %v5753_v40  ;;  %952 = vmatpush2.xpose.msra.mxu1 %v5754_v34  ;;  %v5764_v40 = vld [vmem:[#allocation43_spill] sm:$0xff] }
  0xce   :  { %798 = vmatprep.subr.mxu0 %v5755_v53  ;;  %954 = vmatprep.subr.mxu1 %v5756_v8  ;;  %v5765_v34 = vld [vmem:[#allocation63_spill] sm:$0xff]  ;;  %v5766_v53 = vld [vmem:[#allocation46_spill] sm:$0xff]  ;;  %v5767_v8 = vld [vmem:[#allocation64_spill] sm:$0xff] }
  0xd1   :  { %801 = vmatpush2.xpose.msra.mxu0 %v5757_v42  ;;  %956 = vmatpush2.xpose.msra.mxu1 %v5758_v63  ;;  %v5768_v42 = vld [vmem:[#allocation47_spill] sm:$0xff] }
  0xd2   :  { %804 = vmatprep.subr.mxu0 %v5759_v41  ;;  %958 = vmatprep.subr.mxu1 %v5760_v46  ;;  %v5769_v63 = vld [vmem:[#allocation67_spill] sm:$0xff]  ;;  %v5770_v41 = vld [vmem:[#allocation50_spill] sm:$0xff]  ;;  %v5771_v46 = vld [vmem:[#allocation69_spill] sm:$0xff] }
  0xd5   :  { %807 = vmatpush2.xpose.msra.mxu0 %v5761_v14  ;;  %960 = vmatpush2.xpose.msra.mxu1 %v5762_v47  ;;  %v5772_v14 = vld [vmem:[#allocation51_spill] sm:$0xff]  ;;  %v5773_v47 = vld [vmem:[#allocation72_spill] sm:$0xff] }
  0xd6   :  { %810 = vmatprep.subr.mxu0 %v5763_v51  ;;  %962 = vmatprep.subr.mxu1 %v5764_v40  ;;  %v5774_v51 = vld [vmem:[#allocation55_spill] sm:$0xff]  ;;  %v5775_v40 = vld [vmem:[#allocation73_spill] sm:$0xff] }
  0xd9   :  { %813 = vmatpush2.xpose.msra.mxu0 %v5765_v34  ;;  %964 = vmatpush2.xpose.msra.mxu1 %v5766_v53  ;;  %v5776_v34 = vld [vmem:[#allocation56_spill] sm:$0xff] }
  0xda   :  { %816 = vmatprep.subr.mxu0 %v5767_v8  ;;  %966 = vmatprep.subr.mxu1 %v5768_v42  ;;  %v5777_v53 = vld [vmem:[#allocation76_spill] sm:$0xff]  ;;  %v5778_v8 = vld [vmem:[#allocation61_spill] sm:$0xff] }
  0xdb   :  { %v5779_v42 = vld [vmem:[#allocation77_spill] sm:$0xff] }
  0xdd   :  { %819 = vmatpush2.xpose.msra.mxu0 %v5769_v63  ;;  %968 = vmatpush2.xpose.msra.mxu1 %v5770_v41  ;;  %v5780_v63 = vld [vmem:[#allocation62_spill] sm:$0xff]  ;;  %v5781_v41 = vld [vmem:[#allocation80_spill] sm:$0xff] }
  0xde   :  { %822 = vmatprep.subr.mxu0 %v5771_v46  ;;  %970 = vmatprep.subr.mxu1 %v5772_v14  ;;  %v5782_v46 = vld [vmem:[#allocation66_spill] sm:$0xff]  ;;  %v5783_v14 = vld [vmem:[#allocation81_spill] sm:$0xff] }
  0xe1   :  { %825 = vmatpush2.xpose.msra.mxu0 %v5773_v47  ;;  %972 = vmatpush2.xpose.msra.mxu1 %v5774_v51  ;;  %v5784_v47 = vld [vmem:[#allocation68_spill] sm:$0xff]  ;;  %v5785_v51 = vld [vmem:[#allocation83_spill] sm:$0xff] }
  0xe2   :  { %828 = vmatprep.subr.mxu0 %v5775_v40  ;;  %974 = vmatprep.subr.mxu1 %v5776_v34  ;;  %v5786_v40 = vld [vmem:[#allocation70_spill] sm:$0xff]  ;;  %v5787_v34 = vld [vmem:[#allocation85_spill] sm:$0xff] }
  0xe5   :  { %831 = vmatpush2.xpose.msra.mxu0 %v5777_v53  ;;  %976 = vmatpush2.xpose.msra.mxu1 %v5778_v8  ;;  %v5788_v53 = vld [vmem:[#allocation71_spill] sm:$0xff] }
  0xe6   :  { %834 = vmatprep.subr.mxu0 %v5779_v42  ;;  %978 = vmatprep.subr.mxu1 %v5780_v63  ;;  %v5789_v8 = vld [vmem:[#allocation87_spill] sm:$0xff]  ;;  %v5790_v42 = vld [vmem:[#allocation74_spill] sm:$0xff] }
  0xe9   :  { %837 = vmatpush2.xpose.msra.mxu0 %v5781_v41  ;;  %980 = vmatpush2.xpose.msra.mxu1 %v5782_v46  ;;  %v5791_v41 = vld [vmem:[#allocation75_spill] sm:$0xff] }
  0xea   :  { %840 = vmatprep.subr.mxu0 %v5783_v14  ;;  %982 = vmatprep.subr.mxu1 %v5784_v47  ;;  %v5792_v14 = vld [vmem:[#allocation78_spill] sm:$0xff] }
  0xed   :  { %843 = vmatpush2.xpose.msra.mxu0 %v5785_v51  ;;  %984 = vmatpush2.xpose.msra.mxu1 %v5786_v40  ;;  %v5793_v51 = vld [vmem:[#allocation79_spill] sm:$0xff] }
  0xee   :  { %846 = vmatprep.subr.mxu0 %v5787_v34  ;;  %986 = vmatprep.subr.mxu1 %v5788_v53  ;;  %v5794_v34 = vld [vmem:[#allocation82_spill] sm:$0xff] }
  0xf1   :  { %849 = vmatpush2.xpose.msra.mxu0 %v5789_v8  ;;  %988 = vmatpush2.xpose.msra.mxu1 %v5790_v42  ;;  %v5795_v8 = vld [vmem:[#allocation84_spill] sm:$0xff] }
  0xf2   :  { %852 = vmatprep.subr.mxu0 %v3565_v7  ;;  %990 = vmatprep.subr.mxu1 %v5791_v41 }
  0xf5   :  { %855 = vmatpush2.xpose.msra.mxu0 %v3580_v37  ;;  %992 = vmatpush2.xpose.msra.mxu1 %v5792_v14  ;;  %v5796_v37 = vld [vmem:[#allocation86_spill] sm:$0xff] }
  0xf6   :  { %858 = vmatprep.subr.mxu0 %v3596_v23  ;;  %994 = vmatprep.subr.mxu1 %v5793_v51  ;;  %v5797_v51 = vld [vmem:[#allocation88_spill] sm:$0xff] }
  0xf9   :  { %861 = vmatpush2.xpose.msra.mxu0 %v3614_v29  ;;  %996 = vmatpush2.xpose.msra.mxu1 %v5794_v34  ;;  %v5798_v34 = vand.u32 4294901760, %v2848_v15  ;;  %v5803_v15 = vand.u32 4294901760, %v2868_v22  ;;  %v5808_v22 = vand.u32 4294901760, %v2933_v54 }
  0xfa   :  { %864 = vmatprep.subr.mxu0 %v3622_v32  ;;  %998 = vmatprep.subr.mxu1 %v5795_v8 }
  0xfd   :  { %867 = vmatpush2.xpose.msra.mxu0 %v3636_v33  ;;  %1000 = vmatpush2.xpose.msra.mxu1 %v3541_v62  ;;  %v5799_v33 = vand.u32 4294901760, %v2851_v16  ;;  %v5804_v16 = vand.u32 4294901760, %v2884_v31  ;;  %v5818_v31 = vand.u32 4294901760, %v5717_v19  ;;  %v5840_v19 = vld [vmem:[#allocation13_spill] sm:$0xff] }
  0xfe   :  { %870 = vmatprep.subr.mxu0 %v3644_v55  ;;  %1002 = vmatprep.subr.mxu1 %v5796_v37  ;;  %v5800_v37 = vand.u32 4294901760, %v2856_v18  ;;  %v5805_v18 = vand.u32 4294901760, %v2896_v35  ;;  %v5819_v35 = vand.u32 4294901760, %v5719_v50 }
 0x101   :  { %873 = vmatpush2.xpose.msra.mxu0 %v3655_v52  ;;  %1004 = vmatpush2.xpose.msra.mxu1 %v3570_v25  ;;  %v5801_v52 = vld [vmem:[#allocation54_spill] sm:$0xff] }
 0x102   :  { %1006 = vmatprep.subr.mxu1 %v5797_v51  ;;  %1029 = vmatprep.subr.mxu0 %v5798_v34  ;;  %v5802_v51 = vand.u32 4294901760, %v2865_v21  ;;  %v5806_v21 = vand.u32 4294901760, %v2914_v45  ;;  %v5844_v34 = vld [vmem:[#allocation31_spill] sm:$0xff] }
 0x104   :  { %879 = vmatmul.mubr.f32.vlgmr.msra.gmra.mxu0 %v3628_v1 }
 0x105   :  { %1008 = vmatpush2.xpose.msra.mxu1 %v3598_v57  ;;  %1033 = vmatpush1.xpose.msra.mxu0 %v5799_v33  ;;  %v5838_v33 = vld [vmem:[#allocation26_spill] sm:$0xff] }
 0x106   :  { %1010 = vmatprep.subr.mxu1 %v3608_v6  ;;  %1037 = vmatprep.subr.mxu0 %v5800_v37  ;;  %v5837_v37 = vld [vmem:[#allocation11_spill] sm:$0xff] }
 0x107   :  { %1283 = vmatprep.mubr.f32.mxu0 %v5801_v52 }
 0x109   :  { %1012 = vmatpush2.xpose.msra.mxu1 %v3624_v2  ;;  %1041 = vmatpush1.xpose.msra.mxu0 %v5802_v51 }
 0x10a   :  { %1045 = vmatprep.subr.mxu0 %v5803_v15  ;;  %1292 = vmatprep.subr.mxu1 %v2816_v3  ;;  %v5807_v3 = vand.u32 4294901760, %v2922_v49  ;;  %v5823_v49 = vld [vmem:[#allocation16_spill] sm:$0xff]  ;;  %v5845_v15 = vand.u32 4294901760, %v5844_v34 }
 0x10b   :  { %v5824_v54 = vand.u32 4294901760, %v5823_v49 }
 0x10c   :  { %1020 = vmatmul.mubr.f32.vlgmr.msra.gmra.mxu1 %v3647_v28 }
 0x10d   :  { %1049 = vmatpush1.xpose.msra.mxu0 %v5804_v16  ;;  %1294 = vmatpush1.xpose.msra.mxu1 %v2818_v4  ;;  %v5809_v4 = vand.u32 4294901760, %v2946_v59  ;;  %v5826_v59 = vld [vmem:[#allocation19_spill] sm:$0xff]  ;;  %v5846_v16 = vld [vmem:[#allocation17_spill] sm:$0xff] }
 0x10e   :  { %1053 = vmatprep.subr.mxu0 %v5805_v18  ;;  %1296 = vmatprep.subr.mxu1 %v2820_v5  ;;  %v5810_v5 = vand.u32 4294901760, %v2951_v61  ;;  %v5828_v61 = vld [vmem:[#allocation7_spill] sm:$0xff]  ;;  %v5847_v18 = vld [vmem:[#allocation32_spill] sm:$0xff] }
 0x10f   :  { %1420 = vmatprep.mubr.f32.mxu1 %v5801_v52 }
 0x111   :  { %1057 = vmatpush1.xpose.msra.mxu0 %v5806_v21  ;;  %1298 = vmatpush1.xpose.msra.mxu1 %v2831_v9  ;;  %v5811_v9 = vand.u32 4294901760, %v2972_v13  ;;  %v5848_v21 = vand.u32 4294901760, %v5847_v18 }
 0x112   :  { %1061 = vmatprep.subr.mxu0 %v5807_v3  ;;  %1300 = vmatprep.subr.mxu1 %v2833_v10  ;;  %v5812_v10 = vand.u32 4294901760, %v2987_v36  ;;  %v5831_v36 = vld [vmem:[#allocation8_spill] sm:$0xff]  ;;  %v5849_v3 = vld [vmem:[#allocation18_spill] sm:$0xff] }
 0x115   :  { %1065 = vmatpush1.xpose.msra.mxu0 %v5808_v22  ;;  %1302 = vmatpush1.xpose.msra.mxu1 %v2835_v11  ;;  %v5813_v11 = vand.u32 4294901760, %v2998_v43  ;;  %v5832_v43 = vld [vmem:[#allocation23_spill] sm:$0xff] }
 0x116   :  { %1069 = vmatprep.subr.mxu0 %v5809_v4  ;;  %1304 = vmatprep.subr.mxu1 %v2853_v17  ;;  %v5814_v17 = vand.u32 4294901760, %v3013_v58  ;;  %v5833_v58 = vand.u32 4294901760, %v5832_v43  ;;  %v5850_v22 = vld [vmem:[#allocation35_spill] sm:$0xff] }
 0x117   :  { %v5851_v4 = vand.u32 4294901760, %v5850_v22 }
 0x119   :  { %1073 = vmatpush1.xpose.msra.mxu0 %v5810_v5  ;;  %1306 = vmatpush1.xpose.msra.mxu1 %v2862_v20  ;;  %v5815_v20 = vand.u32 4294901760, %v3024_v27  ;;  %v5834_v27 = vld [vmem:[#allocation9_spill] sm:$0xff] }
 0x11a   :  { %1077 = vmatprep.subr.mxu0 %v5811_v9  ;;  %1308 = vmatprep.subr.mxu1 %v2874_v26  ;;  %v5816_v26 = vand.u32 4294901760, %v3039_v12  ;;  %v5835_v12 = vld [vmem:[#allocation24_spill] sm:$0xff]  ;;  %v5852_v5 = vld [vmem:[#allocation21_spill] sm:$0xff] }
 0x11b   :  { %v5836_v51 = vand.u32 4294901760, %v5835_v12  ;;  %v5853_v9 = vld [vmem:[#allocation36_spill] sm:$0xff] }
 0x11d   :  { %1081 = vmatpush1.xpose.msra.mxu0 %v5812_v10  ;;  %1310 = vmatpush1.xpose.msra.mxu1 %v2881_v30  ;;  %v5817_v30 = vand.u32 4294901760, %v3050_v0  ;;  %v5829_v0 = vld [vmem:[#allocation20_spill] sm:$0xff]  ;;  %v5854_v10 = vand.u32 4294901760, %v5853_v9 }
 0x11e   :  { %1085 = vmatprep.subr.mxu0 %v5813_v11  ;;  %1312 = vmatprep.subr.mxu1 %v2906_v39  ;;  %v5820_v39 = vld [vmem:[#allocation15_spill] sm:$0xff]  ;;  %v5830_v13 = vand.u32 4294901760, %v5829_v0  ;;  %v5855_v11 = vld [vmem:[#allocation22_spill] sm:$0xff] }
 0x11f   :  { %v5821_v45 = vand.u32 4294901760, %v5820_v39  ;;  %v5860_v39 = vld [vmem:[#allocation25_spill] sm:$0xff] }
 0x121   :  { %1089 = vmatpush1.xpose.msra.mxu0 %v5814_v17  ;;  %1314 = vmatpush1.xpose.msra.mxu1 %v2919_v48  ;;  %v5822_v48 = vld [vmem:[#allocation5_spill] sm:$0xff]  ;;  %v5856_v17 = vld [vmem:[#allocation90_spill] sm:$0xff] }
 0x122   :  { %1093 = vmatprep.subr.mxu0 %v5815_v20  ;;  %1316 = vmatprep.subr.mxu1 %v2939_v56  ;;  %v5825_v56 = vld [vmem:[#allocation6_spill] sm:$0xff]  ;;  %v2712_v20 = vmul.f32 %v5856_v17, %v5856_v17 }
 0x125   :  { %1097 = vmatpush1.xpose.msra.mxu0 %v5816_v26  ;;  %1318 = vmatpush1.xpose.msra.mxu1 %v2948_v60  ;;  %v5827_v60 = vand.u32 4294901760, %v5826_v59  ;;  %v5857_v26 = vld [vmem:[#allocation49_spill] sm:$0xff] }
 0x126   :  { %1101 = vmatprep.subr.mxu0 %v5817_v30  ;;  %1320 = vmatprep.subr.mxu1 %v5716_v38  ;;  %v5839_v38 = vand.u32 4294901760, %v5838_v33  ;;  %v2713_v30 = vmul.f32 %v5857_v26, %v5857_v26  ;;  %v5897_v26 = vld [vmem:[#allocation69_spill] sm:$0xff] }
 0x129   :  { %1105 = vmatpush1.xpose.msra.mxu0 %v5818_v31  ;;  %1322 = vmatpush1.xpose.msra.mxu1 %v5718_v44  ;;  %v5841_v44 = vld [vmem:[#allocation28_spill] sm:$0xff]  ;;  %v5858_v31 = vld [vmem:[#allocation39_spill] sm:$0xff] }
 0x12a   :  { %1109 = vmatprep.subr.mxu0 %v5819_v35  ;;  %1324 = vmatprep.subr.mxu1 %v5720_v24  ;;  %v5842_v50 = vand.u32 4294901760, %v5841_v44  ;;  %v5843_v24 = vld [vmem:[#allocation14_spill] sm:$0xff]  ;;  %v5859_v35 = vand.u32 4294901760, %v5858_v31  ;;  %v5899_v31 = vld [vmem:[#allocation51_spill] sm:$0xff] }
 0x12d   :  { %1113 = vmatpush1.xpose.msra.mxu0 %v5821_v45  ;;  %1326 = vmatpush1.xpose.msra.mxu1 %v5822_v48  ;;  %v2714_v45 = vadd.f32 %v2713_v30, %v2712_v20  ;;  %v5861_v48 = vld [vmem:[#allocation40_spill] sm:$0xff]  ;;  %v5896_v20 = vld [vmem:[#allocation50_spill] sm:$0xff]  ;;  %v5898_v30 = vand.u32 4294901760, %v5897_v26 }
 0x12e   :  { %1117 = vmatprep.subr.mxu0 %v5824_v54  ;;  %1328 = vmatprep.subr.mxu1 %v5825_v56  ;;  %v5862_v49 = vand.u32 4294901760, %v5861_v48  ;;  %v5863_v54 = vld [vmem:[#allocation27_spill] sm:$0xff]  ;;  %v5864_v56 = vld [vmem:[#allocation42_spill] sm:$0xff]  ;;  %v5903_v48 = vld [vmem:[#allocation73_spill] sm:$0xff] }
 0x12f   :  { %2715 = vadd.xlane.f32.xlu0 %v2714_v45  ;;  %v5865_v59 = vand.u32 4294901760, %v5864_v56  ;;  %v5902_v45 = vld [vmem:[#allocation55_spill] sm:$0xff]  ;;  %v5906_v56 = vld [vmem:[#allocation76_spill] sm:$0xff] }
 0x131   :  { %1121 = vmatpush1.xpose.msra.mxu0 %v5827_v60  ;;  %1330 = vmatpush1.xpose.msra.mxu1 %v5828_v61  ;;  %v5866_v60 = vld [vmem:[#allocation29_spill] sm:$0xff]  ;;  %v5867_v61 = vld [vmem:[#allocation44_spill] sm:$0xff] }
 0x132   :  { %1125 = vmatprep.subr.mxu0 %v5830_v13  ;;  %1332 = vmatprep.subr.mxu1 %v5831_v36  ;;  %v5868_v0 = vand.u32 4294901760, %v5867_v61  ;;  %v5869_v13 = vld [vmem:[#allocation30_spill] sm:$0xff]  ;;  %v5870_v36 = vld [vmem:[#allocation45_spill] sm:$0xff] }
 0x133   :  { %v5871_v43 = vand.u32 4294901760, %v5870_v36  ;;  %v5909_v61 = vld [vmem:[#allocation77_spill] sm:$0xff] }
 0x135   :  { %1129 = vmatpush1.xpose.msra.mxu0 %v5833_v58  ;;  %1334 = vmatpush1.xpose.msra.mxu1 %v5834_v27  ;;  %v5872_v58 = vld [vmem:[#allocation33_spill] sm:$0xff]  ;;  %v5873_v27 = vld [vmem:[#allocation48_spill] sm:$0xff] }
 0x136   :  { %1133 = vmatprep.subr.mxu0 %v5836_v51  ;;  %1336 = vmatprep.subr.mxu1 %v5837_v37  ;;  %v5874_v12 = vand.u32 4294901760, %v5873_v27  ;;  %v5875_v51 = vld [vmem:[#allocation34_spill] sm:$0xff]  ;;  %v5876_v37 = vld [vmem:[#allocation52_spill] sm:$0xff]  ;;  %v5915_v27 = vld [vmem:[#allocation83_spill] sm:$0xff] }
 0x137   :  { %v5877_v33 = vand.u32 4294901760, %v5876_v37 }
 0x139   :  { %1137 = vmatpush1.xpose.msra.mxu0 %v5839_v38  ;;  %1338 = vmatpush1.xpose.msra.mxu1 %v5840_v19  ;;  %v5878_v38 = vld [vmem:[#allocation37_spill] sm:$0xff] }
 0x13a   :  { %1141 = vmatprep.subr.mxu0 %v5842_v50  ;;  %1340 = vmatprep.subr.mxu1 %v5843_v24  ;;  %v5879_v19 = vld [vmem:[#allocation53_spill] sm:$0xff]  ;;  %v5881_v50 = vld [vmem:[#allocation38_spill] sm:$0xff] }
 0x13b   :  { %v5880_v44 = vand.u32 4294901760, %v5879_v19  ;;  %v5882_v24 = vld [vmem:[#allocation57_spill] sm:$0xff]  ;;  %v5925_v19 = vld [vmem:[#allocation79_spill] sm:$0xff] }
 0x13c   :  { %v5883_v34 = vand.u32 4294901760, %v5882_v24  ;;  %v5928_v24 = vand.u32 4294901760, %v3622_v32 }
 0x13d   :  { %1145 = vmatpush1.xpose.msra.mxu0 %v5845_v15  ;;  %1342 = vmatpush1.xpose.msra.mxu1 %v5846_v16  ;;  %v5884_v15 = vld [vmem:[#allocation41_spill] sm:$0xff]  ;;  %v5885_v16 = vld [vmem:[#allocation59_spill] sm:$0xff] }
 0x13e   :  { %1149 = vmatprep.subr.mxu0 %v5848_v21  ;;  %1344 = vmatprep.subr.mxu1 %v5849_v3  ;;  %v5886_v18 = vand.u32 4294901760, %v5885_v16  ;;  %v5887_v21 = vld [vmem:[#allocation43_spill] sm:$0xff] }
 0x13f   :  { %v5888_v3 = vld [vmem:[#allocation63_spill] sm:$0xff] }
 0x140   :  { %v5889_v22 = vand.u32 4294901760, %v5888_v3  ;;  %v106_v3 = vld [vmem:[%s5183_s1 + $0x2d0] sm:$0xff] }
 0x141   :  { %1153 = vmatpush1.xpose.msra.mxu0 %v5851_v4  ;;  %1346 = vmatpush1.xpose.msra.mxu1 %v5852_v5  ;;  %v5890_v4 = vld [vmem:[#allocation46_spill] sm:$0xff]  ;;  %v5891_v5 = vld [vmem:[#allocation64_spill] sm:$0xff] }
 0x142   :  { %1157 = vmatprep.subr.mxu0 %v5854_v10  ;;  %1348 = vmatprep.subr.mxu1 %v5855_v11  ;;  %v5892_v9 = vand.u32 4294901760, %v5891_v5  ;;  %v5893_v10 = vld [vmem:[#allocation47_spill] sm:$0xff] }
 0x143   :  { %v5894_v11 = vld [vmem:[#allocation67_spill] sm:$0xff] }
 0x144   :  { %v5895_v17 = vand.u32 4294901760, %v5894_v11  ;;  %v4048_v11 = vand.u32 4294901760, %v106_v3 }
 0x145   :  { %1161 = vmatpush2.xpose.msra.mxu0 %v5859_v35  ;;  %1350 = vmatpush1.xpose.msra.mxu1 %v5860_v39  ;;  %v5900_v35 = vld [vmem:[#allocation72_spill] sm:$0xff] }
 0x146   :  { %1165 = vmatprep.subr.mxu0 %v5862_v49  ;;  %1352 = vmatprep.subr.mxu1 %v5863_v54  ;;  %v5901_v39 = vand.u32 4294901760, %v5900_v35  ;;  %v5904_v49 = vand.u32 4294901760, %v5903_v48  ;;  %v5905_v54 = vld [vmem:[#allocation56_spill] sm:$0xff]  ;;  %v5936_v48 = vld [vmem:[#allocation91_spill] sm:$0xff] }
 0x149   :  { %1169 = vmatpush2.xpose.msra.mxu0 %v5865_v59  ;;  %1354 = vmatpush1.xpose.msra.mxu1 %v5866_v60  ;;  %v5907_v59 = vand.u32 4294901760, %v5906_v56  ;;  %v5908_v60 = vld [vmem:[#allocation61_spill] sm:$0xff] }
 0x14a   :  { %1173 = vmatprep.subr.mxu0 %v5868_v0  ;;  %1356 = vmatprep.subr.mxu1 %v5869_v13  ;;  %v5910_v0 = vand.u32 4294901760, %v5909_v61  ;;  %v5911_v13 = vld [vmem:[#allocation80_spill] sm:$0xff] }
 0x14b   :  { %v5912_v36 = vand.u32 4294901760, %v5911_v13  ;;  %v102_v13 = vld [vmem:[%s5183_s1 + $0x2b0] sm:$0xff] }
 0x14d   :  { %1177 = vmatpush2.xpose.msra.mxu0 %v5871_v43  ;;  %1358 = vmatpush2.xpose.msra.mxu1 %v5872_v58  ;;  %v5913_v43 = vld [vmem:[#allocation81_spill] sm:$0xff] }
 0x14e   :  { %1181 = vmatprep.subr.mxu0 %v5874_v12  ;;  %1360 = vmatprep.subr.mxu1 %v5875_v51  ;;  %v5914_v58 = vand.u32 4294901760, %v5913_v43  ;;  %v5916_v12 = vand.u32 4294901760, %v5915_v27  ;;  %v5917_v51 = vld [vmem:[#allocation85_spill] sm:$0xff] }
 0x14f   :  { %v5918_v37 = vand.u32 4294901760, %v5917_v51  ;;  %v5937_v43 = vld [vmem:[#allocation65_spill] sm:$0xff] }
 0x151   :  { %1185 = vmatpush2.xpose.msra.mxu0 %v5877_v33  ;;  %1362 = vmatpush2.xpose.msra.mxu1 %v5878_v38 }
 0x152   :  { %1189 = vmatprep.subr.mxu0 %v5880_v44  ;;  %1364 = vmatprep.subr.mxu1 %v5881_v50  ;;  %v5926_v44 = vand.u32 4294901760, %v3614_v29  ;;  %v5927_v50 = vld [vmem:[#allocation82_spill] sm:$0xff]  ;;  %v107_v29 = vld [vmem:[%s5183_s1 + $0x2d8] sm:$0xff] }
 0x155   :  { %1193 = vmatpush2.xpose.msra.mxu0 %v5883_v34  ;;  %1366 = vmatpush2.xpose.msra.mxu1 %v5884_v15 }
 0x156   :  { %1197 = vmatprep.subr.mxu0 %v5886_v18  ;;  %1368 = vmatprep.subr.mxu1 %v5887_v21  ;;  %v5929_v18 = vld [vmem:[#allocation93_spill] sm:$0xff] }
 0x157   :  { %v5930_v21 = vand.u32 4294901760, %v5929_v18 }
 0x159   :  { %1201 = vmatpush2.xpose.msra.mxu0 %v5889_v22  ;;  %1370 = vmatpush2.xpose.msra.mxu1 %v5890_v4  ;;  %v5931_v22 = vand.u32 4294901760, %v3644_v55  ;;  %v5932_v4 = vld [vmem:[#allocation86_spill] sm:$0xff] }
 0x15a   :  { %1205 = vmatprep.subr.mxu0 %v5892_v9  ;;  %1372 = vmatprep.subr.mxu1 %v5893_v10 }
 0x15d   :  { %1209 = vmatpush2.xpose.msra.mxu0 %v5895_v17  ;;  %1374 = vmatpush2.xpose.msra.mxu1 %v5896_v20  ;;  %v5933_v17 = vld [vmem:[#allocation95_spill] sm:$0xff] }
 0x15e   :  { %1213 = vmatprep.subr.mxu0 %v5898_v30  ;;  %1376 = vmatprep.subr.mxu1 %v5899_v31  ;;  %v5934_v20 = vand.u32 4294901760, %v5933_v17  ;;  %v5935_v30 = vld [vmem:[#allocation88_spill] sm:$0xff] }
 0x161   :  { %1217 = vmatpush2.xpose.msra.mxu0 %v5901_v39  ;;  %1378 = vmatpush2.xpose.msra.mxu1 %v5902_v45  ;;  %v103_v45 = vld [vmem:[%s5183_s1 + $0x2b8] sm:$0xff] }
 0x162   :  { %1221 = vmatprep.subr.mxu0 %v5904_v49  ;;  %1380 = vmatprep.subr.mxu1 %v5905_v54  ;;  %v4073_v49 = vsub.f32 %v106_v3, %v4048_v11 }
 0x164   :  { %v5399_v27 = vand.u32 4294901760, %v4073_v49 }
 0x165   :  { %1225 = vmatpush2.xpose.msra.mxu0 %v5907_v59  ;;  %1382 = vmatpush2.xpose.msra.mxu1 %v5908_v60 }
 0x166   :  { %1229 = vmatprep.subr.mxu0 %v5910_v0  ;;  %1384 = vmatprep.subr.mxu1 %v5780_v63  ;;  %v5919_v63 = vld [vmem:[#allocation87_spill] sm:$0xff] }
 0x167   :  { %v5920_v33 = vand.u32 4294901760, %v5919_v63  ;;  %v4113_v63 = vand.u32 4294901760, %v102_v13 }
 0x169   :  { %1233 = vmatpush2.xpose.msra.mxu0 %v5912_v36  ;;  %1386 = vmatpush2.xpose.msra.mxu1 %v5782_v46  ;;  %v5921_v46 = vand.u32 4294901760, %v3565_v7  ;;  %v110_v7 = vld [vmem:[%s5183_s1 + $0x2f0] sm:$0xff] }
 0x16a   :  { %1237 = vmatprep.subr.mxu0 %v5914_v58  ;;  %1388 = vmatprep.subr.mxu1 %v5784_v47  ;;  %v111_v47 = vld [vmem:[%s5183_s1 + $0x2f8] sm:$0xff] }
 0x16d   :  { %1241 = vmatpush2.xpose.msra.mxu0 %v5916_v12  ;;  %1390 = vmatpush2.xpose.msra.mxu1 %v5786_v40  ;;  %v5922_v40 = vld [vmem:[#allocation89_spill] sm:$0xff] }
 0x16e   :  { %1245 = vmatprep.subr.mxu0 %v5918_v37  ;;  %1392 = vmatprep.subr.mxu1 %v5788_v53  ;;  %v5923_v38 = vand.u32 4294901760, %v5922_v40  ;;  %v5924_v53 = vand.u32 4294901760, %v3596_v23  ;;  %v108_v23 = vld [vmem:[%s5183_s1 + $0x2e0] sm:$0xff] }
 0x16f   :  { %v4022_v16 = vand.u32 4294901760, %v108_v23 }
 0x171   :  { %1249 = vmatpush2.xpose.msra.mxu0 %v5920_v33  ;;  %1394 = vmatpush2.xpose.msra.mxu1 %v5790_v42  ;;  %v3995_v42 = vand.u32 4294901760, %v111_v47  ;;  %v4046_v10 = vsub.f32 %v108_v23, %v4022_v16  ;;  %v98_v23 = vld [vmem:[%s5183_s1 + $0x290] sm:$0xff] }
 0x172   :  { %1253 = vmatprep.subr.mxu0 %v5921_v46  ;;  %1396 = vmatprep.subr.mxu1 %v5791_v41  ;;  %v109_v41 = vld [vmem:[%s5183_s1 + $0x2e8] sm:$0xff] }
 0x173   :  { %v4014_v34 = vand.u32 4294901760, %v109_v41  ;;  %v4020_v15 = vsub.f32 %v111_v47, %v3995_v42  ;;  %v5401_v54 = vand.u32 4294901760, %v4046_v10  ;;  %v100_v47 = vld [vmem:[%s5183_s1 + $0x2a0] sm:$0xff] }
 0x175   :  { %1257 = vmatpush2.xpose.msra.mxu0 %v5923_v38  ;;  %1398 = vmatpush2.xpose.msra.mxu1 %v5792_v14  ;;  %v4006_v14 = vand.u32 4294901760, %v110_v7  ;;  %v5406_v5 = vand.u32 4294901760, %v4020_v15  ;;  %v4040_v9 = vsub.f32 %v109_v41, %v4014_v34  ;;  %v1594_v58 = vsub.f32 %v4046_v10, %v5401_v54  ;;  %v99_v38 = vld [vmem:[%s5183_s1 + $0x298] sm:$0xff]  ;;  %v88_v54 = vld [vmem:[%s5183_s1 + $0x240] sm:$0xff] }
 0x176   :  { %1261 = vmatprep.subr.mxu0 %v5924_v53  ;;  %1400 = vmatprep.subr.mxu1 %v5925_v19  ;;  %v1606_v19 = vsub.f32 %v4073_v49, %v5399_v27  ;;  %v4134_v41 = vsub.f32 %v102_v13, %v4113_v63 }
 0x177   :  { %v4028_v32 = vsub.f32 %v110_v7, %v4006_v14  ;;  %v1576_v31 = vsub.f32 %v4020_v15, %v5406_v5  ;;  %v5403_v39 = vand.u32 4294901760, %v4040_v9  ;;  %v1595_v53 = vand.u32 4294901760, %v1594_v58  ;;  %v85_v5 = vld [vmem:[%s5183_s1 + $0x228] sm:$0xff] }
 0x179   :  { %1265 = vmatpush2.xpose.msra.mxu0 %v5926_v44  ;;  %1402 = vmatpush2.xpose.msra.mxu1 %v5927_v50  ;;  %v5404_v55 = vand.u32 4294901760, %v4028_v32  ;;  %v1577_v61 = vand.u32 4294901760, %v1576_v31  ;;  %v1588_v0 = vsub.f32 %v4040_v9, %v5403_v39  ;;  %v4136_v44 = vand.u32 4294901760, %v100_v47  ;;  %v96_v31 = vld [vmem:[%s5183_s1 + $0x280] sm:$0xff] }
 0x17a   :  { %1269 = vmatprep.subr.mxu0 %v5928_v24  ;;  %1404 = vmatprep.subr.mxu1 %v5795_v8  ;;  %v4030_v8 = vand.u32 4294901760, %v107_v29 }
 0x17b   :  { %v1582_v56 = vsub.f32 %v4028_v32, %v5404_v55  ;;  %v1589_v33 = vand.u32 4294901760, %v1588_v0  ;;  %v95_v0 = vld [vmem:[%s5183_s1 + $0x278] sm:$0xff]  ;;  %v4286_v55 = vand.u32 4294901760, %v88_v54 }
 0x17c   :  { %v4055_v26 = vsub.f32 %v107_v29, %v4030_v8  ;;  %v4146_v29 = vand.u32 4294901760, %v99_v38 }
 0x17d   :  { %1273 = vmatpush2.xpose.msra.mxu0 %v5930_v21  ;;  %1406 = vmatpush2.xpose.msra.mxu1 %v3541_v62  ;;  %v105_v62 = vld [vmem:[%s5183_s1 + $0x2c8] sm:$0xff]  ;;  %v1583_v12 = vand.u32 4294901760, %v1582_v56  ;;  %5946 = vst [vmem:[#allocation70_spill] sm:$0xff] %v4286_v55 }
 0x17e   :  { %1277 = vmatprep.subr.mxu0 %v5931_v22  ;;  %1408 = vmatprep.subr.mxu1 %v5932_v4  ;;  %v4062_v35 = vand.u32 4294901760, %v105_v62  ;;  %v5400_v60 = vand.u32 4294901760, %v4055_v26  ;;  %v97_v21 = vld [vmem:[%s5183_s1 + $0x288] sm:$0xff]  ;;  %v1607_v22 = vand.u32 4294901760, %v1606_v19  ;;  %v4156_v4 = vand.u32 4294901760, %v98_v23  ;;  %v94_v19 = vld [vmem:[%s5183_s1 + $0x270] sm:$0xff] }
 0x180   :  { %v4095_v36 = vsub.f32 %v105_v62, %v4062_v35  ;;  %v1600_v37 = vsub.f32 %v4055_v26, %v5400_v60  ;;  %v4160_v62 = vsub.f32 %v100_v47, %v4136_v44  ;;  %v4183_v13 = vsub.f32 %v98_v23, %v4156_v4 }
 0x181   :  { %1281 = vmatpush2.xpose.msra.mxu0 %v5934_v20  ;;  %1410 = vmatpush2.xpose.msra.mxu1 %v3570_v25  ;;  %v104_v25 = vld [vmem:[%s5183_s1 + $0x2c0] sm:$0xff]  ;;  %v5393_v20 = vand.u32 4294901760, %v4134_v41 }
 0x182   :  { %1412 = vmatprep.subr.mxu1 %v5935_v30  ;;  %1429 = vmatprep.subr.mxu0 %v3995_v42  ;;  %v4081_v59 = vand.u32 4294901760, %v104_v25  ;;  %v1601_v7 = vand.u32 4294901760, %v1600_v37  ;;  %v4166_v30 = vand.u32 4294901760, %v97_v21 }
 0x183   :  { %v1630_v58 = vsub.f32 %v4134_v41, %v5393_v20 }
 0x184   :  { %1285 = vmatmul.mubr.f32.vlgmr.msra.gmra.mxu0 %v5936_v48  ;;  %v4108_v51 = vsub.f32 %v104_v25, %v4081_v59  ;;  %v4193_v37 = vsub.f32 %v97_v21, %v4166_v30 }
 0x185   :  { %1414 = vmatpush2.xpose.msra.mxu1 %v3598_v57  ;;  %1431 = vmatpush1.xpose.msra.mxu0 %v4006_v14  ;;  %v4089_v57 = vand.u32 4294901760, %v103_v45  ;;  %v1631_v21 = vand.u32 4294901760, %v1630_v58 }
 0x186   :  { %1416 = vmatprep.subr.mxu1 %v3608_v6  ;;  %1433 = vmatprep.subr.mxu0 %v4014_v34  ;;  %v101_v6 = vld [vmem:[%s5183_s1 + $0x2a8] sm:$0xff]  ;;  %v5395_v50 = vand.u32 4294901760, %v4108_v51 }
 0x187   :  { %1561 = vmatprep.mubr.f32.mxu0 %v5937_v43  ;;  %v4116_v46 = vand.u32 4294901760, %v101_v6  ;;  %v4123_v40 = vsub.f32 %v103_v45, %v4089_v57 }
 0x188   :  { %v1618_v17 = vsub.f32 %v4108_v51, %v5395_v50 }
 0x189   :  { %1418 = vmatpush2.xpose.msra.mxu1 %v3624_v2  ;;  %1435 = vmatpush1.xpose.msra.mxu0 %v4022_v16  ;;  %v5397_v2 = vand.u32 4294901760, %v4095_v36  ;;  %v5394_v18 = vand.u32 4294901760, %v4123_v40  ;;  %v4153_v3 = vsub.f32 %v101_v6, %v4116_v46  ;;  %v4185_v6 = vand.u32 4294901760, %v96_v31 }
 0x18a   :  { %1437 = vmatprep.subr.mxu0 %v4030_v8  ;;  %1578 = vmatprep.subr.mxu1 %v1577_v61  ;;  %v4177_v61 = vsub.f32 %v99_v38, %v4146_v29  ;;  %v1619_v43 = vand.u32 4294901760, %v1618_v17  ;;  %v4199_v38 = vand.u32 4294901760, %v95_v0  ;;  %v4216_v17 = vand.u32 4294901760, %v94_v19 }
 0x18b   :  { %v1612_v24 = vsub.f32 %v4095_v36, %v5397_v2  ;;  %v1624_v45 = vsub.f32 %v4123_v40, %v5394_v18  ;;  %v5390_v56 = vand.u32 4294901760, %v4153_v3  ;;  %v4209_v23 = vsub.f32 %v96_v31, %v4185_v6 }
 0x18c   :  { %1422 = vmatmul.mubr.f32.vlgmr.msra.gmra.mxu1 %v5936_v48  ;;  %5938 = vst [vmem:[#allocation2_spill] sm:$0xff] %v4199_v38  ;;  %5939 = vst [vmem:[#allocation10_spill] sm:$0xff] %v4216_v17  ;;  %v4229_v58 = vsub.f32 %v95_v0, %v4199_v38  ;;  %v4240_v20 = vsub.f32 %v94_v19, %v4216_v17 }
 0x18d   :  { %1439 = vmatpush1.xpose.msra.mxu0 %v4048_v11  ;;  %1584 = vmatpush1.xpose.msra.mxu1 %v1583_v12  ;;  %v1613_v25 = vand.u32 4294901760, %v1612_v24  ;;  %v5391_v12 = vand.u32 4294901760, %v4160_v62  ;;  %v1636_v47 = vsub.f32 %v4153_v3, %v5390_v56  ;;  %v5396_v24 = vand.u32 4294901760, %v4183_v13 }
 0x18e   :  { %1441 = vmatprep.subr.mxu0 %v4062_v35  ;;  %1590 = vmatprep.subr.mxu1 %v1589_v33  ;;  %v1625_v33 = vand.u32 4294901760, %v1624_v45  ;;  %v5405_v2 = vand.u32 4294901760, %v4229_v58 }
 0x18f   :  { %1958 = vmatprep.mubr.f32.mxu1 %v5801_v52  ;;  %v1637_v45 = vand.u32 4294901760, %v1636_v47  ;;  %v5402_v47 = vand.u32 4294901760, %v4209_v23  ;;  %v4313_v52 = vsub.f32 %v88_v54, %v4286_v55 }
 0x191   :  { %1443 = vmatpush1.xpose.msra.mxu0 %v4081_v59  ;;  %1596 = vmatpush1.xpose.msra.mxu1 %v1595_v53  ;;  %v5392_v53 = vand.u32 4294901760, %v4177_v61  ;;  %5951 = vst [vmem:[#allocation78_spill] sm:$0xff] %v4313_v52 }
 0x192   :  { %1445 = vmatprep.subr.mxu0 %v4089_v57  ;;  %1602 = vmatprep.subr.mxu1 %v1601_v7  ;;  %v93_v7 = vld [vmem:[%s5183_s1 + $0x268] sm:$0xff] }
 0x193   :  { %v1648_v31 = vsub.f32 %v4177_v61, %v5392_v53  ;;  %v4223_v56 = vand.u32 4294901760, %v93_v7 }
 0x195   :  { %1447 = vmatpush1.xpose.msra.mxu0 %v4113_v63  ;;  %1608 = vmatpush1.xpose.msra.mxu1 %v1607_v22  ;;  %v1642_v22 = vsub.f32 %v4160_v62, %v5391_v12  ;;  %5940 = vst [vmem:[#allocation3_spill] sm:$0xff] %v4223_v56  ;;  %v91_v12 = vld [vmem:[%s5183_s1 + $0x258] sm:$0xff]  ;;  %v1649_v50 = vand.u32 4294901760, %v1648_v31  ;;  %v4255_v19 = vsub.f32 %v93_v7, %v4223_v56  ;;  %v5408_v7 = vand.u32 4294901760, %v4240_v20 }
 0x196   :  { %1449 = vmatprep.subr.mxu0 %v4116_v46  ;;  %1614 = vmatprep.subr.mxu1 %v1613_v25  ;;  %v5398_v25 = vand.u32 4294901760, %v4193_v37 }
 0x197   :  { %v1643_v53 = vand.u32 4294901760, %v1642_v22  ;;  %v89_v22 = vld [vmem:[%s5183_s1 + $0x248] sm:$0xff] }
 0x198   :  { %v1660_v0 = vsub.f32 %v4193_v37, %v5398_v25 }
 0x199   :  { %1451 = vmatpush1.xpose.msra.mxu0 %v4136_v44  ;;  %1620 = vmatpush1.xpose.msra.mxu1 %v1619_v43  ;;  %v92_v43 = vld [vmem:[%s5183_s1 + $0x260] sm:$0xff] }
 0x19a   :  { %1453 = vmatprep.subr.mxu0 %v4146_v29  ;;  %1626 = vmatprep.subr.mxu1 %v1625_v33  ;;  %v1654_v33 = vsub.f32 %v4183_v13, %v5396_v24  ;;  %v4245_v18 = vand.u32 4294901760, %v92_v43  ;;  %v4248_v24 = vand.u32 4294901760, %v91_v12  ;;  %v1661_v31 = vand.u32 4294901760, %v1660_v0  ;;  %v87_v0 = vld [vmem:[%s5183_s1 + $0x238] sm:$0xff] }
 0x19c   :  { %5941 = vst [vmem:[#allocation12_spill] sm:$0xff] %v4245_v18  ;;  %5942 = vst [vmem:[#allocation4_spill] sm:$0xff] %v4248_v24  ;;  %v1655_v25 = vand.u32 4294901760, %v1654_v33  ;;  %v4265_v27 = vsub.f32 %v92_v43, %v4245_v18  ;;  %v1672_v33 = vsub.f32 %v4229_v58, %v5405_v2  ;;  %v1678_v2 = vsub.f32 %v4240_v20, %v5408_v7 }
 0x19d   :  { %1455 = vmatpush1.xpose.msra.mxu0 %v4156_v4  ;;  %1632 = vmatpush1.xpose.msra.mxu1 %v1631_v21  ;;  %v90_v21 = vld [vmem:[%s5183_s1 + $0x250] sm:$0xff]  ;;  %v4296_v43 = vand.u32 4294901760, %v87_v0 }
 0x19e   :  { %1457 = vmatprep.subr.mxu0 %v4166_v30  ;;  %1638 = vmatprep.subr.mxu1 %v1637_v45  ;;  %v1666_v45 = vsub.f32 %v4209_v23, %v5402_v47  ;;  %v4267_v60 = vand.u32 4294901760, %v90_v21  ;;  %v4284_v47 = vsub.f32 %v91_v12, %v4248_v24  ;;  %v86_v12 = vld [vmem:[%s5183_s1 + $0x230] sm:$0xff] }
 0x19f   :  { %5948 = vst [vmem:[#allocation74_spill] sm:$0xff] %v4296_v43  ;;  %v4315_v1 = vand.u32 4294901760, %v86_v12  ;;  %v4323_v28 = vsub.f32 %v87_v0, %v4296_v43  ;;  %v83_v0 = vld [vmem:[%s5183_s1 + $0x218] sm:$0xff] }
 0x1a0   :  { %5943 = vst [vmem:[#allocation62_spill] sm:$0xff] %v4267_v60  ;;  %5945 = vst [vmem:[#allocation68_spill] sm:$0xff] %v4284_v47  ;;  %v1667_v39 = vand.u32 4294901760, %v1666_v45  ;;  %v1673_v45 = vand.u32 4294901760, %v1672_v33  ;;  %v5953_v33 = vand.u32 4294901760, %v4265_v27 }
 0x1a1   :  { %1459 = vmatpush1.xpose.msra.mxu0 %v4185_v6  ;;  %1644 = vmatpush1.xpose.msra.mxu1 %v1643_v53  ;;  %v4277_v53 = vand.u32 4294901760, %v89_v22  ;;  %5952 = vst [vmem:[#allocation84_spill] sm:$0xff] %v4315_v1  ;;  %5954 = vst [vmem:[#allocation15_spill] sm:$0xff] %v4323_v28 }
 0x1a2   :  { %1461 = vmatprep.subr.mxu0 %v4199_v38  ;;  %1650 = vmatprep.subr.mxu1 %v1649_v50  ;;  %v4290_v50 = vsub.f32 %v90_v21, %v4267_v60 }
 0x1a3   :  { %5944 = vst [vmem:[#allocation66_spill] sm:$0xff] %v4277_v53  ;;  %v4307_v7 = vsub.f32 %v89_v22, %v4277_v53 }
 0x1a4   :  { %5947 = vst [vmem:[#allocation71_spill] sm:$0xff] %v4290_v50  ;;  %v5423_v22 = vand.u32 4294901760, %v4290_v50 }
 0x1a5   :  { %1463 = vmatpush1.xpose.msra.mxu0 %v4216_v17  ;;  %1656 = vmatpush1.xpose.msra.mxu1 %v1655_v25  ;;  %v5949_v25 = vand.u32 4294901760, %v4255_v19  ;;  %5950 = vst [vmem:[#allocation75_spill] sm:$0xff] %v4307_v7 }
 0x1a6   :  { %1465 = vmatprep.subr.mxu0 %v4223_v56  ;;  %1662 = vmatprep.subr.mxu1 %v1661_v31  ;;  %v1679_v31 = vand.u32 4294901760, %v1678_v2  ;;  %v5955_v56 = vand.u32 4294901760, %v4284_v47  ;;  %v84_v2 = vld [vmem:[%s5183_s1 + $0x220] sm:$0xff] }
 0x1a7   :  { %v1684_v21 = vsub.f32 %v4255_v19, %v5949_v25  ;;  %v1690_v25 = vsub.f32 %v4265_v27, %v5953_v33  ;;  %v4339_v33 = vsub.f32 %v86_v12, %v4315_v1  ;;  %v5959_v12 = vand.u32 4294901760, %v4307_v7 }
 0x1a8   :  { %v1696_v17 = vsub.f32 %v4284_v47, %v5955_v56  ;;  %v4353_v47 = vand.u32 4294901760, %v83_v0 }
 0x1a9   :  { %1467 = vmatpush1.xpose.msra.mxu0 %v4245_v18  ;;  %1668 = vmatpush1.xpose.msra.mxu1 %v1667_v39  ;;  %v1685_v54 = vand.u32 4294901760, %v1684_v21  ;;  %v4329_v18 = vand.u32 4294901760, %v85_v5  ;;  %5957 = vst [vmem:[#allocation16_spill] sm:$0xff] %v4339_v33  ;;  %v1691_v56 = vand.u32 4294901760, %v1690_v25  ;;  %v1702_v21 = vsub.f32 %v4290_v50, %v5423_v22  ;;  %v81_v22 = vld [vmem:[%s5183_s1 + $0x208] sm:$0xff] }
 0x1aa   :  { %1469 = vmatprep.subr.mxu0 %v4248_v24  ;;  %1674 = vmatprep.subr.mxu1 %v1673_v45  ;;  %v4346_v39 = vand.u32 4294901760, %v84_v2  ;;  %v1697_v38 = vand.u32 4294901760, %v1696_v17  ;;  %v1708_v45 = vsub.f32 %v4307_v7, %v5959_v12  ;;  %5960 = vst [vmem:[#allocation19_spill] sm:$0xff] %v4353_v47 }
 0x1ab   :  { %5956 = vst [vmem:[#allocation5_spill] sm:$0xff] %v4329_v18  ;;  %v4359_v25 = vsub.f32 %v85_v5, %v4329_v18  ;;  %v1703_v12 = vand.u32 4294901760, %v1702_v21  ;;  %v5964_v5 = vand.u32 4294901760, %v4323_v28  ;;  %v143_v21 = vld [vmem:[%s5183_s1 + $0x3f8] sm:$0xff] }
 0x1ac   :  { %5958 = vst [vmem:[#allocation6_spill] sm:$0xff] %v4346_v39  ;;  %v1709_v50 = vand.u32 4294901760, %v1708_v45 }
 0x1ad   :  { %1471 = vmatpush1.xpose.msra.mxu0 %v4267_v60  ;;  %1680 = vmatpush1.xpose.msra.mxu1 %v1679_v31  ;;  %v82_v31 = vld [vmem:[%s5183_s1 + $0x210] sm:$0xff]  ;;  %5961 = vst [vmem:[#allocation7_spill] sm:$0xff] %v4359_v25  ;;  %v1720_v60 = vsub.f32 %v4323_v28, %v5964_v5 }
 0x1ae   :  { %1473 = vmatprep.subr.mxu0 %v4277_v53  ;;  %1686 = vmatprep.subr.mxu1 %v1685_v54  ;;  %v5962_v54 = vand.u32 4294901760, %v4313_v52  ;;  %v4370_v53 = vsub.f32 %v84_v2, %v4346_v39  ;;  %v4375_v7 = vand.u32 4294901760, %v82_v31  ;;  %v4385_v2 = vsub.f32 %v83_v0, %v4353_v47  ;;  %v142_v28 = vld [vmem:[%s5183_s1 + $0x3f0] sm:$0xff] }
 0x1af   :  { %v1721_v45 = vand.u32 4294901760, %v1720_v60 }
 0x1b0   :  { %v1714_v17 = vsub.f32 %v4313_v52, %v5962_v54  ;;  %5963 = vst [vmem:[#allocation20_spill] sm:$0xff] %v4370_v53  ;;  %5965 = vst [vmem:[#allocation8_spill] sm:$0xff] %v4375_v7  ;;  %v4378_v54 = vand.u32 4294901760, %v81_v22  ;;  %v4395_v24 = vsub.f32 %v82_v31, %v4375_v7  ;;  %v141_v31 = vld [vmem:[%s5183_s1 + $0x3e8] sm:$0xff] }
 0x1b1   :  { %1475 = vmatpush1.xpose.msra.mxu0 %v4286_v55  ;;  %1692 = vmatpush1.xpose.msra.mxu1 %v1691_v56  ;;  %v80_v56 = vld [vmem:[%s5183_s1 + $0x200] sm:$0xff]  ;;  %5967 = vst [vmem:[#allocation9_spill] sm:$0xff] %v4385_v2 }
 0x1b2   :  { %1477 = vmatprep.subr.mxu0 %v4296_v43  ;;  %1698 = vmatprep.subr.mxu1 %v1697_v38  ;;  %5966 = vst [vmem:[#allocation23_spill] sm:$0xff] %v4378_v54  ;;  %v1715_v5 = vand.u32 4294901760, %v1714_v17  ;;  %v5968_v43 = vand.u32 4294901760, %v4339_v33  ;;  %5969 = vst [vmem:[#allocation24_spill] sm:$0xff] %v4395_v24  ;;  %v4397_v55 = vand.u32 4294901760, %v80_v56  ;;  %v4414_v0 = vsub.f32 %v81_v22, %v4378_v54  ;;  %v140_v22 = vld [vmem:[%s5183_s1 + $0x3e0] sm:$0xff] }
 0x1b3   :  { %v4445_v52 = vand.u32 4294901760, %v140_v22 }
 0x1b4   :  { %v1726_v38 = vsub.f32 %v4339_v33, %v5968_v43  ;;  %5970 = vst [vmem:[#allocation11_spill] sm:$0xff] %v4397_v55  ;;  %v5971_v43 = vand.u32 4294901760, %v4359_v25  ;;  %5973 = vst [vmem:[#allocation13_spill] sm:$0xff] %v4414_v0  ;;  %v4416_v33 = vand.u32 4294901760, %v142_v28 }
 0x1b5   :  { %1479 = vmatpush1.xpose.msra.mxu0 %v4315_v1  ;;  %1704 = vmatpush1.xpose.msra.mxu1 %v1703_v12  ;;  %v4407_v12 = vand.u32 4294901760, %v143_v21  ;;  %5981 = vst [vmem:[#allocation18_spill] sm:$0xff] %v4445_v52 }
 0x1b6   :  { %1481 = vmatprep.subr.mxu0 %v4329_v18  ;;  %1710 = vmatprep.subr.mxu1 %v1709_v50  ;;  %v1732_v17 = vsub.f32 %v4359_v25, %v5971_v43  ;;  %v1727_v1 = vand.u32 4294901760, %v1726_v38  ;;  %5974 = vst [vmem:[#allocation28_spill] sm:$0xff] %v4416_v33  ;;  %v4420_v50 = vsub.f32 %v80_v56, %v4397_v55  ;;  %v5976_v43 = vand.u32 4294901760, %v4370_v53  ;;  %v139_v18 = vld [vmem:[%s5183_s1 + $0x3d8] sm:$0xff] }
 0x1b7   :  { %5972 = vst [vmem:[#allocation26_spill] sm:$0xff] %v4407_v12  ;;  %v4426_v25 = vand.u32 4294901760, %v141_v31 }
 0x1b8   :  { %5975 = vst [vmem:[#allocation14_spill] sm:$0xff] %v4420_v50  ;;  %v1738_v60 = vsub.f32 %v4370_v53, %v5976_v43  ;;  %v1733_v38 = vand.u32 4294901760, %v1732_v17  ;;  %v4437_v43 = vsub.f32 %v143_v21, %v4407_v12  ;;  %v4443_v53 = vsub.f32 %v142_v28, %v4416_v33 }
 0x1b9   :  { %1483 = vmatpush1.xpose.msra.mxu0 %v4346_v39  ;;  %1716 = vmatpush1.xpose.msra.mxu1 %v1715_v5  ;;  %5977 = vst [vmem:[#allocation31_spill] sm:$0xff] %v4426_v25  ;;  %v5978_v5 = vand.u32 4294901760, %v4385_v2  ;;  %v5982_v17 = vand.u32 4294901760, %v4395_v24  ;;  %v5464_v21 = vand.u32 4294901760, %v4420_v50  ;;  %v4453_v39 = vsub.f32 %v141_v31, %v4426_v25  ;;  %v137_v31 = vld [vmem:[%s5183_s1 + $0x3c8] sm:$0xff] }
 0x1ba   :  { %1485 = vmatprep.subr.mxu0 %v4353_v47  ;;  %1722 = vmatprep.subr.mxu1 %v1721_v45  ;;  %5979 = vst [vmem:[#allocation17_spill] sm:$0xff] %v4437_v43  ;;  %5980 = vst [vmem:[#allocation32_spill] sm:$0xff] %v4443_v53  ;;  %v1739_v45 = vand.u32 4294901760, %v1738_v60  ;;  %v5984_v47 = vand.u32 4294901760, %v4414_v0  ;;  %v138_v60 = vld [vmem:[%s5183_s1 + $0x3d0] sm:$0xff] }
 0x1bb   :  { %v1744_v56 = vsub.f32 %v4385_v2, %v5978_v5  ;;  %v1750_v5 = vsub.f32 %v4395_v24, %v5982_v17  ;;  %5983 = vst [vmem:[#allocation35_spill] sm:$0xff] %v4453_v39  ;;  %v4469_v17 = vsub.f32 %v140_v22, %v4445_v52  ;;  %v5988_v22 = vand.u32 4294901760, %v4437_v43 }
 0x1bc   :  { %v1756_v2 = vsub.f32 %v4414_v0, %v5984_v47  ;;  %v4483_v24 = vand.u32 4294901760, %v137_v31 }
 0x1bd   :  { %1487 = vmatpush1.xpose.msra.mxu0 %v4375_v7  ;;  %1728 = vmatpush1.xpose.msra.mxu1 %v1727_v1  ;;  %v1745_v28 = vand.u32 4294901760, %v1744_v56  ;;  %v4459_v7 = vand.u32 4294901760, %v139_v18  ;;  %5986 = vst [vmem:[#allocation36_spill] sm:$0xff] %v4469_v17  ;;  %v1751_v47 = vand.u32 4294901760, %v1750_v5  ;;  %v1762_v56 = vsub.f32 %v4420_v50, %v5464_v21  ;;  %v135_v21 = vld [vmem:[%s5183_s1 + $0x3b8] sm:$0xff] }
 0x1be   :  { %1489 = vmatprep.subr.mxu0 %v4378_v54  ;;  %1734 = vmatprep.subr.mxu1 %v1733_v38  ;;  %v4476_v1 = vand.u32 4294901760, %v138_v60  ;;  %v1757_v0 = vand.u32 4294901760, %v1756_v2  ;;  %v1768_v38 = vsub.f32 %v4437_v43, %v5988_v22  ;;  %5989 = vst [vmem:[#allocation90_spill] sm:$0xff] %v4483_v24 }
 0x1bf   :  { %5985 = vst [vmem:[#allocation21_spill] sm:$0xff] %v4459_v7  ;;  %v4489_v5 = vsub.f32 %v139_v18, %v4459_v7  ;;  %v1763_v22 = vand.u32 4294901760, %v1762_v56  ;;  %v5993_v18 = vand.u32 4294901760, %v4453_v39  ;;  %v133_v56 = vld [vmem:[%s5183_s1 + $0x3a8] sm:$0xff] }
 0x1c0   :  { %5987 = vst [vmem:[#allocation22_spill] sm:$0xff] %v4476_v1  ;;  %v1769_v50 = vand.u32 4294901760, %v1768_v38 }
 0x1c1   :  { %1491 = vmatpush1.xpose.msra.mxu0 %v4397_v55  ;;  %1740 = vmatpush1.xpose.msra.mxu1 %v1739_v45  ;;  %v136_v45 = vld [vmem:[%s5183_s1 + $0x3c0] sm:$0xff]  ;;  %5990 = vst [vmem:[#allocation49_spill] sm:$0xff] %v4489_v5  ;;  %v1780_v55 = vsub.f32 %v4453_v39, %v5993_v18 }
 0x1c2   :  { %1493 = vmatprep.subr.mxu0 %v4407_v12  ;;  %1746 = vmatprep.subr.mxu1 %v1745_v28  ;;  %v5991_v28 = vand.u32 4294901760, %v4443_v53  ;;  %v4500_v12 = vsub.f32 %v138_v60, %v4476_v1  ;;  %v4505_v43 = vand.u32 4294901760, %v136_v45  ;;  %v4515_v60 = vsub.f32 %v137_v31, %v4483_v24  ;;  %v132_v39 = vld [vmem:[%s5183_s1 + $0x3a0] sm:$0xff] }
 0x1c3   :  { %v1781_v38 = vand.u32 4294901760, %v1780_v55 }
 0x1c4   :  { %v1774_v2 = vsub.f32 %v4443_v53, %v5991_v28  ;;  %5992 = vst [vmem:[#allocation39_spill] sm:$0xff] %v4500_v12  ;;  %5994 = vst [vmem:[#allocation25_spill] sm:$0xff] %v4505_v43  ;;  %v4508_v28 = vand.u32 4294901760, %v135_v21  ;;  %v4525_v54 = vsub.f32 %v136_v45, %v4505_v43  ;;  %v131_v45 = vld [vmem:[%s5183_s1 + $0x398] sm:$0xff] }
 0x1c5   :  { %1495 = vmatpush2.xpose.msra.mxu0 %v4416_v33  ;;  %1752 = vmatpush1.xpose.msra.mxu1 %v1751_v47  ;;  %v134_v47 = vld [vmem:[%s5183_s1 + $0x3b0] sm:$0xff]  ;;  %5996 = vst [vmem:[#allocation27_spill] sm:$0xff] %v4515_v60 }
 0x1c6   :  { %1497 = vmatprep.subr.mxu0 %v4426_v25  ;;  %1758 = vmatprep.subr.mxu1 %v1757_v0  ;;  %5995 = vst [vmem:[#allocation40_spill] sm:$0xff] %v4508_v28  ;;  %v1775_v18 = vand.u32 4294901760, %v1774_v2  ;;  %v5997_v25 = vand.u32 4294901760, %v4469_v17  ;;  %5998 = vst [vmem:[#allocation42_spill] sm:$0xff] %v4525_v54  ;;  %v4527_v33 = vand.u32 4294901760, %v134_v47  ;;  %v4544_v31 = vsub.f32 %v135_v21, %v4508_v28  ;;  %v130_v21 = vld [vmem:[%s5183_s1 + $0x390] sm:$0xff] }
 0x1c7   :  { %v4575_v53 = vand.u32 4294901760, %v130_v21 }
 0x1c8   :  { %v1786_v0 = vsub.f32 %v4469_v17, %v5997_v25  ;;  %5999 = vst [vmem:[#allocation29_spill] sm:$0xff] %v4527_v33  ;;  %v6000_v25 = vand.u32 4294901760, %v4489_v5  ;;  %6002 = vst [vmem:[#allocation30_spill] sm:$0xff] %v4544_v31  ;;  %v4546_v17 = vand.u32 4294901760, %v132_v39 }
 0x1c9   :  { %1499 = vmatpush2.xpose.msra.mxu0 %v4445_v52  ;;  %1764 = vmatpush1.xpose.msra.mxu1 %v1763_v22  ;;  %v4537_v22 = vand.u32 4294901760, %v133_v56  ;;  %6010 = vst [vmem:[#allocation37_spill] sm:$0xff] %v4575_v53 }
 0x1ca   :  { %1501 = vmatprep.subr.mxu0 %v4459_v7  ;;  %1770 = vmatprep.subr.mxu1 %v1769_v50  ;;  %v1792_v2 = vsub.f32 %v4489_v5, %v6000_v25  ;;  %v1787_v52 = vand.u32 4294901760, %v1786_v0  ;;  %6003 = vst [vmem:[#allocation45_spill] sm:$0xff] %v4546_v17  ;;  %v4550_v50 = vsub.f32 %v134_v47, %v4527_v33  ;;  %v6005_v25 = vand.u32 4294901760, %v4500_v12  ;;  %v129_v7 = vld [vmem:[%s5183_s1 + $0x388] sm:$0xff] }
 0x1cb   :  { %6001 = vst [vmem:[#allocation44_spill] sm:$0xff] %v4537_v22  ;;  %v4556_v5 = vand.u32 4294901760, %v131_v45 }
 0x1cc   :  { %6004 = vst [vmem:[#allocation33_spill] sm:$0xff] %v4550_v50  ;;  %v1798_v55 = vsub.f32 %v4500_v12, %v6005_v25  ;;  %v1793_v0 = vand.u32 4294901760, %v1792_v2  ;;  %v4567_v25 = vsub.f32 %v133_v56, %v4537_v22  ;;  %v4573_v12 = vsub.f32 %v132_v39, %v4546_v17 }
 0x1cd   :  { %1503 = vmatpush2.xpose.msra.mxu0 %v4476_v1  ;;  %1776 = vmatpush2.xpose.msra.mxu1 %v1775_v18  ;;  %6006 = vst [vmem:[#allocation48_spill] sm:$0xff] %v4556_v5  ;;  %v6007_v18 = vand.u32 4294901760, %v4515_v60  ;;  %v6011_v2 = vand.u32 4294901760, %v4525_v54  ;;  %v5505_v56 = vand.u32 4294901760, %v4550_v50  ;;  %v4583_v1 = vsub.f32 %v131_v45, %v4556_v5  ;;  %v127_v45 = vld [vmem:[%s5183_s1 + $0x378] sm:$0xff] }
 0x1ce   :  { %1505 = vmatprep.subr.mxu0 %v4483_v24  ;;  %1782 = vmatprep.subr.mxu1 %v1781_v38  ;;  %6008 = vst [vmem:[#allocation34_spill] sm:$0xff] %v4567_v25  ;;  %6009 = vst [vmem:[#allocation52_spill] sm:$0xff] %v4573_v12  ;;  %v1799_v38 = vand.u32 4294901760, %v1798_v55  ;;  %v6013_v24 = vand.u32 4294901760, %v4544_v31  ;;  %v128_v55 = vld [vmem:[%s5183_s1 + $0x380] sm:$0xff] }
 0x1cf   :  { %v1804_v47 = vsub.f32 %v4515_v60, %v6007_v18  ;;  %v1810_v18 = vsub.f32 %v4525_v54, %v6011_v2  ;;  %6012 = vst [vmem:[#allocation53_spill] sm:$0xff] %v4583_v1  ;;  %v4599_v2 = vsub.f32 %v130_v21, %v4575_v53  ;;  %v6017_v21 = vand.u32 4294901760, %v4567_v25 }
 0x1d0   :  { %v1816_v60 = vsub.f32 %v4544_v31, %v6013_v24  ;;  %v4613_v54 = vand.u32 4294901760, %v127_v45 }
 0x1d1   :  { %1507 = vmatpush2.xpose.msra.mxu0 %v4505_v43  ;;  %1788 = vmatpush2.xpose.msra.mxu1 %v1787_v52  ;;  %v1805_v39 = vand.u32 4294901760, %v1804_v47  ;;  %v4589_v43 = vand.u32 4294901760, %v129_v7  ;;  %6015 = vst [vmem:[#allocation57_spill] sm:$0xff] %v4599_v2  ;;  %v1811_v24 = vand.u32 4294901760, %v1810_v18  ;;  %v1822_v47 = vsub.f32 %v4550_v50, %v5505_v56  ;;  %v125_v56 = vld [vmem:[%s5183_s1 + $0x368] sm:$0xff] }
 0x1d2   :  { %1509 = vmatprep.subr.mxu0 %v4508_v28  ;;  %1794 = vmatprep.subr.mxu1 %v1793_v0  ;;  %v4606_v52 = vand.u32 4294901760, %v128_v55  ;;  %v1817_v31 = vand.u32 4294901760, %v1816_v60  ;;  %v1828_v0 = vsub.f32 %v4567_v25, %v6017_v21  ;;  %6018 = vst [vmem:[#allocation59_spill] sm:$0xff] %v4613_v54 }
 0x1d3   :  { %6014 = vst [vmem:[#allocation38_spill] sm:$0xff] %v4589_v43  ;;  %v4619_v18 = vsub.f32 %v129_v7, %v4589_v43  ;;  %v1823_v21 = vand.u32 4294901760, %v1822_v47  ;;  %v6022_v7 = vand.u32 4294901760, %v4583_v1  ;;  %v123_v47 = vld [vmem:[%s5183_s1 + $0x358] sm:$0xff] }
 0x1d4   :  { %6016 = vst [vmem:[#allocation41_spill] sm:$0xff] %v4606_v52  ;;  %v1829_v50 = vand.u32 4294901760, %v1828_v0 }
 0x1d5   :  { %1511 = vmatpush2.xpose.msra.mxu0 %v4527_v33  ;;  %1800 = vmatpush2.xpose.msra.mxu1 %v1799_v38  ;;  %v126_v38 = vld [vmem:[%s5183_s1 + $0x370] sm:$0xff]  ;;  %6019 = vst [vmem:[#allocation43_spill] sm:$0xff] %v4619_v18  ;;  %v1840_v33 = vsub.f32 %v4583_v1, %v6022_v7 }
 0x1d6   :  { %1513 = vmatprep.subr.mxu0 %v4537_v22  ;;  %1806 = vmatprep.subr.mxu1 %v1805_v39  ;;  %v6020_v39 = vand.u32 4294901760, %v4573_v12  ;;  %v4630_v22 = vsub.f32 %v128_v55, %v4606_v52  ;;  %v4635_v25 = vand.u32 4294901760, %v126_v38  ;;  %v4645_v55 = vsub.f32 %v127_v45, %v4613_v54  ;;  %v122_v1 = vld [vmem:[%s5183_s1 + $0x350] sm:$0xff] }
 0x1d7   :  { %v1841_v0 = vand.u32 4294901760, %v1840_v33 }
 0x1d8   :  { %v1834_v60 = vsub.f32 %v4573_v12, %v6020_v39  ;;  %6021 = vst [vmem:[#allocation63_spill] sm:$0xff] %v4630_v22  ;;  %6023 = vst [vmem:[#allocation46_spill] sm:$0xff] %v4635_v25  ;;  %v4638_v39 = vand.u32 4294901760, %v125_v56  ;;  %v4655_v28 = vsub.f32 %v126_v38, %v4635_v25  ;;  %v121_v38 = vld [vmem:[%s5183_s1 + $0x348] sm:$0xff] }
 0x1d9   :  { %1515 = vmatpush2.xpose.msra.mxu0 %v4546_v17  ;;  %1812 = vmatpush2.xpose.msra.mxu1 %v1811_v24  ;;  %v124_v24 = vld [vmem:[%s5183_s1 + $0x360] sm:$0xff]  ;;  %6025 = vst [vmem:[#allocation47_spill] sm:$0xff] %v4645_v55 }
 0x1da   :  { %1517 = vmatprep.subr.mxu0 %v4556_v5  ;;  %1818 = vmatprep.subr.mxu1 %v1817_v31  ;;  %6024 = vst [vmem:[#allocation64_spill] sm:$0xff] %v4638_v39  ;;  %v1835_v7 = vand.u32 4294901760, %v1834_v60  ;;  %v6026_v5 = vand.u32 4294901760, %v4599_v2  ;;  %6027 = vst [vmem:[#allocation67_spill] sm:$0xff] %v4655_v28  ;;  %v4657_v17 = vand.u32 4294901760, %v124_v24  ;;  %v4674_v45 = vsub.f32 %v125_v56, %v4638_v39  ;;  %v120_v56 = vld [vmem:[%s5183_s1 + $0x340] sm:$0xff] }
 0x1db   :  { %v4705_v12 = vand.u32 4294901760, %v120_v56 }
 0x1dc   :  { %v1846_v31 = vsub.f32 %v4599_v2, %v6026_v5  ;;  %6028 = vst [vmem:[#allocation50_spill] sm:$0xff] %v4657_v17  ;;  %v6029_v5 = vand.u32 4294901760, %v4619_v18  ;;  %6031 = vst [vmem:[#allocation51_spill] sm:$0xff] %v4674_v45  ;;  %v4676_v2 = vand.u32 4294901760, %v122_v1 }
 0x1dd   :  { %1519 = vmatpush2.xpose.msra.mxu0 %v4575_v53  ;;  %1824 = vmatpush2.xpose.msra.mxu1 %v1823_v21  ;;  %v4667_v21 = vand.u32 4294901760, %v123_v47  ;;  %6039 = vst [vmem:[#allocation61_spill] sm:$0xff] %v4705_v12 }
 0x1de   :  { %1521 = vmatprep.subr.mxu0 %v4589_v43  ;;  %1830 = vmatprep.subr.mxu1 %v1829_v50  ;;  %v1852_v60 = vsub.f32 %v4619_v18, %v6029_v5  ;;  %v1847_v53 = vand.u32 4294901760, %v1846_v31  ;;  %6032 = vst [vmem:[#allocation72_spill] sm:$0xff] %v4676_v2  ;;  %v4680_v50 = vsub.f32 %v124_v24, %v4657_v17  ;;  %v6034_v5 = vand.u32 4294901760, %v4630_v22  ;;  %v119_v43 = vld [vmem:[%s5183_s1 + $0x338] sm:$0xff] }
 0x1df   :  { %6030 = vst [vmem:[#allocation69_spill] sm:$0xff] %v4667_v21  ;;  %v4686_v18 = vand.u32 4294901760, %v121_v38 }
 0x1e0   :  { %6033 = vst [vmem:[#allocation55_spill] sm:$0xff] %v4680_v50  ;;  %v1858_v33 = vsub.f32 %v4630_v22, %v6034_v5  ;;  %v1853_v31 = vand.u32 4294901760, %v1852_v60  ;;  %v4697_v5 = vsub.f32 %v123_v47, %v4667_v21  ;;  %v4703_v22 = vsub.f32 %v122_v1, %v4676_v2 }
 0x1e1   :  { %1523 = vmatpush2.xpose.msra.mxu0 %v4606_v52  ;;  %1836 = vmatpush2.xpose.msra.mxu1 %v1835_v7  ;;  %6035 = vst [vmem:[#allocation73_spill] sm:$0xff] %v4686_v18  ;;  %v6036_v7 = vand.u32 4294901760, %v4645_v55  ;;  %v6040_v60 = vand.u32 4294901760, %v4655_v28  ;;  %v5546_v47 = vand.u32 4294901760, %v4680_v50  ;;  %v4713_v52 = vsub.f32 %v121_v38, %v4686_v18  ;;  %v117_v38 = vld [vmem:[%s5183_s1 + $0x328] sm:$0xff] }
 0x1e2   :  { %1525 = vmatprep.subr.mxu0 %v4613_v54  ;;  %1842 = vmatprep.subr.mxu1 %v1841_v0  ;;  %6037 = vst [vmem:[#allocation56_spill] sm:$0xff] %v4697_v5  ;;  %6038 = vst [vmem:[#allocation76_spill] sm:$0xff] %v4703_v22  ;;  %v1859_v0 = vand.u32 4294901760, %v1858_v33  ;;  %v6042_v54 = vand.u32 4294901760, %v4674_v45  ;;  %v118_v33 = vld [vmem:[%s5183_s1 + $0x330] sm:$0xff] }
 0x1e3   :  { %v1864_v24 = vsub.f32 %v4645_v55, %v6036_v7  ;;  %v1870_v7 = vsub.f32 %v4655_v28, %v6040_v60  ;;  %6041 = vst [vmem:[#allocation77_spill] sm:$0xff] %v4713_v52  ;;  %v4729_v60 = vsub.f32 %v120_v56, %v4705_v12  ;;  %v6046_v56 = vand.u32 4294901760, %v4697_v5 }
 0x1e4   :  { %v1876_v55 = vsub.f32 %v4674_v45, %v6042_v54  ;;  %v4743_v28 = vand.u32 4294901760, %v117_v38 }
 0x1e5   :  { %1527 = vmatpush2.xpose.msra.mxu0 %v4635_v25  ;;  %1848 = vmatpush2.xpose.msra.mxu1 %v1847_v53  ;;  %v1865_v1 = vand.u32 4294901760, %v1864_v24  ;;  %v4719_v25 = vand.u32 4294901760, %v119_v43  ;;  %6044 = vst [vmem:[#allocation81_spill] sm:$0xff] %v4729_v60  ;;  %v1871_v54 = vand.u32 4294901760, %v1870_v7  ;;  %v1882_v24 = vsub.f32 %v4680_v50, %v5546_v47  ;;  %v115_v47 = vld [vmem:[%s5183_s1 + $0x318] sm:$0xff] }
 0x1e6   :  { %1529 = vmatprep.subr.mxu0 %v4638_v39  ;;  %1854 = vmatprep.subr.mxu1 %v1853_v31  ;;  %v4736_v53 = vand.u32 4294901760, %v118_v33  ;;  %v1877_v45 = vand.u32 4294901760, %v1876_v55  ;;  %v1888_v31 = vsub.f32 %v4697_v5, %v6046_v56  ;;  %6047 = vst [vmem:[#allocation85_spill] sm:$0xff] %v4743_v28 }
 0x1e7   :  { %6043 = vst [vmem:[#allocation80_spill] sm:$0xff] %v4719_v25  ;;  %v4749_v7 = vsub.f32 %v119_v43, %v4719_v25  ;;  %v1883_v56 = vand.u32 4294901760, %v1882_v24  ;;  %v6050_v43 = vand.u32 4294901760, %v4713_v52  ;;  %v113_v24 = vld [vmem:[%s5183_s1 + $0x308] sm:$0xff] }
 0x1e8   :  { %6045 = vst [vmem:[#allocation83_spill] sm:$0xff] %v4736_v53  ;;  %v1889_v50 = vand.u32 4294901760, %v1888_v31 }
 0x1e9   :  { %1531 = vmatpush2.xpose.msra.mxu0 %v4657_v17  ;;  %1860 = vmatpush2.xpose.msra.mxu1 %v1859_v0  ;;  %v116_v0 = vld [vmem:[%s5183_s1 + $0x320] sm:$0xff]  ;;  %6048 = vst [vmem:[#allocation87_spill] sm:$0xff] %v4749_v7  ;;  %v1900_v17 = vsub.f32 %v4713_v52, %v6050_v43 }
 0x1ea   :  { %1533 = vmatprep.subr.mxu0 %v4667_v21  ;;  %1866 = vmatprep.subr.mxu1 %v1865_v1  ;;  %v6049_v1 = vand.u32 4294901760, %v4703_v22  ;;  %v4760_v21 = vsub.f32 %v118_v33, %v4736_v53  ;;  %v4765_v5 = vand.u32 4294901760, %v116_v0  ;;  %v4775_v33 = vsub.f32 %v117_v38, %v4743_v28 }
 0x1eb   :  { %v1901_v31 = vand.u32 4294901760, %v1900_v17  ;;  %v112_v17 = vld [vmem:[%s5183_s1 + $0x300] sm:$0xff] }
 0x1ec   :  { %v1894_v55 = vsub.f32 %v4703_v22, %v6049_v1  ;;  %v4768_v1 = vand.u32 4294901760, %v115_v47  ;;  %v4785_v39 = vsub.f32 %v116_v0, %v4765_v5  ;;  %v5567_v38 = vand.u32 4294901760, %v4760_v21 }
 0x1ed   :  { %1535 = vmatpush2.xpose.msra.mxu0 %v4676_v2  ;;  %1872 = vmatpush2.xpose.msra.mxu1 %v1871_v54  ;;  %v114_v54 = vld [vmem:[%s5183_s1 + $0x310] sm:$0xff]  ;;  %v4794_v22 = vand.u32 4294901760, %v113_v24 }
 0x1ee   :  { %1537 = vmatprep.subr.mxu0 %v4686_v18  ;;  %1878 = vmatprep.subr.mxu1 %v1877_v45  ;;  %6051 = vst [vmem:[#allocation89_spill] sm:$0xff] %v4768_v1  ;;  %v1895_v43 = vand.u32 4294901760, %v1894_v55  ;;  %v6052_v18 = vand.u32 4294901760, %v4729_v60  ;;  %v4787_v2 = vand.u32 4294901760, %v114_v54  ;;  %v6053_v55 = vand.u32 4294901760, %v4749_v7 }
 0x1ef   :  { %v4801_v0 = vsub.f32 %v115_v47, %v4768_v1 }
 0x1f0   :  { %v1906_v45 = vsub.f32 %v4729_v60, %v6052_v18  ;;  %v1912_v52 = vsub.f32 %v4749_v7, %v6053_v55  ;;  %v1918_v55 = vsub.f32 %v4760_v21, %v5567_v38  ;;  %v5570_v18 = vand.u32 4294901760, %v4785_v39 }
 0x1f1   :  { %1539 = vmatpush2.xpose.msra.mxu0 %v4705_v12  ;;  %1884 = vmatpush2.xpose.msra.mxu1 %v1883_v56  ;;  %6054 = vst [vmem:[#allocation79_spill] sm:$0xff] %v4801_v0 }
 0x1f2   :  { %1541 = vmatprep.subr.mxu0 %v4719_v25  ;;  %1890 = vmatprep.subr.mxu1 %v1889_v50  ;;  %v1907_v56 = vand.u32 4294901760, %v1906_v45  ;;  %v4805_v50 = vsub.f32 %v114_v54, %v4787_v2  ;;  %v4810_v25 = vand.u32 4294901760, %v112_v17  ;;  %v1913_v47 = vand.u32 4294901760, %v1912_v52 }
 0x1f3   :  { %v6056_v45 = vand.u32 4294901760, %v4775_v33  ;;  %v4819_v54 = vsub.f32 %v113_v24, %v4794_v22  ;;  %v1919_v38 = vand.u32 4294901760, %v1918_v55  ;;  %v1930_v52 = vsub.f32 %v4785_v39, %v5570_v18 }
 0x1f4   :  { %6055 = vst [vmem:[#allocation82_spill] sm:$0xff] %v4805_v50  ;;  %v4823_v12 = vsub.f32 %v112_v17, %v4810_v25 }
 0x1f5   :  { %1543 = vmatpush2.xpose.msra.mxu0 %v4736_v53  ;;  %1896 = vmatpush2.xpose.msra.mxu1 %v1895_v43  ;;  %v1924_v53 = vsub.f32 %v4775_v33, %v6056_v45  ;;  %v5571_v43 = vand.u32 4294901760, %v4801_v0  ;;  %v1931_v17 = vand.u32 4294901760, %v1930_v52 }
 0x1f6   :  { %1545 = vmatprep.subr.mxu0 %v4743_v28  ;;  %1902 = vmatprep.subr.mxu1 %v1901_v31  ;;  %6057 = vst [vmem:[#allocation93_spill] sm:$0xff] %v4823_v12  ;;  %v5572_v31 = vand.u32 4294901760, %v4805_v50  ;;  %v5573_v18 = vand.u32 4294901760, %v4823_v12 }
 0x1f7   :  { %v1925_v45 = vand.u32 4294901760, %v1924_v53  ;;  %v1936_v24 = vsub.f32 %v4801_v0, %v5571_v43 }
 0x1f8   :  { %v1942_v55 = vsub.f32 %v4805_v50, %v5572_v31  ;;  %v6058_v31 = vld [vmem:[#allocation96_spill] sm:$0xff] }
 0x1f9   :  { %1547 = vmatpush2.xpose.msra.mxu0 %v4765_v5  ;;  %1908 = vmatpush2.xpose.msra.mxu1 %v1907_v56  ;;  %v5574_v56 = vand.u32 4294901760, %v4819_v54  ;;  %v1937_v53 = vand.u32 4294901760, %v1936_v24  ;;  %v6059_v24 = vld [vmem:[#allocation58_spill] sm:$0xff] }
 0x1fa   :  { %1549 = vmatprep.subr.mxu0 %v4768_v1  ;;  %1914 = vmatprep.subr.mxu1 %v1913_v47  ;;  %v1943_v43 = vand.u32 4294901760, %v1942_v55  ;;  %v6063_v55 = vld [vmem:[#allocation71_spill] sm:$0xff] }
 0x1fb   :  { %v1948_v47 = vsub.f32 %v4819_v54, %v5574_v56  ;;  %v6072_v56 = vld [vmem:[#allocation62_spill] sm:$0xff] }
 0x1fd   :  { %1551 = vmatpush2.xpose.msra.mxu0 %v4787_v2  ;;  %1920 = vmatpush2.xpose.msra.mxu1 %v1919_v38  ;;  %v1954_v38 = vsub.f32 %v4823_v12, %v5573_v18  ;;  %v1949_v52 = vand.u32 4294901760, %v1948_v47  ;;  %v6065_v47 = vld [vmem:[#allocation75_spill] sm:$0xff]  ;;  %v6071_v18 = vld [vmem:[#allocation16_spill] sm:$0xff] }
 0x1fe   :  { %1553 = vmatprep.subr.mxu0 %v4794_v22  ;;  %1926 = vmatprep.subr.mxu1 %v1925_v45 }
 0x1ff   :  { %v1955_v45 = vand.u32 4294901760, %v1954_v38  ;;  %v6066_v38 = vld [vmem:[#allocation3_spill] sm:$0xff] }
 0x201   :  { %1555 = vmatpush2.xpose.msra.mxu0 %v4810_v25  ;;  %1932 = vmatpush2.xpose.msra.mxu1 %v1931_v17  ;;  %v6062_v17 = vld [vmem:[#allocation2_spill] sm:$0xff] }
 0x202   :  { %1938 = vmatprep.subr.mxu1 %v1937_v53  ;;  %1968 = vmatprep.subr.mxu0 %v4020_v15  ;;  %v6064_v53 = vld [vmem:[#allocation10_spill] sm:$0xff] }
 0x204   :  { %1567 = vmatmul.mubr.f32.vlgmr.msra.gmra.mxu0 %v6058_v31  ;;  %v6061_v31 = vld [vmem:[#allocation68_spill] sm:$0xff] }
 0x205   :  { %1944 = vmatpush2.xpose.msra.mxu1 %v1943_v43  ;;  %1971 = vmatpush1.xpose.msra.mxu0 %v4028_v32  ;;  %v6060_v43 = vld [vmem:[#allocation60_spill] sm:$0xff] }
 0x206   :  { %1950 = vmatprep.subr.mxu1 %v1949_v52  ;;  %1974 = vmatprep.subr.mxu0 %v4040_v9  ;;  %v6067_v52 = vld [vmem:[#allocation78_spill] sm:$0xff] }
 0x207   :  { %2160 = vmatprep.mubr.f32.mxu0 %v6059_v24  ;;  %v6069_v24 = vld [vmem:[#allocation15_spill] sm:$0xff] }
 0x209   :  { %1956 = vmatpush2.xpose.msra.mxu1 %v1955_v45  ;;  %1977 = vmatpush1.xpose.msra.mxu0 %v4046_v10  ;;  %v6068_v45 = vld [vmem:[#allocation12_spill] sm:$0xff] }
 0x20a   :  { %1980 = vmatprep.subr.mxu0 %v4055_v26  ;;  %2170 = vmatprep.subr.mxu1 %v3995_v42 }
 0x20c   :  { %1960 = vmatmul.mubr.f32.vlgmr.msra.gmra.mxu1 %v5936_v48  ;;  %v6073_v48 = vld [vmem:[#allocation7_spill] sm:$0xff] }
 0x20d   :  { %1983 = vmatpush1.xpose.msra.mxu0 %v4073_v49  ;;  %2172 = vmatpush1.xpose.msra.mxu1 %v4006_v14 }
 0x20e   :  { %1986 = vmatprep.subr.mxu0 %v4095_v36  ;;  %2174 = vmatprep.subr.mxu1 %v4014_v34 }
 0x20f   :  { %2300 = vmatprep.mubr.f32.mxu1 %v6060_v43  ;;  %v6070_v43 = vld [vmem:[#allocation4_spill] sm:$0xff] }
 0x211   :  { %1989 = vmatpush1.xpose.msra.mxu0 %v4108_v51  ;;  %2176 = vmatpush1.xpose.msra.mxu1 %v4022_v16 }
 0x212   :  { %1992 = vmatprep.subr.mxu0 %v4123_v40  ;;  %2178 = vmatprep.subr.mxu1 %v4030_v8 }
 0x215   :  { %1995 = vmatpush1.xpose.msra.mxu0 %v4134_v41  ;;  %2180 = vmatpush1.xpose.msra.mxu1 %v4048_v11 }
 0x216   :  { %1998 = vmatprep.subr.mxu0 %v4153_v3  ;;  %2182 = vmatprep.subr.mxu1 %v4062_v35 }
 0x219   :  { %2001 = vmatpush1.xpose.msra.mxu0 %v4160_v62  ;;  %2184 = vmatpush1.xpose.msra.mxu1 %v4081_v59 }
 0x21a   :  { %2004 = vmatprep.subr.mxu0 %v4177_v61  ;;  %2186 = vmatprep.subr.mxu1 %v4089_v57 }
 0x21d   :  { %2007 = vmatpush1.xpose.msra.mxu0 %v4183_v13  ;;  %2188 = vmatpush1.xpose.msra.mxu1 %v4113_v63 }
 0x21e   :  { %2010 = vmatprep.subr.mxu0 %v4193_v37  ;;  %2190 = vmatprep.subr.mxu1 %v4116_v46 }
 0x221   :  { %2013 = vmatpush1.xpose.msra.mxu0 %v4209_v23  ;;  %2192 = vmatpush1.xpose.msra.mxu1 %v4136_v44 }
 0x222   :  { %2016 = vmatprep.subr.mxu0 %v4229_v58  ;;  %2194 = vmatprep.subr.mxu1 %v4146_v29 }
 0x225   :  { %2019 = vmatpush1.xpose.msra.mxu0 %v4240_v20  ;;  %2196 = vmatpush1.xpose.msra.mxu1 %v4156_v4 }
 0x226   :  { %2022 = vmatprep.subr.mxu0 %v4255_v19  ;;  %2198 = vmatprep.subr.mxu1 %v4166_v30 }
 0x229   :  { %2025 = vmatpush1.xpose.msra.mxu0 %v4265_v27  ;;  %2200 = vmatpush1.xpose.msra.mxu1 %v4185_v6 }
 0x22a   :  { %2028 = vmatprep.subr.mxu0 %v6061_v31  ;;  %2202 = vmatprep.subr.mxu1 %v6062_v17 }
 0x22d   :  { %2031 = vmatpush1.xpose.msra.mxu0 %v6063_v55  ;;  %2204 = vmatpush1.xpose.msra.mxu1 %v6064_v53  ;;  %v6074_v55 = vld [vmem:[#allocation66_spill] sm:$0xff]  ;;  %v6075_v53 = vld [vmem:[#allocation20_spill] sm:$0xff] }
 0x22e   :  { %2034 = vmatprep.subr.mxu0 %v6065_v47  ;;  %2206 = vmatprep.subr.mxu1 %v6066_v38  ;;  %v6076_v47 = vld [vmem:[#allocation70_spill] sm:$0xff]  ;;  %v6077_v38 = vld [vmem:[#allocation9_spill] sm:$0xff] }
 0x231   :  { %2037 = vmatpush1.xpose.msra.mxu0 %v6067_v52  ;;  %2208 = vmatpush1.xpose.msra.mxu1 %v6068_v45  ;;  %v6078_v52 = vld [vmem:[#allocation74_spill] sm:$0xff]  ;;  %v6079_v45 = vld [vmem:[#allocation24_spill] sm:$0xff] }
 0x232   :  { %2040 = vmatprep.subr.mxu0 %v6069_v24  ;;  %2210 = vmatprep.subr.mxu1 %v6070_v43  ;;  %v6080_v24 = vld [vmem:[#allocation84_spill] sm:$0xff]  ;;  %v6081_v43 = vld [vmem:[#allocation13_spill] sm:$0xff] }
 0x235   :  { %2043 = vmatpush1.xpose.msra.mxu0 %v6071_v18  ;;  %2212 = vmatpush1.xpose.msra.mxu1 %v6072_v56  ;;  %v6082_v18 = vld [vmem:[#allocation5_spill] sm:$0xff]  ;;  %v6083_v56 = vld [vmem:[#allocation14_spill] sm:$0xff] }
 0x236   :  { %2046 = vmatprep.subr.mxu0 %v6073_v48  ;;  %2214 = vmatprep.subr.mxu1 %v6074_v55  ;;  %v6084_v48 = vld [vmem:[#allocation6_spill] sm:$0xff]  ;;  %v6085_v55 = vld [vmem:[#allocation17_spill] sm:$0xff] }
 0x239   :  { %2049 = vmatpush1.xpose.msra.mxu0 %v6075_v53  ;;  %2216 = vmatpush1.xpose.msra.mxu1 %v6076_v47  ;;  %v6086_v53 = vld [vmem:[#allocation19_spill] sm:$0xff]  ;;  %v6087_v47 = vld [vmem:[#allocation32_spill] sm:$0xff] }
 0x23a   :  { %2052 = vmatprep.subr.mxu0 %v6077_v38  ;;  %2218 = vmatprep.subr.mxu1 %v6078_v52  ;;  %v6088_v38 = vld [vmem:[#allocation8_spill] sm:$0xff]  ;;  %v6089_v52 = vld [vmem:[#allocation35_spill] sm:$0xff] }
 0x23d   :  { %2055 = vmatpush1.xpose.msra.mxu0 %v6079_v45  ;;  %2220 = vmatpush1.xpose.msra.mxu1 %v6080_v24  ;;  %v6090_v45 = vld [vmem:[#allocation23_spill] sm:$0xff]  ;;  %v6091_v24 = vld [vmem:[#allocation36_spill] sm:$0xff] }
 0x23e   :  { %2058 = vmatprep.subr.mxu0 %v6081_v43  ;;  %2222 = vmatprep.subr.mxu1 %v6082_v18  ;;  %v6092_v43 = vld [vmem:[#allocation11_spill] sm:$0xff]  ;;  %v6093_v18 = vld [vmem:[#allocation49_spill] sm:$0xff] }
 0x241   :  { %2061 = vmatpush1.xpose.msra.mxu0 %v6083_v56  ;;  %2224 = vmatpush1.xpose.msra.mxu1 %v6084_v48  ;;  %v6094_v56 = vld [vmem:[#allocation26_spill] sm:$0xff]  ;;  %v6095_v48 = vld [vmem:[#allocation39_spill] sm:$0xff] }
 0x242   :  { %2064 = vmatprep.subr.mxu0 %v6085_v55  ;;  %2226 = vmatprep.subr.mxu1 %v6086_v53  ;;  %v6096_v55 = vld [vmem:[#allocation28_spill] sm:$0xff]  ;;  %v6097_v53 = vld [vmem:[#allocation27_spill] sm:$0xff] }
 0x245   :  { %2067 = vmatpush2.xpose.msra.mxu0 %v6087_v47  ;;  %2228 = vmatpush1.xpose.msra.mxu1 %v6088_v38  ;;  %v6098_v47 = vld [vmem:[#allocation31_spill] sm:$0xff]  ;;  %v6099_v38 = vld [vmem:[#allocation42_spill] sm:$0xff] }
 0x246   :  { %2070 = vmatprep.subr.mxu0 %v6089_v52  ;;  %2230 = vmatprep.subr.mxu1 %v6090_v45  ;;  %v6100_v52 = vld [vmem:[#allocation18_spill] sm:$0xff] }
 0x247   :  { %v6101_v45 = vld [vmem:[#allocation30_spill] sm:$0xff] }
 0x249   :  { %2073 = vmatpush2.xpose.msra.mxu0 %v6091_v24  ;;  %2232 = vmatpush1.xpose.msra.mxu1 %v6092_v43  ;;  %v6102_v24 = vld [vmem:[#allocation21_spill] sm:$0xff] }
 0x24a   :  { %2076 = vmatprep.subr.mxu0 %v6093_v18  ;;  %2234 = vmatprep.subr.mxu1 %v6094_v56  ;;  %v6103_v43 = vld [vmem:[#allocation33_spill] sm:$0xff]  ;;  %v6104_v18 = vld [vmem:[#allocation22_spill] sm:$0xff] }
 0x24b   :  { %v6105_v56 = vld [vmem:[#allocation34_spill] sm:$0xff] }
 0x24d   :  { %2079 = vmatpush2.xpose.msra.mxu0 %v6095_v48  ;;  %2236 = vmatpush2.xpose.msra.mxu1 %v6096_v55  ;;  %v6106_v48 = vld [vmem:[#allocation90_spill] sm:$0xff]  ;;  %v6107_v55 = vld [vmem:[#allocation52_spill] sm:$0xff] }
 0x24e   :  { %2082 = vmatprep.subr.mxu0 %v6097_v53  ;;  %2238 = vmatprep.subr.mxu1 %v6098_v47  ;;  %v6108_v53 = vld [vmem:[#allocation25_spill] sm:$0xff] }
 0x24f   :  { %v6109_v47 = vld [vmem:[#allocation53_spill] sm:$0xff] }
 0x251   :  { %2085 = vmatpush2.xpose.msra.mxu0 %v6099_v38  ;;  %2240 = vmatpush2.xpose.msra.mxu1 %v6100_v52  ;;  %v6110_v38 = vld [vmem:[#allocation40_spill] sm:$0xff]  ;;  %v6111_v52 = vld [vmem:[#allocation57_spill] sm:$0xff] }
 0x252   :  { %2088 = vmatprep.subr.mxu0 %v6101_v45  ;;  %2242 = vmatprep.subr.mxu1 %v6102_v24  ;;  %v6112_v45 = vld [vmem:[#allocation29_spill] sm:$0xff]  ;;  %v6113_v24 = vld [vmem:[#allocation43_spill] sm:$0xff] }
 0x255   :  { %2091 = vmatpush2.xpose.msra.mxu0 %v6103_v43  ;;  %2244 = vmatpush2.xpose.msra.mxu1 %v6104_v18  ;;  %v6114_v43 = vld [vmem:[#allocation44_spill] sm:$0xff]  ;;  %v6115_v18 = vld [vmem:[#allocation63_spill] sm:$0xff] }
 0x256   :  { %2094 = vmatprep.subr.mxu0 %v6105_v56  ;;  %2246 = vmatprep.subr.mxu1 %v6106_v48  ;;  %v6116_v56 = vld [vmem:[#allocation45_spill] sm:$0xff]  ;;  %v6117_v48 = vld [vmem:[#allocation47_spill] sm:$0xff] }
 0x259   :  { %2097 = vmatpush2.xpose.msra.mxu0 %v6107_v55  ;;  %2248 = vmatpush2.xpose.msra.mxu1 %v6108_v53  ;;  %v6118_v55 = vld [vmem:[#allocation48_spill] sm:$0xff]  ;;  %v6119_v53 = vld [vmem:[#allocation67_spill] sm:$0xff] }
 0x25a   :  { %2100 = vmatprep.subr.mxu0 %v6109_v47  ;;  %2250 = vmatprep.subr.mxu1 %v6110_v38  ;;  %v6120_v47 = vld [vmem:[#allocation37_spill] sm:$0xff]  ;;  %v6121_v38 = vld [vmem:[#allocation51_spill] sm:$0xff] }
 0x25d   :  { %2103 = vmatpush2.xpose.msra.mxu0 %v6111_v52  ;;  %2252 = vmatpush2.xpose.msra.mxu1 %v6112_v45  ;;  %v6122_v52 = vld [vmem:[#allocation38_spill] sm:$0xff]  ;;  %v6123_v45 = vld [vmem:[#allocation55_spill] sm:$0xff] }
 0x25e   :  { %2106 = vmatprep.subr.mxu0 %v6113_v24  ;;  %2254 = vmatprep.subr.mxu1 %v6114_v43  ;;  %v6124_v24 = vld [vmem:[#allocation41_spill] sm:$0xff]  ;;  %v6125_v43 = vld [vmem:[#allocation56_spill] sm:$0xff] }
 0x261   :  { %2109 = vmatpush2.xpose.msra.mxu0 %v6115_v18  ;;  %2256 = vmatpush2.xpose.msra.mxu1 %v6116_v56  ;;  %v6126_v18 = vld [vmem:[#allocation59_spill] sm:$0xff]  ;;  %v6127_v56 = vld [vmem:[#allocation76_spill] sm:$0xff] }
 0x262   :  { %2112 = vmatprep.subr.mxu0 %v6117_v48  ;;  %2258 = vmatprep.subr.mxu1 %v6118_v55  ;;  %v6128_v48 = vld [vmem:[#allocation46_spill] sm:$0xff]  ;;  %v6129_v55 = vld [vmem:[#allocation77_spill] sm:$0xff] }
 0x265   :  { %2115 = vmatpush2.xpose.msra.mxu0 %v6119_v53  ;;  %2260 = vmatpush2.xpose.msra.mxu1 %v6120_v47  ;;  %v6130_v53 = vld [vmem:[#allocation64_spill] sm:$0xff] }
 0x266   :  { %2118 = vmatprep.subr.mxu0 %v6121_v38  ;;  %2262 = vmatprep.subr.mxu1 %v6122_v52  ;;  %v6131_v38 = vld [vmem:[#allocation50_spill] sm:$0xff] }
 0x269   :  { %2121 = vmatpush2.xpose.msra.mxu0 %v6123_v45  ;;  %2264 = vmatpush2.xpose.msra.mxu1 %v6124_v24  ;;  %v6132_v45 = vld [vmem:[#allocation69_spill] sm:$0xff] }
 0x26a   :  { %2124 = vmatprep.subr.mxu0 %v6125_v43  ;;  %2266 = vmatprep.subr.mxu1 %v6126_v18  ;;  %v6133_v43 = vld [vmem:[#allocation72_spill] sm:$0xff] }
 0x26d   :  { %2127 = vmatpush2.xpose.msra.mxu0 %v6127_v56  ;;  %2268 = vmatpush2.xpose.msra.mxu1 %v6128_v48  ;;  %v6134_v56 = vld [vmem:[#allocation73_spill] sm:$0xff] }
 0x26e   :  { %2130 = vmatprep.subr.mxu0 %v6129_v55  ;;  %2270 = vmatprep.subr.mxu1 %v6130_v53  ;;  %v6135_v55 = vld [vmem:[#allocation61_spill] sm:$0xff] }
 0x271   :  { %2133 = vmatpush2.xpose.msra.mxu0 %v4729_v60  ;;  %2272 = vmatpush2.xpose.msra.mxu1 %v6131_v38  ;;  %v6136_v60 = vld [vmem:[#allocation80_spill] sm:$0xff] }
 0x272   :  { %2136 = vmatprep.subr.mxu0 %v4749_v7  ;;  %2274 = vmatprep.subr.mxu1 %v6132_v45  ;;  %v6137_v7 = vld [vmem:[#allocation83_spill] sm:$0xff] }
 0x275   :  { %2139 = vmatpush2.xpose.msra.mxu0 %v4760_v21  ;;  %2276 = vmatpush2.xpose.msra.mxu1 %v6133_v43 }
 0x276   :  { %2142 = vmatprep.subr.mxu0 %v4775_v33  ;;  %2278 = vmatprep.subr.mxu1 %v6134_v56 }
 0x279   :  { %2145 = vmatpush2.xpose.msra.mxu0 %v4785_v39  ;;  %2280 = vmatpush2.xpose.msra.mxu1 %v6135_v55  ;;  %v6138_v55 = vand.u32 4294901760, %v4020_v15  ;;  %v6144_v15 = vand.u32 4294901760, %v4055_v26  ;;  %v6150_v26 = vand.u32 4294901760, %v4134_v41  ;;  %v6165_v41 = vld [vmem:[#allocation75_spill] sm:$0xff] }
 0x27a   :  { %2148 = vmatprep.subr.mxu0 %v4801_v0  ;;  %2282 = vmatprep.subr.mxu1 %v6136_v60  ;;  %v6139_v0 = vld [vmem:[#allocation92_spill] sm:$0xff] }
 0x27d   :  { %2151 = vmatpush2.xpose.msra.mxu0 %v4805_v50  ;;  %2284 = vmatpush2.xpose.msra.mxu1 %v6137_v7  ;;  %v6140_v50 = vand.u32 4294901760, %v4028_v32  ;;  %v6146_v32 = vand.u32 4294901760, %v4073_v49  ;;  %v6157_v49 = vand.u32 4294901760, %v4229_v58  ;;  %v6179_v58 = vld [vmem:[#allocation66_spill] sm:$0xff] }
 0x27e   :  { %2154 = vmatprep.subr.mxu0 %v4819_v54  ;;  %2286 = vmatprep.subr.mxu1 %v4743_v28  ;;  %v6141_v28 = vand.u32 4294901760, %v4040_v9  ;;  %v6147_v9 = vand.u32 4294901760, %v4095_v36  ;;  %v6160_v36 = vand.u32 4294901760, %v4265_v27 }
 0x281   :  { %2157 = vmatpush2.xpose.msra.mxu0 %v4823_v12  ;;  %2288 = vmatpush2.xpose.msra.mxu1 %v4765_v5  ;;  %v6142_v12 = vld [vmem:[#allocation54_spill] sm:$0xff] }
 0x282   :  { %2290 = vmatprep.subr.mxu1 %v4768_v1  ;;  %2313 = vmatprep.subr.mxu0 %v6138_v55  ;;  %v6143_v1 = vand.u32 4294901760, %v4046_v10  ;;  %v6148_v10 = vand.u32 4294901760, %v4108_v51  ;;  %v6161_v51 = vand.u32 4294901760, %v6061_v31  ;;  %v6185_v31 = vld [vmem:[#allocation74_spill] sm:$0xff] }
 0x284   :  { %2163 = vmatmul.mubr.f32.vlgmr.msra.gmra.mxu0 %v6139_v0  ;;  %v6145_v0 = vld [vmem:[#allocation94_spill] sm:$0xff] }
 0x285   :  { %2292 = vmatpush2.xpose.msra.mxu1 %v4787_v2  ;;  %2317 = vmatpush1.xpose.msra.mxu0 %v6140_v50 }
 0x286   :  { %2294 = vmatprep.subr.mxu1 %v4794_v22  ;;  %2321 = vmatprep.subr.mxu0 %v6141_v28  ;;  %v6182_v28 = vld [vmem:[#allocation70_spill] sm:$0xff] }
 0x287   :  { %2567 = vmatprep.mubr.f32.mxu0 %v6142_v12 }
 0x289   :  { %2296 = vmatpush2.xpose.msra.mxu1 %v4810_v25  ;;  %2325 = vmatpush1.xpose.msra.mxu0 %v6143_v1  ;;  %v6183_v1 = vld [vmem:[#allocation9_spill] sm:$0xff] }
 0x28a   :  { %2329 = vmatprep.subr.mxu0 %v6144_v15  ;;  %2576 = vmatprep.subr.mxu1 %v3995_v42  ;;  %v6149_v42 = vand.u32 4294901760, %v4123_v40  ;;  %v6164_v40 = vld [vmem:[#allocation10_spill] sm:$0xff]  ;;  %v6184_v50 = vand.u32 4294901760, %v6183_v1  ;;  %v6188_v15 = vld [vmem:[#allocation84_spill] sm:$0xff] }
 0x28b   :  { %v6227_v1 = vld [vmem:[#allocation90_spill] sm:$0xff] }
 0x28c   :  { %2304 = vmatmul.mubr.f32.vlgmr.msra.gmra.mxu1 %v6145_v0  ;;  %v6189_v0 = vld [vmem:[#allocation13_spill] sm:$0xff] }
 0x28d   :  { %2333 = vmatpush1.xpose.msra.mxu0 %v6146_v32  ;;  %2578 = vmatpush1.xpose.msra.mxu1 %v4006_v14  ;;  %v6151_v14 = vand.u32 4294901760, %v4153_v3  ;;  %v6168_v3 = vld [vmem:[#allocation78_spill] sm:$0xff]  ;;  %v6190_v32 = vand.u32 4294901760, %v6189_v0  ;;  %v6233_v0 = vld [vmem:[#allocation40_spill] sm:$0xff] }
 0x28e   :  { %2337 = vmatprep.subr.mxu0 %v6147_v9  ;;  %2580 = vmatprep.subr.mxu1 %v4014_v34  ;;  %v6152_v34 = vand.u32 4294901760, %v4160_v62  ;;  %v6169_v27 = vand.u32 4294901760, %v6168_v3  ;;  %v6171_v62 = vld [vmem:[#allocation15_spill] sm:$0xff]  ;;  %v6191_v9 = vld [vmem:[#allocation5_spill] sm:$0xff]  ;;  %v6212_v3 = vld [vmem:[#allocation28_spill] sm:$0xff] }
 0x28f   :  { %2704 = vmatprep.mubr.f32.mxu1 %v6142_v12 }
 0x291   :  { %2341 = vmatpush1.xpose.msra.mxu0 %v6148_v10  ;;  %2582 = vmatpush1.xpose.msra.mxu1 %v4022_v16  ;;  %v6153_v16 = vand.u32 4294901760, %v4177_v61  ;;  %v6174_v61 = vld [vmem:[#allocation16_spill] sm:$0xff]  ;;  %v6192_v10 = vld [vmem:[#allocation14_spill] sm:$0xff] }
 0x292   :  { %2345 = vmatprep.subr.mxu0 %v6149_v42  ;;  %2584 = vmatprep.subr.mxu1 %v4030_v8  ;;  %v6154_v8 = vand.u32 4294901760, %v4183_v13  ;;  %v6175_v13 = vand.u32 4294901760, %v6174_v61  ;;  %v6193_v42 = vand.u32 4294901760, %v6192_v10  ;;  %v6218_v61 = vld [vmem:[#allocation18_spill] sm:$0xff]  ;;  %v6236_v10 = vld [vmem:[#allocation29_spill] sm:$0xff] }
 0x295   :  { %2349 = vmatpush1.xpose.msra.mxu0 %v6150_v26  ;;  %2586 = vmatpush1.xpose.msra.mxu1 %v4048_v11  ;;  %v6155_v11 = vand.u32 4294901760, %v4193_v37  ;;  %v6177_v37 = vld [vmem:[#allocation7_spill] sm:$0xff]  ;;  %v6194_v26 = vld [vmem:[#allocation6_spill] sm:$0xff] }
 0x296   :  { %2353 = vmatprep.subr.mxu0 %v6151_v14  ;;  %2588 = vmatprep.subr.mxu1 %v4062_v35  ;;  %v6156_v35 = vand.u32 4294901760, %v4209_v23  ;;  %v6178_v23 = vand.u32 4294901760, %v6177_v37  ;;  %v6195_v14 = vld [vmem:[#allocation17_spill] sm:$0xff] }
 0x297   :  { %v6221_v37 = vld [vmem:[#allocation21_spill] sm:$0xff] }
 0x299   :  { %2357 = vmatpush1.xpose.msra.mxu0 %v6152_v34  ;;  %2590 = vmatpush1.xpose.msra.mxu1 %v4081_v59  ;;  %v6158_v59 = vand.u32 4294901760, %v4240_v20  ;;  %v6172_v20 = vand.u32 4294901760, %v6171_v62  ;;  %v6196_v34 = vand.u32 4294901760, %v6195_v14  ;;  %v6215_v62 = vld [vmem:[#allocation31_spill] sm:$0xff]  ;;  %v6239_v14 = vld [vmem:[#allocation44_spill] sm:$0xff] }
 0x29a   :  { %2361 = vmatprep.subr.mxu0 %v6153_v16  ;;  %2592 = vmatprep.subr.mxu1 %v4089_v57  ;;  %v6159_v57 = vand.u32 4294901760, %v4255_v19  ;;  %v6180_v19 = vld [vmem:[#allocation20_spill] sm:$0xff]  ;;  %v6197_v16 = vld [vmem:[#allocation19_spill] sm:$0xff] }
 0x29b   :  { %v6181_v12 = vand.u32 4294901760, %v6180_v19  ;;  %v6224_v19 = vld [vmem:[#allocation22_spill] sm:$0xff] }
 0x29d   :  { %2365 = vmatpush1.xpose.msra.mxu0 %v6154_v8  ;;  %2594 = vmatpush1.xpose.msra.mxu1 %v4113_v63  ;;  %v6162_v63 = vld [vmem:[#allocation71_spill] sm:$0xff]  ;;  %v6198_v8 = vld [vmem:[#allocation32_spill] sm:$0xff] }
 0x29e   :  { %2369 = vmatprep.subr.mxu0 %v6155_v11  ;;  %2596 = vmatprep.subr.mxu1 %v4116_v46  ;;  %v6163_v46 = vand.u32 4294901760, %v6162_v63  ;;  %v6199_v11 = vand.u32 4294901760, %v6198_v8  ;;  %v6206_v63 = vld [vmem:[#allocation11_spill] sm:$0xff]  ;;  %v6242_v8 = vld [vmem:[#allocation45_spill] sm:$0xff] }
 0x2a1   :  { %2373 = vmatpush1.xpose.msra.mxu0 %v6156_v35  ;;  %2598 = vmatpush1.xpose.msra.mxu1 %v4136_v44  ;;  %v6166_v44 = vand.u32 4294901760, %v6165_v41  ;;  %v6200_v35 = vld [vmem:[#allocation8_spill] sm:$0xff]  ;;  %v6209_v41 = vld [vmem:[#allocation26_spill] sm:$0xff] }
 0x2a2   :  { %2377 = vmatprep.subr.mxu0 %v6157_v49  ;;  %2600 = vmatprep.subr.mxu1 %v4146_v29  ;;  %v6167_v29 = vld [vmem:[#allocation3_spill] sm:$0xff] }
 0x2a3   :  { %v6201_v49 = vld [vmem:[#allocation35_spill] sm:$0xff] }
 0x2a5   :  { %2381 = vmatpush1.xpose.msra.mxu0 %v6158_v59  ;;  %2602 = vmatpush1.xpose.msra.mxu1 %v4156_v4  ;;  %v6170_v4 = vld [vmem:[#allocation12_spill] sm:$0xff]  ;;  %v6202_v59 = vand.u32 4294901760, %v6201_v49 }
 0x2a6   :  { %2385 = vmatprep.subr.mxu0 %v6159_v57  ;;  %2604 = vmatprep.subr.mxu1 %v4166_v30  ;;  %v6173_v30 = vld [vmem:[#allocation4_spill] sm:$0xff]  ;;  %v6203_v57 = vld [vmem:[#allocation23_spill] sm:$0xff] }
 0x2a7   :  { %v6245_v49 = vld [vmem:[#allocation48_spill] sm:$0xff] }
 0x2a9   :  { %2389 = vmatpush1.xpose.msra.mxu0 %v6160_v36  ;;  %2606 = vmatpush1.xpose.msra.mxu1 %v4185_v6  ;;  %v6176_v6 = vld [vmem:[#allocation62_spill] sm:$0xff]  ;;  %v6204_v36 = vld [vmem:[#allocation36_spill] sm:$0xff] }
 0x2aa   :  { %2393 = vmatprep.subr.mxu0 %v6161_v51  ;;  %2608 = vmatprep.subr.mxu1 %v6062_v17  ;;  %v6186_v17 = vld [vmem:[#allocation24_spill] sm:$0xff]  ;;  %v6205_v51 = vand.u32 4294901760, %v6204_v36  ;;  %v6248_v36 = vld [vmem:[#allocation51_spill] sm:$0xff] }
 0x2ab   :  { %v6187_v55 = vand.u32 4294901760, %v6186_v17  ;;  %v6230_v17 = vld [vmem:[#allocation25_spill] sm:$0xff] }
 0x2ad   :  { %2397 = vmatpush1.xpose.msra.mxu0 %v6163_v46  ;;  %2610 = vmatpush1.xpose.msra.mxu1 %v6164_v40  ;;  %v6207_v46 = vld [vmem:[#allocation49_spill] sm:$0xff] }
 0x2ae   :  { %2401 = vmatprep.subr.mxu0 %v6166_v44  ;;  %2612 = vmatprep.subr.mxu1 %v6167_v29  ;;  %v6208_v40 = vand.u32 4294901760, %v6207_v46  ;;  %v6210_v44 = vld [vmem:[#allocation39_spill] sm:$0xff] }
 0x2af   :  { %v6211_v29 = vand.u32 4294901760, %v6210_v44  ;;  %v6254_v44 = vld [vmem:[#allocation76_spill] sm:$0xff] }
 0x2b1   :  { %2405 = vmatpush1.xpose.msra.mxu0 %v6169_v27  ;;  %2614 = vmatpush1.xpose.msra.mxu1 %v6170_v4  ;;  %v6213_v27 = vld [vmem:[#allocation27_spill] sm:$0xff] }
 0x2b2   :  { %2409 = vmatprep.subr.mxu0 %v6172_v20  ;;  %2616 = vmatprep.subr.mxu1 %v6173_v30  ;;  %v6214_v4 = vand.u32 4294901760, %v6213_v27  ;;  %v6216_v20 = vld [vmem:[#allocation42_spill] sm:$0xff] }
 0x2b3   :  { %v6217_v30 = vand.u32 4294901760, %v6216_v20 }
 0x2b5   :  { %2413 = vmatpush1.xpose.msra.mxu0 %v6175_v13  ;;  %2618 = vmatpush1.xpose.msra.mxu1 %v6176_v6  ;;  %v6219_v13 = vld [vmem:[#allocation30_spill] sm:$0xff] }
 0x2b6   :  { %2417 = vmatprep.subr.mxu0 %v6178_v23  ;;  %2620 = vmatprep.subr.mxu1 %v6179_v58  ;;  %v6220_v6 = vand.u32 4294901760, %v6219_v13  ;;  %v6222_v23 = vld [vmem:[#allocation33_spill] sm:$0xff] }
 0x2b7   :  { %v6223_v58 = vand.u32 4294901760, %v6222_v23 }
 0x2b9   :  { %2421 = vmatpush1.xpose.msra.mxu0 %v6181_v12  ;;  %2622 = vmatpush1.xpose.msra.mxu1 %v6182_v28  ;;  %v6225_v12 = vld [vmem:[#allocation34_spill] sm:$0xff] }
 0x2ba   :  { %2425 = vmatprep.subr.mxu0 %v6184_v50  ;;  %2624 = vmatprep.subr.mxu1 %v6185_v31  ;;  %v6226_v28 = vand.u32 4294901760, %v6225_v12  ;;  %v6228_v50 = vld [vmem:[#allocation52_spill] sm:$0xff] }
 0x2bb   :  { %v6229_v31 = vand.u32 4294901760, %v6228_v50 }
 0x2bd   :  { %2429 = vmatpush1.xpose.msra.mxu0 %v6187_v55  ;;  %2626 = vmatpush1.xpose.msra.mxu1 %v6188_v15  ;;  %v6231_v55 = vld [vmem:[#allocation53_spill] sm:$0xff] }
 0x2be   :  { %2433 = vmatprep.subr.mxu0 %v6190_v32  ;;  %2628 = vmatprep.subr.mxu1 %v6191_v9  ;;  %v6232_v15 = vand.u32 4294901760, %v6231_v55  ;;  %v6234_v32 = vld [vmem:[#allocation57_spill] sm:$0xff] }
 0x2bf   :  { %v6235_v9 = vand.u32 4294901760, %v6234_v32 }
 0x2c1   :  { %2437 = vmatpush1.xpose.msra.mxu0 %v6193_v42  ;;  %2630 = vmatpush1.xpose.msra.mxu1 %v6194_v26  ;;  %v6237_v42 = vld [vmem:[#allocation43_spill] sm:$0xff] }
 0x2c2   :  { %2441 = vmatprep.subr.mxu0 %v6196_v34  ;;  %2632 = vmatprep.subr.mxu1 %v6197_v16  ;;  %v6238_v26 = vand.u32 4294901760, %v6237_v42  ;;  %v6240_v34 = vld [vmem:[#allocation63_spill] sm:$0xff]  ;;  %v2727_v42 = vlaneseq }
 0x2c3   :  { %v6241_v16 = vand.u32 4294901760, %v6240_v34 }
 0x2c5   :  { %2445 = vmatpush2.xpose.msra.mxu0 %v6199_v11  ;;  %2634 = vmatpush1.xpose.msra.mxu1 %v6200_v35  ;;  %v6243_v11 = vld [vmem:[#allocation47_spill] sm:$0xff] }
 0x2c6   :  { %2449 = vmatprep.subr.mxu0 %v6202_v59  ;;  %2636 = vmatprep.subr.mxu1 %v6203_v57  ;;  %v6244_v35 = vand.u32 4294901760, %v6243_v11  ;;  %v6246_v59 = vld [vmem:[#allocation67_spill] sm:$0xff] }
 0x2c7   :  { %v6247_v57 = vand.u32 4294901760, %v6246_v59 }
 0x2c9   :  { %2453 = vmatpush2.xpose.msra.mxu0 %v6205_v51  ;;  %2638 = vmatpush1.xpose.msra.mxu1 %v6206_v63  ;;  %v6249_v51 = vand.u32 4294901760, %v6248_v36  ;;  %v6250_v63 = vld [vmem:[#allocation55_spill] sm:$0xff] }
 0x2ca   :  { %2457 = vmatprep.subr.mxu0 %v6208_v40  ;;  %2640 = vmatprep.subr.mxu1 %v6209_v41  ;;  %v6251_v46 = vand.u32 4294901760, %v6250_v63  ;;  %v6252_v40 = vld [vmem:[#allocation56_spill] sm:$0xff] }
 0x2cb   :  { %v6253_v41 = vand.u32 4294901760, %v6252_v40 }
 0x2cd   :  { %2461 = vmatpush2.xpose.msra.mxu0 %v6211_v29  ;;  %2642 = vmatpush2.xpose.msra.mxu1 %v6212_v3  ;;  %v6255_v29 = vand.u32 4294901760, %v6254_v44 }
 0x2ce   :  { %2465 = vmatprep.subr.mxu0 %v6214_v4  ;;  %2644 = vmatprep.subr.mxu1 %v6215_v62  ;;  %v6265_v62 = vld [vmem:[#allocation61_spill] sm:$0xff] }
 0x2d1   :  { %2469 = vmatpush2.xpose.msra.mxu0 %v6217_v30  ;;  %2646 = vmatpush2.xpose.msra.mxu1 %v6218_v61  ;;  %v6274_v30 = vld [vmem:[#allocation89_spill] sm:$0xff]  ;;  %v6275_v61 = vld [vmem:[#allocation91_spill] sm:$0xff] }
 0x2d2   :  { %2473 = vmatprep.subr.mxu0 %v6220_v6  ;;  %2648 = vmatprep.subr.mxu1 %v6221_v37 }
 0x2d5   :  { %2477 = vmatpush2.xpose.msra.mxu0 %v6223_v58  ;;  %2650 = vmatpush2.xpose.msra.mxu1 %v6224_v19 }
 0x2d6   :  { %2481 = vmatprep.subr.mxu0 %v6226_v28  ;;  %2652 = vmatprep.subr.mxu1 %v6227_v1 }
 0x2d9   :  { %2485 = vmatpush2.xpose.msra.mxu0 %v6229_v31  ;;  %2654 = vmatpush2.xpose.msra.mxu1 %v6230_v17 }
 0x2da   :  { %2489 = vmatprep.subr.mxu0 %v6232_v15  ;;  %2656 = vmatprep.subr.mxu1 %v6233_v0 }
 0x2dd   :  { %2493 = vmatpush2.xpose.msra.mxu0 %v6235_v9  ;;  %2658 = vmatpush2.xpose.msra.mxu1 %v6236_v10 }
 0x2de   :  { %2497 = vmatprep.subr.mxu0 %v6238_v26  ;;  %2660 = vmatprep.subr.mxu1 %v6239_v14 }
 0x2e1   :  { %2501 = vmatpush2.xpose.msra.mxu0 %v6241_v16  ;;  %2662 = vmatpush2.xpose.msra.mxu1 %v6242_v8 }
 0x2e2   :  { %2505 = vmatprep.subr.mxu0 %v6244_v35  ;;  %2664 = vmatprep.subr.mxu1 %v6245_v49 }
 0x2e5   :  { %2509 = vmatpush2.xpose.msra.mxu0 %v6247_v57  ;;  %2666 = vmatpush2.xpose.msra.mxu1 %v6120_v47  ;;  %v6256_v47 = vld [vmem:[#allocation77_spill] sm:$0xff]  ;;  %v2728_v57 = vshrl.u32 %v2727_v42, 7 }
 0x2e6   :  { %2513 = vmatprep.subr.mxu0 %v6249_v51  ;;  %2668 = vmatprep.subr.mxu1 %v6122_v52  ;;  %v6257_v3 = vand.u32 4294901760, %v6256_v47  ;;  %v6258_v52 = vld [vmem:[#allocation81_spill] sm:$0xff] }
 0x2e7   :  { %v6259_v27 = vand.u32 4294901760, %v6258_v52  ;;  %v2733_v44 = vsub.s32 1, %v2728_v57  ;;  %v2716_v52 = vpop.xlane.xlu0 %2715 }
 0x2e9   :  { %2517 = vmatpush2.xpose.msra.mxu0 %v6251_v46  ;;  %2670 = vmatpush2.xpose.msra.mxu1 %v6124_v24  ;;  %v6260_v24 = vld [vmem:[#allocation87_spill] sm:$0xff] }
 0x2ea   :  { %2521 = vmatprep.subr.mxu0 %v6253_v41  ;;  %2672 = vmatprep.subr.mxu1 %v6126_v18  ;;  %v6261_v4 = vand.u32 4294901760, %v6260_v24  ;;  %v6262_v18 = vand.u32 4294901760, %v4760_v21 }
 0x2ed   :  { %2525 = vmatpush2.xpose.msra.mxu0 %v6255_v29  ;;  %2674 = vmatpush2.xpose.msra.mxu1 %v6128_v48  ;;  %v6263_v48 = vand.u32 4294901760, %v4775_v33  ;;  %v6270_v33 = vand.u32 4294901760, %v4819_v54  ;;  %v677_v54 = vpop.f32.mrf.mxu1 }
 0x2ee   :  { %2529 = vmatprep.subr.mxu0 %v6257_v3  ;;  %2676 = vmatprep.subr.mxu1 %v6130_v53  ;;  %v6264_v53 = vand.u32 4294901760, %v4785_v39  ;;  %v2729_v3 = vsub.s32 0, %v2728_v57 }
 0x2ef   :  { %v679_v6 = vpop.f32.mrf.mxu1 }
 0x2f1   :  { %2533 = vmatpush2.xpose.msra.mxu0 %v6259_v27  ;;  %2678 = vmatpush2.xpose.msra.mxu1 %v6131_v38  ;;  %v6266_v38 = vld [vmem:[#allocation79_spill] sm:$0xff]  ;;  %v1021_v23 = vpop.f32.mrf.mxu1 }
 0x2f2   :  { %2537 = vmatprep.subr.mxu0 %v6261_v4  ;;  %2680 = vmatprep.subr.mxu1 %v6132_v45  ;;  %v6267_v20 = vand.u32 4294901760, %v6266_v38  ;;  %v6268_v45 = vld [vmem:[#allocation82_spill] sm:$0xff] }
 0x2f3   :  { %v6269_v21 = vand.u32 4294901760, %v6268_v45  ;;  %v1023_v58 = vpop.f32.mrf.mxu1  ;;  %v2725_v4 = vld [vmem:[%s5185_s2] sm:$0xf] }
 0x2f4   :  { %v2734_v45 = vrot.slane %v2725_v4, %v2733_v44 }
 0x2f5   :  { %2541 = vmatpush2.xpose.msra.mxu0 %v6262_v18  ;;  %2682 = vmatpush2.xpose.msra.mxu1 %v6133_v43  ;;  %v6271_v43 = vld [vmem:[#allocation85_spill] sm:$0xff]  ;;  %v1423_v12 = vpop.f32.mrf.mxu1  ;;  %v2737_v18 = vsub.s32 2, %v2728_v57 }
 0x2f6   :  { %2545 = vmatprep.subr.mxu0 %v6263_v48  ;;  %2684 = vmatprep.subr.mxu1 %v6134_v56  ;;  %v6272_v56 = vld [vmem:[#allocation93_spill] sm:$0xff]  ;;  %v2741_v48 = vsub.s32 3, %v2728_v57 }
 0x2f7   :  { %v6273_v39 = vand.u32 4294901760, %v6272_v56  ;;  %v1425_v1 = vpop.f32.mrf.mxu1  ;;  %v2738_v56 = vrot.slane %v2725_v4, %v2737_v18 }
 0x2f9   :  { %2549 = vmatpush2.xpose.msra.mxu0 %v6264_v53  ;;  %2686 = vmatpush2.xpose.msra.mxu1 %v6265_v62  ;;  %v1961_v50 = vpop.f32.mrf.mxu1 }
 0x2fa   :  { %2553 = vmatprep.subr.mxu0 %v6267_v20  ;;  %2688 = vmatprep.subr.mxu1 %v6136_v60  ;;  %v284_v60 = vpop.f32.mrf.mxu0 }
 0x2fb   :  { %v678_v31 = vadd.f32 %v677_v54, %v284_v60  ;;  %v1963_v15 = vpop.f32.mrf.mxu1 }
 0x2fd   :  { %2557 = vmatpush2.xpose.msra.mxu0 %v6269_v21  ;;  %2690 = vmatpush2.xpose.msra.mxu1 %v6137_v7  ;;  %v286_v7 = vpop.f32.mrf.mxu0 }
 0x2fe   :  { %2561 = vmatprep.subr.mxu0 %v6270_v33  ;;  %2692 = vmatprep.subr.mxu1 %v6271_v43  ;;  %v2730_v33 = vrot.slane %v2725_v4, %v2729_v3 }
 0x2ff   :  { %v880_v13 = vpop.f32.mrf.mxu0 }
 0x300   :  { %v881_v55 = vadd.f32 %v880_v13, %v678_v31 }
 0x301   :  { %2565 = vmatpush2.xpose.msra.mxu0 %v6273_v39  ;;  %2694 = vmatpush2.xpose.msra.mxu1 %v4765_v5  ;;  %v882_v37 = vpop.f32.mrf.mxu0 }
 0x302   :  { %2696 = vmatprep.subr.mxu1 %v6274_v30  ;;  %v1022_v32 = vadd.f32 %v1021_v23, %v881_v55  ;;  %v2742_v30 = vrot.slane %v2725_v4, %v2741_v48 }
 0x303   :  { %v1286_v5 = vpop.f32.mrf.mxu0 }
 0x304   :  { %2569 = vmatmul.mubr.f32.vlgmr.msra.gmra.mxu0 %v6275_v61  ;;  %v1287_v34 = vadd.f32 %v1286_v5, %v1022_v32  ;;  %v2752_v5 = vand.u32 127, %v2727_v42 }
 0x305   :  { %2698 = vmatpush2.xpose.msra.mxu1 %v4787_v2  ;;  %v1288_v19 = vpop.f32.mrf.mxu0 }
 0x306   :  { %2700 = vmatprep.subr.mxu1 %v4794_v22  ;;  %v680_v22 = vadd.f32 %v679_v6, %v286_v7  ;;  %v1424_v49 = vadd.f32 %v1423_v12, %v1287_v34  ;;  %v2755_v12 = vadd.s32 384, %v2752_v5 }
 0x307   :  { %v1568_v28 = vpop.f32.mrf.mxu0 }
 0x308   :  { %v883_v17 = vadd.f32 %v882_v37, %v680_v22  ;;  %v1962_v14 = vadd.f32 %v1961_v50, %v1568_v28  ;;  %v2717_v29 = vmul.f32 2.0, %v1424_v49  ;;  %v2765_v28 = vcvt.s32.f32 %v2752_v5 }
 0x309   :  { %2702 = vmatpush2.xpose.msra.mxu1 %v4810_v25  ;;  %v1570_v2 = vpop.f32.mrf.mxu0  ;;  %v2768_v50 = vcvt.s32.f32 %v2755_v12 }
 0x30a   :  { %v1024_v0 = vadd.f32 %v1023_v58, %v883_v17  ;;  %v1964_v11 = vadd.f32 %v1963_v15, %v1570_v2  ;;  %v2721_v21 = vsub.f32 %v2716_v52, %v2717_v29  ;;  %v2753_v58 = vadd.s32 128, %v2752_v5 }
 0x30c   :  { %2706 = vmatmul.mubr.f32.vlgmr.msra.gmra.mxu1 %v6275_v61  ;;  %v1289_v26 = vadd.f32 %v1288_v19, %v1024_v0  ;;  %v2747_v13 = vadd.f32 %v2730_v33, %v2721_v21  ;;  %v2754_v19 = vadd.s32 256, %v2752_v5 }
 0x30e   :  { %v1426_v8 = vadd.f32 %v1425_v1, %v1289_v26  ;;  %v2766_v1 = vcvt.s32.f32 %v2753_v58  ;;  %v2767_v2 = vcvt.s32.f32 %v2754_v19 }
 0x310   :  { %v2718_v46 = vmul.f32 2.0, %v1426_v8 }
 0x312   :  { %v2722_v62 = vsub.f32 %v2716_v52, %v2718_v46 }
 0x314   :  { %v2748_v60 = vadd.f32 %v2734_v45, %v2722_v62 }
 0x316   :  { %v2756_v6 = vmin.f32 %v2747_v13, %v2748_v60 }
 0x344   :  { %v2164_v25 = vpop.f32.mrf.mxu0 }
 0x345   :  { %v2165_v35 = vadd.f32 %v2164_v25, %v1962_v14 }
 0x346   :  { %v2166_v9 = vpop.f32.mrf.mxu0 }
 0x347   :  { %v2167_v36 = vadd.f32 %v2166_v9, %v1964_v11 }
 0x34c   :  { %v2305_v10 = vpop.f32.mrf.mxu1 }
 0x34d   :  { %v2306_v51 = vadd.f32 %v2305_v10, %v2165_v35 }
 0x34e   :  { %v2307_v59 = vpop.f32.mrf.mxu1 }
 0x34f   :  { %v2308_v40 = vadd.f32 %v2307_v59, %v2167_v36 }
 0x3c4   :  { %v2570_v16 = vpop.f32.mrf.mxu0 }
 0x3c5   :  { %v2571_v41 = vadd.f32 %v2570_v16, %v2306_v51 }
 0x3c6   :  { %v2572_v63 = vpop.f32.mrf.mxu0 }
 0x3c7   :  { %v2573_v27 = vadd.f32 %v2572_v63, %v2308_v40 }
 0x3cc   :  { %v2707_v47 = vpop.f32.mrf.mxu1 }
 0x3cd   :  { %v2708_v24 = vadd.f32 %v2707_v47, %v2571_v41 }
 0x3ce   :  { %v2709_v53 = vpop.f32.mrf.mxu1 }
 0x3cf   :  { %v2719_v38 = vmul.f32 2.0, %v2708_v24  ;;  %v2710_v20 = vadd.f32 %v2709_v53, %v2573_v27 }
 0x3d1   :  { %v2723_v43 = vsub.f32 %v2716_v52, %v2719_v38  ;;  %v2720_v39 = vmul.f32 2.0, %v2710_v20 }
 0x3d3   :  { %v2724_v61 = vsub.f32 %v2716_v52, %v2720_v39  ;;  %v2749_v7 = vadd.f32 %v2738_v56, %v2723_v43 }
 0x3d5   :  { %v2750_v54 = vadd.f32 %v2742_v30, %v2724_v61 }
 0x3d7   :  { %v2757_v37 = vmin.f32 %v2749_v7, %v2750_v54 }
 0x3d9   :  { %v2758_v23 = vmin.f32 %v2756_v6, %v2757_v37 }
 0x3db   :  { %2759 = vmin.xlane.f32.xlu0 %v2758_v23 }
 0x464   :  { %v2760_v22 = vpop.xlane.xlu0 %2759 }
 0x465   :  { %vm2761_vm0 = vcmp.eq.f32.partialorder %v2747_v13, %v2760_v22  ;;  %vm2762_vm1 = vcmp.eq.f32.partialorder %v2748_v60, %v2760_v22  ;;  %vm2763_vm2 = vcmp.eq.f32.partialorder %v2749_v7, %v2760_v22  ;;  %vm2764_vm3 = vcmp.eq.f32.partialorder %v2750_v54, %v2760_v22 }
 0x466   :  { %v2769_v31 = vsel %vm2761_vm0, %v2765_v28, 512.0  ;;  %v2770_v25 = vsel %vm2762_vm1, %v2766_v1, 512.0  ;;  %v2771_v17 = vsel %vm2763_vm2, %v2767_v2, 512.0  ;;  %v2772_v55 = vsel %vm2764_vm3, %v2768_v50, 512.0 }
 0x467   :  { %v2773_v15 = vmin.f32 %v2769_v31, %v2770_v25  ;;  %v2774_v0 = vmin.f32 %v2771_v17, %v2772_v55 }
 0x469   :  { %v2775_v32 = vmin.f32 %v2773_v15, %v2774_v0 }
 0x46b   :  { %2776 = vmin.xlane.f32.xlu1 %v2775_v32 }
 0x4f4   :  { %v2777_v9 = vpop.xlane.xlu1 %2776 }
 0x4f5   :  { %v2785_v10 = vtrunc.f32 %v2777_v9 }
 0x4f7   :  { %v2786_v42 = vcvt.f32.s32 %v2785_v10 }
 0x4f9   :  { %2780 = vst.msk [vmem:[%s5186_s3] sm:$0xff] %vm2779_vm4, %v2786_v42 }

// kernel: vqgan_forward.11
= control target key start
LH: loop header
LB: loop body
LE: loop exit
PB: predicated region body
PF: predicated region fallthrough
CT: control target
= control target key end

     0   :  { %s2189_s0 = inlined_call_operand.vmem [shape: bf16[32,1024], index: 0, kind: input, shape index: {}]   ;;  %s2190_s1 = inlined_call_operand.vmem [shape: bf16[1024,1024], index: 1, kind: input, shape index: {}]   ;;  %s2191_s2 = inlined_call_operand.vmem [shape: f32[1,1024], index: 2, kind: input, shape index: {}]   ;;  %s2192_s3 = inlined_call_operand.vmem [shape: bf16[32,1024], index: 3, kind: output, shape index: {}]  }
   0x1   :  { %2194 = sst [smem:[#allocation7_spill]] %s2189_s0 }
   0x2   :  { %2195 = sst [smem:[#allocation8_spill]] %s2190_s1 }
   0x3   :  { %s1799_s12 = smov 0   ;;  %s1801_s13 = smov 0  }
   0x4   :  { %s1803_s14 = smov 0   ;;  %s1805_s15 = smov 0  }
   0x5   :  { %s1807_s16 = smov 0   ;;  %s1809_s17 = smov 0  }
   0x6   :  { %s1811_s18 = smov 0   ;;  %s1813_s19 = smov 0  }
   0x7   :  { %s1815_s20 = smov 0   ;;  %s1817_s21 = smov 0  }
   0x8   :  { %s1819_s22 = smov 0  }
   0x9 LB: > { %s1386_s23 = sadd.s32 4294967295, %s1776_s22   ;;  %s25_s24 = sadd.s32 1, %s1768_s20  ;;  %s1776_s22 = sphi %s1819_s22, %s13_s22   ;;  %s1772_s21 = sphi %s1817_s21, %s2212_s21   ;;  %s1768_s20 = sphi %s1815_s20, %s2211_s20   ;;  %s1764_s19 = sphi %s1813_s19, %s2210_s19   ;;  %s1760_s18 = sphi %s1811_s18, %s2209_s18   ;;  %s1756_s17 = sphi %s1809_s17, %s2208_s17   ;;  %s1752_s16 = sphi %s1807_s16, %s2207_s16   ;;  %s1748_s15 = sphi %s1805_s15, %s2206_s15   ;;  %s1744_s14 = sphi %s1803_s14, %s2205_s14   ;;  %s1740_s13 = sphi %s1801_s13, %s2204_s13   ;;  %s1736_s12 = sphi %s1799_s12, %s2203_s12  }
   0xa   : > { %p26_p0 = scmp.ge.s32.totalorder %s25_s24, 2  ;;  %s28_s25 = sadd.s32 1, %s1772_s21 }
   0xb   : > { %s41_s26 = sadd.s32 1, %s1756_s17  ;;  %p48_p1 = scmp.ne.s32.totalorder %s1756_s17, %s1752_s16 }
   0xc   : > { %s2214_s24 = smov (%p26_p0, %s25_s24), 0  ;;  %s2216_s25 = smov (!%p26_p0, %s28_s25), %s1772_s21 }
   0xd   : > { %s37_s27 = ssub.s32 %s1768_s20, %s2214_s24  ;;  %p49_p2 = scmp.eq.s32.totalorder %s1776_s22, 0 }
   0xe   : > { %p30_p3 = scmp.ge.s32.totalorder %s2216_s25, 4  ;;  %p39_p4 = scmp.eq.s32.totalorder %s37_s27, 0 }
   0xf   : > { %p1866_p5 = por %p49_p2, %p48_p1  ;;  %s69_s29 = sadd.s32 1, %s1748_s15 }
  0x10   : > { %s2218_s25 = smov (%p30_p3, %s2216_s25), 0  ;;  %p76_p6 = scmp.ne.s32.totalorder %s1748_s15, %s1744_s14 }
  0x11   : > { %2197 = sst [smem:[#allocation6_spill]] %s2218_s25  ;;  %s65_s4 = ssub.s32 %s1772_s21, %s2218_s25 }
  0x12   : > { %s1874_s30 = scalar_select %p39_p4, %s1756_s17, %s41_s26  }
  0x13   : > { %s66_s5 = sor.u32 %s65_s4, %s37_s27  ;;  %p121_p7 = scmp.eq.s32.totalorder %s65_s4, 0 }
  0x14   : > { %p67_p8 = scmp.eq.s32.totalorder %s66_s5, 0  ;;  %p1880_p9 = por %p76_p6, %p49_p2 }
  0x15   : > { %s123_s7 = sadd.s32 1, %s1740_s13  ;;  %p133_p10 = scmp.ne.s32.totalorder %s1740_s13, %s1736_s12 }
  0x16   : > { %s1888_s8 = scalar_select %p67_p8, %s1748_s15, %s69_s29  }
  0x17   : > { %s1891_s9 = scalar_select %p121_p7, %s1740_s13, %s123_s7  }
  0x18   : > { %p134_p11 = scmp.eq.s32.totalorder %s1386_s23, 7  ;;  %p1389_p13 = scmp.ge.s32.totalorder %s1776_s22, 8 }
  0x1a   : > { %p1893_p12 = por %p134_p11, %p133_p10  ;;  %156 = sbr.rel (%p1389_p13) target bundleno = 119 (0x77), region = 16 }
  0x1f   : > { %159 = sbr.rel (!%p1866_p5) target bundleno = 45 (0x2d), region = 20  ;;  %s161_s11 = sand.u32 (%p1866_p5), 1, %s1756_s17  }
  0x20   : > { %s1486_s26 = sshll.u32 (%p1866_p5), %s1768_s20, 4  ;;  %s1390_s27 = sshll.u32 (%p1866_p5), %s161_s11, 6 }
  0x21   : > { %s2200_s0 = sld [smem:[#allocation7_spill]] (%p1866_p5)  ;;  %s163_s23 = scalar_lea.vmem (%p1866_p5), [#allocation3], %s1390_s27 }
  0x27   : > { %s169_s5 = scalar_lea.vmem %s2200_s0, %s1486_s26 }
  0x28   : > { %v182_v0 = vld [vmem:[%s169_s5] sm:$0xff]  ;;  %v184_v1 = vld [vmem:[%s169_s5 + $0x8] sm:$0xff] }
  0x29   : > { %v186_v2 = vld [vmem:[%s169_s5 + $0x20] sm:$0xff]  ;;  %183 = vst [vmem:[%s163_s23] sm:$0xff] %v182_v0  ;;  %185 = vst [vmem:[%s163_s23 + $0x8] sm:$0xff] %v184_v1  ;;  %v188_v3 = vld [vmem:[%s169_s5 + $0x28] sm:$0xff] }
  0x2a   : > { %187 = vst [vmem:[%s163_s23 + $0x10] sm:$0xff] %v186_v2  ;;  %v190_v4 = vld [vmem:[%s169_s5 + $0x40] sm:$0xff]  ;;  %v192_v5 = vld [vmem:[%s169_s5 + $0x48] sm:$0xff]  ;;  %189 = vst [vmem:[%s163_s23 + $0x18] sm:$0xff] %v188_v3 }
  0x2b   : > { %191 = vst [vmem:[%s163_s23 + $0x20] sm:$0xff] %v190_v4  ;;  %193 = vst [vmem:[%s163_s23 + $0x28] sm:$0xff] %v192_v5  ;;  %v194_v6 = vld [vmem:[%s169_s5 + $0x60] sm:$0xff]  ;;  %v196_v7 = vld [vmem:[%s169_s5 + $0x68] sm:$0xff] }
  0x2c   : > { %195 = vst [vmem:[%s163_s23 + $0x30] sm:$0xff] %v194_v6  ;;  %197 = vst [vmem:[%s163_s23 + $0x38] sm:$0xff] %v196_v7 }
  0x2d PF: > { %203 = sbr.rel (!%p1880_p9) target bundleno = 119 (0x77), region = 43  ;;  %s205_s28 = sand.u32 (%p1880_p9), 1, %s1748_s15  }
  0x2e   : > { %s1395_s7 = sshll.u32 (%p1880_p9), %s1772_s21, 1  ;;  %s1393_s11 = sshll.u32 (%p1880_p9), %s205_s28, 9 }
  0x2f   : > { %s1487_s26 = sshll.u32 (%p1880_p9), %s1768_s20, 9  ;;  %s2201_s1 = sld [smem:[#allocation8_spill]] (%p1880_p9) }
  0x30   : > { %s211_s27 = sadd.s32 (%p1880_p9), %s1487_s26, %s1395_s7  ;;  %s1918_s6 = scalar_lea.vmem (%p1880_p9), [#allocation4], %s1393_s11 }
  0x31   : > { %s1397_s29 = sshll.u32 (%p1880_p9), %s211_s27, 2 }
  0x35   : > { %s1913_s25 = scalar_lea.vmem %s2201_s1, %s1397_s29 }
  0x36   : > { %v368_v8 = vld [vmem:[%s1913_s25] sm:$0xff] }
  0x37   : > { %v370_v9 = vld [vmem:[%s1913_s25 + $0x20] sm:$0xff]  ;;  %369 = vst [vmem:[%s1918_s6] sm:$0xff] %v368_v8 }
  0x38   : > { %v372_v10 = vld [vmem:[%s1913_s25 + $0x40] sm:$0xff]  ;;  %371 = vst [vmem:[%s1918_s6 + $0x8] sm:$0xff] %v370_v9 }
  0x39   : > { %373 = vst [vmem:[%s1918_s6 + $0x10] sm:$0xff] %v372_v10  ;;  %v374_v11 = vld [vmem:[%s1913_s25 + $0x60] sm:$0xff] }
  0x3a   : > { %v376_v12 = vld [vmem:[%s1913_s25 + $0x80] sm:$0xff]  ;;  %375 = vst [vmem:[%s1918_s6 + $0x18] sm:$0xff] %v374_v11 }
  0x3b   : > { %v378_v13 = vld [vmem:[%s1913_s25 + $0xa0] sm:$0xff]  ;;  %377 = vst [vmem:[%s1918_s6 + $0x20] sm:$0xff] %v376_v12 }
  0x3c   : > { %379 = vst [vmem:[%s1918_s6 + $0x28] sm:$0xff] %v378_v13  ;;  %v380_v14 = vld [vmem:[%s1913_s25 + $0xc0] sm:$0xff] }
  0x3d   : > { %v382_v15 = vld [vmem:[%s1913_s25 + $0xe0] sm:$0xff]  ;;  %381 = vst [vmem:[%s1918_s6 + $0x30] sm:$0xff] %v380_v14 }
  0x3e   : > { %v384_v16 = vld [vmem:[%s1913_s25 + $0x100] sm:$0xff]  ;;  %383 = vst [vmem:[%s1918_s6 + $0x38] sm:$0xff] %v382_v15 }
  0x3f   : > { %385 = vst [vmem:[%s1918_s6 + $0x40] sm:$0xff] %v384_v16  ;;  %v386_v17 = vld [vmem:[%s1913_s25 + $0x120] sm:$0xff] }
  0x40   : > { %v388_v18 = vld [vmem:[%s1913_s25 + $0x140] sm:$0xff]  ;;  %387 = vst [vmem:[%s1918_s6 + $0x48] sm:$0xff] %v386_v17 }
  0x41   : > { %v390_v19 = vld [vmem:[%s1913_s25 + $0x160] sm:$0xff]  ;;  %389 = vst [vmem:[%s1918_s6 + $0x50] sm:$0xff] %v388_v18 }
  0x42   : > { %391 = vst [vmem:[%s1918_s6 + $0x58] sm:$0xff] %v390_v19  ;;  %v392_v20 = vld [vmem:[%s1913_s25 + $0x180] sm:$0xff] }
  0x43   : > { %v394_v21 = vld [vmem:[%s1913_s25 + $0x1a0] sm:$0xff]  ;;  %393 = vst [vmem:[%s1918_s6 + $0x60] sm:$0xff] %v392_v20 }
  0x44   : > { %v396_v22 = vld [vmem:[%s1913_s25 + $0x1c0] sm:$0xff]  ;;  %395 = vst [vmem:[%s1918_s6 + $0x68] sm:$0xff] %v394_v21 }
  0x45   : > { %397 = vst [vmem:[%s1918_s6 + $0x70] sm:$0xff] %v396_v22  ;;  %v398_v23 = vld [vmem:[%s1913_s25 + $0x1e0] sm:$0xff] }
  0x46   : > { %v400_v24 = vld [vmem:[%s1913_s25 + $0x200] sm:$0xff]  ;;  %399 = vst [vmem:[%s1918_s6 + $0x78] sm:$0xff] %v398_v23 }
  0x47   : > { %v402_v25 = vld [vmem:[%s1913_s25 + $0x220] sm:$0xff]  ;;  %401 = vst [vmem:[%s1918_s6 + $0x80] sm:$0xff] %v400_v24 }
  0x48   : > { %403 = vst [vmem:[%s1918_s6 + $0x88] sm:$0xff] %v402_v25  ;;  %v404_v26 = vld [vmem:[%s1913_s25 + $0x240] sm:$0xff] }
  0x49   : > { %v406_v27 = vld [vmem:[%s1913_s25 + $0x260] sm:$0xff]  ;;  %405 = vst [vmem:[%s1918_s6 + $0x90] sm:$0xff] %v404_v26 }
  0x4a   : > { %v408_v28 = vld [vmem:[%s1913_s25 + $0x280] sm:$0xff]  ;;  %407 = vst [vmem:[%s1918_s6 + $0x98] sm:$0xff] %v406_v27 }
  0x4b   : > { %409 = vst [vmem:[%s1918_s6 + $0xa0] sm:$0xff] %v408_v28  ;;  %v410_v29 = vld [vmem:[%s1913_s25 + $0x2a0] sm:$0xff] }
  0x4c   : > { %v412_v30 = vld [vmem:[%s1913_s25 + $0x2c0] sm:$0xff]  ;;  %411 = vst [vmem:[%s1918_s6 + $0xa8] sm:$0xff] %v410_v29 }
  0x4d   : > { %v414_v31 = vld [vmem:[%s1913_s25 + $0x2e0] sm:$0xff]  ;;  %413 = vst [vmem:[%s1918_s6 + $0xb0] sm:$0xff] %v412_v30 }
  0x4e   : > { %415 = vst [vmem:[%s1918_s6 + $0xb8] sm:$0xff] %v414_v31  ;;  %v416_v32 = vld [vmem:[%s1913_s25 + $0x300] sm:$0xff] }
  0x4f   : > { %v418_v33 = vld [vmem:[%s1913_s25 + $0x320] sm:$0xff]  ;;  %417 = vst [vmem:[%s1918_s6 + $0xc0] sm:$0xff] %v416_v32 }
  0x50   : > { %v420_v34 = vld [vmem:[%s1913_s25 + $0x340] sm:$0xff]  ;;  %419 = vst [vmem:[%s1918_s6 + $0xc8] sm:$0xff] %v418_v33 }
  0x51   : > { %421 = vst [vmem:[%s1918_s6 + $0xd0] sm:$0xff] %v420_v34  ;;  %v422_v35 = vld [vmem:[%s1913_s25 + $0x360] sm:$0xff] }
  0x52   : > { %v424_v36 = vld [vmem:[%s1913_s25 + $0x380] sm:$0xff]  ;;  %423 = vst [vmem:[%s1918_s6 + $0xd8] sm:$0xff] %v422_v35 }
  0x53   : > { %v426_v37 = vld [vmem:[%s1913_s25 + $0x3a0] sm:$0xff]  ;;  %425 = vst [vmem:[%s1918_s6 + $0xe0] sm:$0xff] %v424_v36 }
  0x54   : > { %427 = vst [vmem:[%s1918_s6 + $0xe8] sm:$0xff] %v426_v37  ;;  %v428_v38 = vld [vmem:[%s1913_s25 + $0x3c0] sm:$0xff] }
  0x55   : > { %v430_v39 = vld [vmem:[%s1913_s25 + $0x3e0] sm:$0xff]  ;;  %429 = vst [vmem:[%s1918_s6 + $0xf0] sm:$0xff] %v428_v38 }
  0x56   : > { %v432_v40 = vld [vmem:[%s1913_s25 + $0x400] sm:$0xff]  ;;  %431 = vst [vmem:[%s1918_s6 + $0xf8] sm:$0xff] %v430_v39 }
  0x57   : > { %433 = vst [vmem:[%s1918_s6 + $0x100] sm:$0xff] %v432_v40  ;;  %v434_v41 = vld [vmem:[%s1913_s25 + $0x420] sm:$0xff] }
  0x58   : > { %v436_v42 = vld [vmem:[%s1913_s25 + $0x440] sm:$0xff]  ;;  %435 = vst [vmem:[%s1918_s6 + $0x108] sm:$0xff] %v434_v41 }
  0x59   : > { %v438_v43 = vld [vmem:[%s1913_s25 + $0x460] sm:$0xff]  ;;  %437 = vst [vmem:[%s1918_s6 + $0x110] sm:$0xff] %v436_v42 }
  0x5a   : > { %439 = vst [vmem:[%s1918_s6 + $0x118] sm:$0xff] %v438_v43  ;;  %v440_v44 = vld [vmem:[%s1913_s25 + $0x480] sm:$0xff] }
  0x5b   : > { %v442_v45 = vld [vmem:[%s1913_s25 + $0x4a0] sm:$0xff]  ;;  %441 = vst [vmem:[%s1918_s6 + $0x120] sm:$0xff] %v440_v44 }
  0x5c   : > { %v444_v46 = vld [vmem:[%s1913_s25 + $0x4c0] sm:$0xff]  ;;  %443 = vst [vmem:[%s1918_s6 + $0x128] sm:$0xff] %v442_v45 }
  0x5d   : > { %445 = vst [vmem:[%s1918_s6 + $0x130] sm:$0xff] %v444_v46  ;;  %v446_v47 = vld [vmem:[%s1913_s25 + $0x4e0] sm:$0xff] }
  0x5e   : > { %v448_v48 = vld [vmem:[%s1913_s25 + $0x500] sm:$0xff]  ;;  %447 = vst [vmem:[%s1918_s6 + $0x138] sm:$0xff] %v446_v47 }
  0x5f   : > { %v450_v49 = vld [vmem:[%s1913_s25 + $0x520] sm:$0xff]  ;;  %449 = vst [vmem:[%s1918_s6 + $0x140] sm:$0xff] %v448_v48 }
  0x60   : > { %451 = vst [vmem:[%s1918_s6 + $0x148] sm:$0xff] %v450_v49  ;;  %v452_v50 = vld [vmem:[%s1913_s25 + $0x540] sm:$0xff] }
  0x61   : > { %v454_v51 = vld [vmem:[%s1913_s25 + $0x560] sm:$0xff]  ;;  %453 = vst [vmem:[%s1918_s6 + $0x150] sm:$0xff] %v452_v50 }
  0x62   : > { %v456_v52 = vld [vmem:[%s1913_s25 + $0x580] sm:$0xff]  ;;  %455 = vst [vmem:[%s1918_s6 + $0x158] sm:$0xff] %v454_v51 }
  0x63   : > { %457 = vst [vmem:[%s1918_s6 + $0x160] sm:$0xff] %v456_v52  ;;  %v458_v53 = vld [vmem:[%s1913_s25 + $0x5a0] sm:$0xff] }
  0x64   : > { %v460_v54 = vld [vmem:[%s1913_s25 + $0x5c0] sm:$0xff]  ;;  %459 = vst [vmem:[%s1918_s6 + $0x168] sm:$0xff] %v458_v53 }
  0x65   : > { %v462_v55 = vld [vmem:[%s1913_s25 + $0x5e0] sm:$0xff]  ;;  %461 = vst [vmem:[%s1918_s6 + $0x170] sm:$0xff] %v460_v54 }
  0x66   : > { %463 = vst [vmem:[%s1918_s6 + $0x178] sm:$0xff] %v462_v55  ;;  %v464_v56 = vld [vmem:[%s1913_s25 + $0x600] sm:$0xff] }
  0x67   : > { %v466_v57 = vld [vmem:[%s1913_s25 + $0x620] sm:$0xff]  ;;  %465 = vst [vmem:[%s1918_s6 + $0x180] sm:$0xff] %v464_v56 }
  0x68   : > { %v468_v58 = vld [vmem:[%s1913_s25 + $0x640] sm:$0xff]  ;;  %467 = vst [vmem:[%s1918_s6 + $0x188] sm:$0xff] %v466_v57 }
  0x69   : > { %469 = vst [vmem:[%s1918_s6 + $0x190] sm:$0xff] %v468_v58  ;;  %v470_v59 = vld [vmem:[%s1913_s25 + $0x660] sm:$0xff] }
  0x6a   : > { %v472_v60 = vld [vmem:[%s1913_s25 + $0x680] sm:$0xff]  ;;  %471 = vst [vmem:[%s1918_s6 + $0x198] sm:$0xff] %v470_v59 }
  0x6b   : > { %v474_v61 = vld [vmem:[%s1913_s25 + $0x6a0] sm:$0xff]  ;;  %473 = vst [vmem:[%s1918_s6 + $0x1a0] sm:$0xff] %v472_v60 }
  0x6c   : > { %475 = vst [vmem:[%s1918_s6 + $0x1a8] sm:$0xff] %v474_v61  ;;  %v476_v62 = vld [vmem:[%s1913_s25 + $0x6c0] sm:$0xff] }
  0x6d   : > { %v478_v63 = vld [vmem:[%s1913_s25 + $0x6e0] sm:$0xff]  ;;  %477 = vst [vmem:[%s1918_s6 + $0x1b0] sm:$0xff] %v476_v62 }
  0x6e   : > { %v480_v0 = vld [vmem:[%s1913_s25 + $0x700] sm:$0xff]  ;;  %479 = vst [vmem:[%s1918_s6 + $0x1b8] sm:$0xff] %v478_v63 }
  0x6f   : > { %481 = vst [vmem:[%s1918_s6 + $0x1c0] sm:$0xff] %v480_v0  ;;  %v482_v1 = vld [vmem:[%s1913_s25 + $0x720] sm:$0xff] }
  0x70   : > { %v484_v2 = vld [vmem:[%s1913_s25 + $0x740] sm:$0xff]  ;;  %483 = vst [vmem:[%s1918_s6 + $0x1c8] sm:$0xff] %v482_v1 }
  0x71   : > { %v486_v3 = vld [vmem:[%s1913_s25 + $0x760] sm:$0xff]  ;;  %485 = vst [vmem:[%s1918_s6 + $0x1d0] sm:$0xff] %v484_v2 }
  0x72   : > { %487 = vst [vmem:[%s1918_s6 + $0x1d8] sm:$0xff] %v486_v3  ;;  %v488_v4 = vld [vmem:[%s1913_s25 + $0x780] sm:$0xff] }
  0x73   : > { %v490_v5 = vld [vmem:[%s1913_s25 + $0x7a0] sm:$0xff]  ;;  %489 = vst [vmem:[%s1918_s6 + $0x1e0] sm:$0xff] %v488_v4 }
  0x74   : > { %v492_v6 = vld [vmem:[%s1913_s25 + $0x7c0] sm:$0xff]  ;;  %491 = vst [vmem:[%s1918_s6 + $0x1e8] sm:$0xff] %v490_v5 }
  0x75   : > { %493 = vst [vmem:[%s1918_s6 + $0x1f0] sm:$0xff] %v492_v6  ;;  %v494_v7 = vld [vmem:[%s1913_s25 + $0x7e0] sm:$0xff] }
  0x76   : > { %495 = vst [vmem:[%s1918_s6 + $0x1f8] sm:$0xff] %v494_v7 }
  0x77 PF: > { %p1398_p0 = scmp.ge.s32.totalorder %s1776_s22, 1  ;;  %p508_p1 = scmp.lt.s32.totalorder %s1776_s22, 9 }
  0x79   : > { %p509_p2 = pnand %p1398_p0, %p508_p1 }
  0x7a   : > { %s515_s0 = sand.u32 (!%p509_p2), 1, %s1752_s16   ;;  %s522_s5 = sand.u32 (!%p509_p2), 1, %s1744_s14  }
  0x7b   : > { %512 = sbr.rel (%p509_p2) target bundleno = 447 (0x1bf), region = 85  ;;  %s1399_s23 = sshll.u32 (!%p509_p2), %s515_s0, 6 }
  0x7c   : > { %s1400_s28 = sshll.u32 (!%p509_p2), %s522_s5, 9  ;;  %s549_s7 = sand.u32 (!%p509_p2), 1, %s1736_s12  }
  0x7d   : > { %s1402_s11 = sshll.u32 (!%p509_p2), %s1764_s19, 1  ;;  %s1401_s25 = sshll.u32 (!%p509_p2), %s549_s7, 5 }
  0x7e   : > { %p557_p3 = scmp.lt.s32.totalorder (!%p509_p2), %s1402_s11, 7  ;;  %s2057_s4 = scalar_lea.vmem (!%p509_p2), [#allocation3], %s1399_s23 }
  0x7f   : > { %s2059_s6 = scalar_lea.vmem (!%p509_p2), [#allocation4], %s1400_s28  ;;  %s2061_s1 = scalar_lea.vmem (!%p509_p2), [#allocation5], %s1401_s25 }
  0x80   : > { %s2220_s11 = smov (!%p557_p3, %s1402_s11), 7  ;;  %p1403_p4 = scmp.ne.s32.totalorder %s1760_s18, 0 }
  0x81   : > { %s559_s29 = scalar_lea.vmem %s2191_s2, %s2220_s11 }
  0x82   : > { %566 = sbr.rel (%p1403_p4) target bundleno = 140 (0x8c), region = 97 }
  0x87   : > { %v1778_v8 = vmov 0.0  }
  0x88   : > { %567 = vst [vmem:[#allocation2 + $0x30] sm:$0xff] %v1778_v8  ;;  %568 = vst [vmem:[#allocation2] sm:$0xff] %v1778_v8 }
  0x89   : > { %569 = vst [vmem:[#allocation2 + $0x18] sm:$0xff] %v1778_v8  ;;  %570 = vst [vmem:[#allocation2 + $0x10] sm:$0xff] %v1778_v8 }
  0x8a   : > { %571 = vst [vmem:[#allocation2 + $0x8] sm:$0xff] %v1778_v8  ;;  %572 = vst [vmem:[#allocation2 + $0x20] sm:$0xff] %v1778_v8 }
  0x8b   : > { %573 = vst [vmem:[#allocation2 + $0x28] sm:$0xff] %v1778_v8  ;;  %574 = vst [vmem:[#allocation2 + $0x38] sm:$0xff] %v1778_v8 }
  0x8c PF: > { %v1582_v9 = vld [vmem:[%s2059_s6 + $0x74] ss:$8 sps:$4 sm:$0xff]   ;;  %v1586_v11 = vld [vmem:[%s2059_s6 + $0x70] ss:$8 sps:$4 sm:$0xff]   ;;  %v1588_v13 = vld [vmem:[%s2059_s6 + $0x64] ss:$8 sps:$4 sm:$0xff]  }
  0x8d   : > { %v1584_v10 = vld [vmem:[%s2059_s6 + $0x174] ss:$8 sps:$4 sm:$0xff]   ;;  %1015 = vmatprep.subr.bf16.mxu0 %v1582_v9  ;;  %v1587_v12 = vld [vmem:[%s2059_s6 + $0x170] ss:$8 sps:$4 sm:$0xff]   ;;  %v1590_v14 = vld [vmem:[%s2059_s6 + $0x164] ss:$8 sps:$4 sm:$0xff]  }
  0x8e   : > { %1068 = vmatprep.subr.bf16.mxu1 %v1584_v10  ;;  %1016 = vmatpush1.bf16.msra.mxu0 %v1586_v11  ;;  %v1592_v15 = vld [vmem:[%s2059_s6 + $0x60] ss:$8 sps:$4 sm:$0xff]   ;;  %v1594_v17 = vld [vmem:[%s2059_s6 + $0x54] ss:$8 sps:$4 sm:$0xff]   ;;  %v1598_v19 = vld [vmem:[%s2059_s6 + $0x50] ss:$8 sps:$4 sm:$0xff]  }
  0x8f   : > { %1069 = vmatpush1.bf16.msra.mxu1 %v1587_v12  ;;  %1017 = vmatprep.subr.bf16.mxu0 %v1588_v13  ;;  %v1593_v16 = vld [vmem:[%s2059_s6 + $0x160] ss:$8 sps:$4 sm:$0xff]   ;;  %v1596_v18 = vld [vmem:[%s2059_s6 + $0x154] ss:$8 sps:$4 sm:$0xff]   ;;  %v1599_v20 = vld [vmem:[%s2059_s6 + $0x150] ss:$8 sps:$4 sm:$0xff]  }
  0x90   : > { %1070 = vmatprep.subr.bf16.mxu1 %v1590_v14  ;;  %v1600_v21 = vld [vmem:[%s2059_s6 + $0x44] ss:$8 sps:$4 sm:$0xff]   ;;  %v1604_v23 = vld [vmem:[%s2059_s6 + $0x40] ss:$8 sps:$4 sm:$0xff]   ;;  %v1606_v25 = vld [vmem:[%s2059_s6 + $0x34] ss:$8 sps:$4 sm:$0xff]  }
  0x91   : > { %v1602_v22 = vld [vmem:[%s2059_s6 + $0x144] ss:$8 sps:$4 sm:$0xff]   ;;  %v1605_v24 = vld [vmem:[%s2059_s6 + $0x140] ss:$8 sps:$4 sm:$0xff]   ;;  %v1608_v26 = vld [vmem:[%s2059_s6 + $0x134] ss:$8 sps:$4 sm:$0xff]  }
  0x92   : > { %1018 = vmatpush1.bf16.msra.mxu0 %v1592_v15  ;;  %v1610_v27 = vld [vmem:[%s2059_s6 + $0x30] ss:$8 sps:$4 sm:$0xff]   ;;  %v1612_v29 = vld [vmem:[%s2059_s6 + $0x24] ss:$8 sps:$4 sm:$0xff]   ;;  %v1616_v31 = vld [vmem:[%s2059_s6 + $0x20] ss:$8 sps:$4 sm:$0xff]  }
  0x93   : > { %1071 = vmatpush1.bf16.msra.mxu1 %v1593_v16  ;;  %1019 = vmatprep.subr.bf16.mxu0 %v1594_v17  ;;  %v1611_v28 = vld [vmem:[%s2059_s6 + $0x130] ss:$8 sps:$4 sm:$0xff]   ;;  %v1614_v30 = vld [vmem:[%s2059_s6 + $0x124] ss:$8 sps:$4 sm:$0xff]   ;;  %v1617_v32 = vld [vmem:[%s2059_s6 + $0x120] ss:$8 sps:$4 sm:$0xff]  }
  0x94   : > { %1072 = vmatprep.subr.bf16.mxu1 %v1596_v18  ;;  %v1618_v33 = vld [vmem:[%s2059_s6 + $0x14] ss:$8 sps:$4 sm:$0xff]   ;;  %v1622_v35 = vld [vmem:[%s2059_s6 + $0x10] ss:$8 sps:$4 sm:$0xff]   ;;  %v1624_v37 = vld [vmem:[%s2059_s6 + $0x4] ss:$8 sps:$4 sm:$0xff]  }
  0x95   : > { %v1620_v34 = vld [vmem:[%s2059_s6 + $0x114] ss:$8 sps:$4 sm:$0xff]   ;;  %v1623_v36 = vld [vmem:[%s2059_s6 + $0x110] ss:$8 sps:$4 sm:$0xff]   ;;  %v1626_v38 = vld [vmem:[%s2059_s6 + $0x104] ss:$8 sps:$4 sm:$0xff]  }
  0x96   : > { %1020 = vmatpush1.bf16.msra.mxu0 %v1598_v19  ;;  %v1628_v39 = vld [vmem:[%s2059_s6] ss:$8 sps:$4 sm:$0xff]   ;;  %v1630_v41 = vld [vmem:[%s2059_s6 + $0xf4] ss:$8 sps:$4 sm:$0xff]   ;;  %v1634_v43 = vld [vmem:[%s2059_s6 + $0xf0] ss:$8 sps:$4 sm:$0xff]  }
  0x97   : > { %1073 = vmatpush1.bf16.msra.mxu1 %v1599_v20  ;;  %1021 = vmatprep.subr.bf16.mxu0 %v1600_v21  ;;  %v1629_v40 = vld [vmem:[%s2059_s6 + $0x100] ss:$8 sps:$4 sm:$0xff]   ;;  %v1632_v42 = vld [vmem:[%s2059_s6 + $0x1f4] ss:$8 sps:$4 sm:$0xff]   ;;  %v1635_v44 = vld [vmem:[%s2059_s6 + $0x1f0] ss:$8 sps:$4 sm:$0xff]  }
  0x98   : > { %1074 = vmatprep.subr.bf16.mxu1 %v1602_v22  ;;  %v1636_v45 = vld [vmem:[%s2059_s6 + $0xe4] ss:$8 sps:$4 sm:$0xff]   ;;  %v1640_v47 = vld [vmem:[%s2059_s6 + $0xe0] ss:$8 sps:$4 sm:$0xff]   ;;  %v1642_v49 = vld [vmem:[%s2059_s6 + $0xd4] ss:$8 sps:$4 sm:$0xff]  }
  0x99   : > { %v1638_v46 = vld [vmem:[%s2059_s6 + $0x1e4] ss:$8 sps:$4 sm:$0xff]   ;;  %v1641_v48 = vld [vmem:[%s2059_s6 + $0x1e0] ss:$8 sps:$4 sm:$0xff]   ;;  %v1644_v50 = vld [vmem:[%s2059_s6 + $0x1d4] ss:$8 sps:$4 sm:$0xff]  }
  0x9a   : > { %1022 = vmatpush1.bf16.msra.mxu0 %v1604_v23  ;;  %v1646_v51 = vld [vmem:[%s2059_s6 + $0xd0] ss:$8 sps:$4 sm:$0xff]   ;;  %v1648_v53 = vld [vmem:[%s2059_s6 + $0xc4] ss:$8 sps:$4 sm:$0xff]   ;;  %v1652_v55 = vld [vmem:[%s2059_s6 + $0xc0] ss:$8 sps:$4 sm:$0xff]  }
  0x9b   : > { %1075 = vmatpush1.bf16.msra.mxu1 %v1605_v24  ;;  %1023 = vmatprep.subr.bf16.mxu0 %v1606_v25  ;;  %v1647_v52 = vld [vmem:[%s2059_s6 + $0x1d0] ss:$8 sps:$4 sm:$0xff]   ;;  %v1650_v54 = vld [vmem:[%s2059_s6 + $0x1c4] ss:$8 sps:$4 sm:$0xff]   ;;  %v1653_v56 = vld [vmem:[%s2059_s6 + $0x1c0] ss:$8 sps:$4 sm:$0xff]  }
  0x9c   : > { %1076 = vmatprep.subr.bf16.mxu1 %v1608_v26  ;;  %v1654_v57 = vld [vmem:[%s2059_s6 + $0xb4] ss:$8 sps:$4 sm:$0xff]   ;;  %v1658_v61 = vld [vmem:[%s2059_s6 + $0xb0] ss:$8 sps:$4 sm:$0xff]   ;;  %v1660_v63 = vld [vmem:[%s2059_s6 + $0xa4] ss:$8 sps:$4 sm:$0xff]  }
  0x9d   : > { %v1680_v58 = vld [vmem:[%s2057_s4 + $0x4] ss:$16 sps:$4 sm:$0xff]   ;;  %v1683_v60 = vld [vmem:[%s2057_s4 + $0xc] ss:$16 sps:$4 sm:$0xff]   ;;  %v1659_v62 = vld [vmem:[%s2059_s6 + $0x1b0] ss:$8 sps:$4 sm:$0xff]  }
  0x9e   : > { %1024 = vmatpush1.bf16.msra.mxu0 %v1610_v27  ;;  %v1656_v59 = vld [vmem:[%s2059_s6 + $0x1b4] ss:$8 sps:$4 sm:$0xff]   ;;  %1047 = vmatprep.mubr.bf16.mxu0 %v1680_v58  ;;  %v1662_v0 = vld [vmem:[%s2059_s6 + $0x1a4] ss:$8 sps:$4 sm:$0xff]   ;;  %v1664_v1 = vld [vmem:[%s2059_s6 + $0xa0] ss:$8 sps:$4 sm:$0xff]  }
  0x9f   : > { %1077 = vmatpush1.bf16.msra.mxu1 %v1611_v28  ;;  %1025 = vmatprep.subr.bf16.mxu0 %v1612_v29  ;;  %v1665_v2 = vld [vmem:[%s2059_s6 + $0x1a0] ss:$8 sps:$4 sm:$0xff]   ;;  %v1666_v3 = vld [vmem:[%s2059_s6 + $0x94] ss:$8 sps:$4 sm:$0xff]   ;;  %v1670_v5 = vld [vmem:[%s2059_s6 + $0x90] ss:$8 sps:$4 sm:$0xff]  }
  0xa0   : > { %1078 = vmatprep.subr.bf16.mxu1 %v1614_v30  ;;  %1100 = vmatprep.mubr.bf16.mxu1 %v1683_v60  ;;  %v1668_v4 = vld [vmem:[%s2059_s6 + $0x194] ss:$8 sps:$4 sm:$0xff]   ;;  %v1671_v6 = vld [vmem:[%s2059_s6 + $0x190] ss:$8 sps:$4 sm:$0xff]   ;;  %v1672_v7 = vld [vmem:[%s2059_s6 + $0x84] ss:$8 sps:$4 sm:$0xff]  }
  0xa1   : > { %v1674_v8 = vld [vmem:[%s2059_s6 + $0x184] ss:$8 sps:$4 sm:$0xff]   ;;  %v1676_v9 = vld [vmem:[%s2059_s6 + $0x80] ss:$8 sps:$4 sm:$0xff]   ;;  %v575_v18 = vld [vmem:[#allocation2 + $0x30] sm:$0xff]  ;;  %p1476_p5 = scmp.ne.s32.totalorder %s1760_s18, 1 }
  0xa2   : > { %1026 = vmatpush1.bf16.msra.mxu0 %v1616_v31  ;;  %v1677_v10 = vld [vmem:[%s2059_s6 + $0x180] ss:$8 sps:$4 sm:$0xff]   ;;  %v1684_v13 = vld [vmem:[%s2057_s4 + $0x24] ss:$16 sps:$4 sm:$0xff]   ;;  %v1686_v14 = vld [vmem:[%s2057_s4 + $0x2c] ss:$16 sps:$4 sm:$0xff]  }
  0xa3   : > { %1079 = vmatpush1.bf16.msra.mxu1 %v1617_v32  ;;  %1027 = vmatprep.subr.bf16.mxu0 %v1618_v33  ;;  %v1678_v11 = vld [vmem:[%s2057_s4] ss:$16 sps:$4 sm:$0xff]   ;;  %v1681_v12 = vld [vmem:[%s2057_s4 + $0x8] ss:$16 sps:$4 sm:$0xff]  }
  0xa4   : > { %1080 = vmatprep.subr.bf16.mxu1 %v1620_v34  ;;  %v1688_v15 = vld [vmem:[%s2057_s4 + $0x20] ss:$16 sps:$4 sm:$0xff]   ;;  %v1689_v16 = vld [vmem:[%s2057_s4 + $0x28] ss:$16 sps:$4 sm:$0xff]  }
  0xa5   : > { %v576_v22 = vld [vmem:[#allocation2] sm:$0xff]  ;;  %v577_v27 = vld [vmem:[#allocation2 + $0x18] sm:$0xff]  ;;  %v578_v32 = vld [vmem:[#allocation2 + $0x10] sm:$0xff] }
  0xa6   : > { %1028 = vmatpush1.bf16.msra.mxu0 %v1622_v35 }
  0xa7   : > { %1081 = vmatpush1.bf16.msra.mxu1 %v1623_v36  ;;  %1029 = vmatprep.subr.bf16.mxu0 %v1624_v37  ;;  %v579_v37 = vld [vmem:[#allocation2 + $0x8] sm:$0xff] }
  0xa8   : > { %1082 = vmatprep.subr.bf16.mxu1 %v1626_v38 }
  0xaa   : > { %1030 = vmatpush1.bf16.msra.mxu0 %v1628_v39 }
  0xab   : > { %1083 = vmatpush1.bf16.msra.mxu1 %v1629_v40  ;;  %1031 = vmatprep.subr.bf16.mxu0 %v1630_v41 }
  0xac   : > { %1084 = vmatprep.subr.bf16.mxu1 %v1632_v42  ;;  %v580_v42 = vld [vmem:[#allocation2 + $0x20] sm:$0xff] }
  0xae   : > { %1032 = vmatpush2.bf16.msra.mxu0 %v1634_v43 }
  0xaf   : > { %1085 = vmatpush2.bf16.msra.mxu1 %v1635_v44  ;;  %1033 = vmatprep.subr.bf16.mxu0 %v1636_v45 }
  0xb0   : > { %1086 = vmatprep.subr.bf16.mxu1 %v1638_v46 }
  0xb2   : > { %1034 = vmatpush2.bf16.msra.mxu0 %v1640_v47  ;;  %v581_v47 = vld [vmem:[#allocation2 + $0x28] sm:$0xff] }
  0xb3   : > { %1087 = vmatpush2.bf16.msra.mxu1 %v1641_v48  ;;  %1035 = vmatprep.subr.bf16.mxu0 %v1642_v49 }
  0xb4   : > { %1088 = vmatprep.subr.bf16.mxu1 %v1644_v50 }
  0xb6   : > { %1036 = vmatpush2.bf16.msra.mxu0 %v1646_v51 }
  0xb7   : > { %1089 = vmatpush2.bf16.msra.mxu1 %v1647_v52  ;;  %1037 = vmatprep.subr.bf16.mxu0 %v1648_v53  ;;  %v582_v52 = vld [vmem:[#allocation2 + $0x38] sm:$0xff] }
  0xb8   : > { %1090 = vmatprep.subr.bf16.mxu1 %v1650_v54 }
  0xba   : > { %1038 = vmatpush2.bf16.msra.mxu0 %v1652_v55 }
  0xbb   : > { %1091 = vmatpush2.bf16.msra.mxu1 %v1653_v56  ;;  %1039 = vmatprep.subr.bf16.mxu0 %v1654_v57 }
  0xbc   : > { %1092 = vmatprep.subr.bf16.mxu1 %v1656_v59 }
  0xbe   : > { %1040 = vmatpush2.bf16.msra.mxu0 %v1658_v61 }
  0xbf   : > { %1093 = vmatpush2.bf16.msra.mxu1 %v1659_v62  ;;  %1041 = vmatprep.subr.bf16.mxu0 %v1660_v63 }
  0xc0   : > { %1094 = vmatprep.subr.bf16.mxu1 %v1662_v0 }
  0xc2   : > { %1042 = vmatpush2.bf16.msra.mxu0 %v1664_v1 }
  0xc3   : > { %1095 = vmatpush2.bf16.msra.mxu1 %v1665_v2  ;;  %1043 = vmatprep.subr.bf16.mxu0 %v1666_v3 }
  0xc4   : > { %1096 = vmatprep.subr.bf16.mxu1 %v1668_v4 }
  0xc6   : > { %1044 = vmatpush2.bf16.msra.mxu0 %v1670_v5 }
  0xc7   : > { %1097 = vmatpush2.bf16.msra.mxu1 %v1671_v6  ;;  %1045 = vmatprep.subr.bf16.mxu0 %v1672_v7 }
  0xc8   : > { %1098 = vmatprep.subr.bf16.mxu1 %v1674_v8 }
  0xca   : > { %1046 = vmatpush2.bf16.msra.mxu0 %v1676_v9 }
  0xcb   : > { %1099 = vmatpush2.bf16.msra.mxu1 %v1677_v10 }
  0xcd   : > { %1048 = vmatmul.mubr.bf16.vlgmr.msra.gmra.mxu0 %v1678_v11 }
  0xce   : > { %1101 = vmatmul.mubr.bf16.vlgmr.msra.gmra.mxu1 %v1681_v12  ;;  %1057 = vmatprep.mubr.bf16.mxu0 %v1684_v13 }
  0xcf   : > { %1110 = vmatprep.mubr.bf16.mxu1 %v1686_v14 }
  0xd5   : > { %1058 = vmatmul.mubr.bf16.gmra.mxu0 %v1688_v15 }
  0xd6   : > { %1111 = vmatmul.mubr.bf16.gmra.mxu1 %v1689_v16 }
 0x18d   : > { %v1049_v17 = vpop.f32.mrf.mxu0 }
 0x18e   : > { %v1102_v19 = vpop.f32.mrf.mxu1 }
 0x18f   : > { %v1103_v20 = vadd.f32 %v1102_v19, %v1049_v17  ;;  %v1051_v21 = vpop.f32.mrf.mxu0 }
 0x190   : > { %v1104_v23 = vpop.f32.mrf.mxu1 }
 0x191   : > { %v1121_v24 = vadd.f32 %v1103_v20, %v575_v18  ;;  %v1105_v25 = vadd.f32 %v1104_v23, %v1051_v21  ;;  %v1053_v26 = vpop.f32.mrf.mxu0 }
 0x192   : > { %v1106_v28 = vpop.f32.mrf.mxu1 }
 0x193   : > { %1129 = vst [vmem:[#allocation2 + $0x30] sm:$0xff] %v1121_v24  ;;  %v1122_v29 = vadd.f32 %v1105_v25, %v576_v22  ;;  %v1107_v30 = vadd.f32 %v1106_v28, %v1053_v26  ;;  %v1055_v31 = vpop.f32.mrf.mxu0 }
 0x194   : > { %v1108_v33 = vpop.f32.mrf.mxu1 }
 0x195   : > { %1130 = vst [vmem:[#allocation2] sm:$0xff] %v1122_v29  ;;  %v1123_v34 = vadd.f32 %v1107_v30, %v577_v27  ;;  %v1109_v35 = vadd.f32 %v1108_v33, %v1055_v31  ;;  %v1059_v36 = vpop.f32.mrf.mxu0 }
 0x196   : > { %v1112_v38 = vpop.f32.mrf.mxu1 }
 0x197   : > { %1131 = vst [vmem:[#allocation2 + $0x18] sm:$0xff] %v1123_v34  ;;  %v1124_v39 = vadd.f32 %v1109_v35, %v578_v32  ;;  %v1113_v40 = vadd.f32 %v1112_v38, %v1059_v36  ;;  %v1061_v41 = vpop.f32.mrf.mxu0 }
 0x198   : > { %v1114_v43 = vpop.f32.mrf.mxu1 }
 0x199   : > { %1132 = vst [vmem:[#allocation2 + $0x10] sm:$0xff] %v1124_v39  ;;  %v1125_v44 = vadd.f32 %v1113_v40, %v579_v37  ;;  %v1115_v45 = vadd.f32 %v1114_v43, %v1061_v41  ;;  %v1063_v46 = vpop.f32.mrf.mxu0 }
 0x19a   : > { %v1116_v48 = vpop.f32.mrf.mxu1 }
 0x19b   : > { %1133 = vst [vmem:[#allocation2 + $0x8] sm:$0xff] %v1125_v44  ;;  %v1126_v49 = vadd.f32 %v1115_v45, %v580_v42  ;;  %v1117_v50 = vadd.f32 %v1116_v48, %v1063_v46  ;;  %v1065_v51 = vpop.f32.mrf.mxu0 }
 0x19c   : > { %v1118_v53 = vpop.f32.mrf.mxu1 }
 0x19d   : > { %1134 = vst [vmem:[#allocation2 + $0x20] sm:$0xff] %v1126_v49  ;;  %v1127_v54 = vadd.f32 %v1117_v50, %v581_v47  ;;  %v1119_v55 = vadd.f32 %v1118_v53, %v1065_v51  ;;  %1140 = sbr.rel (%p1476_p5) target bundleno = 439 (0x1b7), region = 101 }
 0x19f   : > { %1135 = vst [vmem:[#allocation2 + $0x28] sm:$0xff] %v1127_v54  ;;  %v1128_v56 = vadd.f32 %v1119_v55, %v582_v52 }
 0x1a1   : > { %1136 = vst [vmem:[#allocation2 + $0x38] sm:$0xff] %v1128_v56 }
 0x1a2   : > { %v1151_v57 = vlaneseq  ;;  %v1149_v59 = vld [vmem:[%s559_s29] sm:$0x3]  ;;  %v1141_v60 = vld [vmem:[#allocation2 + $0x30] sm:$0xff]  ;;  %v1143_v0 = vld [vmem:[#allocation2 + $0x18] sm:$0xff] }
 0x1a3   : > { %v1142_v61 = vld [vmem:[#allocation2] sm:$0xff]  ;;  %v1144_v1 = vld [vmem:[#allocation2 + $0x10] sm:$0xff]  ;;  %v1145_v2 = vld [vmem:[#allocation2 + $0x8] sm:$0xff] }
 0x1a4   : > { %v1152_v58 = vshrl.u32 %v1151_v57, 7  ;;  %v1146_v5 = vld [vmem:[#allocation2 + $0x20] sm:$0xff] }
 0x1a6   : > { %v1153_v62 = vsub.s32 0, %v1152_v58  ;;  %v1157_v63 = vsub.s32 1, %v1152_v58  ;;  %v1147_v6 = vld [vmem:[#allocation2 + $0x28] sm:$0xff] }
 0x1a8   : > { %v1154_v3 = vrot.slane %v1149_v59, %v1153_v62  ;;  %v1158_v4 = vrot.slane %v1149_v59, %v1157_v63  ;;  %v1148_v7 = vld [vmem:[#allocation2 + $0x38] sm:$0xff] }
 0x1aa   : > { %v1161_v8 = vadd.f32 %v1154_v3, %v1141_v60  ;;  %v1162_v9 = vadd.f32 %v1158_v4, %v1142_v61  ;;  %v1163_v10 = vadd.f32 %v1154_v3, %v1143_v0  ;;  %v1164_v11 = vadd.f32 %v1158_v4, %v1144_v1 }
 0x1ab   : > { %v1165_v12 = vadd.f32 %v1154_v3, %v1145_v2  ;;  %v1166_v13 = vadd.f32 %v1158_v4, %v1146_v5  ;;  %v1167_v14 = vadd.f32 %v1154_v3, %v1147_v6  ;;  %v1168_v15 = vadd.f32 %v1158_v4, %v1148_v7 }
 0x1ac   : > { %vm1169_vm0 = vcmp.ge.f32.partialorder %v1161_v8, 0.0  ;;  %vm1170_vm1 = vcmp.ge.f32.partialorder %v1162_v9, 0.0  ;;  %v1177_v16 = vmul.f32 0.2, %v1161_v8  ;;  %v1178_v17 = vmul.f32 0.2, %v1162_v9 }
 0x1ad   : > { %vm1171_vm2 = vcmp.ge.f32.partialorder %v1163_v10, 0.0  ;;  %vm1172_vm3 = vcmp.ge.f32.partialorder %v1164_v11, 0.0  ;;  %v1179_v18 = vmul.f32 0.2, %v1163_v10  ;;  %v1180_v19 = vmul.f32 0.2, %v1164_v11 }
 0x1ae   : > { %v1185_v20 = vsel %vm1169_vm0, %v1161_v8, %v1177_v16  ;;  %v1186_v21 = vsel %vm1170_vm1, %v1162_v9, %v1178_v17  ;;  %vm1173_vm4 = vcmp.ge.f32.partialorder %v1165_v12, 0.0  ;;  %vm1174_vm5 = vcmp.ge.f32.partialorder %v1166_v13, 0.0 }
 0x1af   : > { %v1488_v22 = vpack.c.bf16 %v1186_v21, %v1185_v20  ;;  %v1187_v23 = vsel %vm1171_vm2, %v1163_v10, %v1179_v18  ;;  %v1188_v24 = vsel %vm1172_vm3, %v1164_v11, %v1180_v19  ;;  %v1181_v25 = vmul.f32 0.2, %v1165_v12 }
 0x1b0   : > { %v1489_v26 = vpack.c.bf16 %v1188_v24, %v1187_v23  ;;  %v1182_v27 = vmul.f32 0.2, %v1166_v13  ;;  %vm1175_vm6 = vcmp.ge.f32.partialorder %v1167_v14, 0.0  ;;  %vm1176_vm7 = vcmp.ge.f32.partialorder %v1168_v15, 0.0 }
 0x1b1   : > { %1217 = vst [vmem:[%s2061_s1] sm:$0xff] %v1488_v22  ;;  %v1189_v28 = vsel %vm1173_vm4, %v1165_v12, %v1181_v25  ;;  %v1183_v29 = vmul.f32 0.2, %v1167_v14  ;;  %v1184_v30 = vmul.f32 0.2, %v1168_v15 }
 0x1b2   : > { %1218 = vst [vmem:[%s2061_s1 + $0x8] sm:$0xff] %v1489_v26  ;;  %v1190_v31 = vsel %vm1174_vm5, %v1166_v13, %v1182_v27 }
 0x1b3   : > { %v1490_v32 = vpack.c.bf16 %v1190_v31, %v1189_v28  ;;  %v1191_v33 = vsel %vm1175_vm6, %v1167_v14, %v1183_v29  ;;  %v1192_v34 = vsel %vm1176_vm7, %v1168_v15, %v1184_v30 }
 0x1b4   : > { %v1491_v35 = vpack.c.bf16 %v1192_v34, %v1191_v33 }
 0x1b5   : > { %1219 = vst [vmem:[%s2061_s1 + $0x10] sm:$0xff] %v1490_v32 }
 0x1b6   : > { %1220 = vst [vmem:[%s2061_s1 + $0x18] sm:$0xff] %v1491_v35 }
 0x1b7 PF: > { %1227 = sbr.rel (!%p1893_p12) target bundleno = 447 (0x1bf), region = 105  ;;  %s1492_s16 = sshll.u32 (%p1893_p12), %s1764_s19, 3 }
 0x1b8   : > { %v1268_v36 = vld [vmem:[%s2061_s1] sm:$0xff] (%p1893_p12)  ;;  %s1233_s5 = scalar_lea.vmem (%p1893_p12), %s2192_s3, %s1492_s16 }
 0x1b9   : > { %v1270_v37 = vld [vmem:[%s2061_s1 + $0x8] sm:$0xff] (%p1893_p12)  ;;  %1269 = vst [vmem:[%s1233_s5] sm:$0xff] (%p1893_p12), %v1268_v36 }
 0x1ba   : > { %1271 = vst [vmem:[%s1233_s5 + $0x20] sm:$0xff] (%p1893_p12), %v1270_v37 }
 0x1bc   : > { %v1272_v38 = vld [vmem:[%s2061_s1 + $0x10] sm:$0xff] }
 0x1bd   : > { %v1274_v39 = vld [vmem:[%s2061_s1 + $0x18] sm:$0xff]  ;;  %1273 = vst [vmem:[%s1233_s5 + $0x40] sm:$0xff] %v1272_v38 }
 0x1be   : > { %1275 = vst [vmem:[%s1233_s5 + $0x60] sm:$0xff] %v1274_v39 }
 0x1bf PF: > { %s13_s22 = sadd.s32 1, %s1776_s22   ;;  %s2202_s10 = sld [smem:[#allocation6_spill]] }
 0x1c0   : > { %p10_p6 = scmp.ge.s32.totalorder %s13_s22, 10   ;;  %s2203_s12 = smov %s1740_s13 }
 0x1c1   : > { %s2204_s13 = smov %s1891_s9  ;;  %s2205_s14 = smov %s1748_s15 }
 0x1c2   : > { %s2206_s15 = smov %s1888_s8  ;;  %s2207_s16 = smov %s1756_s17 }
 0x1c3   : > { %s2208_s17 = smov %s1874_s30  ;;  %s2209_s18 = smov %s1768_s20 }
 0x1c4   : > { %s2210_s19 = smov %s1772_s21  ;;  %s2211_s20 = smov %s2214_s24 }
 0x1c5   : > { %s2212_s21 = smov %s2202_s10  ;;  %12 = sbr.rel (!%p10_p6) target bundleno = 9 (0x9), region = 185 }

// kernel: vqgan_forward.12
= control target key start
LH: loop header
LB: loop body
LE: loop exit
PB: predicated region body
PF: predicated region fallthrough
CT: control target
= control target key end

     0   :  { %s2492_s0 = inlined_call_operand.vmem [shape: bf16[64,1024], index: 0, kind: input, shape index: {}]   ;;  %s2493_s1 = inlined_call_operand.vmem [shape: bf16[1024,512], index: 1, kind: input, shape index: {}]   ;;  %s2494_s2 = inlined_call_operand.vmem [shape: f32[1,512], index: 2, kind: input, shape index: {}]   ;;  %s2495_s3 = inlined_call_operand.vmem [shape: bf16[64,512], index: 3, kind: output, shape index: {}]  }
   0x1   :  { %2497 = sst [smem:[#allocation7_spill]] %s2492_s0 }
   0x2   :  { %2498 = sst [smem:[#allocation8_spill]] %s2493_s1 }
   0x3   :  { %s2047_s12 = smov 0   ;;  %s2049_s13 = smov 0  }
   0x4   :  { %s2051_s14 = smov 0   ;;  %s2053_s15 = smov 0  }
   0x5   :  { %s2055_s16 = smov 0   ;;  %s2057_s17 = smov 0  }
   0x6   :  { %s2059_s18 = smov 0   ;;  %s2061_s19 = smov 0  }
   0x7   :  { %s2063_s20 = smov 0   ;;  %s2065_s21 = smov 0  }
   0x8   :  { %s2067_s22 = smov 0  }
   0x9 LB: > { %s1606_s23 = sadd.s32 4294967295, %s2024_s22   ;;  %s25_s24 = sadd.s32 1, %s2016_s20  ;;  %s2024_s22 = sphi %s2067_s22, %s13_s22   ;;  %s2020_s21 = sphi %s2065_s21, %s2515_s21   ;;  %s2016_s20 = sphi %s2063_s20, %s2514_s20   ;;  %s2012_s19 = sphi %s2061_s19, %s2513_s19   ;;  %s2008_s18 = sphi %s2059_s18, %s2512_s18   ;;  %s2004_s17 = sphi %s2057_s17, %s2511_s17   ;;  %s2000_s16 = sphi %s2055_s16, %s2510_s16   ;;  %s1996_s15 = sphi %s2053_s15, %s2509_s15   ;;  %s1992_s14 = sphi %s2051_s14, %s2508_s14   ;;  %s1988_s13 = sphi %s2049_s13, %s2507_s13   ;;  %s1984_s12 = sphi %s2047_s12, %s2506_s12  }
   0xa   : > { %p26_p0 = scmp.ge.s32.totalorder %s25_s24, 2  ;;  %s28_s25 = sadd.s32 1, %s2020_s21 }
   0xb   : > { %s41_s26 = sadd.s32 1, %s2004_s17  ;;  %p48_p1 = scmp.ne.s32.totalorder %s2004_s17, %s2000_s16 }
   0xc   : > { %s2517_s24 = smov (%p26_p0, %s25_s24), 0  ;;  %s2519_s25 = smov (!%p26_p0, %s28_s25), %s2020_s21 }
   0xd   : > { %s37_s27 = ssub.s32 %s2016_s20, %s2517_s24  ;;  %p49_p2 = scmp.eq.s32.totalorder %s2024_s22, 0 }
   0xe   : > { %p30_p3 = scmp.ge.s32.totalorder %s2519_s25, 2  ;;  %p39_p4 = scmp.eq.s32.totalorder %s37_s27, 0 }
   0xf   : > { %p2114_p5 = por %p49_p2, %p48_p1  ;;  %s69_s29 = sadd.s32 1, %s1996_s15 }
  0x10   : > { %s2521_s25 = smov (%p30_p3, %s2519_s25), 0  ;;  %p76_p6 = scmp.ne.s32.totalorder %s1996_s15, %s1992_s14 }
  0x11   : > { %2500 = sst [smem:[#allocation6_spill]] %s2521_s25  ;;  %s65_s4 = ssub.s32 %s2020_s21, %s2521_s25 }
  0x12   : > { %s2122_s30 = scalar_select %p39_p4, %s2004_s17, %s41_s26  }
  0x13   : > { %s66_s5 = sor.u32 %s65_s4, %s37_s27  ;;  %p121_p7 = scmp.eq.s32.totalorder %s65_s4, 0 }
  0x14   : > { %p67_p8 = scmp.eq.s32.totalorder %s66_s5, 0  ;;  %p2128_p9 = por %p76_p6, %p49_p2 }
  0x15   : > { %s123_s7 = sadd.s32 1, %s1988_s13  ;;  %p133_p10 = scmp.ne.s32.totalorder %s1988_s13, %s1984_s12 }
  0x16   : > { %s2136_s8 = scalar_select %p67_p8, %s1996_s15, %s69_s29  }
  0x17   : > { %s2139_s9 = scalar_select %p121_p7, %s1988_s13, %s123_s7  }
  0x18   : > { %p134_p11 = scmp.eq.s32.totalorder %s1606_s23, 3  ;;  %p1609_p13 = scmp.ge.s32.totalorder %s2024_s22, 4 }
  0x1a   : > { %p2141_p12 = por %p134_p11, %p133_p10  ;;  %156 = sbr.rel (%p1609_p13) target bundleno = 91 (0x5b), region = 16 }
  0x1f   : > { %159 = sbr.rel (!%p2114_p5) target bundleno = 49 (0x31), region = 20  ;;  %s161_s11 = sand.u32 (%p2114_p5), 1, %s2004_s17  }
  0x20   : > { %s1718_s26 = sshll.u32 (%p2114_p5), %s2016_s20, 4  ;;  %s1610_s27 = sshll.u32 (%p2114_p5), %s161_s11, 7 }
  0x21   : > { %s2503_s0 = sld [smem:[#allocation7_spill]] (%p2114_p5)  ;;  %s163_s23 = scalar_lea.vmem (%p2114_p5), [#allocation3], %s1610_s27 }
  0x27   : > { %s2153_s5 = scalar_lea.vmem %s2503_s0, %s1718_s26 }
  0x28   : > { %v182_v0 = vld [vmem:[%s2153_s5] sm:$0xff]  ;;  %v184_v1 = vld [vmem:[%s2153_s5 + $0x8] sm:$0xff] }
  0x29   : > { %v186_v2 = vld [vmem:[%s2153_s5 + $0x20] sm:$0xff]  ;;  %183 = vst [vmem:[%s163_s23] sm:$0xff] %v182_v0  ;;  %185 = vst [vmem:[%s163_s23 + $0x8] sm:$0xff] %v184_v1  ;;  %v188_v3 = vld [vmem:[%s2153_s5 + $0x28] sm:$0xff] }
  0x2a   : > { %187 = vst [vmem:[%s163_s23 + $0x10] sm:$0xff] %v186_v2  ;;  %v190_v4 = vld [vmem:[%s2153_s5 + $0x40] sm:$0xff]  ;;  %v192_v5 = vld [vmem:[%s2153_s5 + $0x48] sm:$0xff]  ;;  %189 = vst [vmem:[%s163_s23 + $0x18] sm:$0xff] %v188_v3 }
  0x2b   : > { %191 = vst [vmem:[%s163_s23 + $0x20] sm:$0xff] %v190_v4  ;;  %193 = vst [vmem:[%s163_s23 + $0x28] sm:$0xff] %v192_v5  ;;  %v194_v6 = vld [vmem:[%s2153_s5 + $0x60] sm:$0xff]  ;;  %v196_v7 = vld [vmem:[%s2153_s5 + $0x68] sm:$0xff] }
  0x2c   : > { %v198_v8 = vld [vmem:[%s2153_s5 + $0x80] sm:$0xff]  ;;  %195 = vst [vmem:[%s163_s23 + $0x30] sm:$0xff] %v194_v6  ;;  %197 = vst [vmem:[%s163_s23 + $0x38] sm:$0xff] %v196_v7  ;;  %v200_v9 = vld [vmem:[%s2153_s5 + $0x88] sm:$0xff] }
  0x2d   : > { %199 = vst [vmem:[%s163_s23 + $0x40] sm:$0xff] %v198_v8  ;;  %v202_v10 = vld [vmem:[%s2153_s5 + $0xa0] sm:$0xff]  ;;  %v204_v11 = vld [vmem:[%s2153_s5 + $0xa8] sm:$0xff]  ;;  %201 = vst [vmem:[%s163_s23 + $0x48] sm:$0xff] %v200_v9 }
  0x2e   : > { %203 = vst [vmem:[%s163_s23 + $0x50] sm:$0xff] %v202_v10  ;;  %205 = vst [vmem:[%s163_s23 + $0x58] sm:$0xff] %v204_v11  ;;  %v206_v12 = vld [vmem:[%s2153_s5 + $0xc0] sm:$0xff]  ;;  %v208_v13 = vld [vmem:[%s2153_s5 + $0xc8] sm:$0xff] }
  0x2f   : > { %v210_v14 = vld [vmem:[%s2153_s5 + $0xe0] sm:$0xff]  ;;  %207 = vst [vmem:[%s163_s23 + $0x60] sm:$0xff] %v206_v12  ;;  %209 = vst [vmem:[%s163_s23 + $0x68] sm:$0xff] %v208_v13  ;;  %v212_v15 = vld [vmem:[%s2153_s5 + $0xe8] sm:$0xff] }
  0x30   : > { %211 = vst [vmem:[%s163_s23 + $0x70] sm:$0xff] %v210_v14  ;;  %213 = vst [vmem:[%s163_s23 + $0x78] sm:$0xff] %v212_v15 }
  0x31 PF: > { %219 = sbr.rel (!%p2128_p9) target bundleno = 91 (0x5b), region = 43  ;;  %s221_s28 = sand.u32 (%p2128_p9), 1, %s1996_s15  }
  0x32   : > { %s1615_s7 = sshll.u32 (%p2128_p9), %s2020_s21, 1  ;;  %s1613_s11 = sshll.u32 (%p2128_p9), %s221_s28, 9 }
  0x33   : > { %s1719_s26 = sshll.u32 (%p2128_p9), %s2016_s20, 8  ;;  %s2504_s1 = sld [smem:[#allocation8_spill]] (%p2128_p9) }
  0x34   : > { %s227_s27 = sadd.s32 (%p2128_p9), %s1719_s26, %s1615_s7  ;;  %s2184_s6 = scalar_lea.vmem (%p2128_p9), [#allocation4], %s1613_s11 }
  0x35   : > { %s1617_s29 = sshll.u32 (%p2128_p9), %s227_s27, 2 }
  0x39   : > { %s2179_s25 = scalar_lea.vmem %s2504_s1, %s1617_s29 }
  0x3a   : > { %v384_v16 = vld [vmem:[%s2179_s25] sm:$0xff]  ;;  %v386_v17 = vld [vmem:[%s2179_s25 + $0x10] sm:$0xff] }
  0x3b   : > { %v388_v18 = vld [vmem:[%s2179_s25 + $0x20] sm:$0xff]  ;;  %385 = vst [vmem:[%s2184_s6] sm:$0xff] %v384_v16  ;;  %387 = vst [vmem:[%s2184_s6 + $0x8] sm:$0xff] %v386_v17  ;;  %v390_v19 = vld [vmem:[%s2179_s25 + $0x30] sm:$0xff] }
  0x3c   : > { %389 = vst [vmem:[%s2184_s6 + $0x10] sm:$0xff] %v388_v18  ;;  %v392_v20 = vld [vmem:[%s2179_s25 + $0x40] sm:$0xff]  ;;  %v394_v21 = vld [vmem:[%s2179_s25 + $0x50] sm:$0xff]  ;;  %391 = vst [vmem:[%s2184_s6 + $0x18] sm:$0xff] %v390_v19 }
  0x3d   : > { %393 = vst [vmem:[%s2184_s6 + $0x20] sm:$0xff] %v392_v20  ;;  %395 = vst [vmem:[%s2184_s6 + $0x28] sm:$0xff] %v394_v21  ;;  %v396_v22 = vld [vmem:[%s2179_s25 + $0x60] sm:$0xff]  ;;  %v398_v23 = vld [vmem:[%s2179_s25 + $0x70] sm:$0xff] }
  0x3e   : > { %v400_v24 = vld [vmem:[%s2179_s25 + $0x80] sm:$0xff]  ;;  %397 = vst [vmem:[%s2184_s6 + $0x30] sm:$0xff] %v396_v22  ;;  %399 = vst [vmem:[%s2184_s6 + $0x38] sm:$0xff] %v398_v23  ;;  %v402_v25 = vld [vmem:[%s2179_s25 + $0x90] sm:$0xff] }
  0x3f   : > { %401 = vst [vmem:[%s2184_s6 + $0x40] sm:$0xff] %v400_v24  ;;  %v404_v26 = vld [vmem:[%s2179_s25 + $0xa0] sm:$0xff]  ;;  %v406_v27 = vld [vmem:[%s2179_s25 + $0xb0] sm:$0xff]  ;;  %403 = vst [vmem:[%s2184_s6 + $0x48] sm:$0xff] %v402_v25 }
  0x40   : > { %405 = vst [vmem:[%s2184_s6 + $0x50] sm:$0xff] %v404_v26  ;;  %407 = vst [vmem:[%s2184_s6 + $0x58] sm:$0xff] %v406_v27  ;;  %v408_v28 = vld [vmem:[%s2179_s25 + $0xc0] sm:$0xff]  ;;  %v410_v29 = vld [vmem:[%s2179_s25 + $0xd0] sm:$0xff] }
  0x41   : > { %v412_v30 = vld [vmem:[%s2179_s25 + $0xe0] sm:$0xff]  ;;  %409 = vst [vmem:[%s2184_s6 + $0x60] sm:$0xff] %v408_v28  ;;  %411 = vst [vmem:[%s2184_s6 + $0x68] sm:$0xff] %v410_v29  ;;  %v414_v31 = vld [vmem:[%s2179_s25 + $0xf0] sm:$0xff] }
  0x42   : > { %413 = vst [vmem:[%s2184_s6 + $0x70] sm:$0xff] %v412_v30  ;;  %v416_v32 = vld [vmem:[%s2179_s25 + $0x100] sm:$0xff]  ;;  %v418_v33 = vld [vmem:[%s2179_s25 + $0x110] sm:$0xff]  ;;  %415 = vst [vmem:[%s2184_s6 + $0x78] sm:$0xff] %v414_v31 }
  0x43   : > { %417 = vst [vmem:[%s2184_s6 + $0x80] sm:$0xff] %v416_v32  ;;  %419 = vst [vmem:[%s2184_s6 + $0x88] sm:$0xff] %v418_v33  ;;  %v420_v34 = vld [vmem:[%s2179_s25 + $0x120] sm:$0xff]  ;;  %v422_v35 = vld [vmem:[%s2179_s25 + $0x130] sm:$0xff] }
  0x44   : > { %v424_v36 = vld [vmem:[%s2179_s25 + $0x140] sm:$0xff]  ;;  %421 = vst [vmem:[%s2184_s6 + $0x90] sm:$0xff] %v420_v34  ;;  %423 = vst [vmem:[%s2184_s6 + $0x98] sm:$0xff] %v422_v35  ;;  %v426_v37 = vld [vmem:[%s2179_s25 + $0x150] sm:$0xff] }
  0x45   : > { %425 = vst [vmem:[%s2184_s6 + $0xa0] sm:$0xff] %v424_v36  ;;  %v428_v38 = vld [vmem:[%s2179_s25 + $0x160] sm:$0xff]  ;;  %v430_v39 = vld [vmem:[%s2179_s25 + $0x170] sm:$0xff]  ;;  %427 = vst [vmem:[%s2184_s6 + $0xa8] sm:$0xff] %v426_v37 }
  0x46   : > { %429 = vst [vmem:[%s2184_s6 + $0xb0] sm:$0xff] %v428_v38  ;;  %431 = vst [vmem:[%s2184_s6 + $0xb8] sm:$0xff] %v430_v39  ;;  %v432_v40 = vld [vmem:[%s2179_s25 + $0x180] sm:$0xff]  ;;  %v434_v41 = vld [vmem:[%s2179_s25 + $0x190] sm:$0xff] }
  0x47   : > { %v436_v42 = vld [vmem:[%s2179_s25 + $0x1a0] sm:$0xff]  ;;  %433 = vst [vmem:[%s2184_s6 + $0xc0] sm:$0xff] %v432_v40  ;;  %435 = vst [vmem:[%s2184_s6 + $0xc8] sm:$0xff] %v434_v41  ;;  %v438_v43 = vld [vmem:[%s2179_s25 + $0x1b0] sm:$0xff] }
  0x48   : > { %437 = vst [vmem:[%s2184_s6 + $0xd0] sm:$0xff] %v436_v42  ;;  %v440_v44 = vld [vmem:[%s2179_s25 + $0x1c0] sm:$0xff]  ;;  %v442_v45 = vld [vmem:[%s2179_s25 + $0x1d0] sm:$0xff]  ;;  %439 = vst [vmem:[%s2184_s6 + $0xd8] sm:$0xff] %v438_v43 }
  0x49   : > { %441 = vst [vmem:[%s2184_s6 + $0xe0] sm:$0xff] %v440_v44  ;;  %443 = vst [vmem:[%s2184_s6 + $0xe8] sm:$0xff] %v442_v45  ;;  %v444_v46 = vld [vmem:[%s2179_s25 + $0x1e0] sm:$0xff]  ;;  %v446_v47 = vld [vmem:[%s2179_s25 + $0x1f0] sm:$0xff] }
  0x4a   : > { %v448_v48 = vld [vmem:[%s2179_s25 + $0x200] sm:$0xff]  ;;  %445 = vst [vmem:[%s2184_s6 + $0xf0] sm:$0xff] %v444_v46  ;;  %447 = vst [vmem:[%s2184_s6 + $0xf8] sm:$0xff] %v446_v47  ;;  %v450_v49 = vld [vmem:[%s2179_s25 + $0x210] sm:$0xff] }
  0x4b   : > { %449 = vst [vmem:[%s2184_s6 + $0x100] sm:$0xff] %v448_v48  ;;  %v452_v50 = vld [vmem:[%s2179_s25 + $0x220] sm:$0xff]  ;;  %v454_v51 = vld [vmem:[%s2179_s25 + $0x230] sm:$0xff]  ;;  %451 = vst [vmem:[%s2184_s6 + $0x108] sm:$0xff] %v450_v49 }
  0x4c   : > { %453 = vst [vmem:[%s2184_s6 + $0x110] sm:$0xff] %v452_v50  ;;  %455 = vst [vmem:[%s2184_s6 + $0x118] sm:$0xff] %v454_v51  ;;  %v456_v52 = vld [vmem:[%s2179_s25 + $0x240] sm:$0xff]  ;;  %v458_v53 = vld [vmem:[%s2179_s25 + $0x250] sm:$0xff] }
  0x4d   : > { %v460_v54 = vld [vmem:[%s2179_s25 + $0x260] sm:$0xff]  ;;  %457 = vst [vmem:[%s2184_s6 + $0x120] sm:$0xff] %v456_v52  ;;  %459 = vst [vmem:[%s2184_s6 + $0x128] sm:$0xff] %v458_v53  ;;  %v462_v55 = vld [vmem:[%s2179_s25 + $0x270] sm:$0xff] }
  0x4e   : > { %461 = vst [vmem:[%s2184_s6 + $0x130] sm:$0xff] %v460_v54  ;;  %v464_v56 = vld [vmem:[%s2179_s25 + $0x280] sm:$0xff]  ;;  %v466_v57 = vld [vmem:[%s2179_s25 + $0x290] sm:$0xff]  ;;  %463 = vst [vmem:[%s2184_s6 + $0x138] sm:$0xff] %v462_v55 }
  0x4f   : > { %465 = vst [vmem:[%s2184_s6 + $0x140] sm:$0xff] %v464_v56  ;;  %467 = vst [vmem:[%s2184_s6 + $0x148] sm:$0xff] %v466_v57  ;;  %v468_v58 = vld [vmem:[%s2179_s25 + $0x2a0] sm:$0xff]  ;;  %v470_v59 = vld [vmem:[%s2179_s25 + $0x2b0] sm:$0xff] }
  0x50   : > { %v472_v60 = vld [vmem:[%s2179_s25 + $0x2c0] sm:$0xff]  ;;  %469 = vst [vmem:[%s2184_s6 + $0x150] sm:$0xff] %v468_v58  ;;  %471 = vst [vmem:[%s2184_s6 + $0x158] sm:$0xff] %v470_v59  ;;  %v474_v61 = vld [vmem:[%s2179_s25 + $0x2d0] sm:$0xff] }
  0x51   : > { %473 = vst [vmem:[%s2184_s6 + $0x160] sm:$0xff] %v472_v60  ;;  %v476_v62 = vld [vmem:[%s2179_s25 + $0x2e0] sm:$0xff]  ;;  %v478_v63 = vld [vmem:[%s2179_s25 + $0x2f0] sm:$0xff]  ;;  %475 = vst [vmem:[%s2184_s6 + $0x168] sm:$0xff] %v474_v61 }
  0x52   : > { %477 = vst [vmem:[%s2184_s6 + $0x170] sm:$0xff] %v476_v62  ;;  %479 = vst [vmem:[%s2184_s6 + $0x178] sm:$0xff] %v478_v63  ;;  %v480_v0 = vld [vmem:[%s2179_s25 + $0x300] sm:$0xff]  ;;  %v482_v1 = vld [vmem:[%s2179_s25 + $0x310] sm:$0xff] }
  0x53   : > { %v484_v2 = vld [vmem:[%s2179_s25 + $0x320] sm:$0xff]  ;;  %481 = vst [vmem:[%s2184_s6 + $0x180] sm:$0xff] %v480_v0  ;;  %483 = vst [vmem:[%s2184_s6 + $0x188] sm:$0xff] %v482_v1  ;;  %v486_v3 = vld [vmem:[%s2179_s25 + $0x330] sm:$0xff] }
  0x54   : > { %485 = vst [vmem:[%s2184_s6 + $0x190] sm:$0xff] %v484_v2  ;;  %v488_v4 = vld [vmem:[%s2179_s25 + $0x340] sm:$0xff]  ;;  %v490_v5 = vld [vmem:[%s2179_s25 + $0x350] sm:$0xff]  ;;  %487 = vst [vmem:[%s2184_s6 + $0x198] sm:$0xff] %v486_v3 }
  0x55   : > { %489 = vst [vmem:[%s2184_s6 + $0x1a0] sm:$0xff] %v488_v4  ;;  %491 = vst [vmem:[%s2184_s6 + $0x1a8] sm:$0xff] %v490_v5  ;;  %v492_v6 = vld [vmem:[%s2179_s25 + $0x360] sm:$0xff]  ;;  %v494_v7 = vld [vmem:[%s2179_s25 + $0x370] sm:$0xff] }
  0x56   : > { %v496_v8 = vld [vmem:[%s2179_s25 + $0x380] sm:$0xff]  ;;  %493 = vst [vmem:[%s2184_s6 + $0x1b0] sm:$0xff] %v492_v6  ;;  %495 = vst [vmem:[%s2184_s6 + $0x1b8] sm:$0xff] %v494_v7  ;;  %v498_v9 = vld [vmem:[%s2179_s25 + $0x390] sm:$0xff] }
  0x57   : > { %497 = vst [vmem:[%s2184_s6 + $0x1c0] sm:$0xff] %v496_v8  ;;  %v500_v10 = vld [vmem:[%s2179_s25 + $0x3a0] sm:$0xff]  ;;  %v502_v11 = vld [vmem:[%s2179_s25 + $0x3b0] sm:$0xff]  ;;  %499 = vst [vmem:[%s2184_s6 + $0x1c8] sm:$0xff] %v498_v9 }
  0x58   : > { %501 = vst [vmem:[%s2184_s6 + $0x1d0] sm:$0xff] %v500_v10  ;;  %503 = vst [vmem:[%s2184_s6 + $0x1d8] sm:$0xff] %v502_v11  ;;  %v504_v12 = vld [vmem:[%s2179_s25 + $0x3c0] sm:$0xff]  ;;  %v506_v13 = vld [vmem:[%s2179_s25 + $0x3d0] sm:$0xff] }
  0x59   : > { %v508_v14 = vld [vmem:[%s2179_s25 + $0x3e0] sm:$0xff]  ;;  %505 = vst [vmem:[%s2184_s6 + $0x1e0] sm:$0xff] %v504_v12  ;;  %507 = vst [vmem:[%s2184_s6 + $0x1e8] sm:$0xff] %v506_v13  ;;  %v510_v15 = vld [vmem:[%s2179_s25 + $0x3f0] sm:$0xff] }
  0x5a   : > { %509 = vst [vmem:[%s2184_s6 + $0x1f0] sm:$0xff] %v508_v14  ;;  %511 = vst [vmem:[%s2184_s6 + $0x1f8] sm:$0xff] %v510_v15 }
  0x5b PF: > { %p1618_p0 = scmp.ge.s32.totalorder %s2024_s22, 1  ;;  %p524_p1 = scmp.lt.s32.totalorder %s2024_s22, 5 }
  0x5d   : > { %p525_p2 = pnand %p1618_p0, %p524_p1 }
  0x5e   : > { %s531_s0 = sand.u32 (!%p525_p2), 1, %s2000_s16   ;;  %s538_s5 = sand.u32 (!%p525_p2), 1, %s1992_s14  }
  0x5f   : > { %528 = sbr.rel (%p525_p2) target bundleno = 449 (0x1c1), region = 85  ;;  %s1619_s23 = sshll.u32 (!%p525_p2), %s531_s0, 7 }
  0x60   : > { %s1620_s28 = sshll.u32 (!%p525_p2), %s538_s5, 9  ;;  %s565_s7 = sand.u32 (!%p525_p2), 1, %s1984_s12  }
  0x61   : > { %s1622_s11 = sshll.u32 (!%p525_p2), %s2012_s19, 1  ;;  %s1621_s25 = sshll.u32 (!%p525_p2), %s565_s7, 6 }
  0x62   : > { %p573_p3 = scmp.lt.s32.totalorder (!%p525_p2), %s1622_s11, 3  ;;  %s2323_s4 = scalar_lea.vmem (!%p525_p2), [#allocation3], %s1619_s23 }
  0x63   : > { %s2325_s6 = scalar_lea.vmem (!%p525_p2), [#allocation4], %s1620_s28  ;;  %s2327_s1 = scalar_lea.vmem (!%p525_p2), [#allocation5], %s1621_s25 }
  0x64   : > { %s2523_s11 = smov (!%p573_p3, %s1622_s11), 3  ;;  %p1623_p4 = scmp.ne.s32.totalorder %s2008_s18, 0 }
  0x65   : > { %s575_s29 = scalar_lea.vmem %s2494_s2, %s2523_s11 }
  0x66   : > { %582 = sbr.rel (%p1623_p4) target bundleno = 116 (0x74), region = 97 }
  0x6b   : > { %v2026_v16 = vmov 0.0  }
  0x6c   : > { %583 = vst [vmem:[#allocation2 + $0x30] sm:$0xff] %v2026_v16  ;;  %584 = vst [vmem:[#allocation2] sm:$0xff] %v2026_v16 }
  0x6d   : > { %585 = vst [vmem:[#allocation2 + $0x58] sm:$0xff] %v2026_v16  ;;  %586 = vst [vmem:[#allocation2 + $0x18] sm:$0xff] %v2026_v16 }
  0x6e   : > { %587 = vst [vmem:[#allocation2 + $0x50] sm:$0xff] %v2026_v16  ;;  %588 = vst [vmem:[#allocation2 + $0x68] sm:$0xff] %v2026_v16 }
  0x6f   : > { %589 = vst [vmem:[#allocation2 + $0x8] sm:$0xff] %v2026_v16  ;;  %590 = vst [vmem:[#allocation2 + $0x48] sm:$0xff] %v2026_v16 }
  0x70   : > { %591 = vst [vmem:[#allocation2 + $0x40] sm:$0xff] %v2026_v16  ;;  %592 = vst [vmem:[#allocation2 + $0x20] sm:$0xff] %v2026_v16 }
  0x71   : > { %593 = vst [vmem:[#allocation2 + $0x10] sm:$0xff] %v2026_v16  ;;  %594 = vst [vmem:[#allocation2 + $0x38] sm:$0xff] %v2026_v16 }
  0x72   : > { %595 = vst [vmem:[#allocation2 + $0x60] sm:$0xff] %v2026_v16  ;;  %596 = vst [vmem:[#allocation2 + $0x70] sm:$0xff] %v2026_v16 }
  0x73   : > { %597 = vst [vmem:[#allocation2 + $0x78] sm:$0xff] %v2026_v16  ;;  %598 = vst [vmem:[#allocation2 + $0x28] sm:$0xff] %v2026_v16 }
  0x74 PF: > { %v1818_v17 = vld [vmem:[%s2325_s6 + $0x74] ss:$8 sps:$4 sm:$0xff]   ;;  %v1822_v19 = vld [vmem:[%s2325_s6 + $0x70] ss:$8 sps:$4 sm:$0xff]   ;;  %v1824_v21 = vld [vmem:[%s2325_s6 + $0x64] ss:$8 sps:$4 sm:$0xff]  }
  0x75   : > { %v1820_v18 = vld [vmem:[%s2325_s6 + $0x174] ss:$8 sps:$4 sm:$0xff]   ;;  %1095 = vmatprep.subr.bf16.mxu0 %v1818_v17  ;;  %v1823_v20 = vld [vmem:[%s2325_s6 + $0x170] ss:$8 sps:$4 sm:$0xff]   ;;  %v1826_v22 = vld [vmem:[%s2325_s6 + $0x164] ss:$8 sps:$4 sm:$0xff]  }
  0x76   : > { %1168 = vmatprep.subr.bf16.mxu1 %v1820_v18  ;;  %1096 = vmatpush1.bf16.msra.mxu0 %v1822_v19  ;;  %v1828_v23 = vld [vmem:[%s2325_s6 + $0x60] ss:$8 sps:$4 sm:$0xff]   ;;  %v1830_v25 = vld [vmem:[%s2325_s6 + $0x54] ss:$8 sps:$4 sm:$0xff]   ;;  %v1834_v27 = vld [vmem:[%s2325_s6 + $0x50] ss:$8 sps:$4 sm:$0xff]  }
  0x77   : > { %1169 = vmatpush1.bf16.msra.mxu1 %v1823_v20  ;;  %1097 = vmatprep.subr.bf16.mxu0 %v1824_v21  ;;  %v1829_v24 = vld [vmem:[%s2325_s6 + $0x160] ss:$8 sps:$4 sm:$0xff]   ;;  %v1832_v26 = vld [vmem:[%s2325_s6 + $0x154] ss:$8 sps:$4 sm:$0xff]   ;;  %v1835_v28 = vld [vmem:[%s2325_s6 + $0x150] ss:$8 sps:$4 sm:$0xff]  }
  0x78   : > { %1170 = vmatprep.subr.bf16.mxu1 %v1826_v22  ;;  %v1836_v29 = vld [vmem:[%s2325_s6 + $0x44] ss:$8 sps:$4 sm:$0xff]   ;;  %v1840_v31 = vld [vmem:[%s2325_s6 + $0x40] ss:$8 sps:$4 sm:$0xff]   ;;  %v1842_v33 = vld [vmem:[%s2325_s6 + $0x34] ss:$8 sps:$4 sm:$0xff]  }
  0x79   : > { %v1838_v30 = vld [vmem:[%s2325_s6 + $0x144] ss:$8 sps:$4 sm:$0xff]   ;;  %v1841_v32 = vld [vmem:[%s2325_s6 + $0x140] ss:$8 sps:$4 sm:$0xff]   ;;  %v1844_v34 = vld [vmem:[%s2325_s6 + $0x134] ss:$8 sps:$4 sm:$0xff]  }
  0x7a   : > { %1098 = vmatpush1.bf16.msra.mxu0 %v1828_v23  ;;  %v1846_v35 = vld [vmem:[%s2325_s6 + $0x30] ss:$8 sps:$4 sm:$0xff]   ;;  %v1848_v37 = vld [vmem:[%s2325_s6 + $0x24] ss:$8 sps:$4 sm:$0xff]   ;;  %v1852_v39 = vld [vmem:[%s2325_s6 + $0x20] ss:$8 sps:$4 sm:$0xff]  }
  0x7b   : > { %1171 = vmatpush1.bf16.msra.mxu1 %v1829_v24  ;;  %1099 = vmatprep.subr.bf16.mxu0 %v1830_v25  ;;  %v1847_v36 = vld [vmem:[%s2325_s6 + $0x130] ss:$8 sps:$4 sm:$0xff]   ;;  %v1850_v38 = vld [vmem:[%s2325_s6 + $0x124] ss:$8 sps:$4 sm:$0xff]   ;;  %v1853_v40 = vld [vmem:[%s2325_s6 + $0x120] ss:$8 sps:$4 sm:$0xff]  }
  0x7c   : > { %1172 = vmatprep.subr.bf16.mxu1 %v1832_v26  ;;  %v1854_v41 = vld [vmem:[%s2325_s6 + $0x14] ss:$8 sps:$4 sm:$0xff]   ;;  %v1858_v43 = vld [vmem:[%s2325_s6 + $0x10] ss:$8 sps:$4 sm:$0xff]   ;;  %v1860_v45 = vld [vmem:[%s2325_s6 + $0x4] ss:$8 sps:$4 sm:$0xff]  }
  0x7d   : > { %v1856_v42 = vld [vmem:[%s2325_s6 + $0x114] ss:$8 sps:$4 sm:$0xff]   ;;  %v1859_v44 = vld [vmem:[%s2325_s6 + $0x110] ss:$8 sps:$4 sm:$0xff]   ;;  %v1862_v46 = vld [vmem:[%s2325_s6 + $0x104] ss:$8 sps:$4 sm:$0xff]  }
  0x7e   : > { %1100 = vmatpush1.bf16.msra.mxu0 %v1834_v27  ;;  %v1864_v47 = vld [vmem:[%s2325_s6] ss:$8 sps:$4 sm:$0xff]   ;;  %v1866_v49 = vld [vmem:[%s2325_s6 + $0xf4] ss:$8 sps:$4 sm:$0xff]   ;;  %v1870_v51 = vld [vmem:[%s2325_s6 + $0xf0] ss:$8 sps:$4 sm:$0xff]  }
  0x7f   : > { %1173 = vmatpush1.bf16.msra.mxu1 %v1835_v28  ;;  %1101 = vmatprep.subr.bf16.mxu0 %v1836_v29  ;;  %v1865_v48 = vld [vmem:[%s2325_s6 + $0x100] ss:$8 sps:$4 sm:$0xff]   ;;  %v1868_v50 = vld [vmem:[%s2325_s6 + $0x1f4] ss:$8 sps:$4 sm:$0xff]   ;;  %v1871_v52 = vld [vmem:[%s2325_s6 + $0x1f0] ss:$8 sps:$4 sm:$0xff]  }
  0x80   : > { %1174 = vmatprep.subr.bf16.mxu1 %v1838_v30  ;;  %v1872_v53 = vld [vmem:[%s2325_s6 + $0xe4] ss:$8 sps:$4 sm:$0xff]   ;;  %v1876_v55 = vld [vmem:[%s2325_s6 + $0xe0] ss:$8 sps:$4 sm:$0xff]   ;;  %v1878_v57 = vld [vmem:[%s2325_s6 + $0xd4] ss:$8 sps:$4 sm:$0xff]  }
  0x81   : > { %v1874_v54 = vld [vmem:[%s2325_s6 + $0x1e4] ss:$8 sps:$4 sm:$0xff]   ;;  %v1877_v56 = vld [vmem:[%s2325_s6 + $0x1e0] ss:$8 sps:$4 sm:$0xff]   ;;  %v1880_v58 = vld [vmem:[%s2325_s6 + $0x1d4] ss:$8 sps:$4 sm:$0xff]  }
  0x82   : > { %1102 = vmatpush1.bf16.msra.mxu0 %v1840_v31  ;;  %v1882_v59 = vld [vmem:[%s2325_s6 + $0xd0] ss:$8 sps:$4 sm:$0xff]   ;;  %v1884_v61 = vld [vmem:[%s2325_s6 + $0xc4] ss:$8 sps:$4 sm:$0xff]   ;;  %v1888_v63 = vld [vmem:[%s2325_s6 + $0xc0] ss:$8 sps:$4 sm:$0xff]  }
  0x83   : > { %1175 = vmatpush1.bf16.msra.mxu1 %v1841_v32  ;;  %1103 = vmatprep.subr.bf16.mxu0 %v1842_v33  ;;  %v1883_v60 = vld [vmem:[%s2325_s6 + $0x1d0] ss:$8 sps:$4 sm:$0xff]   ;;  %v1886_v62 = vld [vmem:[%s2325_s6 + $0x1c4] ss:$8 sps:$4 sm:$0xff]   ;;  %v1889_v0 = vld [vmem:[%s2325_s6 + $0x1c0] ss:$8 sps:$4 sm:$0xff]  }
  0x84   : > { %1176 = vmatprep.subr.bf16.mxu1 %v1844_v34  ;;  %v1890_v1 = vld [vmem:[%s2325_s6 + $0xb4] ss:$8 sps:$4 sm:$0xff]   ;;  %v1894_v5 = vld [vmem:[%s2325_s6 + $0xb0] ss:$8 sps:$4 sm:$0xff]   ;;  %v1896_v7 = vld [vmem:[%s2325_s6 + $0xa4] ss:$8 sps:$4 sm:$0xff]  }
  0x85   : > { %v1916_v2 = vld [vmem:[%s2323_s4 + $0x4] ss:$16 sps:$4 sm:$0xff]   ;;  %v1919_v4 = vld [vmem:[%s2323_s4 + $0xc] ss:$16 sps:$4 sm:$0xff]   ;;  %v1895_v6 = vld [vmem:[%s2325_s6 + $0x1b0] ss:$8 sps:$4 sm:$0xff]  }
  0x86   : > { %1104 = vmatpush1.bf16.msra.mxu0 %v1846_v35  ;;  %v1892_v3 = vld [vmem:[%s2325_s6 + $0x1b4] ss:$8 sps:$4 sm:$0xff]   ;;  %1127 = vmatprep.mubr.bf16.mxu0 %v1916_v2  ;;  %v1898_v8 = vld [vmem:[%s2325_s6 + $0x1a4] ss:$8 sps:$4 sm:$0xff]   ;;  %v1900_v9 = vld [vmem:[%s2325_s6 + $0xa0] ss:$8 sps:$4 sm:$0xff]  }
  0x87   : > { %1177 = vmatpush1.bf16.msra.mxu1 %v1847_v36  ;;  %1105 = vmatprep.subr.bf16.mxu0 %v1848_v37  ;;  %v1901_v10 = vld [vmem:[%s2325_s6 + $0x1a0] ss:$8 sps:$4 sm:$0xff]   ;;  %v1902_v11 = vld [vmem:[%s2325_s6 + $0x94] ss:$8 sps:$4 sm:$0xff]   ;;  %v1906_v13 = vld [vmem:[%s2325_s6 + $0x90] ss:$8 sps:$4 sm:$0xff]  }
  0x88   : > { %1178 = vmatprep.subr.bf16.mxu1 %v1850_v38  ;;  %1200 = vmatprep.mubr.bf16.mxu1 %v1919_v4  ;;  %v1904_v12 = vld [vmem:[%s2325_s6 + $0x194] ss:$8 sps:$4 sm:$0xff]   ;;  %v1907_v14 = vld [vmem:[%s2325_s6 + $0x190] ss:$8 sps:$4 sm:$0xff]   ;;  %v1908_v15 = vld [vmem:[%s2325_s6 + $0x84] ss:$8 sps:$4 sm:$0xff]  }
  0x89   : > { %v1910_v16 = vld [vmem:[%s2325_s6 + $0x184] ss:$8 sps:$4 sm:$0xff]   ;;  %v1912_v17 = vld [vmem:[%s2325_s6 + $0x80] ss:$8 sps:$4 sm:$0xff]   ;;  %v599_v34 = vld [vmem:[#allocation2 + $0x30] sm:$0xff]  ;;  %p1704_p5 = scmp.ne.s32.totalorder %s2008_s18, 1 }
  0x8a   : > { %1106 = vmatpush1.bf16.msra.mxu0 %v1852_v39  ;;  %v1913_v18 = vld [vmem:[%s2325_s6 + $0x180] ss:$8 sps:$4 sm:$0xff]   ;;  %v1920_v21 = vld [vmem:[%s2323_s4 + $0x24] ss:$16 sps:$4 sm:$0xff]   ;;  %v1922_v22 = vld [vmem:[%s2323_s4 + $0x2c] ss:$16 sps:$4 sm:$0xff]  }
  0x8b   : > { %1179 = vmatpush1.bf16.msra.mxu1 %v1853_v40  ;;  %1107 = vmatprep.subr.bf16.mxu0 %v1854_v41  ;;  %v1914_v19 = vld [vmem:[%s2323_s4] ss:$16 sps:$4 sm:$0xff]   ;;  %v1917_v20 = vld [vmem:[%s2323_s4 + $0x8] ss:$16 sps:$4 sm:$0xff]   ;;  %v1926_v25 = vld [vmem:[%s2323_s4 + $0x44] ss:$16 sps:$4 sm:$0xff]  }
  0x8c   : > { %1180 = vmatprep.subr.bf16.mxu1 %v1856_v42  ;;  %v1924_v23 = vld [vmem:[%s2323_s4 + $0x20] ss:$16 sps:$4 sm:$0xff]   ;;  %v1925_v24 = vld [vmem:[%s2323_s4 + $0x28] ss:$16 sps:$4 sm:$0xff]   ;;  %v1928_v26 = vld [vmem:[%s2323_s4 + $0x4c] ss:$16 sps:$4 sm:$0xff]  }
  0x8d   : > { %v1930_v27 = vld [vmem:[%s2323_s4 + $0x40] ss:$16 sps:$4 sm:$0xff]   ;;  %v1931_v28 = vld [vmem:[%s2323_s4 + $0x48] ss:$16 sps:$4 sm:$0xff]   ;;  %v1932_v29 = vld [vmem:[%s2323_s4 + $0x64] ss:$16 sps:$4 sm:$0xff]  }
  0x8e   : > { %1108 = vmatpush1.bf16.msra.mxu0 %v1858_v43  ;;  %v1934_v30 = vld [vmem:[%s2323_s4 + $0x6c] ss:$16 sps:$4 sm:$0xff]   ;;  %v1936_v31 = vld [vmem:[%s2323_s4 + $0x60] ss:$16 sps:$4 sm:$0xff]   ;;  %v1937_v32 = vld [vmem:[%s2323_s4 + $0x68] ss:$16 sps:$4 sm:$0xff]  }
  0x8f   : > { %1181 = vmatpush1.bf16.msra.mxu1 %v1859_v44  ;;  %1109 = vmatprep.subr.bf16.mxu0 %v1860_v45  ;;  %v600_v38 = vld [vmem:[#allocation2] sm:$0xff]  ;;  %v601_v43 = vld [vmem:[#allocation2 + $0x58] sm:$0xff]  ;;  %v606_v4 = vld [vmem:[#allocation2 + $0x48] sm:$0xff] }
  0x90   : > { %1182 = vmatprep.subr.bf16.mxu1 %v1862_v46 }
  0x92   : > { %1110 = vmatpush1.bf16.msra.mxu0 %v1864_v47 }
  0x93   : > { %1183 = vmatpush1.bf16.msra.mxu1 %v1865_v48  ;;  %1111 = vmatprep.subr.bf16.mxu0 %v1866_v49  ;;  %v602_v48 = vld [vmem:[#allocation2 + $0x18] sm:$0xff] }
  0x94   : > { %1184 = vmatprep.subr.bf16.mxu1 %v1868_v50 }
  0x96   : > { %1112 = vmatpush2.bf16.msra.mxu0 %v1870_v51 }
  0x97   : > { %1185 = vmatpush2.bf16.msra.mxu1 %v1871_v52  ;;  %1113 = vmatprep.subr.bf16.mxu0 %v1872_v53  ;;  %v603_v53 = vld [vmem:[#allocation2 + $0x50] sm:$0xff] }
  0x98   : > { %1186 = vmatprep.subr.bf16.mxu1 %v1874_v54 }
  0x9a   : > { %1114 = vmatpush2.bf16.msra.mxu0 %v1876_v55 }
  0x9b   : > { %1187 = vmatpush2.bf16.msra.mxu1 %v1877_v56  ;;  %1115 = vmatprep.subr.bf16.mxu0 %v1878_v57 }
  0x9c   : > { %1188 = vmatprep.subr.bf16.mxu1 %v1880_v58  ;;  %v604_v58 = vld [vmem:[#allocation2 + $0x68] sm:$0xff] }
  0x9e   : > { %1116 = vmatpush2.bf16.msra.mxu0 %v1882_v59 }
  0x9f   : > { %1189 = vmatpush2.bf16.msra.mxu1 %v1883_v60  ;;  %1117 = vmatprep.subr.bf16.mxu0 %v1884_v61 }
  0xa0   : > { %1190 = vmatprep.subr.bf16.mxu1 %v1886_v62 }
  0xa2   : > { %1118 = vmatpush2.bf16.msra.mxu0 %v1888_v63  ;;  %v605_v63 = vld [vmem:[#allocation2 + $0x8] sm:$0xff] }
  0xa3   : > { %1191 = vmatpush2.bf16.msra.mxu1 %v1889_v0  ;;  %1119 = vmatprep.subr.bf16.mxu0 %v1890_v1 }
  0xa4   : > { %1192 = vmatprep.subr.bf16.mxu1 %v1892_v3 }
  0xa6   : > { %1120 = vmatpush2.bf16.msra.mxu0 %v1894_v5 }
  0xa7   : > { %1193 = vmatpush2.bf16.msra.mxu1 %v1895_v6  ;;  %1121 = vmatprep.subr.bf16.mxu0 %v1896_v7 }
  0xa8   : > { %1194 = vmatprep.subr.bf16.mxu1 %v1898_v8 }
  0xaa   : > { %1122 = vmatpush2.bf16.msra.mxu0 %v1900_v9  ;;  %v607_v9 = vld [vmem:[#allocation2 + $0x40] sm:$0xff] }
  0xab   : > { %1195 = vmatpush2.bf16.msra.mxu1 %v1901_v10  ;;  %1123 = vmatprep.subr.bf16.mxu0 %v1902_v11 }
  0xac   : > { %1196 = vmatprep.subr.bf16.mxu1 %v1904_v12 }
  0xae   : > { %1124 = vmatpush2.bf16.msra.mxu0 %v1906_v13 }
  0xaf   : > { %1197 = vmatpush2.bf16.msra.mxu1 %v1907_v14  ;;  %1125 = vmatprep.subr.bf16.mxu0 %v1908_v15  ;;  %v608_v14 = vld [vmem:[#allocation2 + $0x20] sm:$0xff] }
  0xb0   : > { %1198 = vmatprep.subr.bf16.mxu1 %v1910_v16 }
  0xb2   : > { %1126 = vmatpush2.bf16.msra.mxu0 %v1912_v17 }
  0xb3   : > { %1199 = vmatpush2.bf16.msra.mxu1 %v1913_v18 }
  0xb5   : > { %1128 = vmatmul.mubr.bf16.vlgmr.msra.gmra.mxu0 %v1914_v19  ;;  %v609_v19 = vld [vmem:[#allocation2 + $0x10] sm:$0xff] }
  0xb6   : > { %1201 = vmatmul.mubr.bf16.vlgmr.msra.gmra.mxu1 %v1917_v20  ;;  %1137 = vmatprep.mubr.bf16.mxu0 %v1920_v21 }
  0xb7   : > { %1210 = vmatprep.mubr.bf16.mxu1 %v1922_v22 }
  0xbd   : > { %1138 = vmatmul.mubr.bf16.gmra.mxu0 %v1924_v23 }
  0xbe   : > { %1211 = vmatmul.mubr.bf16.gmra.mxu1 %v1925_v24  ;;  %1147 = vmatprep.mubr.bf16.mxu0 %v1926_v25  ;;  %v610_v24 = vld [vmem:[#allocation2 + $0x38] sm:$0xff] }
  0xbf   : > { %1220 = vmatprep.mubr.bf16.mxu1 %v1928_v26 }
  0xc5   : > { %1148 = vmatmul.mubr.bf16.gmra.mxu0 %v1930_v27 }
  0xc6   : > { %1221 = vmatmul.mubr.bf16.gmra.mxu1 %v1931_v28  ;;  %1157 = vmatprep.mubr.bf16.mxu0 %v1932_v29  ;;  %v611_v29 = vld [vmem:[#allocation2 + $0x60] sm:$0xff] }
  0xc7   : > { %1230 = vmatprep.mubr.bf16.mxu1 %v1934_v30 }
  0xcd   : > { %1158 = vmatmul.mubr.bf16.gmra.mxu0 %v1936_v31 }
  0xce   : > { %1231 = vmatmul.mubr.bf16.gmra.mxu1 %v1937_v32 }
 0x175   : > { %v1129_v33 = vpop.f32.mrf.mxu0 }
 0x176   : > { %v1202_v35 = vpop.f32.mrf.mxu1 }
 0x177   : > { %v1203_v36 = vadd.f32 %v1202_v35, %v1129_v33  ;;  %v1131_v37 = vpop.f32.mrf.mxu0 }
 0x178   : > { %v1204_v39 = vpop.f32.mrf.mxu1 }
 0x179   : > { %v1241_v40 = vadd.f32 %v1203_v36, %v599_v34  ;;  %v1205_v41 = vadd.f32 %v1204_v39, %v1131_v37  ;;  %v1133_v42 = vpop.f32.mrf.mxu0  ;;  %v612_v34 = vld [vmem:[#allocation2 + $0x70] sm:$0xff]  ;;  %v613_v39 = vld [vmem:[#allocation2 + $0x78] sm:$0xff] }
 0x17a   : > { %v1206_v44 = vpop.f32.mrf.mxu1 }
 0x17b   : > { %1257 = vst [vmem:[#allocation2 + $0x30] sm:$0xff] %v1241_v40  ;;  %v1242_v45 = vadd.f32 %v1205_v41, %v600_v38  ;;  %v1207_v46 = vadd.f32 %v1206_v44, %v1133_v42  ;;  %v1135_v47 = vpop.f32.mrf.mxu0  ;;  %v614_v44 = vld [vmem:[#allocation2 + $0x28] sm:$0xff] }
 0x17c   : > { %v1208_v49 = vpop.f32.mrf.mxu1 }
 0x17d   : > { %1258 = vst [vmem:[#allocation2] sm:$0xff] %v1242_v45  ;;  %v1243_v50 = vadd.f32 %v1207_v46, %v601_v43  ;;  %v1209_v51 = vadd.f32 %v1208_v49, %v1135_v47  ;;  %v1139_v52 = vpop.f32.mrf.mxu0 }
 0x17e   : > { %v1212_v54 = vpop.f32.mrf.mxu1 }
 0x17f   : > { %1259 = vst [vmem:[#allocation2 + $0x58] sm:$0xff] %v1243_v50  ;;  %v1244_v55 = vadd.f32 %v1209_v51, %v602_v48  ;;  %v1213_v56 = vadd.f32 %v1212_v54, %v1139_v52  ;;  %v1141_v57 = vpop.f32.mrf.mxu0 }
 0x180   : > { %v1214_v59 = vpop.f32.mrf.mxu1 }
 0x181   : > { %1260 = vst [vmem:[#allocation2 + $0x18] sm:$0xff] %v1244_v55  ;;  %v1245_v60 = vadd.f32 %v1213_v56, %v603_v53  ;;  %v1215_v61 = vadd.f32 %v1214_v59, %v1141_v57  ;;  %v1143_v62 = vpop.f32.mrf.mxu0 }
 0x182   : > { %v1216_v0 = vpop.f32.mrf.mxu1 }
 0x183   : > { %1261 = vst [vmem:[#allocation2 + $0x50] sm:$0xff] %v1245_v60  ;;  %v1246_v1 = vadd.f32 %v1215_v61, %v604_v58  ;;  %v1217_v2 = vadd.f32 %v1216_v0, %v1143_v62  ;;  %v1145_v3 = vpop.f32.mrf.mxu0 }
 0x184   : > { %v1218_v5 = vpop.f32.mrf.mxu1 }
 0x185   : > { %1262 = vst [vmem:[#allocation2 + $0x68] sm:$0xff] %v1246_v1  ;;  %v1247_v6 = vadd.f32 %v1217_v2, %v605_v63  ;;  %v1219_v7 = vadd.f32 %v1218_v5, %v1145_v3  ;;  %v1149_v8 = vpop.f32.mrf.mxu0 }
 0x186   : > { %v1222_v10 = vpop.f32.mrf.mxu1 }
 0x187   : > { %1263 = vst [vmem:[#allocation2 + $0x8] sm:$0xff] %v1247_v6  ;;  %v1248_v11 = vadd.f32 %v1219_v7, %v606_v4  ;;  %v1223_v12 = vadd.f32 %v1222_v10, %v1149_v8  ;;  %v1151_v13 = vpop.f32.mrf.mxu0 }
 0x188   : > { %v1224_v15 = vpop.f32.mrf.mxu1 }
 0x189   : > { %1264 = vst [vmem:[#allocation2 + $0x48] sm:$0xff] %v1248_v11  ;;  %v1249_v16 = vadd.f32 %v1223_v12, %v607_v9  ;;  %v1225_v17 = vadd.f32 %v1224_v15, %v1151_v13  ;;  %v1153_v18 = vpop.f32.mrf.mxu0 }
 0x18a   : > { %v1226_v20 = vpop.f32.mrf.mxu1 }
 0x18b   : > { %1265 = vst [vmem:[#allocation2 + $0x40] sm:$0xff] %v1249_v16  ;;  %v1250_v21 = vadd.f32 %v1225_v17, %v608_v14  ;;  %v1227_v22 = vadd.f32 %v1226_v20, %v1153_v18  ;;  %v1155_v23 = vpop.f32.mrf.mxu0 }
 0x18c   : > { %v1228_v25 = vpop.f32.mrf.mxu1 }
 0x18d   : > { %1266 = vst [vmem:[#allocation2 + $0x20] sm:$0xff] %v1250_v21  ;;  %v1251_v26 = vadd.f32 %v1227_v22, %v609_v19  ;;  %v1229_v27 = vadd.f32 %v1228_v25, %v1155_v23  ;;  %v1159_v28 = vpop.f32.mrf.mxu0 }
 0x18e   : > { %v1232_v30 = vpop.f32.mrf.mxu1 }
 0x18f   : > { %1267 = vst [vmem:[#allocation2 + $0x10] sm:$0xff] %v1251_v26  ;;  %v1252_v31 = vadd.f32 %v1229_v27, %v610_v24  ;;  %v1233_v32 = vadd.f32 %v1232_v30, %v1159_v28  ;;  %v1161_v33 = vpop.f32.mrf.mxu0 }
 0x190   : > { %v1234_v35 = vpop.f32.mrf.mxu1 }
 0x191   : > { %1268 = vst [vmem:[#allocation2 + $0x38] sm:$0xff] %v1252_v31  ;;  %v1253_v36 = vadd.f32 %v1233_v32, %v611_v29  ;;  %v1235_v37 = vadd.f32 %v1234_v35, %v1161_v33  ;;  %v1163_v38 = vpop.f32.mrf.mxu0 }
 0x192   : > { %v1236_v40 = vpop.f32.mrf.mxu1 }
 0x193   : > { %1269 = vst [vmem:[#allocation2 + $0x60] sm:$0xff] %v1253_v36  ;;  %v1254_v41 = vadd.f32 %v1235_v37, %v612_v34  ;;  %v1237_v42 = vadd.f32 %v1236_v40, %v1163_v38  ;;  %v1165_v43 = vpop.f32.mrf.mxu0 }
 0x194   : > { %v1238_v45 = vpop.f32.mrf.mxu1 }
 0x195   : > { %1270 = vst [vmem:[#allocation2 + $0x70] sm:$0xff] %v1254_v41  ;;  %v1255_v46 = vadd.f32 %v1237_v42, %v613_v39  ;;  %v1239_v47 = vadd.f32 %v1238_v45, %v1165_v43  ;;  %1276 = sbr.rel (%p1704_p5) target bundleno = 441 (0x1b9), region = 101 }
 0x197   : > { %1271 = vst [vmem:[#allocation2 + $0x78] sm:$0xff] %v1255_v46  ;;  %v1256_v48 = vadd.f32 %v1239_v47, %v614_v44 }
 0x199   : > { %1272 = vst [vmem:[#allocation2 + $0x28] sm:$0xff] %v1256_v48 }
 0x19a   : > { %v1295_v49 = vlaneseq  ;;  %v1293_v51 = vld [vmem:[%s575_s29] sm:$0x3]  ;;  %v1277_v52 = vld [vmem:[#allocation2 + $0x30] sm:$0xff]  ;;  %v1279_v56 = vld [vmem:[#allocation2 + $0x58] sm:$0xff] }
 0x19b   : > { %v1278_v53 = vld [vmem:[#allocation2] sm:$0xff]  ;;  %v1280_v57 = vld [vmem:[#allocation2 + $0x18] sm:$0xff]  ;;  %v1281_v58 = vld [vmem:[#allocation2 + $0x50] sm:$0xff] }
 0x19c   : > { %v1296_v50 = vshrl.u32 %v1295_v49, 7  ;;  %v1282_v61 = vld [vmem:[#allocation2 + $0x68] sm:$0xff]  ;;  %v1285_v14 = vld [vmem:[#allocation2 + $0x40] sm:$0xff]  ;;  %v1287_v20 = vld [vmem:[#allocation2 + $0x10] sm:$0xff] }
 0x19d   : > { %v1283_v62 = vld [vmem:[#allocation2 + $0x8] sm:$0xff]  ;;  %v1286_v19 = vld [vmem:[#allocation2 + $0x20] sm:$0xff]  ;;  %v1288_v21 = vld [vmem:[#allocation2 + $0x38] sm:$0xff] }
 0x19e   : > { %v1297_v54 = vsub.s32 0, %v1296_v50  ;;  %v1301_v55 = vsub.s32 1, %v1296_v50  ;;  %v1284_v63 = vld [vmem:[#allocation2 + $0x48] sm:$0xff]  ;;  %v1289_v35 = vld [vmem:[#allocation2 + $0x60] sm:$0xff]  ;;  %v1290_v36 = vld [vmem:[#allocation2 + $0x70] sm:$0xff] }
 0x19f   : > { %v1291_v40 = vld [vmem:[#allocation2 + $0x78] sm:$0xff] }
 0x1a0   : > { %v2416_v59 = vrot.slane %v1293_v51, %v1297_v54  ;;  %v2418_v60 = vrot.slane %v1293_v51, %v1301_v55  ;;  %v1292_v47 = vld [vmem:[#allocation2 + $0x28] sm:$0xff] }
 0x1a2   : > { %v1305_v0 = vadd.f32 %v2416_v59, %v1277_v52  ;;  %v1306_v1 = vadd.f32 %v2418_v60, %v1278_v53  ;;  %v1307_v2 = vadd.f32 %v2416_v59, %v1279_v56  ;;  %v1308_v3 = vadd.f32 %v2418_v60, %v1280_v57 }
 0x1a3   : > { %v1309_v4 = vadd.f32 %v2416_v59, %v1281_v58  ;;  %v1310_v5 = vadd.f32 %v2418_v60, %v1282_v61  ;;  %v1311_v6 = vadd.f32 %v2416_v59, %v1283_v62  ;;  %v1312_v7 = vadd.f32 %v2418_v60, %v1284_v63 }
 0x1a4   : > { %vm1321_vm0 = vcmp.ge.f32.partialorder %v1305_v0, 0.0  ;;  %vm1322_vm1 = vcmp.ge.f32.partialorder %v1306_v1, 0.0  ;;  %v1337_v8 = vmul.f32 0.2, %v1305_v0  ;;  %v1338_v9 = vmul.f32 0.2, %v1306_v1 }
 0x1a5   : > { %vm1323_vm2 = vcmp.ge.f32.partialorder %v1307_v2, 0.0  ;;  %vm1324_vm3 = vcmp.ge.f32.partialorder %v1308_v3, 0.0  ;;  %v1339_v10 = vmul.f32 0.2, %v1307_v2  ;;  %v1340_v11 = vmul.f32 0.2, %v1308_v3 }
 0x1a6   : > { %v1353_v12 = vsel %vm1321_vm0, %v1305_v0, %v1337_v8  ;;  %v1354_v13 = vsel %vm1322_vm1, %v1306_v1, %v1338_v9  ;;  %vm1325_vm4 = vcmp.ge.f32.partialorder %v1309_v4, 0.0  ;;  %vm1326_vm5 = vcmp.ge.f32.partialorder %v1310_v5, 0.0 }
 0x1a7   : > { %v1720_v15 = vpack.c.bf16 %v1354_v13, %v1353_v12  ;;  %v1355_v16 = vsel %vm1323_vm2, %v1307_v2, %v1339_v10  ;;  %v1356_v17 = vsel %vm1324_vm3, %v1308_v3, %v1340_v11  ;;  %v1341_v18 = vmul.f32 0.2, %v1309_v4 }
 0x1a8   : > { %v1721_v22 = vpack.c.bf16 %v1356_v17, %v1355_v16  ;;  %v1342_v23 = vmul.f32 0.2, %v1310_v5  ;;  %vm1327_vm6 = vcmp.ge.f32.partialorder %v1311_v6, 0.0  ;;  %vm1328_vm7 = vcmp.ge.f32.partialorder %v1312_v7, 0.0 }
 0x1a9   : > { %1417 = vst [vmem:[%s2327_s1] sm:$0xff] %v1720_v15  ;;  %v1357_v24 = vsel %vm1325_vm4, %v1309_v4, %v1341_v18  ;;  %v1343_v25 = vmul.f32 0.2, %v1311_v6  ;;  %v1344_v26 = vmul.f32 0.2, %v1312_v7  ;;  %v1313_v27 = vadd.f32 %v2416_v59, %v1285_v14 }
 0x1aa   : > { %1418 = vst [vmem:[%s2327_s1 + $0x8] sm:$0xff] %v1721_v22  ;;  %v1358_v28 = vsel %vm1326_vm5, %v1310_v5, %v1342_v23  ;;  %v1314_v29 = vadd.f32 %v2418_v60, %v1286_v19  ;;  %v1315_v30 = vadd.f32 %v2416_v59, %v1287_v20  ;;  %v1316_v31 = vadd.f32 %v2418_v60, %v1288_v21 }
 0x1ab   : > { %v1722_v32 = vpack.c.bf16 %v1358_v28, %v1357_v24  ;;  %v1359_v33 = vsel %vm1327_vm6, %v1311_v6, %v1343_v25  ;;  %v1360_v34 = vsel %vm1328_vm7, %v1312_v7, %v1344_v26  ;;  %vm1329_vm8 = vcmp.ge.f32.partialorder %v1313_v27, 0.0 }
 0x1ac   : > { %v1723_v37 = vpack.c.bf16 %v1360_v34, %v1359_v33  ;;  %vm1330_vm9 = vcmp.ge.f32.partialorder %v1314_v29, 0.0  ;;  %v1345_v38 = vmul.f32 0.2, %v1313_v27  ;;  %v1346_v39 = vmul.f32 0.2, %v1314_v29 }
 0x1ad   : > { %1419 = vst [vmem:[%s2327_s1 + $0x10] sm:$0xff] %v1722_v32  ;;  %vm1331_vm10 = vcmp.ge.f32.partialorder %v1315_v30, 0.0  ;;  %vm1332_vm11 = vcmp.ge.f32.partialorder %v1316_v31, 0.0  ;;  %v1347_v41 = vmul.f32 0.2, %v1315_v30  ;;  %v1317_v45 = vadd.f32 %v2416_v59, %v1289_v35 }
 0x1ae   : > { %v1348_v42 = vmul.f32 0.2, %v1316_v31  ;;  %1420 = vst [vmem:[%s2327_s1 + $0x18] sm:$0xff] %v1723_v37  ;;  %v1361_v43 = vsel %vm1329_vm8, %v1313_v27, %v1345_v38  ;;  %v1362_v44 = vsel %vm1330_vm9, %v1314_v29, %v1346_v39  ;;  %v1318_v46 = vadd.f32 %v2418_v60, %v1290_v36 }
 0x1af   : > { %v1724_v48 = vpack.c.bf16 %v1362_v44, %v1361_v43  ;;  %v1363_v49 = vsel %vm1331_vm10, %v1315_v30, %v1347_v41  ;;  %v1319_v51 = vadd.f32 %v2416_v59, %v1291_v40  ;;  %vm1333_vm12 = vcmp.ge.f32.partialorder %v1317_v45, 0.0 }
 0x1b0   : > { %v1364_v50 = vsel %vm1332_vm11, %v1316_v31, %v1348_v42  ;;  %vm1334_vm13 = vcmp.ge.f32.partialorder %v1318_v46, 0.0  ;;  %v1349_v53 = vmul.f32 0.2, %v1317_v45  ;;  %v1350_v54 = vmul.f32 0.2, %v1318_v46 }
 0x1b1   : > { %v1725_v52 = vpack.c.bf16 %v1364_v50, %v1363_v49  ;;  %1421 = vst [vmem:[%s2327_s1 + $0x20] sm:$0xff] %v1724_v48  ;;  %v1320_v55 = vadd.f32 %v2418_v60, %v1292_v47  ;;  %vm1335_vm14 = vcmp.ge.f32.partialorder %v1319_v51, 0.0  ;;  %v1351_v56 = vmul.f32 0.2, %v1319_v51 }
 0x1b2   : > { %v1365_v57 = vsel %vm1333_vm12, %v1317_v45, %v1349_v53  ;;  %v1366_v58 = vsel %vm1334_vm13, %v1318_v46, %v1350_v54 }
 0x1b3   : > { %1422 = vst [vmem:[%s2327_s1 + $0x28] sm:$0xff] %v1725_v52  ;;  %vm1336_vm15 = vcmp.ge.f32.partialorder %v1320_v55, 0.0  ;;  %v1352_v61 = vmul.f32 0.2, %v1320_v55  ;;  %v1367_v62 = vsel %vm1335_vm14, %v1319_v51, %v1351_v56  ;;  %v1726_v63 = vpack.c.bf16 %v1366_v58, %v1365_v57 }
 0x1b5   : > { %v1368_v59 = vsel %vm1336_vm15, %v1320_v55, %v1352_v61  ;;  %1423 = vst [vmem:[%s2327_s1 + $0x30] sm:$0xff] %v1726_v63 }
 0x1b6   : > { %v1727_v0 = vpack.c.bf16 %v1368_v59, %v1367_v62 }
 0x1b8   : > { %1424 = vst [vmem:[%s2327_s1 + $0x38] sm:$0xff] %v1727_v0 }
 0x1b9 PF: > { %1431 = sbr.rel (!%p2141_p12) target bundleno = 449 (0x1c1), region = 105  ;;  %s1728_s16 = sshll.u32 (%p2141_p12), %s2012_s19, 3  ;;  %v1480_v60 = vld [vmem:[%s2327_s1] sm:$0xff] (%p2141_p12)  ;;  %v1482_v1 = vld [vmem:[%s2327_s1 + $0x8] sm:$0xff] (%p2141_p12)  ;;  %v1484_v2 = vld [vmem:[%s2327_s1 + $0x10] sm:$0xff] (%p2141_p12) }
 0x1ba   : > { %s1437_s5 = scalar_lea.vmem (%p2141_p12), %s2495_s3, %s1728_s16  ;;  %v1486_v3 = vld [vmem:[%s2327_s1 + $0x18] sm:$0xff] (%p2141_p12)  ;;  %v1488_v4 = vld [vmem:[%s2327_s1 + $0x20] sm:$0xff] (%p2141_p12)  ;;  %v1490_v5 = vld [vmem:[%s2327_s1 + $0x28] sm:$0xff] (%p2141_p12) }
 0x1bb   : > { %1481 = vst [vmem:[%s1437_s5] sm:$0xff] (%p2141_p12), %v1480_v60  ;;  %1483 = vst [vmem:[%s1437_s5 + $0x10] sm:$0xff] (%p2141_p12), %v1482_v1 }
 0x1bc   : > { %1485 = vst [vmem:[%s1437_s5 + $0x20] sm:$0xff] (%p2141_p12), %v1484_v2  ;;  %1487 = vst [vmem:[%s1437_s5 + $0x30] sm:$0xff] (%p2141_p12), %v1486_v3  ;;  %v1492_v6 = vld [vmem:[%s2327_s1 + $0x30] sm:$0xff] (%p2141_p12) }
 0x1bd   : > { %1489 = vst [vmem:[%s1437_s5 + $0x40] sm:$0xff] (%p2141_p12), %v1488_v4  ;;  %1491 = vst [vmem:[%s1437_s5 + $0x50] sm:$0xff] (%p2141_p12), %v1490_v5 }
 0x1be   : > { %1493 = vst [vmem:[%s1437_s5 + $0x60] sm:$0xff] %v1492_v6 }
 0x1bf   : > { %v1494_v7 = vld [vmem:[%s2327_s1 + $0x38] sm:$0xff] }
 0x1c0   : > { %1495 = vst [vmem:[%s1437_s5 + $0x70] sm:$0xff] %v1494_v7 }
 0x1c1 PF: > { %s13_s22 = sadd.s32 1, %s2024_s22   ;;  %s2505_s10 = sld [smem:[#allocation6_spill]] }
 0x1c2   : > { %p10_p6 = scmp.ge.s32.totalorder %s13_s22, 6   ;;  %s2506_s12 = smov %s1988_s13 }
 0x1c3   : > { %s2507_s13 = smov %s2139_s9  ;;  %s2508_s14 = smov %s1996_s15 }
 0x1c4   : > { %s2509_s15 = smov %s2136_s8  ;;  %s2510_s16 = smov %s2004_s17 }
 0x1c5   : > { %s2511_s17 = smov %s2122_s30  ;;  %s2512_s18 = smov %s2016_s20 }
 0x1c6   : > { %s2513_s19 = smov %s2020_s21  ;;  %s2514_s20 = smov %s2517_s24 }
 0x1c7   : > { %s2515_s21 = smov %s2505_s10  ;;  %12 = sbr.rel (!%p10_p6) target bundleno = 9 (0x9), region = 185 }

// kernel: vqgan_forward.13
= control target key start
LH: loop header
LB: loop body
LE: loop exit
PB: predicated region body
PF: predicated region fallthrough
CT: control target
= control target key end

     0   :  { %s1388_s12 = smov 0   ;;  %s1390_s13 = smov 0   ;;  %s1581_s0 = inlined_call_operand.vmem [shape: bf16[192,512], index: 0, kind: input, shape index: {}]   ;;  %s1582_s1 = inlined_call_operand.vmem [shape: bf16[512,128], index: 1, kind: input, shape index: {}]   ;;  %s1583_s2 = inlined_call_operand.vmem [shape: f32[1,128], index: 2, kind: input, shape index: {}]   ;;  %s1584_s3 = inlined_call_operand.vmem [shape: f32[192,128], index: 3, kind: output, shape index: {}]  }
   0x1   :  { %s1392_s14 = smov 0  }
   0x2 LB: > { %s32_s15 = sadd.s32 1, %s1362_s13  ;;  %p1060_p0 = scmp.ge.s32.totalorder %s1366_s14, 1  ;;  %s1366_s14 = sphi %s1392_s14, %s13_s14   ;;  %s1362_s13 = sphi %s1390_s13, %s1586_s13   ;;  %s1358_s12 = sphi %s1388_s12, %s1585_s12  }
   0x3   : > { %p34_p1 = scmp.ge.s32.totalorder %s32_s15, 2  ;;  %p191_p2 = scmp.lt.s32.totalorder %s1366_s14, 3 }
   0x5   : > { %s1588_s15 = smov (%p34_p1, %s32_s15), 0  ;;  %p192_p3 = pnand %p1060_p0, %p191_p2 }
   0x6   : > { %s234_s23 = smul.u32 (!%p192_p3), 12, %s1358_s12 }
   0x7   : > { %195 = sbr.rel (%p192_p3) target bundleno = 307 (0x133), region = 32 }
   0x8   : > { %p236_p4 = scmp.lt.s32.totalorder (!%p192_p3), %s234_s23, 23 }
   0xc   : > { %v1252_v0 = vld [vmem:[%s1582_s1 + $0x78] sm:$0xff]   ;;  %v1256_v4 = vld [vmem:[%s1582_s1 + $0x70] sm:$0xff]   ;;  %v1260_v8 = vld [vmem:[%s1582_s1 + $0x68] sm:$0xff]   ;;  %s1590_s23 = smov (!%p236_p4, %s234_s23), 23 }
   0xd   : > { %v1253_v1 = vld [vmem:[%s1582_s1 + $0xf8] sm:$0xff]   ;;  %1124 = vmatprep.subr.bf16.mxu0 %v1252_v0  ;;  %v1257_v5 = vld [vmem:[%s1582_s1 + $0xf0] sm:$0xff]   ;;  %v1261_v9 = vld [vmem:[%s1582_s1 + $0xe8] sm:$0xff]   ;;  %s1123_s25 = sshll.u32 %s1590_s23, 4  ;;  %s1063_s17 = sshll.u32 %s1590_s23, 3 }
   0xe   : > { %v1254_v2 = vld [vmem:[%s1582_s1 + $0x38] sm:$0xff]   ;;  %1176 = vmatprep.subr.bf16.mxu1 %v1253_v1  ;;  %v1258_v6 = vld [vmem:[%s1582_s1 + $0x30] sm:$0xff]   ;;  %v1262_v10 = vld [vmem:[%s1582_s1 + $0x28] sm:$0xff]   ;;  %s1505_s6 = scalar_lea.vmem %s1581_s0, %s1123_s25  ;;  %s1550_s20 = scalar_lea.vmem %s1584_s3, %s1063_s17 }
   0xf   : > { %v1255_v3 = vld [vmem:[%s1582_s1 + $0xb8] sm:$0xff]   ;;  %1125 = vmatpush3.bf16.msra.mxu0 %v1254_v2  ;;  %v1259_v7 = vld [vmem:[%s1582_s1 + $0xb0] sm:$0xff]   ;;  %v1263_v11 = vld [vmem:[%s1582_s1 + $0xa8] sm:$0xff]  }
  0x10   : > { %1177 = vmatpush3.bf16.msra.mxu1 %v1255_v3  ;;  %1126 = vmatprep.subr.bf16.mxu0 %v1256_v4  ;;  %v1264_v12 = vld [vmem:[%s1582_s1 + $0x60] sm:$0xff]   ;;  %v1268_v16 = vld [vmem:[%s1582_s1 + $0x58] sm:$0xff]   ;;  %v1272_v20 = vld [vmem:[%s1582_s1 + $0x50] sm:$0xff]  }
  0x11   : > { %1178 = vmatprep.subr.bf16.mxu1 %v1257_v5  ;;  %v1265_v13 = vld [vmem:[%s1582_s1 + $0xe0] sm:$0xff]   ;;  %v1269_v17 = vld [vmem:[%s1582_s1 + $0xd8] sm:$0xff]   ;;  %v1273_v21 = vld [vmem:[%s1582_s1 + $0xd0] sm:$0xff]  }
  0x12   : > { %v1266_v14 = vld [vmem:[%s1582_s1 + $0x20] sm:$0xff]   ;;  %v1270_v18 = vld [vmem:[%s1582_s1 + $0x18] sm:$0xff]   ;;  %v1274_v22 = vld [vmem:[%s1582_s1 + $0x10] sm:$0xff]  }
  0x13   : > { %1127 = vmatpush3.bf16.msra.mxu0 %v1258_v6  ;;  %v1267_v15 = vld [vmem:[%s1582_s1 + $0xa0] sm:$0xff]   ;;  %v1271_v19 = vld [vmem:[%s1582_s1 + $0x98] sm:$0xff]   ;;  %v1275_v23 = vld [vmem:[%s1582_s1 + $0x90] sm:$0xff]  }
  0x14   : > { %1179 = vmatpush3.bf16.msra.mxu1 %v1259_v7  ;;  %1128 = vmatprep.subr.bf16.mxu0 %v1260_v8  ;;  %v1276_v24 = vld [vmem:[%s1582_s1 + $0x48] sm:$0xff]   ;;  %v1280_v28 = vld [vmem:[%s1582_s1 + $0x40] sm:$0xff]  }
  0x15   : > { %1180 = vmatprep.subr.bf16.mxu1 %v1261_v9  ;;  %v1277_v25 = vld [vmem:[%s1582_s1 + $0xc8] sm:$0xff]   ;;  %v1281_v29 = vld [vmem:[%s1582_s1 + $0xc0] sm:$0xff]  }
  0x16   : > { %v1278_v26 = vld [vmem:[%s1582_s1 + $0x8] sm:$0xff]   ;;  %v1282_v30 = vld [vmem:[%s1582_s1] sm:$0xff]  }
  0x17   : > { %1129 = vmatpush3.bf16.msra.mxu0 %v1262_v10  ;;  %v1279_v27 = vld [vmem:[%s1582_s1 + $0x88] sm:$0xff]   ;;  %v1283_v31 = vld [vmem:[%s1582_s1 + $0x80] sm:$0xff]  }
  0x18   : > { %1181 = vmatpush3.bf16.msra.mxu1 %v1263_v11  ;;  %1130 = vmatprep.subr.bf16.mxu0 %v1264_v12  ;;  %v1284_v32 = vld [vmem:[%s1505_s6] ss:$16 sps:$4 sm:$0xff]   ;;  %v1286_v33 = vld [vmem:[%s1505_s6 + $0x4] ss:$16 sps:$4 sm:$0xff]   ;;  %v1287_v34 = vld [vmem:[%s1505_s6 + $0x8] ss:$16 sps:$4 sm:$0xff]  }
  0x19   : > { %1182 = vmatprep.subr.bf16.mxu1 %v1265_v13  ;;  %v1289_v35 = vld [vmem:[%s1505_s6 + $0xc] ss:$16 sps:$4 sm:$0xff]   ;;  %728 = vmatprep.mubr.bf16.mxu0 %v1286_v33  ;;  %v1290_v36 = vld [vmem:[%s1505_s6 + $0x24] ss:$16 sps:$4 sm:$0xff]   ;;  %v1294_v38 = vld [vmem:[%s1505_s6 + $0x20] ss:$16 sps:$4 sm:$0xff]  }
  0x1a   : > { %809 = vmatprep.mubr.bf16.mxu1 %v1289_v35  ;;  %v1292_v37 = vld [vmem:[%s1505_s6 + $0x2c] ss:$16 sps:$4 sm:$0xff]   ;;  %v1295_v39 = vld [vmem:[%s1505_s6 + $0x28] ss:$16 sps:$4 sm:$0xff]   ;;  %v1296_v40 = vld [vmem:[%s1505_s6 + $0x44] ss:$16 sps:$4 sm:$0xff]  }
  0x1b   : > { %1131 = vmatpush3.bf16.msra.mxu0 %v1266_v14  ;;  %v1298_v41 = vld [vmem:[%s1505_s6 + $0x4c] ss:$16 sps:$4 sm:$0xff]   ;;  %v1300_v42 = vld [vmem:[%s1505_s6 + $0x40] ss:$16 sps:$4 sm:$0xff]   ;;  %v1301_v43 = vld [vmem:[%s1505_s6 + $0x48] ss:$16 sps:$4 sm:$0xff]  }
  0x1c   : > { %1183 = vmatpush3.bf16.msra.mxu1 %v1267_v15  ;;  %1132 = vmatprep.subr.bf16.mxu0 %v1268_v16  ;;  %v1302_v44 = vld [vmem:[%s1505_s6 + $0x64] ss:$16 sps:$4 sm:$0xff]   ;;  %v1304_v45 = vld [vmem:[%s1505_s6 + $0x6c] ss:$16 sps:$4 sm:$0xff]   ;;  %v1306_v46 = vld [vmem:[%s1505_s6 + $0x60] ss:$16 sps:$4 sm:$0xff]  }
  0x1d   : > { %1184 = vmatprep.subr.bf16.mxu1 %v1269_v17  ;;  %v1307_v47 = vld [vmem:[%s1505_s6 + $0x68] ss:$16 sps:$4 sm:$0xff]   ;;  %v1308_v48 = vld [vmem:[%s1505_s6 + $0x84] ss:$16 sps:$4 sm:$0xff]   ;;  %v1310_v49 = vld [vmem:[%s1505_s6 + $0x8c] ss:$16 sps:$4 sm:$0xff]  }
  0x1e   : > { %v1312_v50 = vld [vmem:[%s1505_s6 + $0x80] ss:$16 sps:$4 sm:$0xff]   ;;  %v1313_v51 = vld [vmem:[%s1505_s6 + $0x88] ss:$16 sps:$4 sm:$0xff]   ;;  %v1314_v52 = vld [vmem:[%s1505_s6 + $0xa4] ss:$16 sps:$4 sm:$0xff]  }
  0x1f   : > { %1133 = vmatpush3.bf16.msra.mxu0 %v1270_v18  ;;  %v1316_v53 = vld [vmem:[%s1505_s6 + $0xac] ss:$16 sps:$4 sm:$0xff]   ;;  %v1318_v54 = vld [vmem:[%s1505_s6 + $0xa0] ss:$16 sps:$4 sm:$0xff]   ;;  %v1319_v55 = vld [vmem:[%s1505_s6 + $0xa8] ss:$16 sps:$4 sm:$0xff]  }
  0x20   : > { %1185 = vmatpush3.bf16.msra.mxu1 %v1271_v19  ;;  %1134 = vmatprep.subr.bf16.mxu0 %v1272_v20  ;;  %v1540_v63 = vld [vmem:[%s1583_s2] ss:$0 sm:$0xff] }
  0x21   : > { %1186 = vmatprep.subr.bf16.mxu1 %v1273_v21 }
  0x23   : > { %1135 = vmatpush3.bf16.msra.mxu0 %v1274_v22 }
  0x24   : > { %1187 = vmatpush3.bf16.msra.mxu1 %v1275_v23  ;;  %1136 = vmatprep.subr.bf16.mxu0 %v1276_v24 }
  0x25   : > { %1188 = vmatprep.subr.bf16.mxu1 %v1277_v25 }
  0x27   : > { %1137 = vmatpush3.bf16.msra.mxu0 %v1278_v26 }
  0x28   : > { %1189 = vmatpush3.bf16.msra.mxu1 %v1279_v27  ;;  %1138 = vmatprep.subr.bf16.mxu0 %v1280_v28 }
  0x29   : > { %1190 = vmatprep.subr.bf16.mxu1 %v1281_v29 }
  0x2b   : > { %1139 = vmatpush3.bf16.msra.mxu0 %v1282_v30 }
  0x2c   : > { %1191 = vmatpush3.bf16.msra.mxu1 %v1283_v31 }
  0x2e   : > { %729 = vmatmul.mubr.bf16.vlgmr.msra.gmra.mxu0 %v1284_v32 }
  0x2f   : > { %810 = vmatmul.mubr.bf16.vlgmr.msra.gmra.mxu1 %v1287_v34  ;;  %736 = vmatprep.mubr.bf16.mxu0 %v1290_v36 }
  0x30   : > { %817 = vmatprep.mubr.bf16.mxu1 %v1292_v37 }
  0x36   : > { %737 = vmatmul.mubr.bf16.gmra.mxu0 %v1294_v38 }
  0x37   : > { %818 = vmatmul.mubr.bf16.gmra.mxu1 %v1295_v39  ;;  %744 = vmatprep.mubr.bf16.mxu0 %v1296_v40 }
  0x38   : > { %825 = vmatprep.mubr.bf16.mxu1 %v1298_v41 }
  0x3e   : > { %745 = vmatmul.mubr.bf16.gmra.mxu0 %v1300_v42 }
  0x3f   : > { %826 = vmatmul.mubr.bf16.gmra.mxu1 %v1301_v43  ;;  %752 = vmatprep.mubr.bf16.mxu0 %v1302_v44 }
  0x40   : > { %833 = vmatprep.mubr.bf16.mxu1 %v1304_v45 }
  0x46   : > { %753 = vmatmul.mubr.bf16.gmra.mxu0 %v1306_v46 }
  0x47   : > { %834 = vmatmul.mubr.bf16.gmra.mxu1 %v1307_v47  ;;  %760 = vmatprep.mubr.bf16.mxu0 %v1308_v48 }
  0x48   : > { %841 = vmatprep.mubr.bf16.mxu1 %v1310_v49 }
  0x4e   : > { %761 = vmatmul.mubr.bf16.gmra.mxu0 %v1312_v50 }
  0x4f   : > { %842 = vmatmul.mubr.bf16.gmra.mxu1 %v1313_v51  ;;  %768 = vmatprep.mubr.bf16.mxu0 %v1314_v52 }
  0x50   : > { %849 = vmatprep.mubr.bf16.mxu1 %v1316_v53 }
  0x56   : > { %769 = vmatmul.mubr.bf16.gmra.mxu0 %v1318_v54 }
  0x57   : > { %850 = vmatmul.mubr.bf16.gmra.mxu1 %v1319_v55 }
  0xee   : > { %v1140_v56 = vpop.f32.mrf.mxu0 }
  0xef   : > { %v1192_v57 = vpop.f32.mrf.mxu1 }
  0xf0   : > { %v1141_v58 = vpop.f32.mrf.mxu0 }
  0xf1   : > { %v1142_v59 = vadd.f32 %v1141_v58, %v1140_v56  ;;  %v1193_v60 = vpop.f32.mrf.mxu1 }
  0xf2   : > { %v1194_v61 = vadd.f32 %v1193_v60, %v1192_v57  ;;  %v1143_v62 = vpop.f32.mrf.mxu0 }
  0xf3   : > { %v1195_v0 = vpop.f32.mrf.mxu1 }
  0xf4   : > { %v812_v1 = vadd.f32 %v1194_v61, %v1142_v59  ;;  %v1144_v2 = vpop.f32.mrf.mxu0 }
  0xf5   : > { %v1145_v3 = vadd.f32 %v1144_v2, %v1143_v62  ;;  %v1196_v4 = vpop.f32.mrf.mxu1 }
  0xf6   : > { %v904_v5 = vadd.f32 %v1540_v63, %v812_v1  ;;  %v1197_v6 = vadd.f32 %v1196_v4, %v1195_v0  ;;  %v1146_v7 = vpop.f32.mrf.mxu0 }
  0xf7   : > { %v1198_v8 = vpop.f32.mrf.mxu1 }
  0xf8   : > { %1320 = vtanh.f32 %v904_v5  ;;  %v815_v9 = vadd.f32 %v1197_v6, %v1145_v3  ;;  %v1147_v10 = vpop.f32.mrf.mxu0 }
  0xf9   : > { %v1148_v11 = vadd.f32 %v1147_v10, %v1146_v7  ;;  %v1199_v12 = vpop.f32.mrf.mxu1 }
  0xfa   : > { %v905_v13 = vadd.f32 %v1540_v63, %v815_v9  ;;  %v1200_v14 = vadd.f32 %v1199_v12, %v1198_v8  ;;  %v1149_v15 = vpop.f32.mrf.mxu0 }
  0xfb   : > { %v1201_v16 = vpop.f32.mrf.mxu1 }
  0xfc   : > { %1322 = vtanh.f32 %v905_v13  ;;  %v820_v17 = vadd.f32 %v1200_v14, %v1148_v11  ;;  %v1150_v18 = vpop.f32.mrf.mxu0 }
  0xfd   : > { %v1151_v19 = vadd.f32 %v1150_v18, %v1149_v15  ;;  %v1202_v20 = vpop.f32.mrf.mxu1 }
  0xfe   : > { %v906_v21 = vadd.f32 %v1540_v63, %v820_v17  ;;  %v1203_v22 = vadd.f32 %v1202_v20, %v1201_v16  ;;  %v1152_v23 = vpop.f32.mrf.mxu0 }
  0xff   : > { %v1204_v24 = vpop.f32.mrf.mxu1 }
 0x100   : > { %1324 = vtanh.f32 %v906_v21  ;;  %v823_v25 = vadd.f32 %v1203_v22, %v1151_v19  ;;  %v1153_v26 = vpop.f32.mrf.mxu0 }
 0x101   : > { %v1154_v27 = vadd.f32 %v1153_v26, %v1152_v23  ;;  %v1205_v28 = vpop.f32.mrf.mxu1 }
 0x102   : > { %v907_v29 = vadd.f32 %v1540_v63, %v823_v25  ;;  %v1206_v30 = vadd.f32 %v1205_v28, %v1204_v24  ;;  %v1155_v31 = vpop.f32.mrf.mxu0 }
 0x103   : > { %v1207_v32 = vpop.f32.mrf.mxu1 }
 0x104   : > { %1326 = vtanh.f32 %v907_v29  ;;  %v828_v33 = vadd.f32 %v1206_v30, %v1154_v27  ;;  %v1156_v34 = vpop.f32.mrf.mxu0 }
 0x105   : > { %v1321_v35 = vpop.eup %1320  ;;  %v1157_v36 = vadd.f32 %v1156_v34, %v1155_v31  ;;  %v1208_v37 = vpop.f32.mrf.mxu1 }
 0x106   : > { %928 = vst [vmem:[%s1550_s20] sm:$0xff] %v1321_v35  ;;  %v908_v38 = vadd.f32 %v1540_v63, %v828_v33  ;;  %v1209_v39 = vadd.f32 %v1208_v37, %v1207_v32  ;;  %v1158_v40 = vpop.f32.mrf.mxu0 }
 0x107   : > { %v1210_v41 = vpop.f32.mrf.mxu1 }
 0x108   : > { %1328 = vtanh.f32 %v908_v38  ;;  %v831_v42 = vadd.f32 %v1209_v39, %v1157_v36  ;;  %v1159_v43 = vpop.f32.mrf.mxu0 }
 0x109   : > { %v1323_v44 = vpop.eup %1322  ;;  %v1160_v45 = vadd.f32 %v1159_v43, %v1158_v40  ;;  %v1211_v46 = vpop.f32.mrf.mxu1 }
 0x10a   : > { %929 = vst [vmem:[%s1550_s20 + $0x8] sm:$0xff] %v1323_v44  ;;  %v909_v47 = vadd.f32 %v1540_v63, %v831_v42  ;;  %v1212_v48 = vadd.f32 %v1211_v46, %v1210_v41  ;;  %v1161_v49 = vpop.f32.mrf.mxu0 }
 0x10b   : > { %v1213_v50 = vpop.f32.mrf.mxu1 }
 0x10c   : > { %1330 = vtanh.f32 %v909_v47  ;;  %v836_v51 = vadd.f32 %v1212_v48, %v1160_v45  ;;  %v1162_v52 = vpop.f32.mrf.mxu0 }
 0x10d   : > { %v1325_v53 = vpop.eup %1324  ;;  %v1163_v54 = vadd.f32 %v1162_v52, %v1161_v49  ;;  %v1214_v55 = vpop.f32.mrf.mxu1 }
 0x10e   : > { %930 = vst [vmem:[%s1550_s20 + $0x10] sm:$0xff] %v1325_v53  ;;  %v910_v56 = vadd.f32 %v1540_v63, %v836_v51  ;;  %v1215_v57 = vadd.f32 %v1214_v55, %v1213_v50  ;;  %v1164_v58 = vpop.f32.mrf.mxu0 }
 0x10f   : > { %v1216_v59 = vpop.f32.mrf.mxu1 }
 0x110   : > { %1332 = vtanh.f32 %v910_v56  ;;  %v839_v60 = vadd.f32 %v1215_v57, %v1163_v54  ;;  %v1165_v61 = vpop.f32.mrf.mxu0 }
 0x111   : > { %v1327_v62 = vpop.eup %1326  ;;  %v1166_v0 = vadd.f32 %v1165_v61, %v1164_v58  ;;  %v1217_v1 = vpop.f32.mrf.mxu1 }
 0x112   : > { %931 = vst [vmem:[%s1550_s20 + $0x18] sm:$0xff] %v1327_v62  ;;  %v911_v2 = vadd.f32 %v1540_v63, %v839_v60  ;;  %v1218_v3 = vadd.f32 %v1217_v1, %v1216_v59  ;;  %v1167_v4 = vpop.f32.mrf.mxu0 }
 0x113   : > { %v1219_v5 = vpop.f32.mrf.mxu1 }
 0x114   : > { %1334 = vtanh.f32 %v911_v2  ;;  %v844_v6 = vadd.f32 %v1218_v3, %v1166_v0  ;;  %v1168_v7 = vpop.f32.mrf.mxu0 }
 0x115   : > { %v1329_v8 = vpop.eup %1328  ;;  %v1169_v9 = vadd.f32 %v1168_v7, %v1167_v4  ;;  %v1220_v10 = vpop.f32.mrf.mxu1 }
 0x116   : > { %932 = vst [vmem:[%s1550_s20 + $0x20] sm:$0xff] %v1329_v8  ;;  %v912_v11 = vadd.f32 %v1540_v63, %v844_v6  ;;  %v1221_v12 = vadd.f32 %v1220_v10, %v1219_v5  ;;  %v1170_v13 = vpop.f32.mrf.mxu0 }
 0x117   : > { %v1222_v14 = vpop.f32.mrf.mxu1 }
 0x118   : > { %1336 = vtanh.f32 %v912_v11  ;;  %v847_v15 = vadd.f32 %v1221_v12, %v1169_v9  ;;  %v1171_v16 = vpop.f32.mrf.mxu0 }
 0x119   : > { %v1331_v17 = vpop.eup %1330  ;;  %v1172_v18 = vadd.f32 %v1171_v16, %v1170_v13  ;;  %v1223_v19 = vpop.f32.mrf.mxu1 }
 0x11a   : > { %933 = vst [vmem:[%s1550_s20 + $0x28] sm:$0xff] %v1331_v17  ;;  %v913_v20 = vadd.f32 %v1540_v63, %v847_v15  ;;  %v1224_v21 = vadd.f32 %v1223_v19, %v1222_v14  ;;  %v1173_v22 = vpop.f32.mrf.mxu0 }
 0x11b   : > { %v1225_v23 = vpop.f32.mrf.mxu1 }
 0x11c   : > { %1338 = vtanh.f32 %v913_v20  ;;  %v852_v24 = vadd.f32 %v1224_v21, %v1172_v18  ;;  %v1174_v25 = vpop.f32.mrf.mxu0 }
 0x11d   : > { %v1333_v26 = vpop.eup %1332  ;;  %v1175_v27 = vadd.f32 %v1174_v25, %v1173_v22  ;;  %v1226_v28 = vpop.f32.mrf.mxu1 }
 0x11e   : > { %934 = vst [vmem:[%s1550_s20 + $0x30] sm:$0xff] %v1333_v26  ;;  %v914_v29 = vadd.f32 %v1540_v63, %v852_v24  ;;  %v1227_v30 = vadd.f32 %v1226_v28, %v1225_v23 }
 0x120   : > { %1340 = vtanh.f32 %v914_v29  ;;  %v855_v31 = vadd.f32 %v1227_v30, %v1175_v27 }
 0x121   : > { %v1335_v32 = vpop.eup %1334 }
 0x122   : > { %935 = vst [vmem:[%s1550_s20 + $0x38] sm:$0xff] %v1335_v32  ;;  %v915_v33 = vadd.f32 %v1540_v63, %v855_v31 }
 0x124   : > { %1342 = vtanh.f32 %v915_v33 }
 0x125   : > { %v1337_v34 = vpop.eup %1336 }
 0x126   : > { %936 = vst [vmem:[%s1550_s20 + $0x40] sm:$0xff] %v1337_v34 }
 0x129   : > { %v1339_v35 = vpop.eup %1338 }
 0x12a   : > { %937 = vst [vmem:[%s1550_s20 + $0x48] sm:$0xff] %v1339_v35 }
 0x12d   : > { %v1341_v36 = vpop.eup %1340 }
 0x12e   : > { %938 = vst [vmem:[%s1550_s20 + $0x50] sm:$0xff] %v1341_v36 }
 0x131   : > { %v1343_v37 = vpop.eup %1342 }
 0x132   : > { %939 = vst [vmem:[%s1550_s20 + $0x58] sm:$0xff] %v1343_v37 }
 0x133 PF: > { %s13_s14 = sadd.s32 1, %s1366_s14   ;;  %s1585_s12 = smov %s1362_s13 }
 0x134   : > { %p10_p5 = scmp.ge.s32.totalorder %s13_s14, 4   ;;  %s1586_s13 = smov %s1588_s15 }
 0x136   :  { %12 = sbr.rel (!%p10_p5) target bundleno = 2 (0x2), region = 76 }

</bundles_post_ra>
